<compile_context>
chip_gen: v7x
topology: tpu7x:2x2x1
jax: 0.10.0
libtpu: 0.0.40
codegen_flags: <defaults>
</compile_context>

<pallas_src>
import functools

import jax
import jax.numpy as jnp
from jax import lax
from jax.experimental import pallas as pl
from jax.experimental.pallas import tpu as pltpu

_VMEM_LIMIT = 32 * 1024 * 1024


def _round_up(n, m):
    return ((n + m - 1) // m) * m


def _pad_axis(a, axis, target):
    pad = target - a.shape[axis]
    if pad <= 0:
        return a
    widths = [(0, 0)] * a.ndim
    widths[axis] = (0, pad)
    return jnp.pad(a, widths)


# ---------------------------------------------------------------------------
# Pallas kernels
# ---------------------------------------------------------------------------
def _matmul_bias_kernel(x_ref, w_ref, b_ref, o_ref):
    """(tm, K) @ (K, 128) + bias; lane-dense 128-wide unmasked store."""
    acc = jnp.dot(x_ref[...], w_ref[...], preferred_element_type=jnp.float32)
    o_ref[...] = (acc + b_ref[...]).astype(o_ref.dtype)


def _conv2_relu_kernel(x_ref, w_ref, b_ref, o_ref, *, oh, ow):
    """Fused 3x3 conv + bias + ReLU on one image.

    x_ref: (1, oh+2, ow+2, 128)  conv1 output, channels zero-padded to 128
    w_ref: (9, 128, 128)         tap-major weights, in/out channels zero-padded
    b_ref: (1, 128)              bias row (f32)
    o_ref: (1, oh*ow, 128)       conv2 output (rows = oh*ow row-major)

    im2col is done in-kernel: 9 shifted window loads from the VMEM-resident
    input tile, each feeding one MXU matmul into an f32 accumulator.
    """
    acc = jnp.zeros((oh * ow, 128), jnp.float32)
    for t in range(9):
        kh, kw = t // 3, t % 3
        xt = x_ref[0, pl.ds(kh, oh), pl.ds(kw, ow), :]
        xt = xt.astype(jnp.float32).reshape(oh * ow, 128)
        acc = acc + jnp.dot(xt, w_ref[t], preferred_element_type=jnp.float32)
    y = jnp.maximum(acc + b_ref[...], 0.0)
    o_ref[0] = y.astype(o_ref.dtype)


def _fc_fused_kernel(x_ref, w1_ref, b1_ref, w2_ref, b2_ref, o_ref):
    """logits = ((x @ w1 + b1) @ w2 + b2) in one grid step (no K split)."""
    h = jnp.dot(x_ref[...], w1_ref[...], preferred_element_type=jnp.float32)
    h = h + b1_ref[...]
    # TODO(synk): Dropout(p=0.5) is identity here (inference mode only).
    logits = jnp.dot(h.astype(w2_ref.dtype), w2_ref[...],
                     preferred_element_type=jnp.float32) + b2_ref[...]
    o_ref[...] = logits


# ---------------------------------------------------------------------------
# Wrappers around pallas_call
# ---------------------------------------------------------------------------
def pallas_matmul_bias(x, w, b, *, out_dtype, tm_cap=2048):
    """y = x @ w + b.  At small M this is a single grid step."""
    M, K = x.shape
    Kw, N = w.shape
    assert K == Kw
    tm = min(_round_up(M, 8), tm_cap)
    Mp = _round_up(M, tm)
    x = _pad_axis(x, 0, Mp)
    out = pl.pallas_call(
        _matmul_bias_kernel,
        out_shape=jax.ShapeDtypeStruct((Mp, N), out_dtype),
        grid=(Mp // tm,),
        in_specs=[
            pl.BlockSpec((tm, K), lambda i: (i, 0)),
            pl.BlockSpec((K, N), lambda i: (0, 0)),
            pl.BlockSpec((1, N), lambda i: (0, 0)),
        ],
        out_specs=pl.BlockSpec((tm, N), lambda i: (i, 0)),
        compiler_params=pltpu.CompilerParams(
            dimension_semantics=("parallel",),
            vmem_limit_bytes=_VMEM_LIMIT,
        ),
    )(x, w, b)
    return out[:M]


def pallas_conv2_relu(y1, w, b):
    """Per-image fused conv2 + bias + ReLU.  y1: (B, IH, IW, 128) bf16."""
    B, IH, IW, Cp = y1.shape
    OH, OW = IH - 2, IW - 2
    return pl.pallas_call(
        functools.partial(_conv2_relu_kernel, oh=OH, ow=OW),
        out_shape=jax.ShapeDtypeStruct((B, OH * OW, 128), jnp.bfloat16),
        grid=(B,),
        in_specs=[
            pl.BlockSpec((1, IH, IW, Cp), lambda bb: (bb, 0, 0, 0)),
            pl.BlockSpec((9, Cp, 128), lambda bb: (0, 0, 0)),
            pl.BlockSpec((1, 128), lambda bb: (0, 0)),
        ],
        out_specs=pl.BlockSpec((1, OH * OW, 128), lambda bb: (bb, 0, 0)),
        compiler_params=pltpu.CompilerParams(
            dimension_semantics=("parallel",),
            vmem_limit_bytes=_VMEM_LIMIT,
        ),
    )(y1, w, b)


def pallas_fc_fused(x, w1, b1, w2, b2, *, tm_cap=256):
    """logits = (x @ w1 + b1) @ w2 + b2, single-shot; M-tiled only at big batch."""
    M, K = x.shape
    K1, N1 = w1.shape
    N1b, N2 = w2.shape
    assert K == K1 and N1 == N1b
    tm = min(_round_up(M, 8), tm_cap)
    Mp = _round_up(M, tm)
    x = _pad_axis(x, 0, Mp)
    out = pl.pallas_call(
        _fc_fused_kernel,
        out_shape=jax.ShapeDtypeStruct((Mp, N2), jnp.float32),
        grid=(Mp // tm,),
        in_specs=[
            pl.BlockSpec((tm, K), lambda i: (i, 0)),
            pl.BlockSpec((K, N1), lambda i: (0, 0)),
            pl.BlockSpec((1, N1), lambda i: (0, 0)),
            pl.BlockSpec((N1, N2), lambda i: (0, 0)),
            pl.BlockSpec((1, N2), lambda i: (0, 0)),
        ],
        out_specs=pl.BlockSpec((tm, N2), lambda i: (i, 0)),
        compiler_params=pltpu.CompilerParams(
            dimension_semantics=("parallel",),
            vmem_limit_bytes=_VMEM_LIMIT,
        ),
    )(x, w1, b1, w2, b2)
    return out[:M]


# ---------------------------------------------------------------------------
# Model glue
# ---------------------------------------------------------------------------
def _im2col_3x3(x):
    """x: (B,H,W,C) NHWC -> (B*OH*OW, 9*C) patch matrix, (kh,kw,c) col order."""
    B, H, W, C = x.shape
    OH, OW = H - 2, W - 2
    cols = [x[:, kh:kh + OH, kw:kw + OW, :] for kh in range(3) for kw in range(3)]
    p = jnp.concatenate(cols, axis=-1)
    return p.reshape(B * OH * OW, 9 * C), (OH, OW)


def init_params(key, num_channels, num_classes):
    ks = jax.random.split(key, 8)
    s = 0.05
    return {
        "conv1_w": s * jax.random.normal(ks[0], (32, num_channels, 3, 3), jnp.float32),
        "conv1_b": s * jax.random.normal(ks[1], (32,), jnp.float32),
        "conv2_w": s * jax.random.normal(ks[2], (64, 32, 3, 3), jnp.float32),
        "conv2_b": s * jax.random.normal(ks[3], (64,), jnp.float32),
        "fc1_w": s * jax.random.normal(ks[4], (128, 9216), jnp.float32),
        "fc1_b": s * jax.random.normal(ks[5], (128,), jnp.float32),
        "fc2_w": s * jax.random.normal(ks[6], (num_classes, 128), jnp.float32),
        "fc2_b": s * jax.random.normal(ks[7], (num_classes,), jnp.float32),
    }


def prepare_params(params):
    """One-time weight layout prep (all transposes / pads / casts live here).

    * conv weights -> (kh,kw,cin)-major matmul layouts, lane dims padded to 128
    * conv1 output / conv2 input channels stay zero-padded to 128
    * fc1_w rows permuted from torch flatten order (c,h,w) to the (h,w,c)
      order produced by the NHWC pipeline -> no runtime flatten transpose
    * fc weights bf16, conv weights f32, biases f32 (1, N) rows
    """
    c_in = params["conv1_w"].shape[1]

    # conv1: (32, C, 3, 3) -> (9C, 32) -> pad to (round8(9C), 128)
    c1 = jnp.transpose(params["conv1_w"], (2, 3, 1, 0)).reshape(9 * c_in, 32)
    c1 = _pad_axis(_pad_axis(c1, 0, _round_up(9 * c_in, 8)), 1, 128)

    # conv2: (64, 32, 3, 3) -> tap-major (9, 32, 64) -> pad to (9, 128, 128)
    c2 = jnp.transpose(params["conv2_w"], (2, 3, 1, 0)).reshape(9, 32, 64)
    c2 = _pad_axis(_pad_axis(c2, 1, 128), 2, 128)

    # fc1: torch flatten j = c*(s*s) + h*s + w  ->  ours i = (h*s + w)*C2 + c
    n_hidden, feat = params["fc1_w"].shape               # (128, 9216)
    c2_out = params["conv2_w"].shape[0]                   # 64
    s = int(round((feat // c2_out) ** 0.5))               # 12
    w1 = params["fc1_w"].T.reshape(c2_out, s, s, n_hidden)
    w1 = jnp.transpose(w1, (1, 2, 0, 3)).reshape(feat, n_hidden)

    num_classes = params["fc2_w"].shape[0]
    n2p = _round_up(num_classes, 128)
    w2 = _pad_axis(params["fc2_w"].T, 1, n2p)

    def bias_row(b, n):
        return _pad_axis(b, 0, n).reshape(1, n).astype(jnp.float32)

    return {
        "conv1_w": c1.astype(jnp.float32),
        "conv1_b": bias_row(params["conv1_b"], 128),
        "conv2_w": c2.astype(jnp.float32),
        "conv2_b": bias_row(params["conv2_b"], 128),
        "fc1_w": w1.astype(jnp.bfloat16),
        "fc1_b": bias_row(params["fc1_b"], n_hidden),
        "fc2_w": w2.astype(jnp.bfloat16),
        "fc2_b": bias_row(params["fc2_b"], n2p),
    }


def cnn_emnist_forward(x_nchw, prep, *, num_classes):
    """Forward pass matching CNNEMnist (inference mode: dropout = identity)."""
    B = x_nchw.shape[0]
    x = jnp.transpose(x_nchw, (0, 2, 3, 1))            # NCHW -> NHWC (free for C=1)

    # Conv2d(C, 32, k=3)  -- no activation after conv1 in the torch Sequential
    p1, (oh1, ow1) = _im2col_3x3(x)                     # (B*oh1*ow1, 9C) f32, tiny
    p1 = _pad_axis(p1, 1, prep["conv1_w"].shape[0])
    y1 = pallas_matmul_bias(p1, prep["conv1_w"], prep["conv1_b"],
                            out_dtype=jnp.bfloat16)     # (B*oh1*ow1, 128)
    y1 = y1.reshape(B, oh1, ow1, 128)                   # channels stay 128-padded

    # Conv2d(32, 64, k=3) + ReLU: fused per-image kernel with in-kernel im2col
    y2 = pallas_conv2_relu(y1, prep["conv2_w"], prep["conv2_b"])
    oh2, ow2 = oh1 - 2, ow1 - 2
    ph, pw = oh2 // 2, ow2 // 2
    feat = prep["fc1_w"].shape[0]
    c2_out = feat // (ph * pw)                          # 64, static

    # MaxPool2d(2,2) + channel un-pad + flatten: one fused XLA reshape/max,
    # no transposes (fc1_w rows already match this (h, w, c) flatten order).
    y2 = y2.reshape(B, oh2, ow2, 128)[..., :c2_out]
    pooled = jnp.max(y2.reshape(B, ph, 2, pw, 2, c2_out), axis=(2, 4))
    # TODO(synk): Dropout(p=0.25) is identity here (inference mode only).
    flat = pooled.reshape(B, feat).astype(jnp.bfloat16)

    # Linear(9216,128) -> Dropout(0.5, identity) -> Linear(128, classes)
    logits = pallas_fc_fused(flat, prep["fc1_w"], prep["fc1_b"],
                             prep["fc2_w"], prep["fc2_b"])
    return logits[:, :num_classes]


def reference_forward(x, params):
    """Pure-JAX f32 reference implementing the torch module directly."""
    dn = ("NCHW", "OIHW", "NCHW")
    y = lax.conv_general_dilated(x, params["conv1_w"], (1, 1), "VALID",
                                 dimension_numbers=dn)
    y = y + params["conv1_b"][None, :, None, None]
    y = lax.conv_general_dilated(y, params["conv2_w"], (1, 1), "VALID",
                                 dimension_numbers=dn)
    y = jnp.maximum(y + params["conv2_b"][None, :, None, None], 0.0)
    B, C, H, W = y.shape
    y = jnp.max(y.reshape(B, C, H // 2, 2, W // 2, 2), axis=(3, 5))
    flat = y.reshape(B, -1)                             # torch NCHW flatten order
    h = flat @ params["fc1_w"].T + params["fc1_b"]
    return h @ params["fc2_w"].T + params["fc2_b"]


# ---------------------------------------------------------------------------
if __name__ == "__main__":
    batch = 2
    num_channels = 1          # EMNIST is single channel; Linear(9216) => 28x28 input
    num_classes = 47          # EMNIST-balanced style class count

    key = jax.random.PRNGKey(0)
    pkey, xkey = jax.random.split(key)
    params = init_params(pkey, num_channels, num_classes)
    prep = prepare_params(params)
    x = jax.random.normal(xkey, (batch, num_channels, 28, 28), jnp.float32)

    fwd = jax.jit(functools.partial(cnn_emnist_forward, num_classes=num_classes))
    logits = fwd(x, prep)
    jax.block_until_ready(logits)

    assert logits.shape == (batch, num_classes)
    assert bool(jnp.isfinite(logits).all())

    ref = reference_forward(x, params)
    max_err = float(jnp.max(jnp.abs(logits - ref)))
    assert bool(jnp.allclose(logits, ref, atol=5e-2, rtol=5e-2)), max_err

    print("KERNEL_OK")
</pallas_src>

<mosaic_0001>
module attributes {stable_mosaic.version = 11 : i64} {
  func.func @_matmul_bias_kernel(%arg0: i32, %arg1: memref<1352x16xf32, #tpu.memory_space<vmem>>, %arg2: memref<16x128xf32, #tpu.memory_space<vmem>>, %arg3: memref<1x128xf32, #tpu.memory_space<vmem>>, %arg4: memref<1352x128xbf16, #tpu.memory_space<vmem>>) attributes {dimension_semantics = [#tpu.dimension_semantics<parallel>], iteration_bounds = array<i64: 1>, scalar_prefetch = 0 : i64, scratch_operands = 0 : i64, tpu.core_type = #tpu.core_type<tc>, window_params = [{transform_indices = @transform_0, window_bounds = array<i64: 1352, 16>}, {pipeline_mode = #tpu.pipeline_mode<synchronous>, transform_indices = @transform_1, window_bounds = array<i64: 16, 128>}, {pipeline_mode = #tpu.pipeline_mode<synchronous>, transform_indices = @transform_2, window_bounds = array<i64: 1, 128>}, {transform_indices = @transform_3, window_bounds = array<i64: 1352, 128>}]} {
    %c0 = arith.constant 0 : index
    %c0_0 = arith.constant 0 : index
    %0 = vector.load %arg1[%c0, %c0_0] : memref<1352x16xf32, #tpu.memory_space<vmem>>, vector<1352x16xf32>
    %c0_1 = arith.constant 0 : index
    %c0_2 = arith.constant 0 : index
    %1 = vector.load %arg2[%c0_1, %c0_2] : memref<16x128xf32, #tpu.memory_space<vmem>>, vector<16x128xf32>
    %cst = arith.constant dense<0.000000e+00> : vector<1352x128xf32>
    %2 = tpu.matmul %0, %1, %cst {dimension_numbers = #tpu.dot_dimension_numbers<[1], [0], [0], [1], [0, 0, 1, 1], [], []>} : vector<1352x16xf32>, vector<16x128xf32>, vector<1352x128xf32> -> vector<1352x128xf32>
    %c0_3 = arith.constant 0 : index
    %c0_4 = arith.constant 0 : index
    %3 = vector.load %arg3[%c0_3, %c0_4] : memref<1x128xf32, #tpu.memory_space<vmem>>, vector<1x128xf32>
    %4 = vector.broadcast %3 : vector<1x128xf32> to vector<1352x128xf32>
    %5 = arith.addf %2, %4 : vector<1352x128xf32>
    %6 = arith.truncf %5 : vector<1352x128xf32> to vector<1352x128xbf16>
    %c0_5 = arith.constant 0 : index
    %c0_6 = arith.constant 0 : index
    %7 = vector.load %arg4[%c0_5, %c0_6] : memref<1352x128xbf16, #tpu.memory_space<vmem>>, vector<1352x128xbf16>
    tpu.vector_store %arg4[%c0_5, %c0_6], %6 {strides = array<i32>} : memref<1352x128xbf16, #tpu.memory_space<vmem>>, vector<1352x128xbf16>,
    return
  }
  func.func @transform_0(%arg0: i32) -> (i32, i32) {
    %c0_i32 = arith.constant 0 : i32
    %c0_i32_0 = arith.constant 0 : i32
    return %arg0, %c0_i32 : i32, i32
  }
  func.func @transform_1(%arg0: i32) -> (i32, i32) {
    %c0_i32 = arith.constant 0 : i32
    %c0_i32_0 = arith.constant 0 : i32
    %c0_i32_1 = arith.constant 0 : i32
    return %c0_i32, %c0_i32_0 : i32, i32
  }
  func.func @transform_2(%arg0: i32) -> (i32, i32) {
    %c0_i32 = arith.constant 0 : i32
    %c0_i32_0 = arith.constant 0 : i32
    %c0_i32_1 = arith.constant 0 : i32
    return %c0_i32, %c0_i32_0 : i32, i32
  }
  func.func @transform_3(%arg0: i32) -> (i32, i32) {
    %c0_i32 = arith.constant 0 : i32
    %c0_i32_0 = arith.constant 0 : i32
    return %arg0, %c0_i32 : i32, i32
  }
}

module attributes {stable_mosaic.version = 11 : i64} {
  func.func @_conv2_relu_kernel(%arg0: i32, %arg1: memref<1x26x26x128xbf16, #tpu.memory_space<vmem>>, %arg2: memref<9x128x128xf32, #tpu.memory_space<vmem>>, %arg3: memref<1x128xf32, #tpu.memory_space<vmem>>, %arg4: memref<1x576x128xbf16, #tpu.memory_space<vmem>>) attributes {dimension_semantics = [#tpu.dimension_semantics<parallel>], iteration_bounds = array<i64: 2>, scalar_prefetch = 0 : i64, scratch_operands = 0 : i64, tpu.core_type = #tpu.core_type<tc>, window_params = [{transform_indices = @transform_0, window_bounds = array<i64: 1, 26, 26, 128>}, {pipeline_mode = #tpu.pipeline_mode<synchronous>, transform_indices = @transform_1, window_bounds = array<i64: 9, 128, 128>}, {pipeline_mode = #tpu.pipeline_mode<synchronous>, transform_indices = @transform_2, window_bounds = array<i64: 1, 128>}, {transform_indices = @transform_3, window_bounds = array<i64: 1, 576, 128>}]} {
    %cst = arith.constant 0.000000e+00 : f32
    %0 = vector.broadcast %cst : f32 to vector<576x128xf32>
    %c0 = arith.constant 0 : index
    %c0_0 = arith.constant 0 : index
    %c0_1 = arith.constant 0 : index
    %c0_2 = arith.constant 0 : index
    %1 = vector.load %arg1[%c0, %c0_0, %c0_1, %c0_2] : memref<1x26x26x128xbf16, #tpu.memory_space<vmem>>, vector<1x24x24x128xbf16>
    %2 = vector.shape_cast %1 : vector<1x24x24x128xbf16> to vector<24x24x128xbf16>
    %3 = arith.extf %2 : vector<24x24x128xbf16> to vector<24x24x128xf32>
    %4 = vector.shape_cast %3 : vector<24x24x128xf32> to vector<576x128xf32>
    %c0_3 = arith.constant 0 : index
    %c0_4 = arith.constant 0 : index
    %c0_5 = arith.constant 0 : index
    %5 = vector.load %arg2[%c0_3, %c0_4, %c0_5] : memref<9x128x128xf32, #tpu.memory_space<vmem>>, vector<1x128x128xf32>
    %6 = vector.shape_cast %5 : vector<1x128x128xf32> to vector<128x128xf32>
    %cst_6 = arith.constant dense<0.000000e+00> : vector<576x128xf32>
    %7 = tpu.matmul %4, %6, %cst_6 {dimension_numbers = #tpu.dot_dimension_numbers<[1], [0], [0], [1], [0, 0, 1, 1], [], []>} : vector<576x128xf32>, vector<128x128xf32>, vector<576x128xf32> -> vector<576x128xf32>
    %8 = arith.addf %0, %7 : vector<576x128xf32>
    %c0_7 = arith.constant 0 : index
    %c0_8 = arith.constant 0 : index
    %c1 = arith.constant 1 : index
    %c0_9 = arith.constant 0 : index
    %9 = vector.load %arg1[%c0_7, %c0_8, %c1, %c0_9] : memref<1x26x26x128xbf16, #tpu.memory_space<vmem>>, vector<1x24x24x128xbf16>
    %10 = vector.shape_cast %9 : vector<1x24x24x128xbf16> to vector<24x24x128xbf16>
    %11 = arith.extf %10 : vector<24x24x128xbf16> to vector<24x24x128xf32>
    %12 = vector.shape_cast %11 : vector<24x24x128xf32> to vector<576x128xf32>
    %c1_10 = arith.constant 1 : index
    %c0_11 = arith.constant 0 : index
    %c0_12 = arith.constant 0 : index
    %13 = vector.load %arg2[%c1_10, %c0_11, %c0_12] : memref<9x128x128xf32, #tpu.memory_space<vmem>>, vector<1x128x128xf32>
    %14 = vector.shape_cast %13 : vector<1x128x128xf32> to vector<128x128xf32>
    %cst_13 = arith.constant dense<0.000000e+00> : vector<576x128xf32>
    %15 = tpu.matmul %12, %14, %cst_13 {dimension_numbers = #tpu.dot_dimension_numbers<[1], [0], [0], [1], [0, 0, 1, 1], [], []>} : vector<576x128xf32>, vector<128x128xf32>, vector<576x128xf32> -> vector<576x128xf32>
    %16 = arith.addf %8, %15 : vector<576x128xf32>
    %c0_14 = arith.constant 0 : index
    %c0_15 = arith.constant 0 : index
    %c2 = arith.constant 2 : index
    %c0_16 = arith.constant 0 : index
    %17 = vector.load %arg1[%c0_14, %c0_15, %c2, %c0_16] : memref<1x26x26x128xbf16, #tpu.memory_space<vmem>>, vector<1x24x24x128xbf16>
    %18 = vector.shape_cast %17 : vector<1x24x24x128xbf16> to vector<24x24x128xbf16>
    %19 = arith.extf %18 : vector<24x24x128xbf16> to vector<24x24x128xf32>
    %20 = vector.shape_cast %19 : vector<24x24x128xf32> to vector<576x128xf32>
    %c2_17 = arith.constant 2 : index
    %c0_18 = arith.constant 0 : index
    %c0_19 = arith.constant 0 : index
    %21 = vector.load %arg2[%c2_17, %c0_18, %c0_19] : memref<9x128x128xf32, #tpu.memory_space<vmem>>, vector<1x128x128xf32>
    %22 = vector.shape_cast %21 : vector<1x128x128xf32> to vector<128x128xf32>
    %cst_20 = arith.constant dense<0.000000e+00> : vector<576x128xf32>
    %23 = tpu.matmul %20, %22, %cst_20 {dimension_numbers = #tpu.dot_dimension_numbers<[1], [0], [0], [1], [0, 0, 1, 1], [], []>} : vector<576x128xf32>, vector<128x128xf32>, vector<576x128xf32> -> vector<576x128xf32>
    %24 = arith.addf %16, %23 : vector<576x128xf32>
    %c0_21 = arith.constant 0 : index
    %c1_22 = arith.constant 1 : index
    %c0_23 = arith.constant 0 : index
    %c0_24 = arith.constant 0 : index
    %25 = vector.load %arg1[%c0_21, %c1_22, %c0_23, %c0_24] : memref<1x26x26x128xbf16, #tpu.memory_space<vmem>>, vector<1x24x24x128xbf16>
    %26 = vector.shape_cast %25 : vector<1x24x24x128xbf16> to vector<24x24x128xbf16>
    %27 = arith.extf %26 : vector<24x24x128xbf16> to vector<24x24x128xf32>
    %28 = vector.shape_cast %27 : vector<24x24x128xf32> to vector<576x128xf32>
    %c3 = arith.constant 3 : index
    %c0_25 = arith.constant 0 : index
    %c0_26 = arith.constant 0 : index
    %29 = vector.load %arg2[%c3, %c0_25, %c0_26] : memref<9x128x128xf32, #tpu.memory_space<vmem>>, vector<1x128x128xf32>
    %30 = vector.shape_cast %29 : vector<1x128x128xf32> to vector<128x128xf32>
    %cst_27 = arith.constant dense<0.000000e+00> : vector<576x128xf32>
    %31 = tpu.matmul %28, %30, %cst_27 {dimension_numbers = #tpu.dot_dimension_numbers<[1], [0], [0], [1], [0, 0, 1, 1], [], []>} : vector<576x128xf32>, vector<128x128xf32>, vector<576x128xf32> -> vector<576x128xf32>
    %32 = arith.addf %24, %31 : vector<576x128xf32>
    %c0_28 = arith.constant 0 : index
    %c1_29 = arith.constant 1 : index
    %c1_30 = arith.constant 1 : index
    %c0_31 = arith.constant 0 : index
    %33 = vector.load %arg1[%c0_28, %c1_29, %c1_30, %c0_31] : memref<1x26x26x128xbf16, #tpu.memory_space<vmem>>, vector<1x24x24x128xbf16>
    %34 = vector.shape_cast %33 : vector<1x24x24x128xbf16> to vector<24x24x128xbf16>
    %35 = arith.extf %34 : vector<24x24x128xbf16> to vector<24x24x128xf32>
    %36 = vector.shape_cast %35 : vector<24x24x128xf32> to vector<576x128xf32>
    %c4 = arith.constant 4 : index
    %c0_32 = arith.constant 0 : index
    %c0_33 = arith.constant 0 : index
    %37 = vector.load %arg2[%c4, %c0_32, %c0_33] : memref<9x128x128xf32, #tpu.memory_space<vmem>>, vector<1x128x128xf32>
    %38 = vector.shape_cast %37 : vector<1x128x128xf32> to vector<128x128xf32>
    %cst_34 = arith.constant dense<0.000000e+00> : vector<576x128xf32>
    %39 = tpu.matmul %36, %38, %cst_34 {dimension_numbers = #tpu.dot_dimension_numbers<[1], [0], [0], [1], [0, 0, 1, 1], [], []>} : vector<576x128xf32>, vector<128x128xf32>, vector<576x128xf32> -> vector<576x128xf32>
    %40 = arith.addf %32, %39 : vector<576x128xf32>
    %c0_35 = arith.constant 0 : index
    %c1_36 = arith.constant 1 : index
    %c2_37 = arith.constant 2 : index
    %c0_38 = arith.constant 0 : index
    %41 = vector.load %arg1[%c0_35, %c1_36, %c2_37, %c0_38] : memref<1x26x26x128xbf16, #tpu.memory_space<vmem>>, vector<1x24x24x128xbf16>
    %42 = vector.shape_cast %41 : vector<1x24x24x128xbf16> to vector<24x24x128xbf16>
    %43 = arith.extf %42 : vector<24x24x128xbf16> to vector<24x24x128xf32>
    %44 = vector.shape_cast %43 : vector<24x24x128xf32> to vector<576x128xf32>
    %c5 = arith.constant 5 : index
    %c0_39 = arith.constant 0 : index
    %c0_40 = arith.constant 0 : index
    %45 = vector.load %arg2[%c5, %c0_39, %c0_40] : memref<9x128x128xf32, #tpu.memory_space<vmem>>, vector<1x128x128xf32>
    %46 = vector.shape_cast %45 : vector<1x128x128xf32> to vector<128x128xf32>
    %cst_41 = arith.constant dense<0.000000e+00> : vector<576x128xf32>
    %47 = tpu.matmul %44, %46, %cst_41 {dimension_numbers = #tpu.dot_dimension_numbers<[1], [0], [0], [1], [0, 0, 1, 1], [], []>} : vector<576x128xf32>, vector<128x128xf32>, vector<576x128xf32> -> vector<576x128xf32>
    %48 = arith.addf %40, %47 : vector<576x128xf32>
    %c0_42 = arith.constant 0 : index
    %c2_43 = arith.constant 2 : index
    %c0_44 = arith.constant 0 : index
    %c0_45 = arith.constant 0 : index
    %49 = vector.load %arg1[%c0_42, %c2_43, %c0_44, %c0_45] : memref<1x26x26x128xbf16, #tpu.memory_space<vmem>>, vector<1x24x24x128xbf16>
    %50 = vector.shape_cast %49 : vector<1x24x24x128xbf16> to vector<24x24x128xbf16>
    %51 = arith.extf %50 : vector<24x24x128xbf16> to vector<24x24x128xf32>
    %52 = vector.shape_cast %51 : vector<24x24x128xf32> to vector<576x128xf32>
    %c6 = arith.constant 6 : index
    %c0_46 = arith.constant 0 : index
    %c0_47 = arith.constant 0 : index
    %53 = vector.load %arg2[%c6, %c0_46, %c0_47] : memref<9x128x128xf32, #tpu.memory_space<vmem>>, vector<1x128x128xf32>
    %54 = vector.shape_cast %53 : vector<1x128x128xf32> to vector<128x128xf32>
    %cst_48 = arith.constant dense<0.000000e+00> : vector<576x128xf32>
    %55 = tpu.matmul %52, %54, %cst_48 {dimension_numbers = #tpu.dot_dimension_numbers<[1], [0], [0], [1], [0, 0, 1, 1], [], []>} : vector<576x128xf32>, vector<128x128xf32>, vector<576x128xf32> -> vector<576x128xf32>
    %56 = arith.addf %48, %55 : vector<576x128xf32>
    %c0_49 = arith.constant 0 : index
    %c2_50 = arith.constant 2 : index
    %c1_51 = arith.constant 1 : index
    %c0_52 = arith.constant 0 : index
    %57 = vector.load %arg1[%c0_49, %c2_50, %c1_51, %c0_52] : memref<1x26x26x128xbf16, #tpu.memory_space<vmem>>, vector<1x24x24x128xbf16>
    %58 = vector.shape_cast %57 : vector<1x24x24x128xbf16> to vector<24x24x128xbf16>
    %59 = arith.extf %58 : vector<24x24x128xbf16> to vector<24x24x128xf32>
    %60 = vector.shape_cast %59 : vector<24x24x128xf32> to vector<576x128xf32>
    %c7 = arith.constant 7 : index
    %c0_53 = arith.constant 0 : index
    %c0_54 = arith.constant 0 : index
    %61 = vector.load %arg2[%c7, %c0_53, %c0_54] : memref<9x128x128xf32, #tpu.memory_space<vmem>>, vector<1x128x128xf32>
    %62 = vector.shape_cast %61 : vector<1x128x128xf32> to vector<128x128xf32>
    %cst_55 = arith.constant dense<0.000000e+00> : vector<576x128xf32>
    %63 = tpu.matmul %60, %62, %cst_55 {dimension_numbers = #tpu.dot_dimension_numbers<[1], [0], [0], [1], [0, 0, 1, 1], [], []>} : vector<576x128xf32>, vector<128x128xf32>, vector<576x128xf32> -> vector<576x128xf32>
    %64 = arith.addf %56, %63 : vector<576x128xf32>
    %c0_56 = arith.constant 0 : index
    %c2_57 = arith.constant 2 : index
    %c2_58 = arith.constant 2 : index
    %c0_59 = arith.constant 0 : index
    %65 = vector.load %arg1[%c0_56, %c2_57, %c2_58, %c0_59] : memref<1x26x26x128xbf16, #tpu.memory_space<vmem>>, vector<1x24x24x128xbf16>
    %66 = vector.shape_cast %65 : vector<1x24x24x128xbf16> to vector<24x24x128xbf16>
    %67 = arith.extf %66 : vector<24x24x128xbf16> to vector<24x24x128xf32>
    %68 = vector.shape_cast %67 : vector<24x24x128xf32> to vector<576x128xf32>
    %c8 = arith.constant 8 : index
    %c0_60 = arith.constant 0 : index
    %c0_61 = arith.constant 0 : index
    %69 = vector.load %arg2[%c8, %c0_60, %c0_61] : memref<9x128x128xf32, #tpu.memory_space<vmem>>, vector<1x128x128xf32>
    %70 = vector.shape_cast %69 : vector<1x128x128xf32> to vector<128x128xf32>
    %cst_62 = arith.constant dense<0.000000e+00> : vector<576x128xf32>
    %71 = tpu.matmul %68, %70, %cst_62 {dimension_numbers = #tpu.dot_dimension_numbers<[1], [0], [0], [1], [0, 0, 1, 1], [], []>} : vector<576x128xf32>, vector<128x128xf32>, vector<576x128xf32> -> vector<576x128xf32>
    %72 = arith.addf %64, %71 : vector<576x128xf32>
    %c0_63 = arith.constant 0 : index
    %c0_64 = arith.constant 0 : index
    %73 = vector.load %arg3[%c0_63, %c0_64] : memref<1x128xf32, #tpu.memory_space<vmem>>, vector<1x128xf32>
    %74 = vector.broadcast %73 : vector<1x128xf32> to vector<576x128xf32>
    %75 = arith.addf %72, %74 : vector<576x128xf32>
    %cst_65 = arith.constant 0.000000e+00 : f32
    %76 = vector.broadcast %cst_65 : f32 to vector<576x128xf32>
    %77 = arith.maximumf %75, %76 : vector<576x128xf32>
    %78 = arith.truncf %77 : vector<576x128xf32> to vector<576x128xbf16>
    %c0_66 = arith.constant 0 : index
    %c0_67 = arith.constant 0 : index
    %c0_68 = arith.constant 0 : index
    %79 = vector.load %arg4[%c0_66, %c0_67, %c0_68] : memref<1x576x128xbf16, #tpu.memory_space<vmem>>, vector<1x576x128xbf16>
    %80 = vector.shape_cast %79 : vector<1x576x128xbf16> to vector<576x128xbf16>
    %81 = vector.shape_cast %78 : vector<576x128xbf16> to vector<1x576x128xbf16>
    tpu.vector_store %arg4[%c0_66, %c0_67, %c0_68], %81 {strides = array<i32>} : memref<1x576x128xbf16, #tpu.memory_space<vmem>>, vector<1x576x128xbf16>,
    return
  }
  func.func @transform_0(%arg0: i32) -> (i32, i32, i32, i32) {
    %c0_i32 = arith.constant 0 : i32
    %c0_i32_0 = arith.constant 0 : i32
    %c0_i32_1 = arith.constant 0 : i32
    %c0_i32_2 = arith.constant 0 : i32
    return %arg0, %c0_i32, %c0_i32_0, %c0_i32_1 : i32, i32, i32, i32
  }
  func.func @transform_1(%arg0: i32) -> (i32, i32, i32) {
    %c0_i32 = arith.constant 0 : i32
    %c0_i32_0 = arith.constant 0 : i32
    %c0_i32_1 = arith.constant 0 : i32
    %c0_i32_2 = arith.constant 0 : i32
    return %c0_i32, %c0_i32_0, %c0_i32_1 : i32, i32, i32
  }
  func.func @transform_2(%arg0: i32) -> (i32, i32) {
    %c0_i32 = arith.constant 0 : i32
    %c0_i32_0 = arith.constant 0 : i32
    %c0_i32_1 = arith.constant 0 : i32
    return %c0_i32, %c0_i32_0 : i32, i32
  }
  func.func @transform_3(%arg0: i32) -> (i32, i32, i32) {
    %c0_i32 = arith.constant 0 : i32
    %c0_i32_0 = arith.constant 0 : i32
    %c0_i32_1 = arith.constant 0 : i32
    return %arg0, %c0_i32, %c0_i32_0 : i32, i32, i32
  }
}

module attributes {stable_mosaic.version = 11 : i64} {
  func.func @_fc_fused_kernel(%arg0: i32, %arg1: memref<8x9216xbf16, #tpu.memory_space<vmem>>, %arg2: memref<9216x128xbf16, #tpu.memory_space<vmem>>, %arg3: memref<1x128xf32, #tpu.memory_space<vmem>>, %arg4: memref<128x128xbf16, #tpu.memory_space<vmem>>, %arg5: memref<1x128xf32, #tpu.memory_space<vmem>>, %arg6: memref<8x128xf32, #tpu.memory_space<vmem>>) attributes {dimension_semantics = [#tpu.dimension_semantics<parallel>], iteration_bounds = array<i64: 1>, scalar_prefetch = 0 : i64, scratch_operands = 0 : i64, tpu.core_type = #tpu.core_type<tc>, window_params = [{transform_indices = @transform_0, window_bounds = array<i64: 8, 9216>}, {pipeline_mode = #tpu.pipeline_mode<synchronous>, transform_indices = @transform_1, window_bounds = array<i64: 9216, 128>}, {pipeline_mode = #tpu.pipeline_mode<synchronous>, transform_indices = @transform_2, window_bounds = array<i64: 1, 128>}, {pipeline_mode = #tpu.pipeline_mode<synchronous>, transform_indices = @transform_3, window_bounds = array<i64: 128, 128>}, {pipeline_mode = #tpu.pipeline_mode<synchronous>, transform_indices = @transform_4, window_bounds = array<i64: 1, 128>}, {transform_indices = @transform_5, window_bounds = array<i64: 8, 128>}]} {
    %c0 = arith.constant 0 : index
    %c0_0 = arith.constant 0 : index
    %0 = vector.load %arg1[%c0, %c0_0] : memref<8x9216xbf16, #tpu.memory_space<vmem>>, vector<8x9216xbf16>
    %c0_1 = arith.constant 0 : index
    %c0_2 = arith.constant 0 : index
    %1 = vector.load %arg2[%c0_1, %c0_2] : memref<9216x128xbf16, #tpu.memory_space<vmem>>, vector<9216x128xbf16>
    %cst = arith.constant dense<0.000000e+00> : vector<8x128xf32>
    %2 = tpu.matmul %0, %1, %cst {dimension_numbers = #tpu.dot_dimension_numbers<[1], [0], [0], [1], [0, 0, 1, 1], [], []>} : vector<8x9216xbf16>, vector<9216x128xbf16>, vector<8x128xf32> -> vector<8x128xf32>
    %c0_3 = arith.constant 0 : index
    %c0_4 = arith.constant 0 : index
    %3 = vector.load %arg3[%c0_3, %c0_4] : memref<1x128xf32, #tpu.memory_space<vmem>>, vector<1x128xf32>
    %4 = vector.broadcast %3 : vector<1x128xf32> to vector<8x128xf32>
    %5 = arith.addf %2, %4 : vector<8x128xf32>
    %6 = arith.truncf %5 : vector<8x128xf32> to vector<8x128xbf16>
    %c0_5 = arith.constant 0 : index
    %c0_6 = arith.constant 0 : index
    %7 = vector.load %arg4[%c0_5, %c0_6] : memref<128x128xbf16, #tpu.memory_space<vmem>>, vector<128x128xbf16>
    %cst_7 = arith.constant dense<0.000000e+00> : vector<8x128xf32>
    %8 = tpu.matmul %6, %7, %cst_7 {dimension_numbers = #tpu.dot_dimension_numbers<[1], [0], [0], [1], [0, 0, 1, 1], [], []>} : vector<8x128xbf16>, vector<128x128xbf16>, vector<8x128xf32> -> vector<8x128xf32>
    %c0_8 = arith.constant 0 : index
    %c0_9 = arith.constant 0 : index
    %9 = vector.load %arg5[%c0_8, %c0_9] : memref<1x128xf32, #tpu.memory_space<vmem>>, vector<1x128xf32>
    %10 = vector.broadcast %9 : vector<1x128xf32> to vector<8x128xf32>
    %11 = arith.addf %8, %10 : vector<8x128xf32>
    %c0_10 = arith.constant 0 : index
    %c0_11 = arith.constant 0 : index
    %12 = vector.load %arg6[%c0_10, %c0_11] : memref<8x128xf32, #tpu.memory_space<vmem>>, vector<8x128xf32>
    tpu.vector_store %arg6[%c0_10, %c0_11], %11 {strides = array<i32>} : memref<8x128xf32, #tpu.memory_space<vmem>>, vector<8x128xf32>,
    return
  }
  func.func @transform_0(%arg0: i32) -> (i32, i32) {
    %c0_i32 = arith.constant 0 : i32
    %c0_i32_0 = arith.constant 0 : i32
    return %arg0, %c0_i32 : i32, i32
  }
  func.func @transform_1(%arg0: i32) -> (i32, i32) {
    %c0_i32 = arith.constant 0 : i32
    %c0_i32_0 = arith.constant 0 : i32
    %c0_i32_1 = arith.constant 0 : i32
    return %c0_i32, %c0_i32_0 : i32, i32
  }
  func.func @transform_2(%arg0: i32) -> (i32, i32) {
    %c0_i32 = arith.constant 0 : i32
    %c0_i32_0 = arith.constant 0 : i32
    %c0_i32_1 = arith.constant 0 : i32
    return %c0_i32, %c0_i32_0 : i32, i32
  }
  func.func @transform_3(%arg0: i32) -> (i32, i32) {
    %c0_i32 = arith.constant 0 : i32
    %c0_i32_0 = arith.constant 0 : i32
    %c0_i32_1 = arith.constant 0 : i32
    return %c0_i32, %c0_i32_0 : i32, i32
  }
  func.func @transform_4(%arg0: i32) -> (i32, i32) {
    %c0_i32 = arith.constant 0 : i32
    %c0_i32_0 = arith.constant 0 : i32
    %c0_i32_1 = arith.constant 0 : i32
    return %c0_i32, %c0_i32_0 : i32, i32
  }
  func.func @transform_5(%arg0: i32) -> (i32, i32) {
    %c0_i32 = arith.constant 0 : i32
    %c0_i32_0 = arith.constant 0 : i32
    return %arg0, %c0_i32 : i32, i32
  }
}

</mosaic_0001>

<bundles_post_ra>
// kernel: cnn_emnist_forward.3
= control target key start
LH: loop header
LB: loop body
LE: loop exit
PB: predicated region body
PF: predicated region fallthrough
CT: control target
= control target key end

     0   :  { %v4162_v0 = vmov 0.0|0.0   ;;  %vm4163_vm0 = vmmov 0   ;;  %v4164_v4 = vmov 0.0   ;;  %vm192_vm1 = vcmask 130048   ;;  %s5642_s1 = inlined_call_operand.vmem [shape: f32[16,128], index: 1, kind: input, shape index: {}]   ;;  %s5643_s0 = inlined_call_operand.vmem [shape: f32[1352,16], index: 0, kind: input, shape index: {}]   ;;  %s5644_s2 = inlined_call_operand.vmem [shape: f32[1,128], index: 2, kind: input, shape index: {}]   ;;  %s5645_s3 = inlined_call_operand.vmem [shape: bf16[1352,128], index: 3, kind: output, shape index: {}]  }
   0x1   :  { %4153 = vmatprep.subr.bf16.mxu0 %v4162_v0  ;;  %4156 = vmatprep.subr.bf16.mxu1 %v4162_v0  ;;  %v183_v1 = vld [vmem:[%s5642_s1] sm:$0xff]  ;;  %v184_v2 = vld [vmem:[%s5642_s1 + $0x8] sm:$0xff]  ;;  %v100_v8 = vld [vmem:[%s5643_s0 + $0x2b0] sm:$0xff] }
   0x2   :  { %v4154_v3 = vpack.c.bf16 %v184_v2, %v183_v1  ;;  %3646 = vmatprep.mubr.msk.f32.mxu0 %vm4163_vm0, %v4164_v4  ;;  %3901 = vmatprep.mubr.msk.f32.mxu1 %vm4163_vm0, %v4164_v4  ;;  %v14_v5 = vld [vmem:[%s5643_s0] sm:$0xff]  ;;  %v99_v6 = vld [vmem:[%s5643_s0 + $0x2a8] sm:$0xff]  ;;  %v16_v9 = vld [vmem:[%s5643_s0 + $0x10] sm:$0xff] }
   0x3   :  { %v15_v7 = vld [vmem:[%s5643_s0 + $0x8] sm:$0xff]  ;;  %v101_v10 = vld [vmem:[%s5643_s0 + $0x2b8] sm:$0xff]  ;;  %v102_v12 = vld [vmem:[%s5643_s0 + $0x2c0] sm:$0xff] }
   0x4   :  { %4155 = vmatpush3.bf16.msra.mxu0 %v4154_v3  ;;  %4157 = vmatpush3.bf16.msra.mxu1 %v4154_v3  ;;  %v17_v11 = vld [vmem:[%s5643_s0 + $0x18] sm:$0xff]  ;;  %v18_v13 = vld [vmem:[%s5643_s0 + $0x20] sm:$0xff]  ;;  %v103_v14 = vld [vmem:[%s5643_s0 + $0x2c8] sm:$0xff] }
   0x5   :  { %v19_v15 = vld [vmem:[%s5643_s0 + $0x28] sm:$0xff]  ;;  %v104_v16 = vld [vmem:[%s5643_s0 + $0x2d0] sm:$0xff]  ;;  %v105_v18 = vld [vmem:[%s5643_s0 + $0x2d8] sm:$0xff] }
   0x6   :  { %v20_v17 = vld [vmem:[%s5643_s0 + $0x30] sm:$0xff]  ;;  %v21_v19 = vld [vmem:[%s5643_s0 + $0x38] sm:$0xff]  ;;  %v106_v20 = vld [vmem:[%s5643_s0 + $0x2e0] sm:$0xff] }
   0x7   :  { %3647 = vmatmul.mubr.msk.f32.vlgmr.msra.gmra.mrb[0].mxu0 %vm192_vm1, %v14_v5  ;;  %3902 = vmatmul.mubr.msk.f32.vlgmr.msra.gmra.mrb[0].mxu1 %vm192_vm1, %v99_v6  ;;  %v22_v21 = vld [vmem:[%s5643_s0 + $0x40] sm:$0xff]  ;;  %v107_v22 = vld [vmem:[%s5643_s0 + $0x2e8] sm:$0xff]  ;;  %v108_v24 = vld [vmem:[%s5643_s0 + $0x2f0] sm:$0xff] }
   0x8   :  { %3649 = vmatprep.mubr.msk.f32.mxu0 %vm4163_vm0, %v4164_v4  ;;  %3904 = vmatprep.mubr.msk.f32.mxu1 %vm4163_vm0, %v4164_v4  ;;  %v23_v23 = vld [vmem:[%s5643_s0 + $0x48] sm:$0xff]  ;;  %v24_v25 = vld [vmem:[%s5643_s0 + $0x50] sm:$0xff]  ;;  %v109_v26 = vld [vmem:[%s5643_s0 + $0x2f8] sm:$0xff] }
   0x9   :  { %v25_v27 = vld [vmem:[%s5643_s0 + $0x58] sm:$0xff]  ;;  %v110_v28 = vld [vmem:[%s5643_s0 + $0x300] sm:$0xff]  ;;  %v111_v30 = vld [vmem:[%s5643_s0 + $0x308] sm:$0xff] }
   0xa   :  { %v26_v29 = vld [vmem:[%s5643_s0 + $0x60] sm:$0xff]  ;;  %v27_v31 = vld [vmem:[%s5643_s0 + $0x68] sm:$0xff]  ;;  %v112_v32 = vld [vmem:[%s5643_s0 + $0x310] sm:$0xff] }
   0xb   :  { %3650 = vmatmul.mubr.msk.f32.gmra.mrb[2].mxu0 %vm192_vm1, %v15_v7  ;;  %3905 = vmatmul.mubr.msk.f32.gmra.mrb[2].mxu1 %vm192_vm1, %v100_v8  ;;  %v28_v33 = vld [vmem:[%s5643_s0 + $0x70] sm:$0xff]  ;;  %v113_v34 = vld [vmem:[%s5643_s0 + $0x318] sm:$0xff]  ;;  %v114_v36 = vld [vmem:[%s5643_s0 + $0x320] sm:$0xff] }
   0xc   :  { %3652 = vmatprep.mubr.msk.f32.mxu0 %vm4163_vm0, %v4164_v4  ;;  %3907 = vmatprep.mubr.msk.f32.mxu1 %vm4163_vm0, %v4164_v4  ;;  %v29_v35 = vld [vmem:[%s5643_s0 + $0x78] sm:$0xff]  ;;  %v30_v37 = vld [vmem:[%s5643_s0 + $0x80] sm:$0xff]  ;;  %v115_v38 = vld [vmem:[%s5643_s0 + $0x328] sm:$0xff] }
   0xd   :  { %v31_v39 = vld [vmem:[%s5643_s0 + $0x88] sm:$0xff]  ;;  %v116_v40 = vld [vmem:[%s5643_s0 + $0x330] sm:$0xff]  ;;  %v117_v42 = vld [vmem:[%s5643_s0 + $0x338] sm:$0xff] }
   0xe   :  { %v32_v41 = vld [vmem:[%s5643_s0 + $0x90] sm:$0xff]  ;;  %v33_v43 = vld [vmem:[%s5643_s0 + $0x98] sm:$0xff]  ;;  %v118_v44 = vld [vmem:[%s5643_s0 + $0x340] sm:$0xff] }
   0xf   :  { %3653 = vmatmul.mubr.msk.f32.gmra.mrb[4].mxu0 %vm192_vm1, %v16_v9  ;;  %3908 = vmatmul.mubr.msk.f32.gmra.mrb[4].mxu1 %vm192_vm1, %v101_v10  ;;  %v34_v45 = vld [vmem:[%s5643_s0 + $0xa0] sm:$0xff]  ;;  %v119_v46 = vld [vmem:[%s5643_s0 + $0x348] sm:$0xff]  ;;  %v120_v48 = vld [vmem:[%s5643_s0 + $0x350] sm:$0xff] }
  0x10   :  { %3655 = vmatprep.mubr.msk.f32.mxu0 %vm4163_vm0, %v4164_v4  ;;  %3910 = vmatprep.mubr.msk.f32.mxu1 %vm4163_vm0, %v4164_v4  ;;  %v35_v47 = vld [vmem:[%s5643_s0 + $0xa8] sm:$0xff]  ;;  %v36_v49 = vld [vmem:[%s5643_s0 + $0xb0] sm:$0xff]  ;;  %v121_v50 = vld [vmem:[%s5643_s0 + $0x358] sm:$0xff] }
  0x11   :  { %v37_v51 = vld [vmem:[%s5643_s0 + $0xb8] sm:$0xff]  ;;  %v122_v52 = vld [vmem:[%s5643_s0 + $0x360] sm:$0xff]  ;;  %v123_v54 = vld [vmem:[%s5643_s0 + $0x368] sm:$0xff] }
  0x12   :  { %v38_v53 = vld [vmem:[%s5643_s0 + $0xc0] sm:$0xff]  ;;  %v39_v55 = vld [vmem:[%s5643_s0 + $0xc8] sm:$0xff]  ;;  %v124_v56 = vld [vmem:[%s5643_s0 + $0x370] sm:$0xff] }
  0x13   :  { %3656 = vmatmul.mubr.msk.f32.gmra.mrb[6].mxu0 %vm192_vm1, %v17_v11  ;;  %3911 = vmatmul.mubr.msk.f32.gmra.mrb[6].mxu1 %vm192_vm1, %v102_v12  ;;  %v40_v57 = vld [vmem:[%s5643_s0 + $0xd0] sm:$0xff]  ;;  %v125_v58 = vld [vmem:[%s5643_s0 + $0x378] sm:$0xff]  ;;  %v126_v60 = vld [vmem:[%s5643_s0 + $0x380] sm:$0xff] }
  0x14   :  { %3658 = vmatprep.mubr.msk.f32.mxu0 %vm4163_vm0, %v4164_v4  ;;  %3913 = vmatprep.mubr.msk.f32.mxu1 %vm4163_vm0, %v4164_v4  ;;  %v41_v59 = vld [vmem:[%s5643_s0 + $0xd8] sm:$0xff]  ;;  %v42_v61 = vld [vmem:[%s5643_s0 + $0xe0] sm:$0xff]  ;;  %v127_v62 = vld [vmem:[%s5643_s0 + $0x388] sm:$0xff] }
  0x15   :  { %v43_v63 = vld [vmem:[%s5643_s0 + $0xe8] sm:$0xff]  ;;  %v128_v0 = vld [vmem:[%s5643_s0 + $0x390] sm:$0xff]  ;;  %v129_v2 = vld [vmem:[%s5643_s0 + $0x398] sm:$0xff] }
  0x16   :  { %v44_v1 = vld [vmem:[%s5643_s0 + $0xf0] sm:$0xff]  ;;  %v45_v3 = vld [vmem:[%s5643_s0 + $0xf8] sm:$0xff]  ;;  %v130_v5 = vld [vmem:[%s5643_s0 + $0x3a0] sm:$0xff] }
  0x17   :  { %3659 = vmatmul.mubr.msk.f32.gmra.mrb[8].mxu0 %vm192_vm1, %v18_v13  ;;  %3914 = vmatmul.mubr.msk.f32.gmra.mrb[8].mxu1 %vm192_vm1, %v103_v14  ;;  %v46_v6 = vld [vmem:[%s5643_s0 + $0x100] sm:$0xff]  ;;  %v131_v7 = vld [vmem:[%s5643_s0 + $0x3a8] sm:$0xff]  ;;  %v132_v9 = vld [vmem:[%s5643_s0 + $0x3b0] sm:$0xff] }
  0x18   :  { %3661 = vmatprep.mubr.msk.f32.mxu0 %vm4163_vm0, %v4164_v4  ;;  %3916 = vmatprep.mubr.msk.f32.mxu1 %vm4163_vm0, %v4164_v4  ;;  %v47_v8 = vld [vmem:[%s5643_s0 + $0x108] sm:$0xff]  ;;  %v48_v10 = vld [vmem:[%s5643_s0 + $0x110] sm:$0xff]  ;;  %v133_v11 = vld [vmem:[%s5643_s0 + $0x3b8] sm:$0xff] }
  0x19   :  { %v49_v12 = vld [vmem:[%s5643_s0 + $0x118] sm:$0xff]  ;;  %v134_v13 = vld [vmem:[%s5643_s0 + $0x3c0] sm:$0xff] }
  0x1a   :  { %v50_v14 = vld [vmem:[%s5643_s0 + $0x120] sm:$0xff] }
  0x1b   :  { %3662 = vmatmul.mubr.msk.f32.gmra.mrb[10].mxu0 %vm192_vm1, %v19_v15  ;;  %3917 = vmatmul.mubr.msk.f32.gmra.mrb[10].mxu1 %vm192_vm1, %v104_v16  ;;  %v135_v15 = vld [vmem:[%s5643_s0 + $0x3c8] sm:$0xff] }
  0x1c   :  { %3664 = vmatprep.mubr.msk.f32.mxu0 %vm4163_vm0, %v4164_v4  ;;  %3919 = vmatprep.mubr.msk.f32.mxu1 %vm4163_vm0, %v4164_v4  ;;  %v51_v16 = vld [vmem:[%s5643_s0 + $0x128] sm:$0xff] }
  0x1f   :  { %3665 = vmatmul.mubr.msk.f32.gmra.mrb[12].mxu0 %vm192_vm1, %v20_v17  ;;  %3920 = vmatmul.mubr.msk.f32.gmra.mrb[12].mxu1 %vm192_vm1, %v105_v18  ;;  %v136_v17 = vld [vmem:[%s5643_s0 + $0x3d0] sm:$0xff] }
  0x20   :  { %3667 = vmatprep.mubr.msk.f32.mxu0 %vm4163_vm0, %v4164_v4  ;;  %3922 = vmatprep.mubr.msk.f32.mxu1 %vm4163_vm0, %v4164_v4  ;;  %v52_v18 = vld [vmem:[%s5643_s0 + $0x130] sm:$0xff] }
  0x23   :  { %3668 = vmatmul.mubr.msk.f32.gmra.mrb[14].mxu0 %vm192_vm1, %v21_v19  ;;  %3923 = vmatmul.mubr.msk.f32.gmra.mrb[14].mxu1 %vm192_vm1, %v106_v20  ;;  %v137_v19 = vld [vmem:[%s5643_s0 + $0x3d8] sm:$0xff] }
  0x24   :  { %3670 = vmatprep.mubr.msk.f32.mxu0 %vm4163_vm0, %v4164_v4  ;;  %3925 = vmatprep.mubr.msk.f32.mxu1 %vm4163_vm0, %v4164_v4  ;;  %v53_v20 = vld [vmem:[%s5643_s0 + $0x138] sm:$0xff] }
  0x27   :  { %3671 = vmatmul.mubr.msk.f32.gmra.mrb[16].mxu0 %vm192_vm1, %v22_v21  ;;  %3926 = vmatmul.mubr.msk.f32.gmra.mrb[16].mxu1 %vm192_vm1, %v107_v22  ;;  %v138_v21 = vld [vmem:[%s5643_s0 + $0x3e0] sm:$0xff] }
  0x28   :  { %3673 = vmatprep.mubr.msk.f32.mxu0 %vm4163_vm0, %v4164_v4  ;;  %3928 = vmatprep.mubr.msk.f32.mxu1 %vm4163_vm0, %v4164_v4  ;;  %v54_v22 = vld [vmem:[%s5643_s0 + $0x140] sm:$0xff] }
  0x2b   :  { %3674 = vmatmul.mubr.msk.f32.gmra.mrb[18].mxu0 %vm192_vm1, %v23_v23  ;;  %3929 = vmatmul.mubr.msk.f32.gmra.mrb[18].mxu1 %vm192_vm1, %v108_v24  ;;  %v139_v23 = vld [vmem:[%s5643_s0 + $0x3e8] sm:$0xff] }
  0x2c   :  { %3676 = vmatprep.mubr.msk.f32.mxu0 %vm4163_vm0, %v4164_v4  ;;  %3931 = vmatprep.mubr.msk.f32.mxu1 %vm4163_vm0, %v4164_v4  ;;  %v55_v24 = vld [vmem:[%s5643_s0 + $0x148] sm:$0xff] }
  0x2f   :  { %3677 = vmatmul.mubr.msk.f32.gmra.mrb[20].mxu0 %vm192_vm1, %v24_v25  ;;  %3932 = vmatmul.mubr.msk.f32.gmra.mrb[20].mxu1 %vm192_vm1, %v109_v26  ;;  %v140_v25 = vld [vmem:[%s5643_s0 + $0x3f0] sm:$0xff] }
  0x30   :  { %3679 = vmatprep.mubr.msk.f32.mxu0 %vm4163_vm0, %v4164_v4  ;;  %3934 = vmatprep.mubr.msk.f32.mxu1 %vm4163_vm0, %v4164_v4  ;;  %v56_v26 = vld [vmem:[%s5643_s0 + $0x150] sm:$0xff] }
  0x33   :  { %3680 = vmatmul.mubr.msk.f32.gmra.mrb[22].mxu0 %vm192_vm1, %v25_v27  ;;  %3935 = vmatmul.mubr.msk.f32.gmra.mrb[22].mxu1 %vm192_vm1, %v110_v28  ;;  %v141_v27 = vld [vmem:[%s5643_s0 + $0x3f8] sm:$0xff] }
  0x34   :  { %3682 = vmatprep.mubr.msk.f32.mxu0 %vm4163_vm0, %v4164_v4  ;;  %3937 = vmatprep.mubr.msk.f32.mxu1 %vm4163_vm0, %v4164_v4  ;;  %v57_v28 = vld [vmem:[%s5643_s0 + $0x158] sm:$0xff] }
  0x37   :  { %3683 = vmatmul.mubr.msk.f32.gmra.mrb[24].mxu0 %vm192_vm1, %v26_v29  ;;  %3938 = vmatmul.mubr.msk.f32.gmra.mrb[24].mxu1 %vm192_vm1, %v111_v30  ;;  %v142_v29 = vld [vmem:[%s5643_s0 + $0x400] sm:$0xff] }
  0x38   :  { %3685 = vmatprep.mubr.msk.f32.mxu0 %vm4163_vm0, %v4164_v4  ;;  %3940 = vmatprep.mubr.msk.f32.mxu1 %vm4163_vm0, %v4164_v4  ;;  %v58_v30 = vld [vmem:[%s5643_s0 + $0x160] sm:$0xff] }
  0x3b   :  { %3686 = vmatmul.mubr.msk.f32.gmra.mrb[26].mxu0 %vm192_vm1, %v27_v31  ;;  %3941 = vmatmul.mubr.msk.f32.gmra.mrb[26].mxu1 %vm192_vm1, %v112_v32  ;;  %v143_v31 = vld [vmem:[%s5643_s0 + $0x408] sm:$0xff] }
  0x3c   :  { %3688 = vmatprep.mubr.msk.f32.mxu0 %vm4163_vm0, %v4164_v4  ;;  %3943 = vmatprep.mubr.msk.f32.mxu1 %vm4163_vm0, %v4164_v4  ;;  %v59_v32 = vld [vmem:[%s5643_s0 + $0x168] sm:$0xff] }
  0x3f   :  { %3689 = vmatmul.mubr.msk.f32.gmra.mrb[28].mxu0 %vm192_vm1, %v28_v33  ;;  %3944 = vmatmul.mubr.msk.f32.gmra.mrb[28].mxu1 %vm192_vm1, %v113_v34  ;;  %v144_v33 = vld [vmem:[%s5643_s0 + $0x410] sm:$0xff] }
  0x40   :  { %3691 = vmatprep.mubr.msk.f32.mxu0 %vm4163_vm0, %v4164_v4  ;;  %3946 = vmatprep.mubr.msk.f32.mxu1 %vm4163_vm0, %v4164_v4  ;;  %v60_v34 = vld [vmem:[%s5643_s0 + $0x170] sm:$0xff] }
  0x43   :  { %3692 = vmatmul.mubr.msk.f32.gmra.mrb[30].mxu0 %vm192_vm1, %v29_v35  ;;  %3947 = vmatmul.mubr.msk.f32.gmra.mrb[30].mxu1 %vm192_vm1, %v114_v36  ;;  %v145_v35 = vld [vmem:[%s5643_s0 + $0x418] sm:$0xff] }
  0x44   :  { %3694 = vmatprep.mubr.msk.f32.mxu0 %vm4163_vm0, %v4164_v4  ;;  %3949 = vmatprep.mubr.msk.f32.mxu1 %vm4163_vm0, %v4164_v4  ;;  %v61_v36 = vld [vmem:[%s5643_s0 + $0x178] sm:$0xff] }
  0x47   :  { %3695 = vmatmul.mubr.msk.f32.gmra.mrb[32].mxu0 %vm192_vm1, %v30_v37  ;;  %3950 = vmatmul.mubr.msk.f32.gmra.mrb[32].mxu1 %vm192_vm1, %v115_v38  ;;  %v146_v37 = vld [vmem:[%s5643_s0 + $0x420] sm:$0xff] }
  0x48   :  { %3697 = vmatprep.mubr.msk.f32.mxu0 %vm4163_vm0, %v4164_v4  ;;  %3952 = vmatprep.mubr.msk.f32.mxu1 %vm4163_vm0, %v4164_v4  ;;  %v62_v38 = vld [vmem:[%s5643_s0 + $0x180] sm:$0xff] }
  0x4b   :  { %3698 = vmatmul.mubr.msk.f32.gmra.mrb[34].mxu0 %vm192_vm1, %v31_v39  ;;  %3953 = vmatmul.mubr.msk.f32.gmra.mrb[34].mxu1 %vm192_vm1, %v116_v40  ;;  %v147_v39 = vld [vmem:[%s5643_s0 + $0x428] sm:$0xff] }
  0x4c   :  { %3700 = vmatprep.mubr.msk.f32.mxu0 %vm4163_vm0, %v4164_v4  ;;  %3955 = vmatprep.mubr.msk.f32.mxu1 %vm4163_vm0, %v4164_v4  ;;  %v63_v40 = vld [vmem:[%s5643_s0 + $0x188] sm:$0xff] }
  0x4f   :  { %3701 = vmatmul.mubr.msk.f32.gmra.mrb[36].mxu0 %vm192_vm1, %v32_v41  ;;  %3956 = vmatmul.mubr.msk.f32.gmra.mrb[36].mxu1 %vm192_vm1, %v117_v42  ;;  %v148_v41 = vld [vmem:[%s5643_s0 + $0x430] sm:$0xff] }
  0x50   :  { %3703 = vmatprep.mubr.msk.f32.mxu0 %vm4163_vm0, %v4164_v4  ;;  %3958 = vmatprep.mubr.msk.f32.mxu1 %vm4163_vm0, %v4164_v4  ;;  %v64_v42 = vld [vmem:[%s5643_s0 + $0x190] sm:$0xff] }
  0x53   :  { %3704 = vmatmul.mubr.msk.f32.gmra.mrb[38].mxu0 %vm192_vm1, %v33_v43  ;;  %3959 = vmatmul.mubr.msk.f32.gmra.mrb[38].mxu1 %vm192_vm1, %v118_v44  ;;  %v149_v43 = vld [vmem:[%s5643_s0 + $0x438] sm:$0xff] }
  0x54   :  { %3706 = vmatprep.mubr.msk.f32.mxu0 %vm4163_vm0, %v4164_v4  ;;  %3961 = vmatprep.mubr.msk.f32.mxu1 %vm4163_vm0, %v4164_v4  ;;  %v65_v44 = vld [vmem:[%s5643_s0 + $0x198] sm:$0xff] }
  0x57   :  { %3707 = vmatmul.mubr.msk.f32.gmra.mrb[40].mxu0 %vm192_vm1, %v34_v45  ;;  %3962 = vmatmul.mubr.msk.f32.gmra.mrb[40].mxu1 %vm192_vm1, %v119_v46  ;;  %v150_v45 = vld [vmem:[%s5643_s0 + $0x440] sm:$0xff] }
  0x58   :  { %3709 = vmatprep.mubr.msk.f32.mxu0 %vm4163_vm0, %v4164_v4  ;;  %3964 = vmatprep.mubr.msk.f32.mxu1 %vm4163_vm0, %v4164_v4  ;;  %v66_v46 = vld [vmem:[%s5643_s0 + $0x1a0] sm:$0xff] }
  0x5b   :  { %3710 = vmatmul.mubr.msk.f32.gmra.mrb[42].mxu0 %vm192_vm1, %v35_v47  ;;  %3965 = vmatmul.mubr.msk.f32.gmra.mrb[42].mxu1 %vm192_vm1, %v120_v48  ;;  %v151_v47 = vld [vmem:[%s5643_s0 + $0x448] sm:$0xff] }
  0x5c   :  { %3712 = vmatprep.mubr.msk.f32.mxu0 %vm4163_vm0, %v4164_v4  ;;  %3967 = vmatprep.mubr.msk.f32.mxu1 %vm4163_vm0, %v4164_v4  ;;  %v67_v48 = vld [vmem:[%s5643_s0 + $0x1a8] sm:$0xff] }
  0x5f   :  { %3713 = vmatmul.mubr.msk.f32.gmra.mrb[44].mxu0 %vm192_vm1, %v36_v49  ;;  %3968 = vmatmul.mubr.msk.f32.gmra.mrb[44].mxu1 %vm192_vm1, %v121_v50  ;;  %v152_v49 = vld [vmem:[%s5643_s0 + $0x450] sm:$0xff] }
  0x60   :  { %3715 = vmatprep.mubr.msk.f32.mxu0 %vm4163_vm0, %v4164_v4  ;;  %3970 = vmatprep.mubr.msk.f32.mxu1 %vm4163_vm0, %v4164_v4 }
  0x63   :  { %3716 = vmatmul.mubr.msk.f32.gmra.mrb[46].mxu0 %vm192_vm1, %v37_v51  ;;  %3971 = vmatmul.mubr.msk.f32.gmra.mrb[46].mxu1 %vm192_vm1, %v122_v52 }
  0x64   :  { %3718 = vmatprep.mubr.msk.f32.mxu0 %vm4163_vm0, %v4164_v4  ;;  %3973 = vmatprep.mubr.msk.f32.mxu1 %vm4163_vm0, %v4164_v4 }
  0x67   :  { %3719 = vmatmul.mubr.msk.f32.gmra.mrb[48].mxu0 %vm192_vm1, %v38_v53  ;;  %3974 = vmatmul.mubr.msk.f32.gmra.mrb[48].mxu1 %vm192_vm1, %v123_v54  ;;  %v4844_v54 = vld [vmem:[%s5644_s2] ss:$0 sm:$0xff] }
  0x68   :  { %3721 = vmatprep.mubr.msk.f32.mxu0 %vm4163_vm0, %v4164_v4  ;;  %3976 = vmatprep.mubr.msk.f32.mxu1 %vm4163_vm0, %v4164_v4 }
  0x6b   :  { %3722 = vmatmul.mubr.msk.f32.gmra.mrb[50].mxu0 %vm192_vm1, %v39_v55  ;;  %3977 = vmatmul.mubr.msk.f32.gmra.mrb[50].mxu1 %vm192_vm1, %v124_v56  ;;  %v68_v55 = vld [vmem:[%s5643_s0 + $0x1b0] sm:$0xff]  ;;  %v153_v56 = vld [vmem:[%s5643_s0 + $0x458] sm:$0xff] }
  0x6c   :  { %3724 = vmatprep.mubr.msk.f32.mxu0 %vm4163_vm0, %v4164_v4  ;;  %3979 = vmatprep.mubr.msk.f32.mxu1 %vm4163_vm0, %v4164_v4 }
  0x6f   :  { %3725 = vmatmul.mubr.msk.f32.gmra.mrb[52].mxu0 %vm192_vm1, %v40_v57  ;;  %3980 = vmatmul.mubr.msk.f32.gmra.mrb[52].mxu1 %vm192_vm1, %v125_v58 }
  0x70   :  { %3727 = vmatprep.mubr.msk.f32.mxu0 %vm4163_vm0, %v4164_v4  ;;  %3982 = vmatprep.mubr.msk.f32.mxu1 %vm4163_vm0, %v4164_v4 }
  0x73   :  { %3728 = vmatmul.mubr.msk.f32.gmra.mrb[54].mxu0 %vm192_vm1, %v41_v59  ;;  %3983 = vmatmul.mubr.msk.f32.gmra.mrb[54].mxu1 %vm192_vm1, %v126_v60 }
  0x74   :  { %3730 = vmatprep.mubr.msk.f32.mxu0 %vm4163_vm0, %v4164_v4  ;;  %3985 = vmatprep.mubr.msk.f32.mxu1 %vm4163_vm0, %v4164_v4 }
  0x77   :  { %3731 = vmatmul.mubr.msk.f32.gmra.mrb[56].mxu0 %vm192_vm1, %v42_v61  ;;  %3986 = vmatmul.mubr.msk.f32.gmra.mrb[56].mxu1 %vm192_vm1, %v127_v62 }
  0x78   :  { %3733 = vmatprep.mubr.msk.f32.mxu0 %vm4163_vm0, %v4164_v4  ;;  %3988 = vmatprep.mubr.msk.f32.mxu1 %vm4163_vm0, %v4164_v4 }
  0x7b   :  { %3734 = vmatmul.mubr.msk.f32.gmra.mrb[58].mxu0 %vm192_vm1, %v43_v63  ;;  %3989 = vmatmul.mubr.msk.f32.gmra.mrb[58].mxu1 %vm192_vm1, %v128_v0  ;;  %v69_v63 = vld [vmem:[%s5643_s0 + $0x1b8] sm:$0xff]  ;;  %v154_v0 = vld [vmem:[%s5643_s0 + $0x460] sm:$0xff] }
  0x7c   :  { %3736 = vmatprep.mubr.msk.f32.mxu0 %vm4163_vm0, %v4164_v4  ;;  %3991 = vmatprep.mubr.msk.f32.mxu1 %vm4163_vm0, %v4164_v4 }
  0x7f   :  { %3737 = vmatmul.mubr.msk.f32.gmra.mrb[60].mxu0 %vm192_vm1, %v44_v1  ;;  %3992 = vmatmul.mubr.msk.f32.gmra.mrb[60].mxu1 %vm192_vm1, %v129_v2 }
  0x80   :  { %3739 = vmatprep.mubr.msk.f32.mxu0 %vm4163_vm0, %v4164_v4  ;;  %3994 = vmatprep.mubr.msk.f32.mxu1 %vm4163_vm0, %v4164_v4 }
  0x83   :  { %3740 = vmatmul.mubr.msk.f32.gmra.mrb[62].mxu0 %vm192_vm1, %v45_v3  ;;  %3995 = vmatmul.mubr.msk.f32.gmra.mrb[62].mxu1 %vm192_vm1, %v130_v5 }
  0x84   :  { %3742 = vmatprep.mubr.msk.f32.mxu0 %vm4163_vm0, %v4164_v4  ;;  %3997 = vmatprep.mubr.msk.f32.mxu1 %vm4163_vm0, %v4164_v4 }
  0x87   :  { %3743 = vmatmul.mubr.msk.f32.gmra.mrb[64].mxu0 %vm192_vm1, %v46_v6  ;;  %3998 = vmatmul.mubr.msk.f32.gmra.mrb[64].mxu1 %vm192_vm1, %v131_v7 }
  0x88   :  { %3745 = vmatprep.mubr.msk.f32.mxu0 %vm4163_vm0, %v4164_v4  ;;  %4000 = vmatprep.mubr.msk.f32.mxu1 %vm4163_vm0, %v4164_v4 }
  0x8b   :  { %3746 = vmatmul.mubr.msk.f32.gmra.mrb[66].mxu0 %vm192_vm1, %v47_v8  ;;  %4001 = vmatmul.mubr.msk.f32.gmra.mrb[66].mxu1 %vm192_vm1, %v132_v9  ;;  %v70_v9 = vld [vmem:[%s5643_s0 + $0x1c0] sm:$0xff] }
  0x8c   :  { %3748 = vmatprep.mubr.msk.f32.mxu0 %vm4163_vm0, %v4164_v4  ;;  %4003 = vmatprep.mubr.msk.f32.mxu1 %vm4163_vm0, %v4164_v4 }
  0x8f   :  { %3749 = vmatmul.mubr.msk.f32.gmra.mrb[68].mxu0 %vm192_vm1, %v48_v10  ;;  %4004 = vmatmul.mubr.msk.f32.gmra.mrb[68].mxu1 %vm192_vm1, %v133_v11  ;;  %v155_v10 = vld [vmem:[%s5643_s0 + $0x468] sm:$0xff] }
  0x90   :  { %3751 = vmatprep.mubr.msk.f32.mxu0 %vm4163_vm0, %v4164_v4  ;;  %4006 = vmatprep.mubr.msk.f32.mxu1 %vm4163_vm0, %v4164_v4 }
  0x93   :  { %3752 = vmatmul.mubr.msk.f32.gmra.mrb[70].mxu0 %vm192_vm1, %v49_v12  ;;  %4007 = vmatmul.mubr.msk.f32.gmra.mrb[70].mxu1 %vm192_vm1, %v134_v13 }
  0x94   :  { %3754 = vmatprep.mubr.msk.f32.mxu0 %vm4163_vm0, %v4164_v4  ;;  %4009 = vmatprep.mubr.msk.f32.mxu1 %vm4163_vm0, %v4164_v4 }
  0x97   :  { %3755 = vmatmul.mubr.msk.f32.gmra.mrb[72].mxu0 %vm192_vm1, %v50_v14  ;;  %4010 = vmatmul.mubr.msk.f32.gmra.mrb[72].mxu1 %vm192_vm1, %v135_v15 }
  0x98   :  { %3757 = vmatprep.mubr.msk.f32.mxu0 %vm4163_vm0, %v4164_v4  ;;  %4012 = vmatprep.mubr.msk.f32.mxu1 %vm4163_vm0, %v4164_v4 }
  0x9b   :  { %3758 = vmatmul.mubr.msk.f32.gmra.mrb[74].mxu0 %vm192_vm1, %v51_v16  ;;  %4013 = vmatmul.mubr.msk.f32.gmra.mrb[74].mxu1 %vm192_vm1, %v136_v17 }
  0x9c   :  { %3760 = vmatprep.mubr.msk.f32.mxu0 %vm4163_vm0, %v4164_v4  ;;  %4015 = vmatprep.mubr.msk.f32.mxu1 %vm4163_vm0, %v4164_v4 }
  0x9f   :  { %3761 = vmatmul.mubr.msk.f32.gmra.mrb[76].mxu0 %vm192_vm1, %v52_v18  ;;  %4016 = vmatmul.mubr.msk.f32.gmra.mrb[76].mxu1 %vm192_vm1, %v137_v19  ;;  %v71_v18 = vld [vmem:[%s5643_s0 + $0x1c8] sm:$0xff]  ;;  %v156_v19 = vld [vmem:[%s5643_s0 + $0x470] sm:$0xff] }
  0xa0   :  { %3763 = vmatprep.mubr.msk.f32.mxu0 %vm4163_vm0, %v4164_v4  ;;  %4018 = vmatprep.mubr.msk.f32.mxu1 %vm4163_vm0, %v4164_v4 }
  0xa3   :  { %3764 = vmatmul.mubr.msk.f32.gmra.mrb[78].mxu0 %vm192_vm1, %v53_v20  ;;  %4019 = vmatmul.mubr.msk.f32.gmra.mrb[78].mxu1 %vm192_vm1, %v138_v21 }
  0xa4   :  { %3766 = vmatprep.mubr.msk.f32.mxu0 %vm4163_vm0, %v4164_v4  ;;  %4021 = vmatprep.mubr.msk.f32.mxu1 %vm4163_vm0, %v4164_v4 }
  0xa7   :  { %3767 = vmatmul.mubr.msk.f32.gmra.mrb[80].mxu0 %vm192_vm1, %v54_v22  ;;  %4022 = vmatmul.mubr.msk.f32.gmra.mrb[80].mxu1 %vm192_vm1, %v139_v23 }
  0xa8   :  { %3769 = vmatprep.mubr.msk.f32.mxu0 %vm4163_vm0, %v4164_v4  ;;  %4024 = vmatprep.mubr.msk.f32.mxu1 %vm4163_vm0, %v4164_v4 }
  0xab   :  { %3770 = vmatmul.mubr.msk.f32.gmra.mrb[82].mxu0 %vm192_vm1, %v55_v24  ;;  %4025 = vmatmul.mubr.msk.f32.gmra.mrb[82].mxu1 %vm192_vm1, %v140_v25 }
  0xac   :  { %3772 = vmatprep.mubr.msk.f32.mxu0 %vm4163_vm0, %v4164_v4  ;;  %4027 = vmatprep.mubr.msk.f32.mxu1 %vm4163_vm0, %v4164_v4 }
  0xaf   :  { %3773 = vmatmul.mubr.msk.f32.gmra.mrb[84].mxu0 %vm192_vm1, %v56_v26  ;;  %4028 = vmatmul.mubr.msk.f32.gmra.mrb[84].mxu1 %vm192_vm1, %v141_v27  ;;  %v72_v27 = vld [vmem:[%s5643_s0 + $0x1d0] sm:$0xff] }
  0xb0   :  { %3775 = vmatprep.mubr.msk.f32.mxu0 %vm4163_vm0, %v4164_v4  ;;  %4030 = vmatprep.mubr.msk.f32.mxu1 %vm4163_vm0, %v4164_v4 }
  0xb3   :  { %3776 = vmatmul.mubr.msk.f32.gmra.mrb[86].mxu0 %vm192_vm1, %v57_v28  ;;  %4031 = vmatmul.mubr.msk.f32.gmra.mrb[86].mxu1 %vm192_vm1, %v142_v29  ;;  %v157_v28 = vld [vmem:[%s5643_s0 + $0x478] sm:$0xff] }
  0xb4   :  { %3778 = vmatprep.mubr.msk.f32.mxu0 %vm4163_vm0, %v4164_v4  ;;  %4033 = vmatprep.mubr.msk.f32.mxu1 %vm4163_vm0, %v4164_v4 }
  0xb7   :  { %3779 = vmatmul.mubr.msk.f32.gmra.mrb[88].mxu0 %vm192_vm1, %v58_v30  ;;  %4034 = vmatmul.mubr.msk.f32.gmra.mrb[88].mxu1 %vm192_vm1, %v143_v31 }
  0xb8   :  { %3781 = vmatprep.mubr.msk.f32.mxu0 %vm4163_vm0, %v4164_v4  ;;  %4036 = vmatprep.mubr.msk.f32.mxu1 %vm4163_vm0, %v4164_v4 }
  0xbb   :  { %3782 = vmatmul.mubr.msk.f32.gmra.mrb[90].mxu0 %vm192_vm1, %v59_v32  ;;  %4037 = vmatmul.mubr.msk.f32.gmra.mrb[90].mxu1 %vm192_vm1, %v144_v33 }
  0xbc   :  { %3784 = vmatprep.mubr.msk.f32.mxu0 %vm4163_vm0, %v4164_v4  ;;  %4039 = vmatprep.mubr.msk.f32.mxu1 %vm4163_vm0, %v4164_v4 }
  0xbf   :  { %3785 = vmatmul.mubr.msk.f32.gmra.mrb[92].mxu0 %vm192_vm1, %v60_v34  ;;  %4040 = vmatmul.mubr.msk.f32.gmra.mrb[92].mxu1 %vm192_vm1, %v145_v35 }
  0xc0   :  { %3787 = vmatprep.mubr.msk.f32.mxu0 %vm4163_vm0, %v4164_v4  ;;  %4042 = vmatprep.mubr.msk.f32.mxu1 %vm4163_vm0, %v4164_v4 }
  0xc3   :  { %3788 = vmatmul.mubr.msk.f32.gmra.mrb[94].mxu0 %vm192_vm1, %v61_v36  ;;  %4043 = vmatmul.mubr.msk.f32.gmra.mrb[94].mxu1 %vm192_vm1, %v146_v37  ;;  %v73_v36 = vld [vmem:[%s5643_s0 + $0x1d8] sm:$0xff]  ;;  %v158_v37 = vld [vmem:[%s5643_s0 + $0x480] sm:$0xff] }
  0xc4   :  { %3790 = vmatprep.mubr.msk.f32.mxu0 %vm4163_vm0, %v4164_v4  ;;  %4045 = vmatprep.mubr.msk.f32.mxu1 %vm4163_vm0, %v4164_v4 }
  0xc7   :  { %3791 = vmatmul.mubr.msk.f32.gmra.mrb[96].mxu0 %vm192_vm1, %v62_v38  ;;  %4046 = vmatmul.mubr.msk.f32.gmra.mrb[96].mxu1 %vm192_vm1, %v147_v39 }
  0xc8   :  { %3793 = vmatprep.mubr.msk.f32.mxu0 %vm4163_vm0, %v4164_v4  ;;  %4048 = vmatprep.mubr.msk.f32.mxu1 %vm4163_vm0, %v4164_v4 }
  0xcb   :  { %3794 = vmatmul.mubr.msk.f32.gmra.mrb[98].mxu0 %vm192_vm1, %v63_v40  ;;  %4049 = vmatmul.mubr.msk.f32.gmra.mrb[98].mxu1 %vm192_vm1, %v148_v41 }
  0xcc   :  { %3796 = vmatprep.mubr.msk.f32.mxu0 %vm4163_vm0, %v4164_v4  ;;  %4051 = vmatprep.mubr.msk.f32.mxu1 %vm4163_vm0, %v4164_v4 }
  0xcf   :  { %3797 = vmatmul.mubr.msk.f32.gmra.mrb[100].mxu0 %vm192_vm1, %v64_v42  ;;  %4052 = vmatmul.mubr.msk.f32.gmra.mrb[100].mxu1 %vm192_vm1, %v149_v43 }
  0xd0   :  { %3799 = vmatprep.mubr.msk.f32.mxu0 %vm4163_vm0, %v4164_v4  ;;  %4054 = vmatprep.mubr.msk.f32.mxu1 %vm4163_vm0, %v4164_v4 }
  0xd3   :  { %3800 = vmatmul.mubr.msk.f32.gmra.mrb[102].mxu0 %vm192_vm1, %v65_v44  ;;  %4055 = vmatmul.mubr.msk.f32.gmra.mrb[102].mxu1 %vm192_vm1, %v150_v45  ;;  %v74_v45 = vld [vmem:[%s5643_s0 + $0x1e0] sm:$0xff] }
  0xd4   :  { %3802 = vmatprep.mubr.msk.f32.mxu0 %vm4163_vm0, %v4164_v4  ;;  %4057 = vmatprep.mubr.msk.f32.mxu1 %vm4163_vm0, %v4164_v4 }
  0xd7   :  { %3803 = vmatmul.mubr.msk.f32.gmra.mrb[104].mxu0 %vm192_vm1, %v66_v46  ;;  %4058 = vmatmul.mubr.msk.f32.gmra.mrb[104].mxu1 %vm192_vm1, %v151_v47  ;;  %v159_v46 = vld [vmem:[%s5643_s0 + $0x488] sm:$0xff] }
  0xd8   :  { %3805 = vmatprep.mubr.msk.f32.mxu0 %vm4163_vm0, %v4164_v4  ;;  %4060 = vmatprep.mubr.msk.f32.mxu1 %vm4163_vm0, %v4164_v4 }
  0xda   :  { %v766_v50 = vpop.f32.mrb[0].mxu0  ;;  %v4837_v51 = vpop.f32.mrb[0].mxu1 }
  0xdb   :  { %v3648_v52 = vpop.f32.mrb[1].mxu0  ;;  %3806 = vmatmul.mubr.msk.f32.gmra.mrb[106].mxu0 %vm192_vm1, %v67_v48  ;;  %4061 = vmatmul.mubr.msk.f32.gmra.mrb[106].mxu1 %vm192_vm1, %v152_v49  ;;  %v3903_v53 = vpop.f32.mrb[1].mxu1  ;;  %v767_v59 = vadd.f32 %v4844_v54, %v766_v50 }
  0xdc   :  { %3808 = vmatprep.mubr.msk.f32.mxu0 %vm4163_vm0, %v4164_v4  ;;  %4063 = vmatprep.mubr.msk.f32.mxu1 %vm4163_vm0, %v4164_v4 }
  0xde   :  { %v771_v57 = vpop.f32.mrb[2].mxu0  ;;  %v1196_v58 = vpop.f32.mrb[2].mxu1 }
  0xdf   :  { %v772_v60 = vadd.f32 %v4844_v54, %v771_v57  ;;  %v3651_v61 = vpop.f32.mrb[3].mxu0  ;;  %3809 = vmatmul.mubr.msk.f32.gmra.mrb[108].mxu0 %vm192_vm1, %v68_v55  ;;  %4064 = vmatmul.mubr.msk.f32.gmra.mrb[108].mxu1 %vm192_vm1, %v153_v56  ;;  %v3906_v62 = vpop.f32.mrb[3].mxu1  ;;  %v1197_v2 = vadd.f32 %v4844_v54, %v1196_v58  ;;  %v75_v56 = vld [vmem:[%s5643_s0 + $0x1e8] sm:$0xff]  ;;  %v160_v57 = vld [vmem:[%s5643_s0 + $0x490] sm:$0xff] }
  0xe0   :  { %3811 = vmatprep.mubr.msk.f32.mxu0 %vm4163_vm0, %v4164_v4  ;;  %4066 = vmatprep.mubr.msk.f32.mxu1 %vm4163_vm0, %v4164_v4 }
  0xe1   :  { %v2971_v1 = vpack.c.bf16 %v772_v60, %v767_v59 }
  0xe2   :  { %v776_v3 = vpop.f32.mrb[4].mxu0  ;;  %v1201_v5 = vpop.f32.mrb[4].mxu1 }
  0xe3   :  { %2972 = vst [vmem:[%s5645_s3] sm:$0xff] %v2971_v1   ;;  %v1202_v6 = vadd.f32 %v4844_v54, %v1201_v5  ;;  %v3654_v7 = vpop.f32.mrb[5].mxu0  ;;  %3812 = vmatmul.mubr.msk.f32.gmra.mrb[110].mxu0 %vm192_vm1, %v69_v63  ;;  %4067 = vmatmul.mubr.msk.f32.gmra.mrb[110].mxu1 %vm192_vm1, %v154_v0  ;;  %v3909_v8 = vpop.f32.mrb[5].mxu1  ;;  %v777_v14 = vadd.f32 %v4844_v54, %v776_v3  ;;  %v76_v1 = vld [vmem:[%s5643_s0 + $0x1f0] sm:$0xff] }
  0xe4   :  { %3814 = vmatprep.mubr.msk.f32.mxu0 %vm4163_vm0, %v4164_v4  ;;  %4069 = vmatprep.mubr.msk.f32.mxu1 %vm4163_vm0, %v4164_v4 }
  0xe5   :  { %v3186_v11 = vpack.c.bf16 %v1202_v6, %v1197_v2  ;;  %v161_v2 = vld [vmem:[%s5643_s0 + $0x498] sm:$0xff] }
  0xe6   :  { %v781_v12 = vpop.f32.mrb[6].mxu0  ;;  %v1206_v13 = vpop.f32.mrb[6].mxu1 }
  0xe7   :  { %3430 = vst [vmem:[%s5645_s3 + $0x158] sm:$0xff] %v3186_v11   ;;  %v782_v15 = vadd.f32 %v4844_v54, %v781_v12  ;;  %v3657_v16 = vpop.f32.mrb[7].mxu0  ;;  %3815 = vmatmul.mubr.msk.f32.gmra.mrb[112].mxu0 %vm192_vm1, %v70_v9  ;;  %4070 = vmatmul.mubr.msk.f32.gmra.mrb[112].mxu1 %vm192_vm1, %v155_v10  ;;  %v3912_v17 = vpop.f32.mrb[7].mxu1  ;;  %v1207_v21 = vadd.f32 %v4844_v54, %v1206_v13  ;;  %v77_v11 = vld [vmem:[%s5643_s0 + $0x1f8] sm:$0xff]  ;;  %v162_v12 = vld [vmem:[%s5643_s0 + $0x4a0] sm:$0xff] }
  0xe8   :  { %3817 = vmatprep.mubr.msk.f32.mxu0 %vm4163_vm0, %v4164_v4  ;;  %4072 = vmatprep.mubr.msk.f32.mxu1 %vm4163_vm0, %v4164_v4 }
  0xe9   :  { %v2976_v20 = vpack.c.bf16 %v782_v15, %v777_v14 }
  0xea   :  { %v786_v22 = vpop.f32.mrb[8].mxu0  ;;  %v1211_v23 = vpop.f32.mrb[8].mxu1 }
  0xeb   :  { %3388 = vst [vmem:[%s5645_s3 + $0x8] sm:$0xff] %v2976_v20   ;;  %v1212_v24 = vadd.f32 %v4844_v54, %v1211_v23  ;;  %v3660_v25 = vpop.f32.mrb[9].mxu0  ;;  %3818 = vmatmul.mubr.msk.f32.gmra.mrb[114].mxu0 %vm192_vm1, %v71_v18  ;;  %4073 = vmatmul.mubr.msk.f32.gmra.mrb[114].mxu1 %vm192_vm1, %v156_v19  ;;  %v3915_v26 = vpop.f32.mrb[9].mxu1  ;;  %v787_v32 = vadd.f32 %v4844_v54, %v786_v22  ;;  %v78_v20 = vld [vmem:[%s5643_s0 + $0x200] sm:$0xff] }
  0xec   :  { %3820 = vmatprep.mubr.msk.f32.mxu0 %vm4163_vm0, %v4164_v4  ;;  %4075 = vmatprep.mubr.msk.f32.mxu1 %vm4163_vm0, %v4164_v4 }
  0xed   :  { %v3191_v29 = vpack.c.bf16 %v1212_v24, %v1207_v21  ;;  %v163_v21 = vld [vmem:[%s5643_s0 + $0x4a8] sm:$0xff] }
  0xee   :  { %v791_v30 = vpop.f32.mrb[10].mxu0  ;;  %v1216_v31 = vpop.f32.mrb[10].mxu1 }
  0xef   :  { %3431 = vst [vmem:[%s5645_s3 + $0x160] sm:$0xff] %v3191_v29   ;;  %v792_v33 = vadd.f32 %v4844_v54, %v791_v30  ;;  %v3663_v34 = vpop.f32.mrb[11].mxu0  ;;  %3821 = vmatmul.mubr.msk.f32.gmra.mrb[116].mxu0 %vm192_vm1, %v72_v27  ;;  %4076 = vmatmul.mubr.msk.f32.gmra.mrb[116].mxu1 %vm192_vm1, %v157_v28  ;;  %v3918_v35 = vpop.f32.mrb[11].mxu1  ;;  %v1217_v39 = vadd.f32 %v4844_v54, %v1216_v31  ;;  %v79_v29 = vld [vmem:[%s5643_s0 + $0x208] sm:$0xff]  ;;  %v164_v30 = vld [vmem:[%s5643_s0 + $0x4b0] sm:$0xff] }
  0xf0   :  { %3823 = vmatprep.mubr.msk.f32.mxu0 %vm4163_vm0, %v4164_v4  ;;  %4078 = vmatprep.mubr.msk.f32.mxu1 %vm4163_vm0, %v4164_v4 }
  0xf1   :  { %v2981_v38 = vpack.c.bf16 %v792_v33, %v787_v32 }
  0xf2   :  { %v796_v40 = vpop.f32.mrb[12].mxu0  ;;  %v1221_v41 = vpop.f32.mrb[12].mxu1 }
  0xf3   :  { %3389 = vst [vmem:[%s5645_s3 + $0x10] sm:$0xff] %v2981_v38   ;;  %v1222_v42 = vadd.f32 %v4844_v54, %v1221_v41  ;;  %v3666_v43 = vpop.f32.mrb[13].mxu0  ;;  %3824 = vmatmul.mubr.msk.f32.gmra.mrb[118].mxu0 %vm192_vm1, %v73_v36  ;;  %4079 = vmatmul.mubr.msk.f32.gmra.mrb[118].mxu1 %vm192_vm1, %v158_v37  ;;  %v3921_v44 = vpop.f32.mrb[13].mxu1  ;;  %v797_v50 = vadd.f32 %v4844_v54, %v796_v40  ;;  %v80_v38 = vld [vmem:[%s5643_s0 + $0x210] sm:$0xff] }
  0xf4   :  { %3826 = vmatprep.mubr.msk.f32.mxu0 %vm4163_vm0, %v4164_v4  ;;  %4081 = vmatprep.mubr.msk.f32.mxu1 %vm4163_vm0, %v4164_v4 }
  0xf5   :  { %v3196_v47 = vpack.c.bf16 %v1222_v42, %v1217_v39  ;;  %v165_v39 = vld [vmem:[%s5643_s0 + $0x4b8] sm:$0xff] }
  0xf6   :  { %v801_v48 = vpop.f32.mrb[14].mxu0  ;;  %v1226_v49 = vpop.f32.mrb[14].mxu1 }
  0xf7   :  { %3432 = vst [vmem:[%s5645_s3 + $0x168] sm:$0xff] %v3196_v47   ;;  %v802_v52 = vadd.f32 %v4844_v54, %v801_v48  ;;  %v3669_v53 = vpop.f32.mrb[15].mxu0  ;;  %3827 = vmatmul.mubr.msk.f32.gmra.mrb[120].mxu0 %vm192_vm1, %v74_v45  ;;  %4082 = vmatmul.mubr.msk.f32.gmra.mrb[120].mxu1 %vm192_vm1, %v159_v46  ;;  %v3924_v55 = vpop.f32.mrb[15].mxu1  ;;  %v1227_v59 = vadd.f32 %v4844_v54, %v1226_v49  ;;  %v81_v47 = vld [vmem:[%s5643_s0 + $0x218] sm:$0xff]  ;;  %v166_v48 = vld [vmem:[%s5643_s0 + $0x4c0] sm:$0xff] }
  0xf8   :  { %3829 = vmatprep.mubr.msk.f32.mxu0 %vm4163_vm0, %v4164_v4  ;;  %4084 = vmatprep.mubr.msk.f32.mxu1 %vm4163_vm0, %v4164_v4 }
  0xf9   :  { %v2986_v58 = vpack.c.bf16 %v802_v52, %v797_v50 }
  0xfa   :  { %v806_v60 = vpop.f32.mrb[16].mxu0  ;;  %v1231_v61 = vpop.f32.mrb[16].mxu1 }
  0xfb   :  { %3390 = vst [vmem:[%s5645_s3 + $0x18] sm:$0xff] %v2986_v58   ;;  %v1232_v62 = vadd.f32 %v4844_v54, %v1231_v61  ;;  %v3672_v63 = vpop.f32.mrb[17].mxu0  ;;  %3830 = vmatmul.mubr.msk.f32.gmra.mrb[122].mxu0 %vm192_vm1, %v75_v56  ;;  %4085 = vmatmul.mubr.msk.f32.gmra.mrb[122].mxu1 %vm192_vm1, %v160_v57  ;;  %v3927_v0 = vpop.f32.mrb[17].mxu1  ;;  %v807_v7 = vadd.f32 %v4844_v54, %v806_v60  ;;  %v82_v58 = vld [vmem:[%s5643_s0 + $0x220] sm:$0xff] }
  0xfc   :  { %3832 = vmatprep.mubr.msk.f32.mxu0 %vm4163_vm0, %v4164_v4  ;;  %4087 = vmatprep.mubr.msk.f32.mxu1 %vm4163_vm0, %v4164_v4 }
  0xfd   :  { %v3201_v3 = vpack.c.bf16 %v1232_v62, %v1227_v59  ;;  %v167_v59 = vld [vmem:[%s5643_s0 + $0x4c8] sm:$0xff] }
  0xfe   :  { %v811_v5 = vpop.f32.mrb[18].mxu0  ;;  %v1236_v6 = vpop.f32.mrb[18].mxu1 }
  0xff   :  { %3433 = vst [vmem:[%s5645_s3 + $0x170] sm:$0xff] %v3201_v3   ;;  %v812_v8 = vadd.f32 %v4844_v54, %v811_v5  ;;  %v3675_v9 = vpop.f32.mrb[19].mxu0  ;;  %3833 = vmatmul.mubr.msk.f32.gmra.mrb[124].mxu0 %vm192_vm1, %v76_v1  ;;  %4088 = vmatmul.mubr.msk.f32.gmra.mrb[124].mxu1 %vm192_vm1, %v161_v2  ;;  %v3930_v10 = vpop.f32.mrb[19].mxu1  ;;  %v1237_v14 = vadd.f32 %v4844_v54, %v1236_v6  ;;  %v83_v3 = vld [vmem:[%s5643_s0 + $0x228] sm:$0xff]  ;;  %v168_v5 = vld [vmem:[%s5643_s0 + $0x4d0] sm:$0xff] }
 0x100   :  { %3835 = vmatprep.mubr.msk.f32.mxu0 %vm4163_vm0, %v4164_v4  ;;  %4090 = vmatprep.mubr.msk.f32.mxu1 %vm4163_vm0, %v4164_v4 }
 0x101   :  { %v2991_v13 = vpack.c.bf16 %v812_v8, %v807_v7 }
 0x102   :  { %v816_v15 = vpop.f32.mrb[20].mxu0  ;;  %v1241_v16 = vpop.f32.mrb[20].mxu1 }
 0x103   :  { %3391 = vst [vmem:[%s5645_s3 + $0x20] sm:$0xff] %v2991_v13   ;;  %v1242_v17 = vadd.f32 %v4844_v54, %v1241_v16  ;;  %v3678_v18 = vpop.f32.mrb[21].mxu0  ;;  %3836 = vmatmul.mubr.msk.f32.gmra.mrb[126].mxu0 %vm192_vm1, %v77_v11  ;;  %4091 = vmatmul.mubr.msk.f32.gmra.mrb[126].mxu1 %vm192_vm1, %v162_v12  ;;  %v3933_v19 = vpop.f32.mrb[21].mxu1  ;;  %v817_v25 = vadd.f32 %v4844_v54, %v816_v15  ;;  %v84_v13 = vld [vmem:[%s5643_s0 + $0x230] sm:$0xff] }
 0x104   :  { %3838 = vmatprep.mubr.msk.f32.mxu0 %vm4163_vm0, %v4164_v4  ;;  %4093 = vmatprep.mubr.msk.f32.mxu1 %vm4163_vm0, %v4164_v4 }
 0x105   :  { %v3206_v22 = vpack.c.bf16 %v1242_v17, %v1237_v14  ;;  %v169_v14 = vld [vmem:[%s5643_s0 + $0x4d8] sm:$0xff] }
 0x106   :  { %v821_v23 = vpop.f32.mrb[22].mxu0  ;;  %v1246_v24 = vpop.f32.mrb[22].mxu1 }
 0x107   :  { %3434 = vst [vmem:[%s5645_s3 + $0x178] sm:$0xff] %v3206_v22   ;;  %v822_v26 = vadd.f32 %v4844_v54, %v821_v23  ;;  %v3681_v27 = vpop.f32.mrb[23].mxu0  ;;  %3839 = vmatmul.mubr.msk.f32.gmra.mrb[128].mxu0 %vm192_vm1, %v78_v20  ;;  %4094 = vmatmul.mubr.msk.f32.gmra.mrb[128].mxu1 %vm192_vm1, %v163_v21  ;;  %v3936_v28 = vpop.f32.mrb[23].mxu1  ;;  %v1247_v32 = vadd.f32 %v4844_v54, %v1246_v24  ;;  %v85_v22 = vld [vmem:[%s5643_s0 + $0x238] sm:$0xff]  ;;  %v170_v23 = vld [vmem:[%s5643_s0 + $0x4e0] sm:$0xff] }
 0x108   :  { %3841 = vmatprep.mubr.msk.f32.mxu0 %vm4163_vm0, %v4164_v4  ;;  %4096 = vmatprep.mubr.msk.f32.mxu1 %vm4163_vm0, %v4164_v4 }
 0x109   :  { %v2996_v31 = vpack.c.bf16 %v822_v26, %v817_v25 }
 0x10a   :  { %v826_v33 = vpop.f32.mrb[24].mxu0  ;;  %v1251_v34 = vpop.f32.mrb[24].mxu1 }
 0x10b   :  { %3392 = vst [vmem:[%s5645_s3 + $0x28] sm:$0xff] %v2996_v31   ;;  %v1252_v35 = vadd.f32 %v4844_v54, %v1251_v34  ;;  %v3684_v36 = vpop.f32.mrb[25].mxu0  ;;  %3842 = vmatmul.mubr.msk.f32.gmra.mrb[130].mxu0 %vm192_vm1, %v79_v29  ;;  %4097 = vmatmul.mubr.msk.f32.gmra.mrb[130].mxu1 %vm192_vm1, %v164_v30  ;;  %v3939_v37 = vpop.f32.mrb[25].mxu1  ;;  %v827_v43 = vadd.f32 %v4844_v54, %v826_v33  ;;  %v86_v31 = vld [vmem:[%s5643_s0 + $0x240] sm:$0xff] }
 0x10c   :  { %3844 = vmatprep.mubr.msk.f32.mxu0 %vm4163_vm0, %v4164_v4  ;;  %4099 = vmatprep.mubr.msk.f32.mxu1 %vm4163_vm0, %v4164_v4 }
 0x10d   :  { %v3211_v40 = vpack.c.bf16 %v1252_v35, %v1247_v32  ;;  %v171_v32 = vld [vmem:[%s5643_s0 + $0x4e8] sm:$0xff] }
 0x10e   :  { %v831_v41 = vpop.f32.mrb[26].mxu0  ;;  %v1256_v42 = vpop.f32.mrb[26].mxu1 }
 0x10f   :  { %3435 = vst [vmem:[%s5645_s3 + $0x180] sm:$0xff] %v3211_v40   ;;  %v832_v44 = vadd.f32 %v4844_v54, %v831_v41  ;;  %v3687_v45 = vpop.f32.mrb[27].mxu0  ;;  %3845 = vmatmul.mubr.msk.f32.gmra.mrb[132].mxu0 %vm192_vm1, %v80_v38  ;;  %4100 = vmatmul.mubr.msk.f32.gmra.mrb[132].mxu1 %vm192_vm1, %v165_v39  ;;  %v3942_v46 = vpop.f32.mrb[27].mxu1  ;;  %v1257_v50 = vadd.f32 %v4844_v54, %v1256_v42  ;;  %v87_v40 = vld [vmem:[%s5643_s0 + $0x248] sm:$0xff]  ;;  %v172_v41 = vld [vmem:[%s5643_s0 + $0x4f0] sm:$0xff] }
 0x110   :  { %3847 = vmatprep.mubr.msk.f32.mxu0 %vm4163_vm0, %v4164_v4  ;;  %4102 = vmatprep.mubr.msk.f32.mxu1 %vm4163_vm0, %v4164_v4 }
 0x111   :  { %v3001_v49 = vpack.c.bf16 %v832_v44, %v827_v43 }
 0x112   :  { %v836_v52 = vpop.f32.mrb[28].mxu0  ;;  %v1261_v53 = vpop.f32.mrb[28].mxu1 }
 0x113   :  { %3393 = vst [vmem:[%s5645_s3 + $0x30] sm:$0xff] %v3001_v49   ;;  %v1262_v55 = vadd.f32 %v4844_v54, %v1261_v53  ;;  %v3690_v56 = vpop.f32.mrb[29].mxu0  ;;  %3848 = vmatmul.mubr.msk.f32.gmra.mrb[134].mxu0 %vm192_vm1, %v81_v47  ;;  %4103 = vmatmul.mubr.msk.f32.gmra.mrb[134].mxu1 %vm192_vm1, %v166_v48  ;;  %v3945_v57 = vpop.f32.mrb[29].mxu1  ;;  %v837_v63 = vadd.f32 %v4844_v54, %v836_v52  ;;  %v88_v49 = vld [vmem:[%s5643_s0 + $0x250] sm:$0xff] }
 0x114   :  { %3850 = vmatprep.mubr.msk.f32.mxu0 %vm4163_vm0, %v4164_v4  ;;  %4105 = vmatprep.mubr.msk.f32.mxu1 %vm4163_vm0, %v4164_v4 }
 0x115   :  { %v3216_v60 = vpack.c.bf16 %v1262_v55, %v1257_v50  ;;  %v173_v50 = vld [vmem:[%s5643_s0 + $0x4f8] sm:$0xff] }
 0x116   :  { %v841_v61 = vpop.f32.mrb[30].mxu0  ;;  %v1266_v62 = vpop.f32.mrb[30].mxu1 }
 0x117   :  { %3436 = vst [vmem:[%s5645_s3 + $0x188] sm:$0xff] %v3216_v60   ;;  %v842_v0 = vadd.f32 %v4844_v54, %v841_v61  ;;  %v3693_v1 = vpop.f32.mrb[31].mxu0  ;;  %3851 = vmatmul.mubr.msk.f32.gmra.mrb[136].mxu0 %vm192_vm1, %v82_v58  ;;  %4106 = vmatmul.mubr.msk.f32.gmra.mrb[136].mxu1 %vm192_vm1, %v167_v59  ;;  %v3948_v2 = vpop.f32.mrb[31].mxu1  ;;  %v1267_v7 = vadd.f32 %v4844_v54, %v1266_v62  ;;  %v89_v60 = vld [vmem:[%s5643_s0 + $0x258] sm:$0xff]  ;;  %v174_v61 = vld [vmem:[%s5643_s0 + $0x500] sm:$0xff] }
 0x118   :  { %3853 = vmatprep.mubr.msk.f32.mxu0 %vm4163_vm0, %v4164_v4  ;;  %4108 = vmatprep.mubr.msk.f32.mxu1 %vm4163_vm0, %v4164_v4 }
 0x119   :  { %v3006_v6 = vpack.c.bf16 %v842_v0, %v837_v63 }
 0x11a   :  { %v846_v8 = vpop.f32.mrb[32].mxu0  ;;  %v1271_v9 = vpop.f32.mrb[32].mxu1 }
 0x11b   :  { %3394 = vst [vmem:[%s5645_s3 + $0x38] sm:$0xff] %v3006_v6   ;;  %v1272_v10 = vadd.f32 %v4844_v54, %v1271_v9  ;;  %v3696_v11 = vpop.f32.mrb[33].mxu0  ;;  %3854 = vmatmul.mubr.msk.f32.gmra.mrb[138].mxu0 %vm192_vm1, %v83_v3  ;;  %4109 = vmatmul.mubr.msk.f32.gmra.mrb[138].mxu1 %vm192_vm1, %v168_v5  ;;  %v3951_v12 = vpop.f32.mrb[33].mxu1  ;;  %v847_v18 = vadd.f32 %v4844_v54, %v846_v8  ;;  %v90_v6 = vld [vmem:[%s5643_s0 + $0x260] sm:$0xff] }
 0x11c   :  { %3856 = vmatprep.mubr.msk.f32.mxu0 %vm4163_vm0, %v4164_v4  ;;  %4111 = vmatprep.mubr.msk.f32.mxu1 %vm4163_vm0, %v4164_v4 }
 0x11d   :  { %v3221_v15 = vpack.c.bf16 %v1272_v10, %v1267_v7  ;;  %v175_v7 = vld [vmem:[%s5643_s0 + $0x508] sm:$0xff] }
 0x11e   :  { %v851_v16 = vpop.f32.mrb[34].mxu0  ;;  %v1276_v17 = vpop.f32.mrb[34].mxu1 }
 0x11f   :  { %3437 = vst [vmem:[%s5645_s3 + $0x190] sm:$0xff] %v3221_v15   ;;  %v852_v19 = vadd.f32 %v4844_v54, %v851_v16  ;;  %v3699_v20 = vpop.f32.mrb[35].mxu0  ;;  %3857 = vmatmul.mubr.msk.f32.gmra.mrb[140].mxu0 %vm192_vm1, %v84_v13  ;;  %4112 = vmatmul.mubr.msk.f32.gmra.mrb[140].mxu1 %vm192_vm1, %v169_v14  ;;  %v3954_v21 = vpop.f32.mrb[35].mxu1  ;;  %v1277_v25 = vadd.f32 %v4844_v54, %v1276_v17  ;;  %v91_v15 = vld [vmem:[%s5643_s0 + $0x268] sm:$0xff]  ;;  %v176_v16 = vld [vmem:[%s5643_s0 + $0x510] sm:$0xff] }
 0x120   :  { %3859 = vmatprep.mubr.msk.f32.mxu0 %vm4163_vm0, %v4164_v4  ;;  %4114 = vmatprep.mubr.msk.f32.mxu1 %vm4163_vm0, %v4164_v4 }
 0x121   :  { %v3011_v24 = vpack.c.bf16 %v852_v19, %v847_v18 }
 0x122   :  { %v856_v26 = vpop.f32.mrb[36].mxu0  ;;  %v1281_v27 = vpop.f32.mrb[36].mxu1 }
 0x123   :  { %3395 = vst [vmem:[%s5645_s3 + $0x40] sm:$0xff] %v3011_v24   ;;  %v1282_v28 = vadd.f32 %v4844_v54, %v1281_v27  ;;  %v3702_v29 = vpop.f32.mrb[37].mxu0  ;;  %3860 = vmatmul.mubr.msk.f32.gmra.mrb[142].mxu0 %vm192_vm1, %v85_v22  ;;  %4115 = vmatmul.mubr.msk.f32.gmra.mrb[142].mxu1 %vm192_vm1, %v170_v23  ;;  %v3957_v30 = vpop.f32.mrb[37].mxu1  ;;  %v857_v36 = vadd.f32 %v4844_v54, %v856_v26  ;;  %v92_v24 = vld [vmem:[%s5643_s0 + $0x270] sm:$0xff] }
 0x124   :  { %3862 = vmatprep.mubr.msk.f32.mxu0 %vm4163_vm0, %v4164_v4  ;;  %4117 = vmatprep.mubr.msk.f32.mxu1 %vm4163_vm0, %v4164_v4 }
 0x125   :  { %v3226_v33 = vpack.c.bf16 %v1282_v28, %v1277_v25  ;;  %v177_v25 = vld [vmem:[%s5643_s0 + $0x518] sm:$0xff] }
 0x126   :  { %v861_v34 = vpop.f32.mrb[38].mxu0  ;;  %v1286_v35 = vpop.f32.mrb[38].mxu1 }
 0x127   :  { %3438 = vst [vmem:[%s5645_s3 + $0x198] sm:$0xff] %v3226_v33   ;;  %v862_v37 = vadd.f32 %v4844_v54, %v861_v34  ;;  %v3705_v38 = vpop.f32.mrb[39].mxu0  ;;  %3863 = vmatmul.mubr.msk.f32.gmra.mrb[144].mxu0 %vm192_vm1, %v86_v31  ;;  %4118 = vmatmul.mubr.msk.f32.gmra.mrb[144].mxu1 %vm192_vm1, %v171_v32  ;;  %v3960_v39 = vpop.f32.mrb[39].mxu1  ;;  %v1287_v43 = vadd.f32 %v4844_v54, %v1286_v35  ;;  %v93_v33 = vld [vmem:[%s5643_s0 + $0x278] sm:$0xff]  ;;  %v178_v34 = vld [vmem:[%s5643_s0 + $0x520] sm:$0xff] }
 0x128   :  { %3865 = vmatprep.mubr.msk.f32.mxu0 %vm4163_vm0, %v4164_v4  ;;  %4120 = vmatprep.mubr.msk.f32.mxu1 %vm4163_vm0, %v4164_v4 }
 0x129   :  { %v3016_v42 = vpack.c.bf16 %v862_v37, %v857_v36 }
 0x12a   :  { %v866_v44 = vpop.f32.mrb[40].mxu0  ;;  %v1291_v45 = vpop.f32.mrb[40].mxu1 }
 0x12b   :  { %3396 = vst [vmem:[%s5645_s3 + $0x48] sm:$0xff] %v3016_v42   ;;  %v1292_v46 = vadd.f32 %v4844_v54, %v1291_v45  ;;  %v3708_v47 = vpop.f32.mrb[41].mxu0  ;;  %3866 = vmatmul.mubr.msk.f32.gmra.mrb[146].mxu0 %vm192_vm1, %v87_v40  ;;  %4121 = vmatmul.mubr.msk.f32.gmra.mrb[146].mxu1 %vm192_vm1, %v172_v41  ;;  %v3963_v48 = vpop.f32.mrb[41].mxu1  ;;  %v867_v56 = vadd.f32 %v4844_v54, %v866_v44  ;;  %v94_v42 = vld [vmem:[%s5643_s0 + $0x280] sm:$0xff] }
 0x12c   :  { %3868 = vmatprep.mubr.msk.f32.mxu0 %vm4163_vm0, %v4164_v4  ;;  %4123 = vmatprep.mubr.msk.f32.mxu1 %vm4163_vm0, %v4164_v4 }
 0x12d   :  { %v3231_v52 = vpack.c.bf16 %v1292_v46, %v1287_v43  ;;  %v179_v43 = vld [vmem:[%s5643_s0 + $0x528] sm:$0xff] }
 0x12e   :  { %v871_v53 = vpop.f32.mrb[42].mxu0  ;;  %v1296_v55 = vpop.f32.mrb[42].mxu1 }
 0x12f   :  { %3439 = vst [vmem:[%s5645_s3 + $0x1a0] sm:$0xff] %v3231_v52   ;;  %v872_v57 = vadd.f32 %v4844_v54, %v871_v53  ;;  %v3711_v58 = vpop.f32.mrb[43].mxu0  ;;  %3869 = vmatmul.mubr.msk.f32.gmra.mrb[148].mxu0 %vm192_vm1, %v88_v49  ;;  %4124 = vmatmul.mubr.msk.f32.gmra.mrb[148].mxu1 %vm192_vm1, %v173_v50  ;;  %v3966_v59 = vpop.f32.mrb[43].mxu1  ;;  %v1297_v63 = vadd.f32 %v4844_v54, %v1296_v55  ;;  %v95_v52 = vld [vmem:[%s5643_s0 + $0x288] sm:$0xff]  ;;  %v180_v53 = vld [vmem:[%s5643_s0 + $0x530] sm:$0xff] }
 0x130   :  { %3871 = vmatprep.mubr.msk.f32.mxu0 %vm4163_vm0, %v4164_v4  ;;  %4126 = vmatprep.mubr.msk.f32.mxu1 %vm4163_vm0, %v4164_v4 }
 0x131   :  { %v3021_v62 = vpack.c.bf16 %v872_v57, %v867_v56 }
 0x132   :  { %v876_v0 = vpop.f32.mrb[44].mxu0  ;;  %v1301_v1 = vpop.f32.mrb[44].mxu1 }
 0x133   :  { %3397 = vst [vmem:[%s5645_s3 + $0x50] sm:$0xff] %v3021_v62   ;;  %v1302_v2 = vadd.f32 %v4844_v54, %v1301_v1  ;;  %v3714_v3 = vpop.f32.mrb[45].mxu0  ;;  %3872 = vmatmul.mubr.msk.f32.gmra.mrb[150].mxu0 %vm192_vm1, %v89_v60  ;;  %4127 = vmatmul.mubr.msk.f32.gmra.mrb[150].mxu1 %vm192_vm1, %v174_v61  ;;  %v3969_v5 = vpop.f32.mrb[45].mxu1  ;;  %v877_v11 = vadd.f32 %v4844_v54, %v876_v0  ;;  %v96_v62 = vld [vmem:[%s5643_s0 + $0x290] sm:$0xff] }
 0x134   :  { %3874 = vmatprep.mubr.msk.f32.mxu0 %vm4163_vm0, %v4164_v4  ;;  %4129 = vmatprep.mubr.msk.f32.mxu1 %vm4163_vm0, %v4164_v4 }
 0x135   :  { %v3236_v8 = vpack.c.bf16 %v1302_v2, %v1297_v63  ;;  %v181_v63 = vld [vmem:[%s5643_s0 + $0x538] sm:$0xff] }
 0x136   :  { %v881_v9 = vpop.f32.mrb[46].mxu0  ;;  %v1306_v10 = vpop.f32.mrb[46].mxu1 }
 0x137   :  { %3440 = vst [vmem:[%s5645_s3 + $0x1a8] sm:$0xff] %v3236_v8   ;;  %v882_v12 = vadd.f32 %v4844_v54, %v881_v9  ;;  %v3717_v13 = vpop.f32.mrb[47].mxu0  ;;  %3875 = vmatmul.mubr.msk.f32.gmra.mrb[152].mxu0 %vm192_vm1, %v90_v6  ;;  %4130 = vmatmul.mubr.msk.f32.gmra.mrb[152].mxu1 %vm192_vm1, %v175_v7  ;;  %v3972_v14 = vpop.f32.mrb[47].mxu1  ;;  %v1307_v18 = vadd.f32 %v4844_v54, %v1306_v10  ;;  %v97_v8 = vld [vmem:[%s5643_s0 + $0x298] sm:$0xff]  ;;  %v182_v9 = vld [vmem:[%s5643_s0 + $0x540] sm:$0xff] }
 0x138   :  { %3877 = vmatprep.mubr.msk.f32.mxu0 %vm4163_vm0, %v4164_v4  ;;  %4132 = vmatprep.mubr.msk.f32.mxu1 %vm4163_vm0, %v4164_v4 }
 0x139   :  { %v3026_v17 = vpack.c.bf16 %v882_v12, %v877_v11 }
 0x13a   :  { %v886_v19 = vpop.f32.mrb[48].mxu0  ;;  %v1311_v20 = vpop.f32.mrb[48].mxu1 }
 0x13b   :  { %3398 = vst [vmem:[%s5645_s3 + $0x58] sm:$0xff] %v3026_v17   ;;  %v1312_v21 = vadd.f32 %v4844_v54, %v1311_v20  ;;  %v3720_v22 = vpop.f32.mrb[49].mxu0  ;;  %3878 = vmatmul.mubr.msk.f32.gmra.mrb[154].mxu0 %vm192_vm1, %v91_v15  ;;  %4133 = vmatmul.mubr.msk.f32.gmra.mrb[154].mxu1 %vm192_vm1, %v176_v16  ;;  %v3975_v23 = vpop.f32.mrb[49].mxu1  ;;  %v887_v29 = vadd.f32 %v4844_v54, %v886_v19  ;;  %v98_v17 = vld [vmem:[%s5643_s0 + $0x2a0] sm:$0xff] }
 0x13c   :  { %3880 = vmatprep.mubr.msk.f32.mxu0 %vm4163_vm0, %v4164_v4  ;;  %4135 = vmatprep.mubr.msk.f32.mxu1 %vm4163_vm0, %v4164_v4 }
 0x13d   :  { %v3241_v26 = vpack.c.bf16 %v1312_v21, %v1307_v18 }
 0x13e   :  { %v891_v27 = vpop.f32.mrb[50].mxu0  ;;  %v1316_v28 = vpop.f32.mrb[50].mxu1 }
 0x13f   :  { %3441 = vst [vmem:[%s5645_s3 + $0x1b0] sm:$0xff] %v3241_v26   ;;  %v892_v30 = vadd.f32 %v4844_v54, %v891_v27  ;;  %v3723_v31 = vpop.f32.mrb[51].mxu0  ;;  %3881 = vmatmul.mubr.msk.f32.gmra.mrb[156].mxu0 %vm192_vm1, %v92_v24  ;;  %4136 = vmatmul.mubr.msk.f32.gmra.mrb[156].mxu1 %vm192_vm1, %v177_v25  ;;  %v3978_v32 = vpop.f32.mrb[51].mxu1  ;;  %v1317_v36 = vadd.f32 %v4844_v54, %v1316_v28 }
 0x140   :  { %3883 = vmatprep.mubr.msk.f32.mxu0 %vm4163_vm0, %v4164_v4  ;;  %4138 = vmatprep.mubr.msk.f32.mxu1 %vm4163_vm0, %v4164_v4 }
 0x141   :  { %v3031_v35 = vpack.c.bf16 %v892_v30, %v887_v29 }
 0x142   :  { %v896_v37 = vpop.f32.mrb[52].mxu0  ;;  %v1321_v38 = vpop.f32.mrb[52].mxu1 }
 0x143   :  { %3399 = vst [vmem:[%s5645_s3 + $0x60] sm:$0xff] %v3031_v35   ;;  %v1322_v39 = vadd.f32 %v4844_v54, %v1321_v38  ;;  %v3726_v40 = vpop.f32.mrb[53].mxu0  ;;  %3884 = vmatmul.mubr.msk.f32.gmra.mrb[158].mxu0 %vm192_vm1, %v93_v33  ;;  %4139 = vmatmul.mubr.msk.f32.gmra.mrb[158].mxu1 %vm192_vm1, %v178_v34  ;;  %v3981_v41 = vpop.f32.mrb[53].mxu1  ;;  %v897_v47 = vadd.f32 %v4844_v54, %v896_v37 }
 0x144   :  { %3886 = vmatprep.mubr.msk.f32.mxu0 %vm4163_vm0, %v4164_v4  ;;  %4141 = vmatprep.mubr.msk.f32.mxu1 %vm4163_vm0, %v4164_v4 }
 0x145   :  { %v3246_v44 = vpack.c.bf16 %v1322_v39, %v1317_v36 }
 0x146   :  { %v901_v45 = vpop.f32.mrb[54].mxu0  ;;  %v1326_v46 = vpop.f32.mrb[54].mxu1 }
 0x147   :  { %3442 = vst [vmem:[%s5645_s3 + $0x1b8] sm:$0xff] %v3246_v44   ;;  %v902_v48 = vadd.f32 %v4844_v54, %v901_v45  ;;  %v3729_v49 = vpop.f32.mrb[55].mxu0  ;;  %3887 = vmatmul.mubr.msk.f32.gmra.mrb[160].mxu0 %vm192_vm1, %v94_v42  ;;  %4142 = vmatmul.mubr.msk.f32.gmra.mrb[160].mxu1 %vm192_vm1, %v179_v43  ;;  %v3984_v50 = vpop.f32.mrb[55].mxu1  ;;  %v1327_v56 = vadd.f32 %v4844_v54, %v1326_v46 }
 0x148   :  { %3889 = vmatprep.mubr.msk.f32.mxu0 %vm4163_vm0, %v4164_v4  ;;  %4144 = vmatprep.mubr.msk.f32.mxu1 %vm4163_vm0, %v4164_v4 }
 0x149   :  { %v3036_v55 = vpack.c.bf16 %v902_v48, %v897_v47 }
 0x14a   :  { %v906_v57 = vpop.f32.mrb[56].mxu0  ;;  %v1331_v58 = vpop.f32.mrb[56].mxu1 }
 0x14b   :  { %3400 = vst [vmem:[%s5645_s3 + $0x68] sm:$0xff] %v3036_v55   ;;  %v1332_v59 = vadd.f32 %v4844_v54, %v1331_v58  ;;  %v3732_v60 = vpop.f32.mrb[57].mxu0  ;;  %3890 = vmatmul.mubr.msk.f32.gmra.mrb[162].mxu0 %vm192_vm1, %v95_v52  ;;  %4145 = vmatmul.mubr.msk.f32.gmra.mrb[162].mxu1 %vm192_vm1, %v180_v53  ;;  %v3987_v61 = vpop.f32.mrb[57].mxu1  ;;  %v907_v3 = vadd.f32 %v4844_v54, %v906_v57 }
 0x14c   :  { %3892 = vmatprep.mubr.msk.f32.mxu0 %vm4163_vm0, %v4164_v4  ;;  %4147 = vmatprep.mubr.msk.f32.mxu1 %vm4163_vm0, %v4164_v4 }
 0x14d   :  { %v3251_v0 = vpack.c.bf16 %v1332_v59, %v1327_v56 }
 0x14e   :  { %v911_v1 = vpop.f32.mrb[58].mxu0  ;;  %v1336_v2 = vpop.f32.mrb[58].mxu1 }
 0x14f   :  { %3443 = vst [vmem:[%s5645_s3 + $0x1c0] sm:$0xff] %v3251_v0   ;;  %v912_v5 = vadd.f32 %v4844_v54, %v911_v1  ;;  %v3735_v6 = vpop.f32.mrb[59].mxu0  ;;  %3893 = vmatmul.mubr.msk.f32.gmra.mrb[164].mxu0 %vm192_vm1, %v96_v62  ;;  %4148 = vmatmul.mubr.msk.f32.gmra.mrb[164].mxu1 %vm192_vm1, %v181_v63  ;;  %v3990_v7 = vpop.f32.mrb[59].mxu1  ;;  %v1337_v11 = vadd.f32 %v4844_v54, %v1336_v2 }
 0x150   :  { %3895 = vmatprep.mubr.msk.f32.mxu0 %vm4163_vm0, %v4164_v4  ;;  %4150 = vmatprep.mubr.msk.f32.mxu1 %vm4163_vm0, %v4164_v4 }
 0x151   :  { %v3041_v10 = vpack.c.bf16 %v912_v5, %v907_v3 }
 0x152   :  { %v916_v12 = vpop.f32.mrb[60].mxu0  ;;  %v1341_v13 = vpop.f32.mrb[60].mxu1 }
 0x153   :  { %3401 = vst [vmem:[%s5645_s3 + $0x70] sm:$0xff] %v3041_v10   ;;  %v1342_v14 = vadd.f32 %v4844_v54, %v1341_v13  ;;  %v3738_v15 = vpop.f32.mrb[61].mxu0  ;;  %3896 = vmatmul.mubr.msk.f32.gmra.mrb[166].mxu0 %vm192_vm1, %v97_v8  ;;  %v3993_v16 = vpop.f32.mrb[61].mxu1  ;;  %4151 = vmatmul.mubr.msk.f32.gmra.mrb[166].mxu1 %vm192_vm1, %v182_v9  ;;  %v917_v21 = vadd.f32 %v4844_v54, %v916_v12 }
 0x154   :  { %3898 = vmatprep.mubr.msk.f32.mxu0 %vm4163_vm0, %v4164_v4 }
 0x155   :  { %v3256_v18 = vpack.c.bf16 %v1342_v14, %v1337_v11 }
 0x156   :  { %v921_v19 = vpop.f32.mrb[62].mxu0  ;;  %v1346_v20 = vpop.f32.mrb[62].mxu1 }
 0x157   :  { %3444 = vst [vmem:[%s5645_s3 + $0x1c8] sm:$0xff] %v3256_v18   ;;  %v922_v22 = vadd.f32 %v4844_v54, %v921_v19  ;;  %v3741_v23 = vpop.f32.mrb[63].mxu0  ;;  %3899 = vmatmul.mubr.msk.f32.gmra.mrb[168].mxu0 %vm192_vm1, %v98_v17  ;;  %v3996_v24 = vpop.f32.mrb[63].mxu1  ;;  %v1347_v25 = vadd.f32 %v4844_v54, %v1346_v20 }
 0x159   :  { %v3046_v4 = vpack.c.bf16 %v922_v22, %v917_v21 }
 0x15a   :  { %v926_v26 = vpop.f32.mrb[64].mxu0  ;;  %v1351_v27 = vpop.f32.mrb[64].mxu1 }
 0x15b   :  { %3402 = vst [vmem:[%s5645_s3 + $0x78] sm:$0xff] %v3046_v4   ;;  %v1352_v28 = vadd.f32 %v4844_v54, %v1351_v27  ;;  %v3744_v29 = vpop.f32.mrb[65].mxu0  ;;  %v3999_v30 = vpop.f32.mrb[65].mxu1  ;;  %v927_v34 = vadd.f32 %v4844_v54, %v926_v26 }
 0x15d   :  { %v3261_v31 = vpack.c.bf16 %v1352_v28, %v1347_v25 }
 0x15e   :  { %v931_v32 = vpop.f32.mrb[66].mxu0  ;;  %v1356_v33 = vpop.f32.mrb[66].mxu1 }
 0x15f   :  { %3445 = vst [vmem:[%s5645_s3 + $0x1d0] sm:$0xff] %v3261_v31   ;;  %v932_v35 = vadd.f32 %v4844_v54, %v931_v32  ;;  %v3747_v36 = vpop.f32.mrb[67].mxu0  ;;  %v4002_v37 = vpop.f32.mrb[67].mxu1  ;;  %v1357_v39 = vadd.f32 %v4844_v54, %v1356_v33  ;;  %v5417_v33 = vld [vmem:[%s5644_s2] ss:$0 sm:$0xff] }
 0x161   :  { %v3051_v38 = vpack.c.bf16 %v932_v35, %v927_v34 }
 0x162   :  { %v936_v40 = vpop.f32.mrb[68].mxu0  ;;  %v1361_v41 = vpop.f32.mrb[68].mxu1 }
 0x163   :  { %3403 = vst [vmem:[%s5645_s3 + $0x80] sm:$0xff] %v3051_v38   ;;  %v1362_v42 = vadd.f32 %v4844_v54, %v1361_v41  ;;  %v3750_v43 = vpop.f32.mrb[69].mxu0  ;;  %v4005_v44 = vpop.f32.mrb[69].mxu1  ;;  %v937_v48 = vadd.f32 %v4844_v54, %v936_v40 }
 0x165   :  { %v3266_v45 = vpack.c.bf16 %v1362_v42, %v1357_v39 }
 0x166   :  { %v941_v46 = vpop.f32.mrb[70].mxu0  ;;  %v1366_v47 = vpop.f32.mrb[70].mxu1 }
 0x167   :  { %3446 = vst [vmem:[%s5645_s3 + $0x1d8] sm:$0xff] %v3266_v45   ;;  %v942_v49 = vadd.f32 %v4844_v54, %v941_v46  ;;  %v3753_v50 = vpop.f32.mrb[71].mxu0  ;;  %v4008_v52 = vpop.f32.mrb[71].mxu1  ;;  %v1367_v55 = vadd.f32 %v4844_v54, %v1366_v47 }
 0x169   :  { %v3056_v53 = vpack.c.bf16 %v942_v49, %v937_v48 }
 0x16a   :  { %v946_v56 = vpop.f32.mrb[72].mxu0  ;;  %v1371_v57 = vpop.f32.mrb[72].mxu1 }
 0x16b   :  { %3404 = vst [vmem:[%s5645_s3 + $0x88] sm:$0xff] %v3056_v53   ;;  %v1372_v58 = vadd.f32 %v4844_v54, %v1371_v57  ;;  %v3756_v59 = vpop.f32.mrb[73].mxu0  ;;  %v4011_v60 = vpop.f32.mrb[73].mxu1  ;;  %v947_v0 = vadd.f32 %v4844_v54, %v946_v56 }
 0x16d   :  { %v3271_v61 = vpack.c.bf16 %v1372_v58, %v1367_v55 }
 0x16e   :  { %v951_v62 = vpop.f32.mrb[74].mxu0  ;;  %v1376_v63 = vpop.f32.mrb[74].mxu1 }
 0x16f   :  { %3447 = vst [vmem:[%s5645_s3 + $0x1e0] sm:$0xff] %v3271_v61   ;;  %v952_v1 = vadd.f32 %v4844_v54, %v951_v62  ;;  %v3759_v2 = vpop.f32.mrb[75].mxu0  ;;  %v4014_v3 = vpop.f32.mrb[75].mxu1  ;;  %v1377_v6 = vadd.f32 %v4844_v54, %v1376_v63 }
 0x171   :  { %v3061_v5 = vpack.c.bf16 %v952_v1, %v947_v0 }
 0x172   :  { %v956_v7 = vpop.f32.mrb[76].mxu0  ;;  %v1381_v8 = vpop.f32.mrb[76].mxu1 }
 0x173   :  { %3405 = vst [vmem:[%s5645_s3 + $0x90] sm:$0xff] %v3061_v5   ;;  %v1382_v9 = vadd.f32 %v4844_v54, %v1381_v8  ;;  %v3762_v10 = vpop.f32.mrb[77].mxu0  ;;  %v4017_v11 = vpop.f32.mrb[77].mxu1  ;;  %v957_v15 = vadd.f32 %v4844_v54, %v956_v7 }
 0x175   :  { %v3276_v12 = vpack.c.bf16 %v1382_v9, %v1377_v6 }
 0x176   :  { %v961_v13 = vpop.f32.mrb[78].mxu0  ;;  %v1386_v14 = vpop.f32.mrb[78].mxu1 }
 0x177   :  { %3448 = vst [vmem:[%s5645_s3 + $0x1e8] sm:$0xff] %v3276_v12   ;;  %v962_v16 = vadd.f32 %v4844_v54, %v961_v13  ;;  %v3765_v17 = vpop.f32.mrb[79].mxu0  ;;  %v4020_v18 = vpop.f32.mrb[79].mxu1  ;;  %v1387_v20 = vadd.f32 %v4844_v54, %v1386_v14 }
 0x179   :  { %v3066_v19 = vpack.c.bf16 %v962_v16, %v957_v15 }
 0x17a   :  { %v966_v21 = vpop.f32.mrb[80].mxu0  ;;  %v1391_v22 = vpop.f32.mrb[80].mxu1 }
 0x17b   :  { %3406 = vst [vmem:[%s5645_s3 + $0x98] sm:$0xff] %v3066_v19   ;;  %v1392_v23 = vadd.f32 %v4844_v54, %v1391_v22  ;;  %v3768_v24 = vpop.f32.mrb[81].mxu0  ;;  %v4023_v4 = vpop.f32.mrb[81].mxu1  ;;  %v967_v28 = vadd.f32 %v4844_v54, %v966_v21 }
 0x17d   :  { %v3281_v25 = vpack.c.bf16 %v1392_v23, %v1387_v20 }
 0x17e   :  { %v971_v26 = vpop.f32.mrb[82].mxu0  ;;  %v1396_v27 = vpop.f32.mrb[82].mxu1 }
 0x17f   :  { %3449 = vst [vmem:[%s5645_s3 + $0x1f0] sm:$0xff] %v3281_v25   ;;  %v972_v29 = vadd.f32 %v4844_v54, %v971_v26  ;;  %v3771_v30 = vpop.f32.mrb[83].mxu0  ;;  %v4026_v31 = vpop.f32.mrb[83].mxu1  ;;  %v1397_v34 = vadd.f32 %v5417_v33, %v1396_v27 }
 0x181   :  { %v3071_v32 = vpack.c.bf16 %v972_v29, %v967_v28 }
 0x182   :  { %v976_v35 = vpop.f32.mrb[84].mxu0  ;;  %v1401_v36 = vpop.f32.mrb[84].mxu1 }
 0x183   :  { %3407 = vst [vmem:[%s5645_s3 + $0xa0] sm:$0xff] %v3071_v32   ;;  %v1402_v37 = vadd.f32 %v5417_v33, %v1401_v36  ;;  %v3774_v38 = vpop.f32.mrb[85].mxu0  ;;  %v4029_v54 = vpop.f32.mrb[85].mxu1  ;;  %v977_v42 = vadd.f32 %v5417_v33, %v976_v35 }
 0x185   :  { %v3286_v39 = vpack.c.bf16 %v1402_v37, %v1397_v34 }
 0x186   :  { %v981_v40 = vpop.f32.mrb[86].mxu0  ;;  %v1406_v41 = vpop.f32.mrb[86].mxu1 }
 0x187   :  { %3450 = vst [vmem:[%s5645_s3 + $0x1f8] sm:$0xff] %v3286_v39   ;;  %v982_v43 = vadd.f32 %v5417_v33, %v981_v40  ;;  %v3777_v44 = vpop.f32.mrb[87].mxu0  ;;  %v4032_v45 = vpop.f32.mrb[87].mxu1  ;;  %v1407_v47 = vadd.f32 %v5417_v33, %v1406_v41 }
 0x189   :  { %v3076_v46 = vpack.c.bf16 %v982_v43, %v977_v42 }
 0x18a   :  { %v986_v48 = vpop.f32.mrb[88].mxu0  ;;  %v1411_v49 = vpop.f32.mrb[88].mxu1 }
 0x18b   :  { %3408 = vst [vmem:[%s5645_s3 + $0xa8] sm:$0xff] %v3076_v46   ;;  %v1412_v50 = vadd.f32 %v5417_v33, %v1411_v49  ;;  %v3780_v52 = vpop.f32.mrb[89].mxu0  ;;  %v4035_v53 = vpop.f32.mrb[89].mxu1  ;;  %v987_v58 = vadd.f32 %v5417_v33, %v986_v48 }
 0x18d   :  { %v3291_v55 = vpack.c.bf16 %v1412_v50, %v1407_v47 }
 0x18e   :  { %v991_v56 = vpop.f32.mrb[90].mxu0  ;;  %v1416_v57 = vpop.f32.mrb[90].mxu1 }
 0x18f   :  { %3451 = vst [vmem:[%s5645_s3 + $0x200] sm:$0xff] %v3291_v55   ;;  %v992_v59 = vadd.f32 %v5417_v33, %v991_v56  ;;  %v3783_v60 = vpop.f32.mrb[91].mxu0  ;;  %v4038_v61 = vpop.f32.mrb[91].mxu1  ;;  %v1417_v63 = vadd.f32 %v5417_v33, %v1416_v57 }
 0x191   :  { %v3081_v62 = vpack.c.bf16 %v992_v59, %v987_v58 }
 0x192   :  { %v996_v0 = vpop.f32.mrb[92].mxu0  ;;  %v1421_v1 = vpop.f32.mrb[92].mxu1 }
 0x193   :  { %3409 = vst [vmem:[%s5645_s3 + $0xb0] sm:$0xff] %v3081_v62   ;;  %v1422_v2 = vadd.f32 %v5417_v33, %v1421_v1  ;;  %v3786_v3 = vpop.f32.mrb[93].mxu0  ;;  %v4041_v5 = vpop.f32.mrb[93].mxu1  ;;  %v997_v9 = vadd.f32 %v5417_v33, %v996_v0 }
 0x195   :  { %v3296_v6 = vpack.c.bf16 %v1422_v2, %v1417_v63 }
 0x196   :  { %v1001_v7 = vpop.f32.mrb[94].mxu0  ;;  %v1426_v8 = vpop.f32.mrb[94].mxu1 }
 0x197   :  { %3452 = vst [vmem:[%s5645_s3 + $0x208] sm:$0xff] %v3296_v6   ;;  %v1002_v10 = vadd.f32 %v5417_v33, %v1001_v7  ;;  %v3789_v11 = vpop.f32.mrb[95].mxu0  ;;  %v4044_v12 = vpop.f32.mrb[95].mxu1  ;;  %v1427_v14 = vadd.f32 %v5417_v33, %v1426_v8 }
 0x199   :  { %v3086_v13 = vpack.c.bf16 %v1002_v10, %v997_v9 }
 0x19a   :  { %v1006_v15 = vpop.f32.mrb[96].mxu0  ;;  %v1431_v16 = vpop.f32.mrb[96].mxu1 }
 0x19b   :  { %3410 = vst [vmem:[%s5645_s3 + $0xb8] sm:$0xff] %v3086_v13   ;;  %v1432_v17 = vadd.f32 %v5417_v33, %v1431_v16  ;;  %v3792_v18 = vpop.f32.mrb[97].mxu0  ;;  %v4047_v19 = vpop.f32.mrb[97].mxu1  ;;  %v1007_v23 = vadd.f32 %v5417_v33, %v1006_v15 }
 0x19d   :  { %v3301_v20 = vpack.c.bf16 %v1432_v17, %v1427_v14 }
 0x19e   :  { %v1011_v21 = vpop.f32.mrb[98].mxu0  ;;  %v1436_v22 = vpop.f32.mrb[98].mxu1 }
 0x19f   :  { %3453 = vst [vmem:[%s5645_s3 + $0x210] sm:$0xff] %v3301_v20   ;;  %v1012_v24 = vadd.f32 %v5417_v33, %v1011_v21  ;;  %v3795_v4 = vpop.f32.mrb[99].mxu0  ;;  %v4050_v25 = vpop.f32.mrb[99].mxu1  ;;  %v1437_v27 = vadd.f32 %v5417_v33, %v1436_v22 }
 0x1a1   :  { %v3091_v26 = vpack.c.bf16 %v1012_v24, %v1007_v23 }
 0x1a2   :  { %v1016_v28 = vpop.f32.mrb[100].mxu0  ;;  %v1441_v29 = vpop.f32.mrb[100].mxu1 }
 0x1a3   :  { %3411 = vst [vmem:[%s5645_s3 + $0xc0] sm:$0xff] %v3091_v26   ;;  %v1442_v30 = vadd.f32 %v5417_v33, %v1441_v29  ;;  %v3798_v31 = vpop.f32.mrb[101].mxu0  ;;  %v4053_v32 = vpop.f32.mrb[101].mxu1  ;;  %v1017_v37 = vadd.f32 %v5417_v33, %v1016_v28 }
 0x1a5   :  { %v3306_v34 = vpack.c.bf16 %v1442_v30, %v1437_v27 }
 0x1a6   :  { %v1021_v35 = vpop.f32.mrb[102].mxu0  ;;  %v1446_v36 = vpop.f32.mrb[102].mxu1 }
 0x1a7   :  { %3454 = vst [vmem:[%s5645_s3 + $0x218] sm:$0xff] %v3306_v34   ;;  %v1022_v38 = vadd.f32 %v5417_v33, %v1021_v35  ;;  %v3801_v54 = vpop.f32.mrb[103].mxu0  ;;  %v4056_v39 = vpop.f32.mrb[103].mxu1  ;;  %v1447_v41 = vadd.f32 %v5417_v33, %v1446_v36 }
 0x1a9   :  { %v3096_v40 = vpack.c.bf16 %v1022_v38, %v1017_v37 }
 0x1aa   :  { %v1026_v42 = vpop.f32.mrb[104].mxu0  ;;  %v1451_v43 = vpop.f32.mrb[104].mxu1 }
 0x1ab   :  { %3412 = vst [vmem:[%s5645_s3 + $0xc8] sm:$0xff] %v3096_v40   ;;  %v1452_v44 = vadd.f32 %v5417_v33, %v1451_v43  ;;  %v3804_v45 = vpop.f32.mrb[105].mxu0  ;;  %v4059_v46 = vpop.f32.mrb[105].mxu1  ;;  %v1027_v50 = vadd.f32 %v5417_v33, %v1026_v42 }
 0x1ad   :  { %v3311_v47 = vpack.c.bf16 %v1452_v44, %v1447_v41 }
 0x1ae   :  { %v1031_v48 = vpop.f32.mrb[106].mxu0  ;;  %v1456_v49 = vpop.f32.mrb[106].mxu1 }
 0x1af   :  { %3455 = vst [vmem:[%s5645_s3 + $0x220] sm:$0xff] %v3311_v47   ;;  %v1032_v52 = vadd.f32 %v5417_v33, %v1031_v48  ;;  %v3807_v53 = vpop.f32.mrb[107].mxu0  ;;  %v4062_v55 = vpop.f32.mrb[107].mxu1  ;;  %v1457_v57 = vadd.f32 %v5417_v33, %v1456_v49 }
 0x1b1   :  { %v3101_v56 = vpack.c.bf16 %v1032_v52, %v1027_v50 }
 0x1b2   :  { %v1036_v58 = vpop.f32.mrb[108].mxu0  ;;  %v1461_v59 = vpop.f32.mrb[108].mxu1 }
 0x1b3   :  { %3413 = vst [vmem:[%s5645_s3 + $0xd0] sm:$0xff] %v3101_v56   ;;  %v1462_v60 = vadd.f32 %v5417_v33, %v1461_v59  ;;  %v3810_v61 = vpop.f32.mrb[109].mxu0  ;;  %v4065_v62 = vpop.f32.mrb[109].mxu1  ;;  %v1037_v2 = vadd.f32 %v5417_v33, %v1036_v58 }
 0x1b5   :  { %v3316_v63 = vpack.c.bf16 %v1462_v60, %v1457_v57 }
 0x1b6   :  { %v1041_v0 = vpop.f32.mrb[110].mxu0  ;;  %v1466_v1 = vpop.f32.mrb[110].mxu1 }
 0x1b7   :  { %3456 = vst [vmem:[%s5645_s3 + $0x228] sm:$0xff] %v3316_v63   ;;  %v1042_v3 = vadd.f32 %v5417_v33, %v1041_v0  ;;  %v3813_v5 = vpop.f32.mrb[111].mxu0  ;;  %v4068_v6 = vpop.f32.mrb[111].mxu1  ;;  %v1467_v8 = vadd.f32 %v5417_v33, %v1466_v1 }
 0x1b9   :  { %v3106_v7 = vpack.c.bf16 %v1042_v3, %v1037_v2 }
 0x1ba   :  { %v1046_v9 = vpop.f32.mrb[112].mxu0  ;;  %v1471_v10 = vpop.f32.mrb[112].mxu1 }
 0x1bb   :  { %3414 = vst [vmem:[%s5645_s3 + $0xd8] sm:$0xff] %v3106_v7   ;;  %v1472_v11 = vadd.f32 %v5417_v33, %v1471_v10  ;;  %v3816_v12 = vpop.f32.mrb[113].mxu0  ;;  %v4071_v13 = vpop.f32.mrb[113].mxu1  ;;  %v1047_v17 = vadd.f32 %v5417_v33, %v1046_v9 }
 0x1bd   :  { %v3321_v14 = vpack.c.bf16 %v1472_v11, %v1467_v8 }
 0x1be   :  { %v1051_v15 = vpop.f32.mrb[114].mxu0  ;;  %v1476_v16 = vpop.f32.mrb[114].mxu1 }
 0x1bf   :  { %3457 = vst [vmem:[%s5645_s3 + $0x230] sm:$0xff] %v3321_v14   ;;  %v1052_v18 = vadd.f32 %v5417_v33, %v1051_v15  ;;  %v3819_v19 = vpop.f32.mrb[115].mxu0  ;;  %v4074_v20 = vpop.f32.mrb[115].mxu1  ;;  %v1477_v22 = vadd.f32 %v5417_v33, %v1476_v16 }
 0x1c1   :  { %v3111_v21 = vpack.c.bf16 %v1052_v18, %v1047_v17 }
 0x1c2   :  { %v1056_v23 = vpop.f32.mrb[116].mxu0  ;;  %v1481_v24 = vpop.f32.mrb[116].mxu1 }
 0x1c3   :  { %3415 = vst [vmem:[%s5645_s3 + $0xe0] sm:$0xff] %v3111_v21   ;;  %v1482_v4 = vadd.f32 %v5417_v33, %v1481_v24  ;;  %v3822_v25 = vpop.f32.mrb[117].mxu0  ;;  %v4077_v26 = vpop.f32.mrb[117].mxu1  ;;  %v1057_v30 = vadd.f32 %v5417_v33, %v1056_v23 }
 0x1c5   :  { %v3326_v27 = vpack.c.bf16 %v1482_v4, %v1477_v22 }
 0x1c6   :  { %v1061_v28 = vpop.f32.mrb[118].mxu0  ;;  %v1486_v29 = vpop.f32.mrb[118].mxu1 }
 0x1c7   :  { %3458 = vst [vmem:[%s5645_s3 + $0x238] sm:$0xff] %v3326_v27   ;;  %v1062_v31 = vadd.f32 %v5417_v33, %v1061_v28  ;;  %v3825_v32 = vpop.f32.mrb[119].mxu0  ;;  %v4080_v34 = vpop.f32.mrb[119].mxu1  ;;  %v1487_v36 = vadd.f32 %v5417_v33, %v1486_v29 }
 0x1c9   :  { %v3116_v35 = vpack.c.bf16 %v1062_v31, %v1057_v30 }
 0x1ca   :  { %v1066_v37 = vpop.f32.mrb[120].mxu0  ;;  %v1491_v38 = vpop.f32.mrb[120].mxu1 }
 0x1cb   :  { %3416 = vst [vmem:[%s5645_s3 + $0xe8] sm:$0xff] %v3116_v35   ;;  %v1492_v54 = vadd.f32 %v5417_v33, %v1491_v38  ;;  %v3828_v39 = vpop.f32.mrb[121].mxu0  ;;  %v4083_v40 = vpop.f32.mrb[121].mxu1  ;;  %v1067_v44 = vadd.f32 %v5417_v33, %v1066_v37 }
 0x1cd   :  { %v3331_v41 = vpack.c.bf16 %v1492_v54, %v1487_v36 }
 0x1ce   :  { %v1071_v42 = vpop.f32.mrb[122].mxu0  ;;  %v1496_v43 = vpop.f32.mrb[122].mxu1 }
 0x1cf   :  { %3459 = vst [vmem:[%s5645_s3 + $0x240] sm:$0xff] %v3331_v41   ;;  %v1072_v45 = vadd.f32 %v5417_v33, %v1071_v42  ;;  %v3831_v46 = vpop.f32.mrb[123].mxu0  ;;  %v4086_v47 = vpop.f32.mrb[123].mxu1  ;;  %v1497_v49 = vadd.f32 %v5417_v33, %v1496_v43 }
 0x1d1   :  { %v3121_v48 = vpack.c.bf16 %v1072_v45, %v1067_v44 }
 0x1d2   :  { %v1076_v50 = vpop.f32.mrb[124].mxu0  ;;  %v1501_v52 = vpop.f32.mrb[124].mxu1 }
 0x1d3   :  { %3417 = vst [vmem:[%s5645_s3 + $0xf0] sm:$0xff] %v3121_v48   ;;  %v1502_v53 = vadd.f32 %v5417_v33, %v1501_v52  ;;  %v3834_v55 = vpop.f32.mrb[125].mxu0  ;;  %v4089_v56 = vpop.f32.mrb[125].mxu1  ;;  %v1077_v60 = vadd.f32 %v5417_v33, %v1076_v50 }
 0x1d5   :  { %v3336_v57 = vpack.c.bf16 %v1502_v53, %v1497_v49 }
 0x1d6   :  { %v1081_v58 = vpop.f32.mrb[126].mxu0  ;;  %v1506_v59 = vpop.f32.mrb[126].mxu1 }
 0x1d7   :  { %3460 = vst [vmem:[%s5645_s3 + $0x248] sm:$0xff] %v3336_v57   ;;  %v1082_v61 = vadd.f32 %v5417_v33, %v1081_v58  ;;  %v3837_v62 = vpop.f32.mrb[127].mxu0  ;;  %v4092_v63 = vpop.f32.mrb[127].mxu1  ;;  %v1507_v1 = vadd.f32 %v5417_v33, %v1506_v59 }
 0x1d9   :  { %v3126_v0 = vpack.c.bf16 %v1082_v61, %v1077_v60 }
 0x1da   :  { %v1086_v2 = vpop.f32.mrb[128].mxu0  ;;  %v1511_v3 = vpop.f32.mrb[128].mxu1 }
 0x1db   :  { %3418 = vst [vmem:[%s5645_s3 + $0xf8] sm:$0xff] %v3126_v0   ;;  %v1512_v5 = vadd.f32 %v5417_v33, %v1511_v3  ;;  %v3840_v6 = vpop.f32.mrb[129].mxu0  ;;  %v4095_v7 = vpop.f32.mrb[129].mxu1  ;;  %v1087_v11 = vadd.f32 %v5417_v33, %v1086_v2 }
 0x1dd   :  { %v3341_v8 = vpack.c.bf16 %v1512_v5, %v1507_v1 }
 0x1de   :  { %v1091_v9 = vpop.f32.mrb[130].mxu0  ;;  %v1516_v10 = vpop.f32.mrb[130].mxu1 }
 0x1df   :  { %3461 = vst [vmem:[%s5645_s3 + $0x250] sm:$0xff] %v3341_v8   ;;  %v1092_v12 = vadd.f32 %v5417_v33, %v1091_v9  ;;  %v3843_v13 = vpop.f32.mrb[131].mxu0  ;;  %v4098_v14 = vpop.f32.mrb[131].mxu1  ;;  %v1517_v16 = vadd.f32 %v5417_v33, %v1516_v10 }
 0x1e1   :  { %v3131_v15 = vpack.c.bf16 %v1092_v12, %v1087_v11 }
 0x1e2   :  { %v1096_v17 = vpop.f32.mrb[132].mxu0  ;;  %v1521_v18 = vpop.f32.mrb[132].mxu1 }
 0x1e3   :  { %3419 = vst [vmem:[%s5645_s3 + $0x100] sm:$0xff] %v3131_v15   ;;  %v1522_v19 = vadd.f32 %v5417_v33, %v1521_v18  ;;  %v3846_v20 = vpop.f32.mrb[133].mxu0  ;;  %v4101_v21 = vpop.f32.mrb[133].mxu1  ;;  %v1097_v4 = vadd.f32 %v5417_v33, %v1096_v17 }
 0x1e5   :  { %v3346_v22 = vpack.c.bf16 %v1522_v19, %v1517_v16 }
 0x1e6   :  { %v1101_v23 = vpop.f32.mrb[134].mxu0  ;;  %v1526_v24 = vpop.f32.mrb[134].mxu1 }
 0x1e7   :  { %3462 = vst [vmem:[%s5645_s3 + $0x258] sm:$0xff] %v3346_v22   ;;  %v1102_v25 = vadd.f32 %v5417_v33, %v1101_v23  ;;  %v3849_v26 = vpop.f32.mrb[135].mxu0  ;;  %v4104_v27 = vpop.f32.mrb[135].mxu1  ;;  %v1527_v29 = vadd.f32 %v5417_v33, %v1526_v24 }
 0x1e9   :  { %v3136_v28 = vpack.c.bf16 %v1102_v25, %v1097_v4 }
 0x1ea   :  { %v1106_v30 = vpop.f32.mrb[136].mxu0  ;;  %v1531_v31 = vpop.f32.mrb[136].mxu1 }
 0x1eb   :  { %3420 = vst [vmem:[%s5645_s3 + $0x108] sm:$0xff] %v3136_v28   ;;  %v1532_v32 = vadd.f32 %v5417_v33, %v1531_v31  ;;  %v3852_v34 = vpop.f32.mrb[137].mxu0  ;;  %v4107_v35 = vpop.f32.mrb[137].mxu1  ;;  %v1107_v54 = vadd.f32 %v5417_v33, %v1106_v30 }
 0x1ed   :  { %v3351_v36 = vpack.c.bf16 %v1532_v32, %v1527_v29 }
 0x1ee   :  { %v1111_v37 = vpop.f32.mrb[138].mxu0  ;;  %v1536_v38 = vpop.f32.mrb[138].mxu1 }
 0x1ef   :  { %3463 = vst [vmem:[%s5645_s3 + $0x260] sm:$0xff] %v3351_v36   ;;  %v1112_v39 = vadd.f32 %v5417_v33, %v1111_v37  ;;  %v3855_v40 = vpop.f32.mrb[139].mxu0  ;;  %v4110_v41 = vpop.f32.mrb[139].mxu1  ;;  %v1537_v43 = vadd.f32 %v5417_v33, %v1536_v38 }
 0x1f1   :  { %v3141_v42 = vpack.c.bf16 %v1112_v39, %v1107_v54 }
 0x1f2   :  { %v1116_v44 = vpop.f32.mrb[140].mxu0  ;;  %v1541_v45 = vpop.f32.mrb[140].mxu1 }
 0x1f3   :  { %3421 = vst [vmem:[%s5645_s3 + $0x110] sm:$0xff] %v3141_v42   ;;  %v1542_v46 = vadd.f32 %v5417_v33, %v1541_v45  ;;  %v3858_v47 = vpop.f32.mrb[141].mxu0  ;;  %v4113_v48 = vpop.f32.mrb[141].mxu1  ;;  %v1117_v53 = vadd.f32 %v5417_v33, %v1116_v44 }
 0x1f5   :  { %v3356_v49 = vpack.c.bf16 %v1542_v46, %v1537_v43 }
 0x1f6   :  { %v1121_v50 = vpop.f32.mrb[142].mxu0  ;;  %v1546_v52 = vpop.f32.mrb[142].mxu1 }
 0x1f7   :  { %3464 = vst [vmem:[%s5645_s3 + $0x268] sm:$0xff] %v3356_v49   ;;  %v1122_v55 = vadd.f32 %v5417_v33, %v1121_v50  ;;  %v3861_v56 = vpop.f32.mrb[143].mxu0  ;;  %v4116_v57 = vpop.f32.mrb[143].mxu1  ;;  %v1547_v59 = vadd.f32 %v5417_v33, %v1546_v52 }
 0x1f9   :  { %v3146_v58 = vpack.c.bf16 %v1122_v55, %v1117_v53 }
 0x1fa   :  { %v1126_v60 = vpop.f32.mrb[144].mxu0  ;;  %v1551_v61 = vpop.f32.mrb[144].mxu1 }
 0x1fb   :  { %3422 = vst [vmem:[%s5645_s3 + $0x118] sm:$0xff] %v3146_v58   ;;  %v1552_v62 = vadd.f32 %v5417_v33, %v1551_v61  ;;  %v3864_v63 = vpop.f32.mrb[145].mxu0  ;;  %v4119_v0 = vpop.f32.mrb[145].mxu1  ;;  %v1127_v5 = vadd.f32 %v5417_v33, %v1126_v60 }
 0x1fd   :  { %v3361_v1 = vpack.c.bf16 %v1552_v62, %v1547_v59 }
 0x1fe   :  { %v1131_v2 = vpop.f32.mrb[146].mxu0  ;;  %v1556_v3 = vpop.f32.mrb[146].mxu1 }
 0x1ff   :  { %3465 = vst [vmem:[%s5645_s3 + $0x270] sm:$0xff] %v3361_v1   ;;  %v1132_v6 = vadd.f32 %v5417_v33, %v1131_v2  ;;  %v3867_v7 = vpop.f32.mrb[147].mxu0  ;;  %v4122_v8 = vpop.f32.mrb[147].mxu1  ;;  %v1557_v10 = vadd.f32 %v5417_v33, %v1556_v3 }
 0x201   :  { %v3151_v9 = vpack.c.bf16 %v1132_v6, %v1127_v5 }
 0x202   :  { %v1136_v11 = vpop.f32.mrb[148].mxu0  ;;  %v1561_v12 = vpop.f32.mrb[148].mxu1 }
 0x203   :  { %3423 = vst [vmem:[%s5645_s3 + $0x120] sm:$0xff] %v3151_v9   ;;  %v1562_v13 = vadd.f32 %v5417_v33, %v1561_v12  ;;  %v3870_v14 = vpop.f32.mrb[149].mxu0  ;;  %v4125_v15 = vpop.f32.mrb[149].mxu1  ;;  %v1137_v19 = vadd.f32 %v5417_v33, %v1136_v11 }
 0x205   :  { %v3366_v16 = vpack.c.bf16 %v1562_v13, %v1557_v10 }
 0x206   :  { %v1141_v17 = vpop.f32.mrb[150].mxu0  ;;  %v1566_v18 = vpop.f32.mrb[150].mxu1 }
 0x207   :  { %3466 = vst [vmem:[%s5645_s3 + $0x278] sm:$0xff] %v3366_v16   ;;  %v1142_v20 = vadd.f32 %v5417_v33, %v1141_v17  ;;  %v3873_v21 = vpop.f32.mrb[151].mxu0  ;;  %v4128_v22 = vpop.f32.mrb[151].mxu1  ;;  %v1567_v24 = vadd.f32 %v5417_v33, %v1566_v18 }
 0x208   :  { %v1192_v21 = vadd.f32 %v5417_v33, %v4837_v51 }
 0x209   :  { %v3156_v23 = vpack.c.bf16 %v1142_v20, %v1137_v19 }
 0x20a   :  { %v1146_v4 = vpop.f32.mrb[152].mxu0  ;;  %v1571_v25 = vpop.f32.mrb[152].mxu1 }
 0x20b   :  { %3424 = vst [vmem:[%s5645_s3 + $0x128] sm:$0xff] %v3156_v23   ;;  %v1572_v26 = vadd.f32 %v5417_v33, %v1571_v25  ;;  %v3876_v27 = vpop.f32.mrb[153].mxu0  ;;  %v4131_v28 = vpop.f32.mrb[153].mxu1  ;;  %v1147_v32 = vadd.f32 %v5417_v33, %v1146_v4 }
 0x20d   :  { %v3371_v29 = vpack.c.bf16 %v1572_v26, %v1567_v24 }
 0x20e   :  { %v1151_v30 = vpop.f32.mrb[154].mxu0  ;;  %v1576_v31 = vpop.f32.mrb[154].mxu1 }
 0x20f   :  { %3467 = vst [vmem:[%s5645_s3 + $0x280] sm:$0xff] %v3371_v29   ;;  %v1152_v34 = vadd.f32 %v5417_v33, %v1151_v30  ;;  %v3879_v35 = vpop.f32.mrb[155].mxu0  ;;  %v4134_v36 = vpop.f32.mrb[155].mxu1  ;;  %v1577_v38 = vadd.f32 %v5417_v33, %v1576_v31 }
 0x211   :  { %v3161_v37 = vpack.c.bf16 %v1152_v34, %v1147_v32 }
 0x212   :  { %v1156_v54 = vpop.f32.mrb[156].mxu0  ;;  %v1581_v39 = vpop.f32.mrb[156].mxu1 }
 0x213   :  { %3425 = vst [vmem:[%s5645_s3 + $0x130] sm:$0xff] %v3161_v37   ;;  %v1582_v40 = vadd.f32 %v5417_v33, %v1581_v39  ;;  %v3882_v41 = vpop.f32.mrb[157].mxu0  ;;  %v4137_v42 = vpop.f32.mrb[157].mxu1  ;;  %v1157_v46 = vadd.f32 %v5417_v33, %v1156_v54 }
 0x215   :  { %v3376_v43 = vpack.c.bf16 %v1582_v40, %v1577_v38 }
 0x216   :  { %v1161_v44 = vpop.f32.mrb[158].mxu0  ;;  %v1586_v45 = vpop.f32.mrb[158].mxu1 }
 0x217   :  { %3468 = vst [vmem:[%s5645_s3 + $0x288] sm:$0xff] %v3376_v43   ;;  %v1162_v47 = vadd.f32 %v5417_v33, %v1161_v44  ;;  %v3885_v48 = vpop.f32.mrb[159].mxu0  ;;  %v4140_v49 = vpop.f32.mrb[159].mxu1  ;;  %v1587_v52 = vadd.f32 %v5417_v33, %v1586_v45 }
 0x219   :  { %v3166_v50 = vpack.c.bf16 %v1162_v47, %v1157_v46 }
 0x21a   :  { %v1166_v53 = vpop.f32.mrb[160].mxu0  ;;  %v1591_v55 = vpop.f32.mrb[160].mxu1 }
 0x21b   :  { %3426 = vst [vmem:[%s5645_s3 + $0x138] sm:$0xff] %v3166_v50   ;;  %v1592_v56 = vadd.f32 %v5417_v33, %v1591_v55  ;;  %v3888_v57 = vpop.f32.mrb[161].mxu0  ;;  %v4143_v58 = vpop.f32.mrb[161].mxu1  ;;  %v1167_v62 = vadd.f32 %v5417_v33, %v1166_v53 }
 0x21d   :  { %v3381_v59 = vpack.c.bf16 %v1592_v56, %v1587_v52 }
 0x21e   :  { %v1171_v60 = vpop.f32.mrb[162].mxu0  ;;  %v1596_v61 = vpop.f32.mrb[162].mxu1 }
 0x21f   :  { %3469 = vst [vmem:[%s5645_s3 + $0x290] sm:$0xff] %v3381_v59   ;;  %v1172_v63 = vadd.f32 %v5417_v33, %v1171_v60  ;;  %v3891_v0 = vpop.f32.mrb[163].mxu0  ;;  %v4146_v1 = vpop.f32.mrb[163].mxu1  ;;  %v1597_v3 = vadd.f32 %v5417_v33, %v1596_v61 }
 0x221   :  { %v3171_v2 = vpack.c.bf16 %v1172_v63, %v1167_v62 }
 0x222   :  { %v1176_v5 = vpop.f32.mrb[164].mxu0  ;;  %v1601_v6 = vpop.f32.mrb[164].mxu1 }
 0x223   :  { %3427 = vst [vmem:[%s5645_s3 + $0x140] sm:$0xff] %v3171_v2   ;;  %v1602_v7 = vadd.f32 %v5417_v33, %v1601_v6  ;;  %v3894_v8 = vpop.f32.mrb[165].mxu0  ;;  %v4149_v9 = vpop.f32.mrb[165].mxu1  ;;  %v1177_v13 = vadd.f32 %v5417_v33, %v1176_v5 }
 0x225   :  { %v3386_v10 = vpack.c.bf16 %v1602_v7, %v1597_v3 }
 0x226   :  { %v1181_v11 = vpop.f32.mrb[166].mxu0  ;;  %v1606_v12 = vpop.f32.mrb[166].mxu1 }
 0x227   :  { %3470 = vst [vmem:[%s5645_s3 + $0x298] sm:$0xff] %v3386_v10   ;;  %v1182_v14 = vadd.f32 %v5417_v33, %v1181_v11  ;;  %v3897_v15 = vpop.f32.mrb[167].mxu0  ;;  %v1607_v16 = vadd.f32 %v5417_v33, %v1606_v12  ;;  %v4152_v17 = vpop.f32.mrb[167].mxu1 }
 0x229   :  { %v3176_v18 = vpack.c.bf16 %v1182_v14, %v1177_v13  ;;  %v2967_v19 = vpack.c.bf16 %v1607_v16, %v1607_v16 }
 0x22a   :  { %v1186_v20 = vpop.f32.mrb[168].mxu0 }
 0x22b   :  { %3428 = vst [vmem:[%s5645_s3 + $0x148] sm:$0xff] %v3176_v18   ;;  %2455 = vst [vmem:[%s5645_s3 + $0x2a0] sm:$0xf] %v2967_v19  ;;  %v1187_v22 = vadd.f32 %v5417_v33, %v1186_v20  ;;  %v3900_v23 = vpop.f32.mrb[169].mxu0 }
 0x22d   :  { %v3181_v24 = vpack.c.bf16 %v1192_v21, %v1187_v22 }
 0x22f   :  { %3429 = vst [vmem:[%s5645_s3 + $0x150] sm:$0xff] %v3181_v24  }

// kernel: cnn_emnist_forward.4
= control target key start
LH: loop header
LB: loop body
LE: loop exit
PB: predicated region body
PF: predicated region fallthrough
CT: control target
= control target key end

     0   :  { %s12492_s12 = smov 0   ;;  %s15844_s0 = inlined_call_operand.vmem [shape: bf16[2,26,26,128], index: 0, kind: input, shape index: {}]   ;;  %s15845_s1 = inlined_call_operand.vmem [shape: f32[9,128,128], index: 1, kind: input, shape index: {}]   ;;  %s15846_s2 = inlined_call_operand.vmem [shape: f32[1,128], index: 2, kind: input, shape index: {}]   ;;  %s15847_s3 = inlined_call_operand.vmem [shape: bf16[2,576,128], index: 3, kind: output, shape index: {}]  }
   0x1 LB: > { %s8030_s13 = sadd.s32 4294967295, %s12470_s12   ;;  %p8034_p0 = scmp.ge.s32.totalorder %s12470_s12, 1  ;;  %s12470_s12 = sphi %s12492_s12, %s13_s12  }
   0x2   : > { %p137_p1 = scmp.lt.s32.totalorder %s12470_s12, 3 }
   0x4   : > { %p138_p2 = pnand %p8034_p0, %p137_p1 }
   0x6   : > { %141 = sbr.rel (%p138_p2) target bundleno = 915 (0x393), region = 32 }
   0xd   : > { %v8037_v0 = vld [vmem:[%s15845_s1 + $0x80] sm:$0xff]  ;;  %v8038_v1 = vld [vmem:[%s15845_s1 + $0x88] sm:$0xff]  ;;  %p161_p3 = scmp.lt.s32.totalorder %s8030_s13, 1  ;;  %v8039_v5 = vld [vmem:[%s15845_s1 + $0x90] sm:$0xff]  ;;  %vm475_vm0 = vcmask 1046528   ;;  %vm1655_vm1 = vcmask 1045504  }
   0xe   : > { %v8253_v2 = vld [vmem:[%s15845_s1 + $0x200] sm:$0xff]  ;;  %v11562_v3 = vpack.c.bf16 %v8038_v1, %v8037_v0  ;;  %v8254_v4 = vld [vmem:[%s15845_s1 + $0x208] sm:$0xff]  ;;  %v8040_v6 = vld [vmem:[%s15845_s1 + $0x98] sm:$0xff] }
   0xf   : > { %v12518_v7 = vpack.c.bf16 %v8254_v4, %v8253_v2  ;;  %v11566_v8 = vpack.c.bf16 %v8040_v6, %v8039_v5  ;;  %v8255_v9 = vld [vmem:[%s15845_s1 + $0x210] sm:$0xff]  ;;  %v8256_v10 = vld [vmem:[%s15845_s1 + $0x218] sm:$0xff]  ;;  %v8041_v11 = vld [vmem:[%s15845_s1 + $0xa0] sm:$0xff]  ;;  %s16702_s13 = smov (!%p161_p3, %s8030_s13), 1 }
  0x10   : > { %11563 = vmatprep.subr.bf16.mxu1 %v11562_v3  ;;  %v12531_v12 = vpack.c.bf16 %v8256_v10, %v8255_v9  ;;  %v8042_v13 = vld [vmem:[%s15845_s1 + $0xa8] sm:$0xff]  ;;  %v8257_v14 = vld [vmem:[%s15845_s1 + $0x220] sm:$0xff]  ;;  %s12442_s11 = smul.u32 416, %s16702_s13  ;;  %v8043_v18 = vld [vmem:[%s15845_s1 + $0xb0] sm:$0xff] }
  0x11   : > { %16165 = vst [vmem:[#allocation2_spill] sm:$0xff] %v12518_v7  ;;  %v8258_v15 = vld [vmem:[%s15845_s1 + $0x228] sm:$0xff]  ;;  %11691 = vmatprep.subr.bf16.mxu0 %v12518_v7  ;;  %11565 = vmatpush3.bf16.msra.mxu1 %v11562_v3  ;;  %v11570_v16 = vpack.c.bf16 %v8042_v13, %v8041_v11  ;;  %v8044_v19 = vld [vmem:[%s15845_s1 + $0xb8] sm:$0xff]  ;;  %v8259_v20 = vld [vmem:[%s15845_s1 + $0x230] sm:$0xff]  ;;  %s12443_s17 = smul.u32 288, %s16702_s13 }
  0x12   : > { %16166 = vst [vmem:[#allocation3_spill] sm:$0xff] %v12531_v12  ;;  %11693 = vmatpush3.bf16.msra.mxu0 %v12518_v7  ;;  %11567 = vmatprep.subr.bf16.mxu1 %v11566_v8  ;;  %v12546_v17 = vpack.c.bf16 %v8258_v15, %v8257_v14  ;;  %v8260_v21 = vld [vmem:[%s15845_s1 + $0x238] sm:$0xff]  ;;  %s12563_s24 = scalar_lea.vmem %s15844_s0, %s12442_s11  ;;  %v11574_v22 = vpack.c.bf16 %v8044_v19, %v8043_v18  ;;  %v8045_v24 = vld [vmem:[%s15845_s1 + $0xc0] sm:$0xff]  ;;  %v8046_v25 = vld [vmem:[%s15845_s1 + $0xc8] sm:$0xff] }
  0x13   : > { %11695 = vmatprep.subr.bf16.mxu0 %v12531_v12  ;;  %v12567_v23 = vpack.c.bf16 %v8260_v21, %v8259_v20  ;;  %v12576_v26 = vld [vmem:[%s12563_s24] sm:$0xff]   ;;  %v8262_v28 = vld [vmem:[%s15845_s1 + $0x248] sm:$0xff]  ;;  %v12589_v31 = vld [vmem:[%s12563_s24 + $0x10] sm:$0xff]   ;;  %v11578_v34 = vpack.c.bf16 %v8046_v25, %v8045_v24  ;;  %s15704_s20 = scalar_lea.vmem %s15847_s3, %s12443_s17 }
  0x14   : > { %16167 = vst [vmem:[#allocation4_spill] sm:$0xff] %v12546_v17  ;;  %v8261_v27 = vld [vmem:[%s15845_s1 + $0x240] sm:$0xff]  ;;  %v15853_v29 = vunpack.c.l.bf16 %v12576_v26  ;;  %v12586_v30 = vunpack.c.h.bf16 %v12576_v26  ;;  %16170 = vst [vmem:[#allocation7_spill] sm:$0xff] %v12589_v31  ;;  %v15852_v32 = vunpack.c.l.bf16 %v12589_v31  ;;  %v12593_v33 = vunpack.c.h.bf16 %v12589_v31  ;;  %v8047_v38 = vld [vmem:[%s15845_s1 + $0xd0] sm:$0xff] }
  0x15   : > { %11569 = vmatpush3.bf16.msra.mxu1 %v11566_v8  ;;  %16168 = vst [vmem:[#allocation5_spill] sm:$0xff] %v12567_v23  ;;  %v12600_v37 = vpack.c.bf16 %v8262_v28, %v8261_v27  ;;  %v8048_v39 = vld [vmem:[%s15845_s1 + $0xd8] sm:$0xff]  ;;  %v8263_v42 = vld [vmem:[%s15845_s1 + $0x250] sm:$0xff]  ;;  %v8049_v48 = vld [vmem:[%s15845_s1 + $0xe0] sm:$0xff] }
  0x16   : > { %11697 = vmatpush3.bf16.msra.mxu0 %v12531_v12  ;;  %11571 = vmatprep.subr.bf16.mxu1 %v11570_v16  ;;  %16169 = vst [vmem:[#allocation6_spill] sm:$0xff] %v12586_v30  ;;  %v476_v35 = vrot.slane %v15853_v29, 1  ;;  %v477_v36 = vrot.slane %v12586_v30, 1  ;;  %v3357_v40 = vrot.slane %v15852_v32, 1  ;;  %v12611_v41 = vrot.slane %v12593_v33, 1  ;;  %v8264_v43 = vld [vmem:[%s15845_s1 + $0x258] sm:$0xff] }
  0x17   : > { %11699 = vmatprep.subr.bf16.mxu0 %v12546_v17  ;;  %16171 = vst [vmem:[#allocation8_spill] sm:$0xff] %v12600_v37  ;;  %v11582_v46 = vpack.c.bf16 %v8048_v39, %v8047_v38  ;;  %v12628_v47 = vpack.c.bf16 %v8264_v43, %v8263_v42  ;;  %v8050_v49 = vld [vmem:[%s15845_s1 + $0xe8] sm:$0xff]  ;;  %v8265_v50 = vld [vmem:[%s15845_s1 + $0x260] sm:$0xff]  ;;  %v8051_v55 = vld [vmem:[%s15845_s1 + $0xf0] sm:$0xff] }
  0x18   : > { %v478_v44 = vsel %vm475_vm0, %v476_v35, %v477_v36  ;;  %v12624_v45 = vsel %vm475_vm0, %v3357_v40, %v12611_v41  ;;  %v8266_v51 = vld [vmem:[%s15845_s1 + $0x268] sm:$0xff]  ;;  %v11586_v52 = vpack.c.bf16 %v8050_v49, %v8049_v48  ;;  %v8052_v56 = vld [vmem:[%s15845_s1 + $0xf8] sm:$0xff]  ;;  %v8267_v57 = vld [vmem:[%s15845_s1 + $0x270] sm:$0xff] }
  0x19   : > { %11573 = vmatpush3.bf16.msra.mxu1 %v11570_v16  ;;  %10334 = vmatprep.mubr.f32.mxu1 %v478_v44  ;;  %16172 = vst [vmem:[#allocation9_spill] sm:$0xff] %v12628_v47  ;;  %v12645_v53 = vld [vmem:[%s12563_s24 + $0x8] ss:$16 sps:$4 sm:$0xff]   ;;  %v12648_v54 = vpack.c.bf16 %v8266_v51, %v8265_v50  ;;  %v12663_v59 = vld [vmem:[%s12563_s24 + $0xc] sm:$0x1]  ;;  %v11590_v62 = vpack.c.bf16 %v8052_v56, %v8051_v55  ;;  %v12674_v0 = vld [vmem:[%s12563_s24 + $0x20] sm:$0xff]  }
  0x1a   : > { %11701 = vmatpush3.bf16.msra.mxu0 %v12546_v17  ;;  %11575 = vmatprep.subr.bf16.mxu1 %v11574_v22  ;;  %v8268_v58 = vld [vmem:[%s15845_s1 + $0x278] sm:$0xff]  ;;  %16174 = vst [vmem:[#allocation11_spill] sm:$0xff] %v12663_v59  ;;  %v12666_v60 = vunpack.c.l.bf16 %v12645_v53  ;;  %v15864_v63 = vunpack.c.h.bf16 %v12645_v53  ;;  %16176 = vst [vmem:[#allocation13_spill] sm:$0xff] %v12674_v0  ;;  %v315_v2 = vld [vmem:[%s15845_s1] sm:$0xff]  ;;  %v15849_v4 = vunpack.c.l.bf16 %v12663_v59  ;;  %v15851_v11 = vunpack.c.l.bf16 %v12674_v0 }
  0x1b   : > { %11703 = vmatprep.subr.bf16.mxu0 %v12567_v23  ;;  %10894 = vmatprep.mubr.f32.mxu0 %v12624_v45  ;;  %16173 = vst [vmem:[#allocation10_spill] sm:$0xff] %v12648_v54  ;;  %v12669_v61 = vld [vmem:[%s12563_s24 + $0x1c] sm:$0x1]  ;;  %v12677_v1 = vpack.c.bf16 %v8268_v58, %v8267_v57  ;;  %v316_v3 = vld [vmem:[%s15845_s1 + $0x8] sm:$0xff]  ;;  %v8293_v6 = vld [vmem:[%s15845_s1 + $0x280] sm:$0xff]  ;;  %v12699_v13 = vunpack.c.h.bf16 %v12674_v0 }
  0x1c   : > { %16175 = vst [vmem:[#allocation12_spill] sm:$0xff] %v12666_v60  ;;  %v12687_v5 = vld [vmem:[%s12563_s24 + $0x18] ss:$16 sps:$4 sm:$0xff]   ;;  %v15863_v9 = vunpack.c.l.bf16 %v12669_v61  ;;  %v479_v10 = vrot.slane %v12666_v60, 1  ;;  %v12702_v14 = vld [vmem:[%s12563_s24 + $0x1c] sm:$0x1]  ;;  %v11594_v15 = vpack.c.bf16 %v316_v3, %v315_v2 }
  0x1d   : > { %11577 = vmatpush3.bf16.msra.mxu1 %v11574_v22  ;;  %16177 = vst [vmem:[#allocation14_spill] sm:$0xff] %v12677_v1  ;;  %v8294_v8 = vld [vmem:[%s15845_s1 + $0x288] sm:$0xff]  ;;  %16178 = vst [vmem:[#allocation15_spill] sm:$0xff] %v12699_v13  ;;  %v3360_v16 = vrot.slane %v15864_v63, 1  ;;  %v12708_v18 = vunpack.c.l.bf16 %v12687_v5  ;;  %v15861_v19 = vunpack.c.h.bf16 %v12687_v5  ;;  %v481_v21 = vrot.slane %v15849_v4, 1  ;;  %v8295_v27 = vld [vmem:[%s15845_s1 + $0x290] sm:$0xff] }
  0x1e   : > { %11705 = vmatpush3.bf16.msra.mxu0 %v12567_v23  ;;  %11579 = vmatprep.subr.bf16.mxu1 %v11578_v34  ;;  %16179 = vst [vmem:[#allocation16_spill] sm:$0xff] %v12702_v14  ;;  %v11722_v20 = vpack.c.bf16 %v8294_v8, %v8293_v6  ;;  %v12715_v22 = vld [vmem:[%s12563_s24 + $0x2c] sm:$0x1]  ;;  %v3362_v24 = vrot.slane %v15863_v9, 1  ;;  %v15848_v25 = vunpack.c.l.bf16 %v12702_v14  ;;  %v8296_v28 = vld [vmem:[%s15845_s1 + $0x298] sm:$0xff]  ;;  %v480_v35 = vsel %vm475_vm0, %v477_v36, %v479_v10  ;;  %v317_v42 = vld [vmem:[%s15845_s1 + $0x10] sm:$0xff] }
  0x1f   : > { %11707 = vmatprep.subr.bf16.mxu0 %v12600_v37  ;;  %16180 = vst [vmem:[#allocation17_spill] sm:$0xff] %v12708_v18  ;;  %v3364_v38 = vrot.slane %v15851_v11, 1  ;;  %v12735_v39 = vrot.slane %v12699_v13, 1  ;;  %v12738_v40 = vld [vmem:[%s12563_s24 + $0x28] ss:$16 sps:$4 sm:$0xff]   ;;  %v3361_v36 = vsel %vm475_vm0, %v12611_v41, %v3360_v16  ;;  %v486_v44 = vrot.slane %v12708_v18, 1 }
  0x20   : > { %v318_v43 = vld [vmem:[%s15845_s1 + $0x18] sm:$0xff]  ;;  %v15858_v48 = vunpack.c.l.bf16 %v12715_v22  ;;  %v482_v49 = vsel %vm475_vm0, %v479_v10, %v481_v21  ;;  %v11726_v50 = vpack.c.bf16 %v8296_v28, %v8295_v27  ;;  %v12759_v55 = vld [vmem:[%s12563_s24 + $0x2c] sm:$0x1]  ;;  %v3363_v56 = vsel %vm475_vm0, %v3360_v16, %v3362_v24  ;;  %v8297_v3 = vld [vmem:[%s15845_s1 + $0x2a0] sm:$0xff] }
  0x21   : > { %11581 = vmatpush3.bf16.msra.mxu1 %v11578_v34  ;;  %v12727_v34 = vld [vmem:[%s12563_s24 + $0x30] sm:$0xff]   ;;  %16183 = vst [vmem:[#allocation20_spill] sm:$0xff] %v12759_v55  ;;  %v488_v57 = vrot.slane %v15848_v25, 1  ;;  %v12765_v58 = vunpack.c.l.bf16 %v12738_v40  ;;  %v11598_v2 = vpack.c.bf16 %v318_v43, %v317_v42  ;;  %v8298_v6 = vld [vmem:[%s15845_s1 + $0x2a8] sm:$0xff]  ;;  %v3366_v8 = vsel %vm475_vm0, %v3364_v38, %v12735_v39  ;;  %v319_v28 = vld [vmem:[%s15845_s1 + $0x20] sm:$0xff] }
  0x22   : > { %11709 = vmatpush3.bf16.msra.mxu0 %v12600_v37  ;;  %11583 = vmatprep.subr.bf16.mxu1 %v11582_v46  ;;  %16181 = vst [vmem:[#allocation18_spill] sm:$0xff] %v12727_v34  ;;  %v15850_v51 = vunpack.c.l.bf16 %v12727_v34  ;;  %v15857_v10 = vunpack.c.h.bf16 %v12738_v40  ;;  %v487_v16 = vsel %vm475_vm0, %v12611_v41, %v486_v44  ;;  %v3369_v24 = vrot.slane %v15858_v48, 1  ;;  %v12802_v43 = vld [vmem:[%s12563_s24 + $0x38] ss:$16 sps:$4 sm:$0xff]   ;;  %v12869_v48 = vld [vmem:[%s12563_s24 + $0x4c] sm:$0x1] }
  0x23   : > { %11711 = vmatprep.subr.bf16.mxu0 %v12628_v47  ;;  %16184 = vst [vmem:[#allocation21_spill] sm:$0xff] %v12765_v58  ;;  %v15854_v27 = vunpack.c.l.bf16 %v12759_v55  ;;  %v11730_v42 = vpack.c.bf16 %v8298_v6, %v8297_v3  ;;  %v8300_v25 = vld [vmem:[%s15845_s1 + $0x2b8] sm:$0xff]  ;;  %v15860_v11 = vunpack.c.h.bf16 %v12802_v43  ;;  %16189 = vst [vmem:[#allocation26_spill] sm:$0xff] %v12869_v48  ;;  %v13290_v31 = vld [vmem:[%s12563_s24 + $0xd0] sm:$0xff]  }
  0x24   : > { %v3371_v41 = vrot.slane %v15850_v51, 1  ;;  %v3374_v3 = vrot.slane %v15857_v10, 1  ;;  %v12826_v51 = vunpack.c.l.bf16 %v12802_v43  ;;  %v12911_v9 = vld [vmem:[%s12563_s24 + $0x58] ss:$16 sps:$4 sm:$0xff]   ;;  %v12981_v17 = vld [vmem:[%s12563_s24 + $0x7c] sm:$0x1] }
  0x25   : > { %11585 = vmatpush3.bf16.msra.mxu1 %v11582_v46  ;;  %v3367_v46 = vrot.slane %v15861_v19, 1  ;;  %v12955_v37 = vld [vmem:[%s12563_s24 + $0x68] ss:$16 sps:$4 sm:$0xff]   ;;  %v16248_v0 = vunpack.c.h.bf16 %v12911_v9  ;;  %16254 = vst [vmem:[#allocation51_spill] sm:$0xff] %v13290_v31 }
  0x26   : > { %11713 = vmatpush3.bf16.msra.mxu0 %v12628_v47  ;;  %11587 = vmatprep.subr.bf16.mxu1 %v11586_v52  ;;  %16187 = vst [vmem:[#allocation24_spill] sm:$0xff] %v12826_v51  ;;  %v12934_v47 = vld [vmem:[%s12563_s24 + $0x5c] sm:$0x1] }
  0x27   : > { %11715 = vmatprep.subr.bf16.mxu0 %v12648_v54  ;;  %v3368_v21 = vsel %vm475_vm0, %v12735_v39, %v3367_v46  ;;  %v3370_v4 = vsel %vm475_vm0, %v3367_v46, %v3369_v24  ;;  %v12838_v24 = vld [vmem:[%s12563_s24 + $0x50] sm:$0xff]   ;;  %16194 = vst [vmem:[#allocation30_spill] sm:$0xff] %v12934_v47  ;;  %v13260_v18 = vrot.slane %v16248_v0, 2  ;;  %v328_v0 = vld [vmem:[%s15845_s1 + $0x68] sm:$0xff] }
  0x28   : > { %16188 = vst [vmem:[#allocation25_spill] sm:$0xff] %v12838_v24  ;;  %v12866_v10 = vunpack.c.h.bf16 %v12838_v24 }
  0x29   : > { %11589 = vmatpush3.bf16.msra.mxu1 %v11586_v52  ;;  %v12756_v52 = vunpack.c.h.bf16 %v12727_v34  ;;  %v16233_v34 = vunpack.c.h.bf16 %v12802_v43 }
  0x2a   : > { %11717 = vmatpush3.bf16.msra.mxu0 %v12648_v54  ;;  %11591 = vmatprep.subr.bf16.mxu1 %v11590_v62  ;;  %v12907_v19 = vrot.slane %v12866_v10, 1 }
  0x2b   : > { %11719 = vmatprep.subr.bf16.mxu0 %v12677_v1  ;;  %16182 = vst [vmem:[#allocation19_spill] sm:$0xff] %v12756_v52 }
  0x2d   : > { %11593 = vmatpush3.bf16.msra.mxu1 %v11590_v62  ;;  %v12768_v62 = vld [vmem:[%s12563_s24 + $0x3c] sm:$0x1] }
  0x2e   : > { %11721 = vmatpush3.bf16.msra.mxu0 %v12677_v1  ;;  %11595 = vmatprep.subr.bf16.mxu1 %v11594_v15  ;;  %v15855_v38 = vunpack.c.l.bf16 %v12768_v62 }
  0x2f   : > { %11723 = vmatprep.subr.bf16.mxu0 %v11722_v20 }
  0x30   : > { %10335 = vmatmul.mubr.f32.vlgmr.msra.gmra.mrb[0].mxu1 %v480_v35  ;;  %v12798_v35 = vrot.slane %v12756_v52, 1  ;;  %v3376_v29 = vrot.slane %v15855_v38, 1 }
  0x31   : > { %10895 = vmatmul.mubr.f32.vlgmr.msra.gmra.mrb[0].mxu0 %v3361_v36  ;;  %11597 = vmatpush3.bf16.msra.mxu1 %v11594_v15  ;;  %v12787_v15 = vld [vmem:[%s12563_s24 + $0x40] sm:$0xff]   ;;  %v489_v36 = vsel %vm475_vm0, %v486_v44, %v488_v57  ;;  %v12820_v57 = vld [vmem:[%s12563_s24 + $0x3c] sm:$0x1] }
  0x32   : > { %11725 = vmatpush3.bf16.msra.mxu0 %v11722_v20  ;;  %10337 = vmatprep.mubr.f32.mxu1 %v482_v49  ;;  %16185 = vst [vmem:[#allocation22_spill] sm:$0xff] %v12787_v15  ;;  %v320_v20 = vld [vmem:[%s15845_s1 + $0x28] sm:$0xff]  ;;  %v493_v49 = vrot.slane %v12765_v58, 1  ;;  %v12817_v44 = vunpack.c.h.bf16 %v12787_v15  ;;  %16186 = vst [vmem:[#allocation23_spill] sm:$0xff] %v12820_v57  ;;  %v3373_v32 = vsel %vm475_vm0, %v3371_v41, %v12798_v35  ;;  %v13184_v58 = vrot.slane %v16233_v34, 2 }
  0x33   : > { %10897 = vmatprep.mubr.f32.mxu0 %v3363_v56  ;;  %11727 = vmatprep.subr.bf16.mxu0 %v11726_v50  ;;  %v8299_v56 = vld [vmem:[%s15845_s1 + $0x2b0] sm:$0xff]  ;;  %v11602_v6 = vpack.c.bf16 %v320_v20, %v319_v28  ;;  %v8301_v28 = vld [vmem:[%s15845_s1 + $0x2c0] sm:$0xff]  ;;  %v8302_v20 = vld [vmem:[%s15845_s1 + $0x2c8] sm:$0xff]  ;;  %v3377_v38 = vsel %vm475_vm0, %v3374_v3, %v3376_v29 }
  0x34   : > { %10338 = vmatmul.mubr.f32.gmra.mrb[2].mxu1 %v12624_v45  ;;  %11599 = vmatprep.subr.bf16.mxu1 %v11598_v2  ;;  %v15856_v45 = vunpack.c.l.bf16 %v12787_v15  ;;  %v11734_v46 = vpack.c.bf16 %v8300_v25, %v8299_v56  ;;  %v494_v25 = vsel %vm475_vm0, %v12735_v39, %v493_v49  ;;  %v8303_v29 = vld [vmem:[%s15845_s1 + $0x2d0] sm:$0xff] }
  0x35   : > { %10898 = vmatmul.mubr.f32.gmra.mrb[2].mxu0 %v3366_v8  ;;  %10340 = vmatprep.mubr.f32.mxu1 %v487_v16  ;;  %v495_v16 = vrot.slane %v15854_v27, 1  ;;  %v12861_v27 = vld [vmem:[%s12563_s24 + $0x48] ss:$16 sps:$4 sm:$0xff]  }
  0x36   : > { %10900 = vmatprep.mubr.f32.mxu0 %v3368_v21  ;;  %11729 = vmatpush3.bf16.msra.mxu0 %v11726_v50  ;;  %v12834_v21 = vld [vmem:[%s12563_s24 + $0x4c] sm:$0x1]  ;;  %v15859_v50 = vunpack.c.l.bf16 %v12820_v57  ;;  %v3378_v41 = vrot.slane %v15856_v45, 1  ;;  %v15865_v45 = vunpack.c.l.bf16 %v12838_v24  ;;  %v8381_v57 = vld [vmem:[%s15845_s1 + $0x300] sm:$0xff] }
  0x37   : > { %11731 = vmatprep.subr.bf16.mxu0 %v11730_v42  ;;  %11601 = vmatpush3.bf16.msra.mxu1 %v11598_v2  ;;  %v3375_v2 = vsel %vm475_vm0, %v12798_v35, %v3374_v3  ;;  %v496_v56 = vsel %vm475_vm0, %v493_v49, %v495_v16  ;;  %v15862_v39 = vunpack.c.l.bf16 %v12834_v21  ;;  %v11738_v49 = vpack.c.bf16 %v8302_v20, %v8301_v28  ;;  %v12874_v16 = vld [vmem:[%s12563_s24 + $0x5c] sm:$0x1] }
  0x38   : > { %10341 = vmatmul.mubr.f32.gmra.mrb[4].mxu1 %v489_v36  ;;  %11603 = vmatprep.subr.bf16.mxu1 %v11602_v6  ;;  %v12853_v36 = vrot.slane %v12817_v44, 1  ;;  %v8304_v3 = vld [vmem:[%s15845_s1 + $0x2d8] sm:$0xff]  ;;  %v12885_v28 = vunpack.c.l.bf16 %v12861_v27  ;;  %v15872_v20 = vunpack.c.h.bf16 %v12861_v27 }
  0x39   : > { %10901 = vmatmul.mubr.f32.gmra.mrb[4].mxu0 %v3370_v4  ;;  %10343 = vmatprep.mubr.f32.mxu1 %v3366_v8  ;;  %v500_v4 = vrot.slane %v12826_v51, 1  ;;  %v3381_v8 = vrot.slane %v15860_v11, 1  ;;  %v12896_v11 = vld [vmem:[%s12563_s24 + $0x60] sm:$0xff]  }
  0x3a   : > { %10903 = vmatprep.mubr.f32.mxu0 %v3373_v32  ;;  %11733 = vmatpush3.bf16.msra.mxu0 %v11730_v42  ;;  %v502_v42 = vrot.slane %v15859_v50, 1  ;;  %16190 = vst [vmem:[#allocation27_spill] sm:$0xff] %v12885_v28  ;;  %16191 = vst [vmem:[#allocation28_spill] sm:$0xff] %v12896_v11  ;;  %v12928_v54 = vunpack.c.h.bf16 %v12896_v11 }
  0x3b   : > { %11735 = vmatprep.subr.bf16.mxu0 %v11734_v46  ;;  %11605 = vmatpush3.bf16.msra.mxu1 %v11602_v6  ;;  %v3380_v6 = vsel %vm475_vm0, %v3378_v41, %v12853_v36  ;;  %v3382_v50 = vsel %vm475_vm0, %v12853_v36, %v3381_v8  ;;  %v321_v41 = vld [vmem:[%s15845_s1 + $0x30] sm:$0xff] }
  0x3c   : > { %10344 = vmatmul.mubr.f32.gmra.mrb[6].mxu1 %v494_v25  ;;  %v501_v25 = vsel %vm475_vm0, %v12798_v35, %v500_v4  ;;  %v3385_v35 = vrot.slane %v15865_v45, 1  ;;  %v503_v63 = vsel %vm475_vm0, %v500_v4, %v502_v42  ;;  %v8306_v45 = vld [vmem:[%s15845_s1 + $0x2e8] sm:$0xff]  ;;  %v16192_v42 = vunpack.c.l.bf16 %v12869_v48 }
  0x3d   : > { %10904 = vmatmul.mubr.f32.gmra.mrb[6].mxu0 %v3375_v2  ;;  %10346 = vmatprep.mubr.f32.mxu1 %v496_v56  ;;  %v3383_v2 = vrot.slane %v15862_v39, 1  ;;  %v8305_v56 = vld [vmem:[%s15845_s1 + $0x2e0] sm:$0xff]  ;;  %v507_v39 = vrot.slane %v12885_v28, 1  ;;  %v13168_v28 = vld [vmem:[%s12563_s24 + $0xa8] ss:$16 sps:$4 sm:$0xff]  }
  0x3e   : > { %10906 = vmatprep.mubr.f32.mxu0 %v3377_v38  ;;  %11737 = vmatpush3.bf16.msra.mxu0 %v11734_v46  ;;  %v322_v38 = vld [vmem:[%s15845_s1 + $0x38] sm:$0xff]  ;;  %v11742_v46 = vpack.c.bf16 %v8304_v3, %v8303_v29  ;;  %v3388_v29 = vrot.slane %v15872_v20, 1  ;;  %v509_v1 = vrot.slane %v16192_v42, 1  ;;  %v11746_v42 = vpack.c.bf16 %v8306_v45, %v8305_v56  ;;  %v12945_v20 = vld [vmem:[%s12563_s24 + $0x70] sm:$0xff]  }
  0x3f   : > { %11739 = vmatprep.subr.bf16.mxu0 %v11738_v49  ;;  %v11606_v3 = vpack.c.bf16 %v322_v38, %v321_v41  ;;  %v3384_v4 = vsel %vm475_vm0, %v3381_v8, %v3383_v2  ;;  %v3387_v41 = vsel %vm475_vm0, %v3385_v35, %v12907_v19  ;;  %v12942_v2 = vld [vmem:[%s12563_s24 + $0x6c] sm:$0x1]  ;;  %16196 = vst [vmem:[#allocation31_spill] sm:$0xff] %v12945_v20  ;;  %v3393_v45 = vrot.slane %v12928_v54, 1  ;;  %v8307_v56 = vld [vmem:[%s15845_s1 + $0x2f0] sm:$0xff]  ;;  %v12987_v8 = vld [vmem:[%s12563_s24 + $0x80] sm:$0xff]  }
  0x40   : > { %10347 = vmatmul.mubr.f32.gmra.mrb[8].mxu1 %v3373_v32  ;;  %v15875_v32 = vunpack.c.l.bf16 %v12896_v11  ;;  %v3389_v35 = vsel %vm475_vm0, %v12907_v19, %v3388_v29  ;;  %v12972_v23 = vunpack.c.h.bf16 %v12945_v20  ;;  %16201 = vst [vmem:[#allocation34_spill] sm:$0xff] %v12987_v8  ;;  %v16202_v7 = vunpack.c.l.bf16 %v12942_v2 }
  0x41   : > { %10907 = vmatmul.mubr.f32.gmra.mrb[8].mxu0 %v3380_v6  ;;  %10349 = vmatprep.mubr.f32.mxu1 %v501_v25  ;;  %v12931_v25 = vunpack.c.l.bf16 %v12911_v9  ;;  %v16209_v55 = vunpack.c.l.bf16 %v12987_v8 }
  0x42   : > { %10909 = vmatprep.mubr.f32.mxu0 %v3382_v50  ;;  %11741 = vmatpush3.bf16.msra.mxu0 %v11738_v49  ;;  %v16195_v50 = vunpack.c.l.bf16 %v12874_v16  ;;  %v508_v49 = vsel %vm475_vm0, %v12853_v36, %v507_v39  ;;  %v12978_v36 = vunpack.c.l.bf16 %v12955_v37  ;;  %v3397_v48 = vrot.slane %v16202_v7, 1 }
  0x43   : > { %16193 = vst [vmem:[#allocation29_spill] sm:$0xff] %v12931_v25  ;;  %11743 = vmatprep.subr.bf16.mxu0 %v11742_v46  ;;  %11607 = vmatprep.subr.bf16.mxu1 %v11606_v3  ;;  %v3406_v14 = vrot.slane %v16209_v55, 1 }
  0x44   : > { %v3390_v38 = vrot.slane %v16195_v50, 1  ;;  %10350 = vmatmul.mubr.f32.gmra.mrb[10].mxu1 %v503_v63  ;;  %v3392_v50 = vrot.slane %v15875_v32, 1  ;;  %v510_v63 = vsel %vm475_vm0, %v507_v39, %v509_v1  ;;  %v16197_v1 = vunpack.c.h.bf16 %v12911_v9  ;;  %16199 = vst [vmem:[#allocation33_spill] sm:$0xff] %v12978_v36 }
  0x45   : > { %10910 = vmatmul.mubr.f32.gmra.mrb[10].mxu0 %v3384_v4  ;;  %10352 = vmatprep.mubr.f32.mxu1 %v3380_v6  ;;  %v514_v6 = vrot.slane %v12931_v25, 1  ;;  %v8308_v4 = vld [vmem:[%s15845_s1 + $0x2f8] sm:$0xff]  ;;  %v521_v7 = vrot.slane %v12978_v36, 1 }
  0x46   : > { %10912 = vmatprep.mubr.f32.mxu0 %v3387_v41  ;;  %11745 = vmatpush3.bf16.msra.mxu0 %v11742_v46  ;;  %v3391_v32 = vsel %vm475_vm0, %v3388_v29, %v3390_v38  ;;  %v3395_v39 = vrot.slane %v16197_v1, 1  ;;  %v12975_v46 = vld [vmem:[%s12563_s24 + $0x6c] sm:$0x1]  ;;  %v16200_v29 = vunpack.c.l.bf16 %v12934_v47  ;;  %v11750_v12 = vpack.c.bf16 %v8308_v4, %v8307_v56  ;;  %v326_v25 = vld [vmem:[%s15845_s1 + $0x58] sm:$0xff] }
  0x47   : > { %16198 = vst [vmem:[#allocation32_spill] sm:$0xff] %v12975_v46  ;;  %11747 = vmatprep.subr.bf16.mxu0 %v11746_v42  ;;  %11609 = vmatpush3.bf16.msra.mxu1 %v11606_v3  ;;  %v3394_v3 = vsel %vm475_vm0, %v3392_v50, %v3393_v45  ;;  %v12999_v56 = vrot.slane %v12972_v23, 1  ;;  %v13003_v50 = vld [vmem:[%s12563_s24 + $0x78] ss:$16 sps:$4 sm:$0xff]   ;;  %v16204_v4 = vunpack.c.h.bf16 %v12955_v37  ;;  %v13029_v47 = vld [vmem:[%s12563_s24 + $0x8c] sm:$0x1] }
  0x48   : > { %10353 = vmatmul.mubr.f32.gmra.mrb[12].mxu1 %v508_v49  ;;  %v516_v38 = vrot.slane %v16200_v29, 1  ;;  %v515_v49 = vsel %vm475_vm0, %v12907_v19, %v514_v6  ;;  %v16203_v29 = vunpack.c.l.bf16 %v12945_v20  ;;  %v324_v19 = vld [vmem:[%s15845_s1 + $0x48] sm:$0xff]  ;;  %v13047_v20 = vld [vmem:[%s12563_s24 + $0x90] sm:$0xff]  }
  0x49   : > { %10913 = vmatmul.mubr.f32.gmra.mrb[12].mxu0 %v3389_v35  ;;  %10355 = vmatprep.mubr.f32.mxu1 %v510_v63  ;;  %v3396_v63 = vsel %vm475_vm0, %v3393_v45, %v3395_v39  ;;  %v13011_v35 = vunpack.c.h.bf16 %v12987_v8  ;;  %16210 = vst [vmem:[#allocation37_spill] sm:$0xff] %v13047_v20 }
  0x4a   : > { %10915 = vmatprep.mubr.f32.mxu0 %v3391_v32  ;;  %11749 = vmatpush3.bf16.msra.mxu0 %v11746_v42  ;;  %v3399_v1 = vrot.slane %v16203_v29, 1  ;;  %v517_v42 = vsel %vm475_vm0, %v514_v6, %v516_v38  ;;  %v3402_v29 = vrot.slane %v16204_v4, 1  ;;  %v13014_v32 = vld [vmem:[%s12563_s24 + $0x7c] sm:$0x1]  ;;  %v3398_v6 = vsel %vm475_vm0, %v3395_v39, %v3397_v48 }
  0x4b   : > { %11751 = vmatprep.subr.bf16.mxu0 %v11750_v12  ;;  %16205 = vst [vmem:[#allocation35_spill] sm:$0xff] %v13014_v32  ;;  %v16206_v38 = vunpack.c.l.bf16 %v12975_v46  ;;  %v13026_v4 = vunpack.c.l.bf16 %v13003_v50  ;;  %v16208_v39 = vunpack.c.l.bf16 %v12981_v17  ;;  %v13054_v46 = vld [vmem:[%s12563_s24 + $0x88] ss:$16 sps:$4 sm:$0xff]  }
  0x4c   : > { %10356 = vmatmul.mubr.f32.gmra.mrb[14].mxu1 %v3387_v41  ;;  %v323_v41 = vld [vmem:[%s15845_s1 + $0x40] sm:$0xff]  ;;  %v3401_v48 = vsel %vm475_vm0, %v3399_v1, %v12999_v56  ;;  %v3403_v1 = vsel %vm475_vm0, %v12999_v56, %v3402_v29 }
  0x4d   : > { %10916 = vmatmul.mubr.f32.gmra.mrb[14].mxu0 %v3394_v3  ;;  %10358 = vmatprep.mubr.f32.mxu1 %v515_v49  ;;  %v523_v49 = vrot.slane %v16206_v38, 1  ;;  %16207 = vst [vmem:[#allocation36_spill] sm:$0xff] %v13026_v4  ;;  %v3404_v38 = vrot.slane %v16208_v39, 1  ;;  %v11610_v36 = vpack.c.bf16 %v324_v19, %v323_v41  ;;  %v3407_v39 = vrot.slane %v13011_v35, 1  ;;  %v13061_v19 = vld [vmem:[%s12563_s24 + $0x8c] sm:$0x1] }
  0x4e   : > { %10918 = vmatprep.mubr.f32.mxu0 %v3396_v63  ;;  %11753 = vmatpush3.bf16.msra.mxu0 %v11750_v12  ;;  %v8382_v63 = vld [vmem:[%s15845_s1 + $0x308] sm:$0xff]  ;;  %v522_v12 = vsel %vm475_vm0, %v3393_v45, %v521_v7  ;;  %v528_v59 = vrot.slane %v13026_v4, 1  ;;  %16211 = vst [vmem:[#allocation38_spill] sm:$0xff] %v13061_v19 }
  0x4f   : > { %v13056_v45 = vpack.c.bf16 %v8382_v63, %v8381_v57  ;;  %v524_v55 = vsel %vm475_vm0, %v521_v7, %v523_v49  ;;  %11611 = vmatprep.subr.bf16.mxu1 %v11610_v36  ;;  %v16214_v57 = vunpack.c.h.bf16 %v13003_v50  ;;  %v13074_v7 = vunpack.c.h.bf16 %v13047_v20  ;;  %v13077_v49 = vld [vmem:[%s12563_s24 + $0x9c] sm:$0x1] }
  0x50   : > { %10359 = vmatmul.mubr.f32.gmra.mrb[16].mxu1 %v517_v42  ;;  %v3405_v42 = vsel %vm475_vm0, %v3402_v29, %v3404_v38  ;;  %v13083_v29 = vunpack.c.l.bf16 %v13054_v46  ;;  %v3408_v11 = vsel %vm475_vm0, %v3406_v14, %v3407_v39  ;;  %v529_v38 = vsel %vm475_vm0, %v12999_v56, %v528_v59 }
  0x51   : > { %10919 = vmatmul.mubr.f32.gmra.mrb[16].mxu0 %v3398_v6  ;;  %10361 = vmatprep.mubr.f32.mxu1 %v3394_v3  ;;  %v16212_v3 = vunpack.c.h.bf16 %v12645_v53  ;;  %v16213_v6 = vunpack.c.l.bf16 %v12669_v61  ;;  %v3409_v63 = vrot.slane %v16214_v57, 1  ;;  %v16215_v53 = vunpack.c.l.bf16 %v13014_v32  ;;  %v13102_v32 = vld [vmem:[%s12563_s24 + $0xa0] sm:$0xff]  }
  0x52   : > { %10921 = vmatprep.mubr.f32.mxu0 %v3401_v48  ;;  %11755 = vmatprep.subr.bf16.mxu0 %v13056_v45  ;;  %16216 = vst [vmem:[#allocation39_spill] sm:$0xff] %v13083_v29  ;;  %16219 = vst [vmem:[#allocation40_spill] sm:$0xff] %v13102_v32  ;;  %v535_v56 = vrot.slane %v13083_v29, 1 }
  0x53   : > { %v13065_v41 = vrot.slane %v16212_v3, 2  ;;  %v4188_v8 = vrot.slane %v16213_v6, 2  ;;  %11613 = vmatpush3.bf16.msra.mxu1 %v11610_v36  ;;  %v530_v61 = vrot.slane %v16215_v53, 1  ;;  %v16217_v6 = vunpack.c.l.bf16 %v13029_v47  ;;  %v13111_v36 = vld [vmem:[%s12563_s24 + $0x98] ss:$16 sps:$4 sm:$0xff]  }
  0x54   : > { %10362 = vmatmul.mubr.f32.gmra.mrb[18].mxu1 %v522_v12  ;;  %v16218_v12 = vunpack.c.h.bf16 %v12687_v5  ;;  %v16221_v5 = vunpack.c.l.bf16 %v13047_v20  ;;  %v16223_v20 = vunpack.c.l.bf16 %v13061_v19  ;;  %v13134_v29 = vunpack.c.l.bf16 %v13111_v36 }
  0x55   : > { %v13088_v3 = vsel %vm1655_vm1, %v13065_v41, %v4188_v8  ;;  %10922 = vmatmul.mubr.f32.gmra.mrb[18].mxu0 %v3403_v1  ;;  %10364 = vmatprep.mubr.f32.mxu1 %v524_v55  ;;  %v3411_v57 = vrot.slane %v16217_v6, 1  ;;  %v16220_v1 = vunpack.c.l.bf16 %v12715_v22  ;;  %v3410_v6 = vsel %vm475_vm0, %v3407_v39, %v3409_v63 }
  0x56   : > { %v13095_v53 = vrot.slane %v16218_v12, 2  ;;  %10924 = vmatprep.mubr.f32.mxu0 %v3405_v42  ;;  %v3413_v12 = vrot.slane %v16221_v5, 1  ;;  %v3414_v42 = vrot.slane %v13074_v7, 1  ;;  %v531_v14 = vsel %vm475_vm0, %v528_v59, %v530_v61  ;;  %v13129_v61 = vld [vmem:[%s12563_s24 + $0x9c] sm:$0x1]  ;;  %16226 = vst [vmem:[#allocation42_spill] sm:$0xff] %v13134_v29 }
  0x57   : > { %v4195_v55 = vrot.slane %v16220_v1, 2  ;;  %v16222_v8 = vunpack.c.h.bf16 %v13054_v46  ;;  %v3412_v5 = vsel %vm475_vm0, %v3409_v63, %v3411_v57  ;;  %v537_v4 = vrot.slane %v16223_v20, 1  ;;  %16224 = vst [vmem:[#allocation41_spill] sm:$0xff] %v13129_v61 }
  0x58   : > { %10365 = vmatmul.mubr.f32.gmra.mrb[20].mxu1 %v3401_v48  ;;  %v13126_v59 = vunpack.c.h.bf16 %v13102_v32  ;;  %v16227_v63 = vunpack.c.h.bf16 %v12738_v40  ;;  %v16228_v57 = vunpack.c.l.bf16 %v12768_v62  ;;  %v3415_v19 = vsel %vm475_vm0, %v3413_v12, %v3414_v42  ;;  %v13156_v62 = vld [vmem:[%s12563_s24 + $0xb0] sm:$0xff]  }
  0x59   : > { %v3416_v22 = vrot.slane %v16222_v8, 1  ;;  %v13119_v1 = vsel %vm1655_vm1, %v13095_v53, %v4195_v55  ;;  %10925 = vmatmul.mubr.f32.gmra.mrb[20].mxu0 %v3408_v11  ;;  %10367 = vmatprep.mubr.f32.mxu1 %v529_v38  ;;  %v16225_v8 = vunpack.c.l.bf16 %v13077_v49  ;;  %v13137_v38 = vld [vmem:[%s12563_s24 + $0xac] sm:$0x1]  ;;  %v536_v40 = vsel %vm475_vm0, %v3407_v39, %v535_v56  ;;  %16229 = vst [vmem:[#allocation43_spill] sm:$0xff] %v13156_v62 }
  0x5a   : > { %10927 = vmatprep.mubr.f32.mxu0 %v3410_v6  ;;  %v13141_v20 = vrot.slane %v16227_v63, 2  ;;  %v4202_v48 = vrot.slane %v16228_v57, 2  ;;  %v16230_v57 = vunpack.c.l.bf16 %v13102_v32  ;;  %v3421_v24 = vrot.slane %v13126_v59, 1  ;;  %v13180_v39 = vld [vmem:[%s12563_s24 + $0xac] sm:$0x1] }
  0x5b   : > { %v3418_v55 = vrot.slane %v16225_v8, 1  ;;  %v325_v8 = vld [vmem:[%s15845_s1 + $0x50] sm:$0xff]  ;;  %v3417_v63 = vsel %vm475_vm0, %v3414_v42, %v3416_v22  ;;  %v538_v15 = vsel %vm475_vm0, %v535_v56, %v537_v4  ;;  %v16231_v32 = vunpack.c.h.bf16 %v13111_v36  ;;  %16232 = vst [vmem:[#allocation44_spill] sm:$0xff] %v13180_v39 }
  0x5c   : > { %10368 = vmatmul.mubr.f32.gmra.mrb[22].mxu1 %v531_v14  ;;  %v13160_v12 = vsel %vm1655_vm1, %v13141_v20, %v4202_v48  ;;  %v3420_v6 = vrot.slane %v16230_v57, 1  ;;  %v13177_v14 = vunpack.c.h.bf16 %v13156_v62  ;;  %v13187_v4 = vunpack.c.l.bf16 %v13168_v28 }
  0x5d   : > { %10928 = vmatmul.mubr.f32.gmra.mrb[22].mxu0 %v3412_v5  ;;  %10370 = vmatprep.mubr.f32.mxu1 %v3408_v11  ;;  %v3419_v48 = vsel %vm475_vm0, %v3416_v22, %v3418_v55  ;;  %v542_v5 = vrot.slane %v13134_v29, 1  ;;  %v11614_v11 = vpack.c.bf16 %v326_v25, %v325_v8  ;;  %v3423_v57 = vrot.slane %v16231_v32, 1  ;;  %v13190_v25 = vld [vmem:[%s12563_s24 + $0xbc] sm:$0x1] }
  0x5e   : > { %10930 = vmatprep.mubr.f32.mxu0 %v3415_v19  ;;  %16234 = vst [vmem:[#allocation45_spill] sm:$0xff] %v13187_v4  ;;  %v16235_v32 = vunpack.c.l.bf16 %v12834_v21  ;;  %v3422_v22 = vsel %vm475_vm0, %v3420_v6, %v3421_v24  ;;  %v16236_v55 = vunpack.c.l.bf16 %v13129_v61  ;;  %v16237_v34 = vunpack.c.l.bf16 %v13137_v38 }
  0x5f   : > { %11615 = vmatprep.subr.bf16.mxu1 %v11614_v11  ;;  %v543_v51 = vsel %vm475_vm0, %v3414_v42, %v542_v5  ;;  %v3424_v6 = vsel %vm475_vm0, %v3421_v24, %v3423_v57  ;;  %v13215_v42 = vld [vmem:[%s12563_s24 + $0xb8] ss:$16 sps:$4 sm:$0xff]  }
  0x60   : > { %10371 = vmatmul.mubr.f32.gmra.mrb[24].mxu1 %v536_v40  ;;  %v4209_v56 = vrot.slane %v16235_v32, 2  ;;  %v544_v43 = vrot.slane %v16236_v55, 1  ;;  %v3425_v8 = vrot.slane %v16237_v34, 1  ;;  %v13200_v40 = vld [vmem:[%s12563_s24 + $0xc0] sm:$0xff]   ;;  %v3428_v55 = vrot.slane %v13177_v14, 1 }
  0x61   : > { %10931 = vmatmul.mubr.f32.gmra.mrb[24].mxu0 %v3417_v63  ;;  %10373 = vmatprep.mubr.f32.mxu1 %v538_v15  ;;  %16238 = vst [vmem:[#allocation46_spill] sm:$0xff] %v13200_v40  ;;  %v16239_v63 = vunpack.c.l.bf16 %v13156_v62  ;;  %v549_v34 = vrot.slane %v13187_v4, 1  ;;  %v13221_v21 = vunpack.c.h.bf16 %v13200_v40  ;;  %v8269_v4 = vld [vmem:[%s12563_s24 + $0x10] sm:$0xe] }
  0x62   : > { %10933 = vmatprep.mubr.f32.mxu0 %v3419_v48  ;;  %11617 = vmatpush3.bf16.msra.mxu1 %v11614_v11  ;;  %v13207_v15 = vsel %vm1655_vm1, %v13184_v58, %v4209_v56  ;;  %v545_v56 = vsel %vm475_vm0, %v542_v5, %v544_v43  ;;  %v16241_v48 = vunpack.c.l.bf16 %v12874_v16  ;;  %v3426_v61 = vsel %vm475_vm0, %v3423_v57, %v3425_v8  ;;  %v13245_v57 = vld [vmem:[%s12563_s24 + $0xcc] sm:$0x1] }
  0x63   : > { %v3427_v32 = vrot.slane %v16239_v63, 1  ;;  %v16240_v63 = vunpack.c.h.bf16 %v12861_v27  ;;  %v16242_v11 = vunpack.c.h.bf16 %v13168_v28  ;;  %v13235_v43 = vunpack.c.l.bf16 %v13215_v42  ;;  %v13238_v27 = vld [vmem:[%s12563_s24 + $0xbc] sm:$0x1] }
  0x64   : > { %10374 = vmatmul.mubr.f32.gmra.mrb[26].mxu1 %v3415_v19  ;;  %v4216_v19 = vrot.slane %v16241_v48, 2  ;;  %16245 = vst [vmem:[#allocation48_spill] sm:$0xff] %v13238_v27  ;;  %v16246_v16 = vunpack.c.l.bf16 %v13190_v25  ;;  %v16255_v60 = vunpack.c.l.bf16 %v13245_v57 }
  0x65   : > { %10934 = vmatmul.mubr.f32.gmra.mrb[26].mxu0 %v3422_v22  ;;  %10376 = vmatprep.mubr.f32.mxu1 %v543_v51  ;;  %v13225_v29 = vrot.slane %v16240_v63, 2  ;;  %v3430_v62 = vrot.slane %v16242_v11, 1  ;;  %v16243_v51 = vunpack.c.l.bf16 %v13180_v39  ;;  %16244 = vst [vmem:[#allocation47_spill] sm:$0xff] %v13235_v43  ;;  %v3429_v63 = vsel %vm475_vm0, %v3427_v32, %v3428_v55 }
  0x66   : > { %10936 = vmatprep.mubr.f32.mxu0 %v3424_v6  ;;  %v3432_v48 = vrot.slane %v16246_v16, 1  ;;  %v550_v11 = vsel %vm475_vm0, %v3421_v24, %v549_v34  ;;  %v3435_v32 = vrot.slane %v13221_v21, 1  ;;  %v209_v6 = vld [vmem:[%s12563_s24 + $0xc8] ss:$16 sps:$4 sm:$0xff]   ;;  %v327_v16 = vld [vmem:[%s15845_s1 + $0x60] sm:$0xff] }
  0x67   : > { %v551_v5 = vrot.slane %v16243_v51, 1  ;;  %v13249_v8 = vsel %vm1655_vm1, %v13225_v29, %v4216_v19  ;;  %v16247_v51 = vunpack.c.l.bf16 %v13200_v40  ;;  %v3431_v24 = vsel %vm475_vm0, %v3428_v55, %v3430_v62 }
  0x68   : > { %10377 = vmatmul.mubr.f32.gmra.mrb[28].mxu1 %v545_v56  ;;  %v16249_v56 = vunpack.c.l.bf16 %v12942_v2  ;;  %v3433_v9 = vsel %vm475_vm0, %v3430_v62, %v3432_v48  ;;  %v16250_v2 = vunpack.c.h.bf16 %v13215_v42  ;;  %v4135_v40 = vunpack.c.l.bf16 %v8269_v4 }
  0x69   : > { %v3434_v39 = vrot.slane %v16247_v51, 1  ;;  %10937 = vmatmul.mubr.f32.gmra.mrb[28].mxu0 %v3426_v61  ;;  %10379 = vmatprep.mubr.f32.mxu1 %v3422_v22  ;;  %v552_v51 = vsel %vm475_vm0, %v549_v34, %v551_v5  ;;  %v556_v61 = vrot.slane %v13235_v43, 1  ;;  %v13278_v34 = vld [vmem:[%s12563_s24 + $0xcc] sm:$0x1]  ;;  %v13284_v22 = vunpack.c.l.bf16 %v209_v6 }
  0x6a   : > { %v4223_v19 = vrot.slane %v16249_v56, 2  ;;  %10939 = vmatprep.mubr.f32.mxu0 %v3429_v63  ;;  %v3437_v56 = vrot.slane %v16250_v2, 1  ;;  %16251 = vst [vmem:[#allocation49_spill] sm:$0xff] %v13278_v34  ;;  %v16253_v62 = vunpack.c.l.bf16 %v13238_v27  ;;  %v11618_v4 = vpack.c.bf16 %v328_v0, %v327_v16  ;;  %v13323_v27 = vld [vmem:[%s12563_s24 + $0xdc] sm:$0x1] }
  0x6b   : > { %16252 = vst [vmem:[#allocation50_spill] sm:$0xff] %v13284_v22  ;;  %v3436_v43 = vsel %vm475_vm0, %v3434_v39, %v3435_v32  ;;  %v557_v2 = vsel %vm475_vm0, %v3428_v55, %v556_v61  ;;  %v4183_v30 = vrot.slane %v4135_v40, 2  ;;  %v16258_v55 = vunpack.c.l.bf16 %v12981_v17  ;;  %16261 = vst [vmem:[#allocation54_spill] sm:$0xff] %v13323_v27 }
  0x6c   : > { %v13282_v5 = vsel %vm1655_vm1, %v13260_v18, %v4223_v19  ;;  %10380 = vmatmul.mubr.f32.gmra.mrb[30].mxu1 %v550_v11  ;;  %v558_v48 = vrot.slane %v16253_v62, 1  ;;  %v3439_v19 = vrot.slane %v16255_v60, 1  ;;  %v13296_v11 = vrot.slane %v12593_v33, 2  ;;  %11619 = vmatprep.subr.bf16.mxu1 %v11618_v4 }
  0x6d   : > { %10940 = vmatmul.mubr.f32.gmra.mrb[30].mxu0 %v3431_v24  ;;  %10382 = vmatprep.mubr.f32.mxu1 %v552_v51  ;;  %v8270_v51 = vld [vmem:[%s12563_s24 + $0x20] sm:$0xe]  ;;  %v3438_v39 = vsel %vm475_vm0, %v3435_v32, %v3437_v56  ;;  %v16257_v62 = vunpack.c.h.bf16 %v12955_v37  ;;  %v4230_v0 = vrot.slane %v16258_v55, 2  ;;  %v563_v60 = vrot.slane %v13284_v22, 1 }
  0x6e   : > { %10942 = vmatprep.mubr.f32.mxu0 %v3433_v9  ;;  %16256 = vst [vmem:[#allocation52_spill] sm:$0xff] %v13296_v11  ;;  %v13310_v24 = vunpack.c.h.bf16 %v13290_v31  ;;  %v559_v37 = vsel %vm475_vm0, %v556_v61, %v558_v48  ;;  %v4136_v40 = vunpack.c.l.bf16 %v8270_v51  ;;  %v16260_v55 = vunpack.c.l.bf16 %v13278_v34  ;;  %v13326_v22 = vld [vmem:[%s12563_s24 + $0xe0] sm:$0xff]   ;;  %11621 = vmatpush3.bf16.msra.mxu1 %v11618_v4  ;;  %v13332_v48 = vld [vmem:[%s12563_s24 + $0xe8] ss:$16 sps:$4 sm:$0xff]  }
  0x6f   : > { %v13303_v16 = vrot.slane %v16257_v62, 2  ;;  %v13313_v62 = vunpack.c.h.bf16 %v209_v6  ;;  %16262 = vst [vmem:[#allocation55_spill] sm:$0xff] %v13326_v22  ;;  %v4185_v61 = vsel %vm1655_vm1, %v4183_v30, %v13296_v11  ;;  %v8271_v6 = vld [vmem:[%s12563_s24 + $0x30] sm:$0xe]  ;;  %v13347_v30 = vrot.slane %v12699_v13, 2 }
  0x70   : > { %10383 = vmatmul.mubr.f32.gmra.mrb[32].mxu1 %v3429_v63  ;;  %v3440_v63 = vsel %vm475_vm0, %v3437_v56, %v3439_v19  ;;  %v565_v9 = vrot.slane %v16260_v55, 1  ;;  %v16264_v56 = vunpack.c.l.bf16 %v13029_v47  ;;  %v13344_v55 = vrot.slane %v13310_v24, 1  ;;  %v8384_v47 = vld [vmem:[%s15845_s1 + $0x318] sm:$0xff] }
  0x71   : > { %10943 = vmatmul.mubr.f32.gmra.mrb[32].mxu0 %v3436_v43  ;;  %10385 = vmatprep.mubr.f32.mxu1 %v557_v2  ;;  %16259 = vst [vmem:[#allocation53_spill] sm:$0xff] %v13313_v62  ;;  %v13317_v17 = vsel %vm1655_vm1, %v13303_v16, %v4230_v0  ;;  %v16263_v2 = vunpack.c.h.bf16 %v13003_v50  ;;  %v16265_v0 = vunpack.c.l.bf16 %v13290_v31  ;;  %16267 = vst [vmem:[#allocation57_spill] sm:$0xff] %v13347_v30  ;;  %v8383_v50 = vld [vmem:[%s15845_s1 + $0x310] sm:$0xff] }
  0x72   : > { %10945 = vmatprep.mubr.f32.mxu0 %v3438_v39  ;;  %v4237_v19 = vrot.slane %v16264_v56, 2  ;;  %v564_v39 = vsel %vm475_vm0, %v3435_v32, %v563_v60  ;;  %16266 = vst [vmem:[#allocation56_spill] sm:$0xff] %v13344_v55  ;;  %v4190_v32 = vrot.slane %v4136_v40, 2  ;;  %v13358_v56 = vld [vmem:[%s12563_s24 + $0xec] sm:$0x1]  ;;  %v4187_v34 = vsel %vm1655_vm1, %v13296_v11, %v13065_v41  ;;  %v8385_v41 = vld [vmem:[%s15845_s1 + $0x320] sm:$0xff] }
  0x73   : > { %v13336_v51 = vrot.slane %v16263_v2, 2  ;;  %v567_v4 = vrot.slane %v16265_v0, 1  ;;  %16268 = vst [vmem:[#allocation58_spill] sm:$0xff] %v13358_v56  ;;  %v566_v31 = vsel %vm475_vm0, %v563_v60, %v565_v9  ;;  %v13370_v40 = vunpack.c.h.bf16 %v13326_v22  ;;  %v8386_v60 = vld [vmem:[%s15845_s1 + $0x328] sm:$0xff] }
  0x74   : > { %10386 = vmatmul.mubr.f32.gmra.mrb[34].mxu1 %v559_v37  ;;  %v570_v37 = vrot.slane %v13313_v62, 1  ;;  %v13373_v2 = vunpack.c.l.bf16 %v13332_v48  ;;  %v11758_v62 = vpack.c.bf16 %v8384_v47, %v8383_v50  ;;  %v16269_v9 = vunpack.c.h.bf16 %v13054_v46 }
  0x75   : > { %10946 = vmatmul.mubr.f32.gmra.mrb[34].mxu0 %v3440_v63  ;;  %10388 = vmatprep.mubr.f32.mxu1 %v3436_v43  ;;  %v13362_v0 = vsel %vm1655_vm1, %v13336_v51, %v4237_v19  ;;  %v4137_v63 = vunpack.c.l.bf16 %v8271_v6  ;;  %v16270_v6 = vunpack.c.l.bf16 %v13077_v49  ;;  %v4192_v50 = vsel %vm1655_vm1, %v4190_v32, %v13347_v30  ;;  %v329_v49 = vld [vmem:[%s15845_s1 + $0x70] sm:$0xff] }
  0x76   : > { %11034 = vmatprep.mubr.f32.mxu0 %v4185_v61  ;;  %v13384_v19 = vrot.slane %v16269_v9, 2  ;;  %v571_v47 = vsel %vm475_vm0, %v13344_v55, %v570_v37  ;;  %v16271_v61 = vunpack.c.l.bf16 %v13323_v27  ;;  %v13397_v9 = vld [vmem:[%s12563_s24 + $0xf0] sm:$0xff]   ;;  %v13410_v32 = vrot.slane %v13370_v40, 1 }
  0x77   : > { %v4244_v43 = vrot.slane %v16270_v6, 2  ;;  %v8272_v6 = vld [vmem:[%s12563_s24 + $0x40] sm:$0xe]  ;;  %v577_v27 = vrot.slane %v13373_v2, 1  ;;  %v16275_v11 = vunpack.c.l.bf16 %v13358_v56 }
  0x78   : > { %10389 = vmatmul.mubr.f32.gmra.mrb[36].mxu1 %v564_v39  ;;  %v569_v39 = vsel %vm475_vm0, %v567_v4, %v13344_v55  ;;  %v572_v46 = vrot.slane %v16271_v61, 1  ;;  %16273 = vst [vmem:[#allocation59_spill] sm:$0xff] %v13410_v32  ;;  %v13413_v61 = vrot.slane %v12756_v52, 2  ;;  %v15948_v52 = vunpack.c.l.bf16 %v13397_v9 }
  0x79   : > { %11035 = vmatmul.mubr.f32.vlgmr.msra.gmra.mrb[0].mxu0 %v4187_v34  ;;  %10391 = vmatprep.mubr.f32.mxu1 %v566_v31  ;;  %v330_v31 = vld [vmem:[%s15845_s1 + $0x78] sm:$0xff]  ;;  %v16272_v34 = vunpack.c.l.bf16 %v13326_v22  ;;  %v13418_v55 = vsel %vm1655_vm1, %v13384_v19, %v4244_v43  ;;  %v579_v22 = vrot.slane %v16275_v11, 1  ;;  %v8387_v43 = vld [vmem:[%s15845_s1 + $0x330] sm:$0xff]  ;;  %v4138_v11 = vunpack.c.l.bf16 %v8272_v6 }
  0x7a   : > { %11757 = vmatpush3.bf16.msra.mxu0 %v13056_v45  ;;  %11037 = vmatprep.mubr.f32.mxu0 %v13088_v3  ;;  %16274 = vst [vmem:[#allocation60_spill] sm:$0xff] %v13413_v61  ;;  %v4194_v45 = vsel %vm1655_vm1, %v13347_v30, %v13095_v53  ;;  %v4197_v3 = vrot.slane %v4137_v63, 2  ;;  %v11622_v13 = vpack.c.bf16 %v330_v31, %v329_v49  ;;  %v8388_v53 = vld [vmem:[%s15845_s1 + $0x338] sm:$0xff] }
  0x7b   : > { %v574_v4 = vrot.slane %v16272_v34, 1  ;;  %11759 = vmatprep.subr.bf16.mxu0 %v11758_v62  ;;  %v11762_v34 = vpack.c.bf16 %v8386_v60, %v8385_v41  ;;  %v573_v63 = vsel %vm475_vm0, %v570_v37, %v572_v46  ;;  %v13435_v41 = vunpack.c.h.bf16 %v13397_v9  ;;  %v13438_v60 = vld [vmem:[%s12563_s24 + $0xfc] sm:$0x1] }
  0x7c   : > { %10392 = vmatmul.mubr.f32.gmra.mrb[38].mxu1 %v569_v39  ;;  %16276 = vst [vmem:[#allocation61_spill] sm:$0xff] %v13438_v60  ;;  %v16277_v39 = vunpack.c.h.bf16 %v13111_v36  ;;  %v13450_v37 = vunpack.c.h.bf16 %v13332_v48  ;;  %v16278_v46 = vunpack.c.l.bf16 %v13137_v38  ;;  %v4199_v6 = vsel %vm1655_vm1, %v4197_v3, %v13413_v61  ;;  %11623 = vmatprep.subr.bf16.mxu1 %v11622_v13  ;;  %v8273_v38 = vld [vmem:[%s12563_s24 + $0x50] sm:$0xe]  ;;  %v13490_v48 = vld [vmem:[%s12563_s24 + $0x10c] sm:$0x1] }
  0x7d   : > { %11038 = vmatmul.mubr.f32.gmra.mrb[2].mxu0 %v4192_v50  ;;  %10394 = vmatprep.mubr.f32.mxu1 %v571_v47  ;;  %v576_v31 = vsel %vm475_vm0, %v574_v4, %v13410_v32  ;;  %v4201_v50 = vsel %vm1655_vm1, %v13413_v61, %v13141_v20  ;;  %v13453_v47 = vld [vmem:[%s12563_s24 + $0x100] sm:$0xff]   ;;  %v11766_v4 = vpack.c.bf16 %v8388_v53, %v8387_v43  ;;  %v4204_v43 = vrot.slane %v4138_v11, 2  ;;  %v221_v53 = vld [vmem:[%s12563_s24 + $0x108] ss:$16 sps:$4 sm:$0xff]  }
  0x7e   : > { %v13442_v49 = vrot.slane %v16277_v39, 2  ;;  %11040 = vmatprep.mubr.f32.mxu0 %v4194_v45  ;;  %11761 = vmatpush3.bf16.msra.mxu0 %v11758_v62  ;;  %v4251_v36 = vrot.slane %v16278_v46, 2  ;;  %v578_v45 = vsel %vm475_vm0, %v13410_v32, %v577_v27  ;;  %v580_v20 = vsel %vm475_vm0, %v577_v27, %v579_v22  ;;  %16283 = vst [vmem:[#allocation64_spill] sm:$0xff] %v13490_v48  ;;  %v8276_v61 = vld [vmem:[%s12563_s24 + $0x80] sm:$0xe] }
  0x7f   : > { %11763 = vmatprep.subr.bf16.mxu0 %v11762_v34  ;;  %v581_v62 = vrot.slane %v15948_v52, 1  ;;  %v13472_v39 = vrot.slane %v13435_v41, 1  ;;  %v13475_v27 = vrot.slane %v12817_v44, 2  ;;  %v13481_v46 = vunpack.c.h.bf16 %v13453_v47  ;;  %11625 = vmatpush3.bf16.msra.mxu1 %v11622_v13 }
  0x80   : > { %10395 = vmatmul.mubr.f32.gmra.mrb[40].mxu1 %v573_v63  ;;  %v13468_v3 = vsel %vm1655_vm1, %v13442_v49, %v4251_v36  ;;  %v584_v63 = vrot.slane %v13450_v37, 1  ;;  %v16282_v11 = vunpack.c.l.bf16 %v13190_v25  ;;  %v4139_v52 = vunpack.c.l.bf16 %v8273_v38  ;;  %v13507_v38 = vld [vmem:[%s12563_s24 + $0x110] sm:$0xff]  }
  0x81   : > { %11041 = vmatmul.mubr.f32.gmra.mrb[4].mxu0 %v13119_v1  ;;  %10397 = vmatprep.mubr.f32.mxu1 %v576_v31  ;;  %16279 = vst [vmem:[#allocation62_spill] sm:$0xff] %v13472_v39  ;;  %16280 = vst [vmem:[#allocation63_spill] sm:$0xff] %v13475_v27  ;;  %v16281_v1 = vunpack.c.h.bf16 %v13168_v28  ;;  %v13494_v32 = vunpack.c.l.bf16 %v221_v53  ;;  %v583_v25 = vsel %vm475_vm0, %v581_v62, %v13472_v39  ;;  %v16285_v13 = vunpack.c.l.bf16 %v13453_v47 }
  0x82   : > { %11043 = vmatprep.mubr.f32.mxu0 %v4199_v6  ;;  %11765 = vmatpush3.bf16.msra.mxu0 %v11762_v34  ;;  %v4258_v36 = vrot.slane %v16282_v11, 2  ;;  %v16284_v6 = vunpack.c.l.bf16 %v13438_v60  ;;  %v4206_v34 = vsel %vm1655_vm1, %v4204_v43, %v13475_v27  ;;  %v13513_v11 = vrot.slane %v13481_v46, 1 }
  0x83   : > { %v13485_v31 = vrot.slane %v16281_v1, 2  ;;  %11767 = vmatprep.subr.bf16.mxu0 %v11766_v4  ;;  %v585_v1 = vsel %vm475_vm0, %v13472_v39, %v584_v63  ;;  %v16287_v62 = vunpack.c.h.bf16 %v13215_v42  ;;  %v16289_v42 = vunpack.c.l.bf16 %v13245_v57  ;;  %v8390_v39 = vld [vmem:[%s15845_s1 + $0x348] sm:$0xff] }
  0x84   : > { %10398 = vmatmul.mubr.f32.gmra.mrb[42].mxu1 %v578_v45  ;;  %v586_v22 = vrot.slane %v16284_v6, 1  ;;  %v588_v45 = vrot.slane %v16285_v13, 1  ;;  %16286 = vst [vmem:[#allocation65_spill] sm:$0xff] %v13513_v11  ;;  %v4208_v6 = vsel %vm1655_vm1, %v13475_v27, %v13184_v58  ;;  %v4211_v13 = vrot.slane %v4139_v52, 2 }
  0x85   : > { %v13498_v28 = vsel %vm1655_vm1, %v13485_v31, %v4258_v36  ;;  %11044 = vmatmul.mubr.f32.gmra.mrb[6].mxu0 %v4201_v50  ;;  %10400 = vmatprep.mubr.f32.mxu1 %v580_v20  ;;  %v8274_v20 = vld [vmem:[%s12563_s24 + $0x60] sm:$0xe]  ;;  %v13519_v43 = vrot.slane %v16287_v62, 2  ;;  %v13531_v50 = vrot.slane %v12866_v10, 2  ;;  %v591_v52 = vrot.slane %v13494_v32, 1 }
  0x86   : > { %11046 = vmatprep.mubr.f32.mxu0 %v13160_v12  ;;  %11769 = vmatpush3.bf16.msra.mxu0 %v11766_v4  ;;  %v8053_v36 = vld [vmem:[%s15845_s1 + $0x100] sm:$0xff]  ;;  %v8054_v12 = vld [vmem:[%s15845_s1 + $0x108] sm:$0xff]  ;;  %v4265_v4 = vrot.slane %v16289_v42, 2  ;;  %v587_v60 = vsel %vm475_vm0, %v584_v63, %v586_v22  ;;  %v13545_v57 = vunpack.c.h.bf16 %v13507_v38  ;;  %v4140_v42 = vunpack.c.l.bf16 %v8274_v20 }
  0x87   : > { %16288 = vst [vmem:[#allocation66_spill] sm:$0xff] %v13531_v50  ;;  %v8389_v62 = vld [vmem:[%s15845_s1 + $0x340] sm:$0xff]  ;;  %v13551_v27 = vpack.c.bf16 %v8054_v12, %v8053_v36  ;;  %v590_v22 = vsel %vm475_vm0, %v588_v45, %v13513_v11  ;;  %v16290_v63 = vunpack.c.l.bf16 %v13490_v48  ;;  %v4213_v20 = vsel %vm1655_vm1, %v4211_v13, %v13531_v50  ;;  %v8275_v12 = vld [vmem:[%s12563_s24 + $0x70] sm:$0xe] }
  0x88   : > { %10401 = vmatmul.mubr.f32.gmra.mrb[44].mxu1 %v583_v25  ;;  %v13549_v56 = vsel %vm1655_vm1, %v13519_v43, %v4265_v4  ;;  %v11770_v58 = vpack.c.bf16 %v8390_v39, %v8389_v62  ;;  %v13565_v4 = vld [vmem:[%s12563_s24 + $0x120] sm:$0xff]   ;;  %v592_v45 = vsel %vm475_vm0, %v13513_v11, %v591_v52  ;;  %v16292_v36 = vunpack.c.l.bf16 %v13507_v38  ;;  %v8391_v62 = vld [vmem:[%s15845_s1 + $0x350] sm:$0xff] }
  0x89   : > { %11047 = vmatmul.mubr.f32.gmra.mrb[8].mxu0 %v4206_v34  ;;  %10403 = vmatprep.mubr.f32.mxu1 %v585_v1  ;;  %v593_v25 = vrot.slane %v16290_v63, 1  ;;  %v13557_v34 = vunpack.c.h.bf16 %v221_v53  ;;  %v13560_v1 = vld [vmem:[%s12563_s24 + $0x11c] sm:$0x1]  ;;  %v4215_v53 = vsel %vm1655_vm1, %v13531_v50, %v13225_v29  ;;  %v13581_v13 = vrot.slane %v12928_v54, 2  ;;  %v227_v63 = vld [vmem:[%s12563_s24 + $0x128] ss:$16 sps:$4 sm:$0xff]  }
  0x8a   : > { %11049 = vmatprep.mubr.f32.mxu0 %v4208_v6  ;;  %16291 = vst [vmem:[#allocation67_spill] sm:$0xff] %v13560_v1  ;;  %11627 = vmatprep.subr.bf16.mxu1 %v13551_v27  ;;  %v595_v39 = vrot.slane %v16292_v36, 1  ;;  %v13578_v6 = vrot.slane %v13545_v57, 1  ;;  %v13610_v50 = vld [vmem:[%s12563_s24 + $0x130] sm:$0xff]  }
  0x8b   : > { %11771 = vmatprep.subr.bf16.mxu0 %v11770_v58  ;;  %16294 = vst [vmem:[#allocation69_spill] sm:$0xff] %v13581_v13  ;;  %v594_v29 = vsel %vm475_vm0, %v591_v52, %v593_v25  ;;  %v598_v36 = vrot.slane %v13557_v34, 1  ;;  %v8392_v52 = vld [vmem:[%s15845_s1 + $0x358] sm:$0xff]  ;;  %v13600_v25 = vunpack.c.l.bf16 %v227_v63  ;;  %16297 = vst [vmem:[#allocation71_spill] sm:$0xff] %v13610_v50 }
  0x8c   : > { %10404 = vmatmul.mubr.f32.gmra.mrb[46].mxu1 %v587_v60  ;;  %16293 = vst [vmem:[#allocation68_spill] sm:$0xff] %v13578_v6  ;;  %v4218_v60 = vrot.slane %v4140_v42, 2  ;;  %11773 = vmatpush3.bf16.msra.mxu0 %v11770_v58  ;;  %v4141_v42 = vunpack.c.l.bf16 %v8275_v12  ;;  %v16296_v12 = vunpack.c.l.bf16 %v13560_v1  ;;  %v13625_v1 = vrot.slane %v12972_v23, 2 }
  0x8d   : > { %11050 = vmatmul.mubr.f32.gmra.mrb[10].mxu0 %v13207_v15  ;;  %10406 = vmatprep.mubr.f32.mxu1 %v590_v22  ;;  %v13589_v15 = vunpack.c.h.bf16 %v13565_v4  ;;  %v13592_v22 = vld [vmem:[%s12563_s24 + $0x12c] sm:$0x1] }
  0x8e   : > { %11052 = vmatprep.mubr.f32.mxu0 %v4213_v20  ;;  %16295 = vst [vmem:[#allocation70_spill] sm:$0xff] %v13592_v22  ;;  %v597_v20 = vsel %vm475_vm0, %v595_v39, %v13578_v6  ;;  %v4220_v58 = vsel %vm1655_vm1, %v4218_v60, %v13581_v13  ;;  %v600_v11 = vrot.slane %v16296_v12, 1  ;;  %v11774_v60 = vpack.c.bf16 %v8392_v52, %v8391_v62 }
  0x8f   : > { %v13618_v39 = vrot.slane %v13589_v15, 1  ;;  %v4222_v12 = vsel %vm1655_vm1, %v13581_v13, %v13260_v18  ;;  %v4225_v48 = vrot.slane %v4141_v42, 2  ;;  %16300 = vst [vmem:[#allocation73_spill] sm:$0xff] %v13625_v1  ;;  %v16301_v18 = vunpack.c.l.bf16 %v13592_v22 }
  0x90   : > { %10407 = vmatmul.mubr.f32.gmra.mrb[48].mxu1 %v592_v45  ;;  %v599_v45 = vsel %vm475_vm0, %v13578_v6, %v598_v36  ;;  %v13630_v6 = vunpack.c.h.bf16 %v13610_v50  ;;  %11775 = vmatprep.subr.bf16.mxu0 %v11774_v60  ;;  %v601_v62 = vsel %vm475_vm0, %v598_v36, %v600_v11  ;;  %v4142_v52 = vunpack.c.l.bf16 %v8276_v61  ;;  %v8393_v11 = vld [vmem:[%s15845_s1 + $0x360] sm:$0xff]  ;;  %v8394_v61 = vld [vmem:[%s15845_s1 + $0x368] sm:$0xff] }
  0x91   : > { %11053 = vmatmul.mubr.f32.gmra.mrb[12].mxu0 %v4215_v53  ;;  %10409 = vmatprep.mubr.f32.mxu1 %v594_v29  ;;  %v16298_v53 = vunpack.c.l.bf16 %v13565_v4  ;;  %16299 = vst [vmem:[#allocation72_spill] sm:$0xff] %v13618_v39  ;;  %v607_v42 = vrot.slane %v16301_v18, 1  ;;  %v13637_v13 = vunpack.c.h.bf16 %v227_v63  ;;  %v4229_v36 = vsel %vm1655_vm1, %v13625_v1, %v13303_v16  ;;  %v233_v16 = vld [vmem:[%s12563_s24 + $0x148] ss:$16 sps:$4 sm:$0xff]  }
  0x92   : > { %11055 = vmatprep.mubr.f32.mxu0 %v13249_v8  ;;  %v605_v8 = vrot.slane %v13600_v25, 1  ;;  %11777 = vmatpush3.bf16.msra.mxu0 %v11774_v60  ;;  %v13661_v60 = vrot.slane %v13630_v6, 1  ;;  %v4232_v18 = vrot.slane %v4142_v52, 2 }
  0x93   : > { %v602_v29 = vrot.slane %v16298_v53, 1  ;;  %16302 = vst [vmem:[#allocation74_spill] sm:$0xff] %v13637_v13  ;;  %v13640_v53 = vld [vmem:[%s12563_s24 + $0x13c] sm:$0x1] }
  0x94   : > { %10410 = vmatmul.mubr.f32.gmra.mrb[50].mxu1 %v597_v20  ;;  %16303 = vst [vmem:[#allocation75_spill] sm:$0xff] %v13640_v53  ;;  %v606_v63 = vsel %vm475_vm0, %v13618_v39, %v605_v8  ;;  %16306 = vst [vmem:[#allocation77_spill] sm:$0xff] %v13661_v60  ;;  %v15976_v22 = vunpack.c.l.bf16 %v13640_v53 }
  0x95   : > { %11056 = vmatmul.mubr.f32.gmra.mrb[14].mxu0 %v4220_v58  ;;  %10412 = vmatprep.mubr.f32.mxu1 %v599_v45  ;;  %v604_v20 = vsel %vm475_vm0, %v602_v29, %v13618_v39  ;;  %v4227_v58 = vsel %vm1655_vm1, %v4225_v48, %v13625_v1  ;;  %v13645_v45 = vld [vmem:[%s12563_s24 + $0x140] sm:$0xff]   ;;  %v16305_v48 = vunpack.c.l.bf16 %v13610_v50  ;;  %v13667_v39 = vrot.slane %v13011_v35, 2 }
  0x96   : > { %11058 = vmatprep.mubr.f32.mxu0 %v4222_v12  ;;  %16304 = vst [vmem:[#allocation76_spill] sm:$0xff] %v13645_v45  ;;  %v8277_v12 = vld [vmem:[%s12563_s24 + $0x90] sm:$0xe]  ;;  %v13674_v30 = vunpack.c.h.bf16 %v13645_v45  ;;  %v614_v1 = vrot.slane %v15976_v22, 1  ;;  %v13730_v50 = vld [vmem:[%s12563_s24 + $0x160] sm:$0xff]  }
  0x97   : > { %v609_v29 = vrot.slane %v16305_v48, 1  ;;  %16307 = vst [vmem:[#allocation78_spill] sm:$0xff] %v13667_v39  ;;  %v612_v48 = vrot.slane %v13637_v13, 1  ;;  %v13725_v13 = vld [vmem:[%s12563_s24 + $0x15c] sm:$0x1] }
  0x98   : > { %10413 = vmatmul.mubr.f32.gmra.mrb[52].mxu1 %v601_v62  ;;  %v608_v62 = vsel %vm475_vm0, %v605_v8, %v607_v42  ;;  %v13677_v8 = vld [vmem:[%s12563_s24 + $0x14c] sm:$0x1]  ;;  %v13679_v42 = vunpack.c.l.bf16 %v233_v16  ;;  %16314 = vst [vmem:[#allocation83_spill] sm:$0xff] %v13725_v13 }
  0x99   : > { %11059 = vmatmul.mubr.f32.gmra.mrb[16].mxu0 %v13282_v5  ;;  %10415 = vmatprep.mubr.f32.mxu1 %v604_v20  ;;  %v11778_v5 = vpack.c.bf16 %v8394_v61, %v8393_v11  ;;  %v4143_v20 = vunpack.c.l.bf16 %v8277_v12  ;;  %16308 = vst [vmem:[#allocation79_spill] sm:$0xff] %v13677_v8  ;;  %v611_v52 = vsel %vm475_vm0, %v609_v29, %v13661_v60  ;;  %v13688_v11 = vld [vmem:[%s12563_s24 + $0x150] sm:$0xff]   ;;  %v13696_v12 = vrot.slane %v13674_v30, 1 }
  0x9a   : > { %11061 = vmatprep.mubr.f32.mxu0 %v4227_v58  ;;  %16309 = vst [vmem:[#allocation80_spill] sm:$0xff] %v13679_v42  ;;  %v4234_v58 = vsel %vm1655_vm1, %v4232_v18, %v13667_v39  ;;  %v613_v61 = vsel %vm475_vm0, %v13661_v60, %v612_v48  ;;  %v4236_v18 = vsel %vm1655_vm1, %v13667_v39, %v13336_v51  ;;  %v8396_v60 = vld [vmem:[%s15845_s1 + $0x378] sm:$0xff]  ;;  %v13715_v51 = vunpack.c.h.bf16 %v13688_v11 }
  0x9b   : > { %11779 = vmatprep.subr.bf16.mxu0 %v11778_v5  ;;  %16311 = vst [vmem:[#allocation81_spill] sm:$0xff] %v13696_v12  ;;  %v4239_v22 = vrot.slane %v4143_v20, 2  ;;  %v615_v20 = vsel %vm475_vm0, %v612_v48, %v614_v1  ;;  %v13718_v39 = vunpack.c.h.bf16 %v233_v16  ;;  %v16315_v16 = vunpack.c.l.bf16 %v13688_v11 }
  0x9c   : > { %10416 = vmatmul.mubr.f32.gmra.mrb[54].mxu1 %v606_v63  ;;  %v16310_v63 = vunpack.c.l.bf16 %v13645_v45  ;;  %11781 = vmatpush3.bf16.msra.mxu0 %v11778_v5  ;;  %v619_v5 = vrot.slane %v13679_v42, 1 }
  0x9d   : > { %11062 = vmatmul.mubr.f32.gmra.mrb[18].mxu0 %v4229_v36  ;;  %10418 = vmatprep.mubr.f32.mxu1 %v608_v62  ;;  %v8278_v62 = vld [vmem:[%s12563_s24 + $0xa0] sm:$0xe]  ;;  %v623_v48 = vrot.slane %v16315_v16, 1  ;;  %v13756_v16 = vld [vmem:[%s12563_s24 + $0x16c] sm:$0x1] }
  0x9e   : > { %11064 = vmatprep.mubr.f32.mxu0 %v13317_v17  ;;  %v616_v36 = vrot.slane %v16310_v63, 1  ;;  %v13704_v17 = vrot.slane %v13074_v7, 2  ;;  %v8395_v63 = vld [vmem:[%s15845_s1 + $0x370] sm:$0xff]  ;;  %v4144_v53 = vunpack.c.l.bf16 %v8278_v62  ;;  %v620_v1 = vsel %vm475_vm0, %v13696_v12, %v619_v5  ;;  %16318 = vst [vmem:[#allocation86_spill] sm:$0xff] %v13756_v16 }
  0x9f   : > { %v11782_v29 = vpack.c.bf16 %v8396_v60, %v8395_v63  ;;  %v13742_v60 = vrot.slane %v13126_v59, 2  ;;  %v626_v62 = vrot.slane %v13718_v39, 1 }
  0xa0   : > { %16312 = vst [vmem:[#allocation82_spill] sm:$0xff] %v13704_v17  ;;  %10419 = vmatmul.mubr.f32.gmra.mrb[56].mxu1 %v611_v52  ;;  %v618_v45 = vsel %vm475_vm0, %v616_v36, %v13696_v12  ;;  %v16313_v52 = vunpack.c.l.bf16 %v13677_v8  ;;  %v8279_v36 = vld [vmem:[%s12563_s24 + $0xb0] sm:$0xe]  ;;  %v4243_v63 = vsel %vm1655_vm1, %v13704_v17, %v13384_v19  ;;  %v8494_v19 = vld [vmem:[%s15845_s1 + $0x388] sm:$0xff] }
  0xa1   : > { %11065 = vmatmul.mubr.f32.gmra.mrb[20].mxu0 %v4234_v58  ;;  %10421 = vmatprep.mubr.f32.mxu1 %v613_v61  ;;  %v4241_v58 = vsel %vm1655_vm1, %v4239_v22, %v13704_v17  ;;  %v13737_v61 = vrot.slane %v13715_v51, 1  ;;  %v4246_v22 = vrot.slane %v4144_v53, 2  ;;  %16317 = vst [vmem:[#allocation85_spill] sm:$0xff] %v13742_v60  ;;  %v239_v53 = vld [vmem:[%s12563_s24 + $0x168] ss:$16 sps:$4 sm:$0xff]  }
  0xa2   : > { %11067 = vmatprep.mubr.f32.mxu0 %v4236_v18  ;;  %v621_v42 = vrot.slane %v16313_v52, 1  ;;  %11783 = vmatprep.subr.bf16.mxu0 %v11782_v29  ;;  %v15990_v18 = vunpack.c.l.bf16 %v13725_v13  ;;  %v13772_v52 = vunpack.c.l.bf16 %v239_v53  ;;  %v8280_v13 = vld [vmem:[%s12563_s24 + $0xc0] sm:$0xe]  ;;  %v14015_v17 = vld [vmem:[%s12563_s24 + $0x138] ss:$16 sps:$4 sm:$0xff]  }
  0xa3   : > { %16316 = vst [vmem:[#allocation84_spill] sm:$0xff] %v13737_v61  ;;  %11785 = vmatpush3.bf16.msra.mxu0 %v11782_v29  ;;  %v4248_v29 = vsel %vm1655_vm1, %v4246_v22, %v13742_v60  ;;  %v4146_v8 = vunpack.c.l.bf16 %v8280_v13 }
  0xa4   : > { %10422 = vmatmul.mubr.f32.gmra.mrb[58].mxu1 %v615_v20  ;;  %v622_v20 = vsel %vm475_vm0, %v619_v5, %v621_v42  ;;  %v625_v42 = vsel %vm475_vm0, %v623_v48, %v13737_v61  ;;  %v627_v5 = vsel %vm475_vm0, %v13737_v61, %v626_v62 }
  0xa5   : > { %11068 = vmatmul.mubr.f32.gmra.mrb[22].mxu0 %v13362_v0  ;;  %10424 = vmatprep.mubr.f32.mxu1 %v618_v45  ;;  %v13752_v0 = vunpack.c.h.bf16 %v13730_v50  ;;  %v4145_v45 = vunpack.c.l.bf16 %v8279_v36  ;;  %v628_v36 = vrot.slane %v15990_v18, 1  ;;  %v4250_v18 = vsel %vm1655_vm1, %v13742_v60, %v13442_v49 }
  0xa6   : > { %11070 = vmatprep.mubr.f32.mxu0 %v4241_v58  ;;  %v8493_v58 = vld [vmem:[%s15845_s1 + $0x380] sm:$0xff]  ;;  %v13804_v60 = vunpack.c.h.bf16 %v239_v53 }
  0xa7   : > { %v13778_v48 = vrot.slane %v13752_v0, 1  ;;  %v13784_v22 = vpack.c.bf16 %v8494_v19, %v8493_v58  ;;  %v4253_v61 = vrot.slane %v4145_v45, 2  ;;  %v633_v58 = vrot.slane %v13772_v52, 1 }
  0xa8   : > { %10425 = vmatmul.mubr.f32.gmra.mrb[60].mxu1 %v620_v1  ;;  %v16319_v1 = vunpack.c.l.bf16 %v13730_v50 }
  0xa9   : > { %11071 = vmatmul.mubr.f32.gmra.mrb[24].mxu0 %v4243_v63  ;;  %10427 = vmatprep.mubr.f32.mxu1 %v622_v20  ;;  %16320 = vst [vmem:[#allocation87_spill] sm:$0xff] %v13778_v48  ;;  %v15997_v63 = vunpack.c.l.bf16 %v13756_v16  ;;  %v13782_v20 = vld [vmem:[%s12563_s24 + $0x170] sm:$0xff]   ;;  %v634_v13 = vsel %vm475_vm0, %v13778_v48, %v633_v58  ;;  %v16336_v16 = vld [vmem:[#allocation7_spill] sm:$0xff] }
  0xaa   : > { %11073 = vmatprep.mubr.f32.mxu0 %v13418_v55  ;;  %v630_v12 = vrot.slane %v16319_v1, 1  ;;  %v13790_v55 = vrot.slane %v13177_v14, 2  ;;  %11787 = vmatprep.subr.bf16.mxu0 %v13784_v22  ;;  %v629_v1 = vsel %vm475_vm0, %v626_v62, %v628_v36  ;;  %v15998_v19 = vunpack.c.l.bf16 %v13782_v20 }
  0xab   : > { %v13798_v49 = vunpack.c.h.bf16 %v13782_v20 }
  0xac   : > { %16321 = vst [vmem:[#allocation88_spill] sm:$0xff] %v13790_v55  ;;  %10428 = vmatmul.mubr.f32.gmra.mrb[62].mxu1 %v625_v42  ;;  %v632_v45 = vsel %vm475_vm0, %v630_v12, %v13778_v48  ;;  %v635_v42 = vrot.slane %v15997_v63, 1  ;;  %v4255_v62 = vsel %vm1655_vm1, %v4253_v61, %v13790_v55  ;;  %v637_v12 = vrot.slane %v15998_v19, 1  ;;  %v13830_v63 = vld [vmem:[%s12563_s24 + $0xd8] ss:$16 sps:$4 sm:$0xff]  }
  0xad   : > { %11074 = vmatmul.mubr.f32.gmra.mrb[26].mxu0 %v4248_v29  ;;  %10430 = vmatprep.mubr.f32.mxu1 %v627_v5  ;;  %v13807_v29 = vld [vmem:[%s12563_s24 + $0x17c] sm:$0x1]  ;;  %v8281_v5 = vld [vmem:[%s12563_s24 + $0xd0] sm:$0xe]  ;;  %v13821_v53 = vrot.slane %v13798_v49, 1  ;;  %16325 = vst [vmem:[#allocation92_spill] sm:$0xff] %v13830_v63  ;;  %v16007_v48 = vunpack.c.h.bf16 %v13830_v63 }
  0xae   : > { %11076 = vmatprep.mubr.f32.mxu0 %v4250_v18  ;;  %16322 = vst [vmem:[#allocation89_spill] sm:$0xff] %v13807_v29  ;;  %v4257_v18 = vsel %vm1655_vm1, %v13790_v55, %v13485_v31  ;;  %v15999_v61 = vunpack.c.l.bf16 %v13807_v29  ;;  %v636_v36 = vsel %vm475_vm0, %v633_v58, %v635_v42  ;;  %v4260_v31 = vrot.slane %v4146_v8, 2  ;;  %v13833_v19 = vld [vmem:[%s12563_s24 + $0xdc] sm:$0x1]  ;;  %v13862_v29 = vld [vmem:[%s12563_s24 + $0xec] sm:$0x1] }
  0xaf   : > { %16323 = vst [vmem:[#allocation90_spill] sm:$0xff] %v13821_v53  ;;  %16326 = vst [vmem:[#allocation93_spill] sm:$0xff] %v13833_v19  ;;  %v13993_v55 = vld [vmem:[%s12563_s24 + $0x12c] sm:$0x1] }
  0xb0   : > { %10431 = vmatmul.mubr.f32.gmra.mrb[64].mxu1 %v629_v1  ;;  %v13826_v1 = vrot.slane %v13221_v21, 2  ;;  %v642_v8 = vrot.slane %v15999_v61, 1  ;;  %16328 = vst [vmem:[#allocation95_spill] sm:$0xff] %v13862_v29 }
  0xb1   : > { %11077 = vmatmul.mubr.f32.gmra.mrb[28].mxu0 %v13468_v3  ;;  %10433 = vmatprep.mubr.f32.mxu1 %v632_v45  ;;  %v640_v3 = vrot.slane %v13804_v60, 1  ;;  %v4147_v45 = vunpack.c.l.bf16 %v8281_v5  ;;  %v16006_v5 = vunpack.c.l.bf16 %v13830_v63  ;;  %v8284_v63 = vld [vmem:[%s12563_s24 + $0x100] sm:$0xe] }
  0xb2   : > { %11079 = vmatprep.mubr.f32.mxu0 %v4255_v62  ;;  %16324 = vst [vmem:[#allocation91_spill] sm:$0xff] %v13826_v1  ;;  %v639_v62 = vsel %vm475_vm0, %v637_v12, %v13821_v53  ;;  %v4262_v58 = vsel %vm1655_vm1, %v4260_v31, %v13826_v1  ;;  %v13849_v12 = vrot.slane %v13310_v24, 2 }
  0xb3   : > { %v641_v42 = vsel %vm475_vm0, %v13821_v53, %v640_v3  ;;  %v643_v31 = vsel %vm475_vm0, %v640_v3, %v642_v8  ;;  %v4270_v61 = vrot.slane %v16006_v5, 2  ;;  %v8055_v3 = vld [vmem:[%s15845_s1 + $0x110] sm:$0xff]  ;;  %v8056_v8 = vld [vmem:[%s15845_s1 + $0x118] sm:$0xff] }
  0xb4   : > { %10434 = vmatmul.mubr.f32.gmra.mrb[66].mxu1 %v634_v13  ;;  %v4267_v13 = vrot.slane %v4147_v45, 2  ;;  %16327 = vst [vmem:[#allocation94_spill] sm:$0xff] %v13849_v12 }
  0xb5   : > { %11080 = vmatmul.mubr.f32.gmra.mrb[30].mxu0 %v4257_v18  ;;  %10436 = vmatprep.mubr.f32.mxu1 %v636_v36  ;;  %v4264_v18 = vsel %vm1655_vm1, %v13826_v1, %v13519_v43  ;;  %v8282_v36 = vld [vmem:[%s12563_s24 + $0xe0] sm:$0xe]  ;;  %v13950_v1 = vld [vmem:[%s12563_s24 + $0x118] ss:$16 sps:$4 sm:$0xff]  }
  0xb6   : > { %11082 = vmatprep.mubr.f32.mxu0 %v13498_v28  ;;  %v16005_v28 = vunpack.c.l.bf16 %v13833_v19  ;;  %v4148_v53 = vunpack.c.l.bf16 %v8282_v36  ;;  %v4269_v43 = vsel %vm1655_vm1, %v4267_v13, %v13849_v12  ;;  %v13877_v13 = vrot.slane %v13370_v40, 2 }
  0xb7   : > { %v16012_v36 = vunpack.c.l.bf16 %v13862_v29 }
  0xb8   : > { %10437 = vmatmul.mubr.f32.gmra.mrb[68].mxu1 %v639_v62  ;;  %v4272_v45 = vrot.slane %v16005_v28, 2  ;;  %v8283_v62 = vld [vmem:[%s12563_s24 + $0xf0] sm:$0xe]  ;;  %16330 = vst [vmem:[#allocation96_spill] sm:$0xff] %v13877_v13  ;;  %v4277_v28 = vrot.slane %v16007_v48, 2  ;;  %v8060_v48 = vld [vmem:[%s15845_s1 + $0x138] sm:$0xff] }
  0xb9   : > { %11083 = vmatmul.mubr.f32.gmra.mrb[32].mxu0 %v4262_v58  ;;  %10439 = vmatprep.mubr.f32.mxu1 %v641_v42  ;;  %v16329_v58 = vunpack.c.l.bf16 %v12576_v26  ;;  %v4271_v42 = vsel %vm1655_vm1, %v13849_v12, %v4270_v61  ;;  %v4149_v5 = vunpack.c.l.bf16 %v8283_v62  ;;  %v11630_v26 = vpack.c.bf16 %v8056_v8, %v8055_v3  ;;  %v13928_v12 = vld [vmem:[%s12563_s24 + $0x10c] sm:$0x1] }
  0xba   : > { %11085 = vmatprep.mubr.f32.mxu0 %v4264_v18  ;;  %v4274_v18 = vrot.slane %v4148_v53, 2  ;;  %v8057_v53 = vld [vmem:[%s15845_s1 + $0x120] sm:$0xff]  ;;  %v4279_v3 = vrot.slane %v16012_v36, 2  ;;  %v13903_v8 = vrot.slane %v13435_v41, 2  ;;  %v4278_v19 = vsel %vm1655_vm1, %v13877_v13, %v4277_v28  ;;  %v8059_v36 = vld [vmem:[%s15845_s1 + $0x130] sm:$0xff]  ;;  %16339 = vst [vmem:[#allocation7_spill] sm:$0xff] %v13928_v12 }
  0xbc   : > { %10440 = vmatmul.mubr.f32.gmra.mrb[70].mxu1 %v643_v31  ;;  %v4273_v31 = vsel %vm1655_vm1, %v4270_v61, %v4272_v45  ;;  %v8058_v61 = vld [vmem:[%s15845_s1 + $0x128] sm:$0xff]  ;;  %v16334_v45 = vld [vmem:[#allocation12_spill] sm:$0xff]  ;;  %v4276_v62 = vsel %vm1655_vm1, %v4274_v18, %v13877_v13  ;;  %v16337_v18 = vunpack.c.l.bf16 %v16336_v16  ;;  %v4150_v16 = vunpack.c.l.bf16 %v8284_v63  ;;  %v8061_v63 = vld [vmem:[%s15845_s1 + $0x140] sm:$0xff] }
  0xbd   : > { %11086 = vmatmul.mubr.f32.gmra.mrb[34].mxu0 %v13549_v56  ;;  %10474 = vmatprep.mubr.f32.mxu1 %v16329_v58  ;;  %v13884_v56 = vld [vmem:[%s12563_s24 + $0xf8] ss:$16 sps:$4 sm:$0xff]   ;;  %v16332_v58 = vld [vmem:[#allocation6_spill] sm:$0xff]  ;;  %16335 = vst [vmem:[#allocation12_spill] sm:$0xff] %v13903_v8 }
  0xbe   : > { %11088 = vmatprep.mubr.f32.mxu0 %v4269_v43  ;;  %16331 = vst [vmem:[#allocation97_spill] sm:$0xff] %v13884_v56  ;;  %v13888_v43 = vld [vmem:[%s12563_s24 + $0xfc] sm:$0x1]  ;;  %v16022_v13 = vunpack.c.h.bf16 %v13884_v56 }
  0xbf   : > { %16333 = vst [vmem:[#allocation6_spill] sm:$0xff] %v13888_v43 }
  0xc0   : > { %10475 = vmatmul.mubr.f32.vlgmr.msra.gmra.mrb[0].mxu1 %v16332_v58 }
  0xc1   : > { %11089 = vmatmul.mubr.f32.gmra.mrb[36].mxu0 %v4271_v42  ;;  %11629 = vmatpush3.bf16.msra.mxu1 %v13551_v27  ;;  %v4281_v42 = vrot.slane %v4149_v5, 2  ;;  %v16018_v27 = vunpack.c.l.bf16 %v13888_v43  ;;  %v4280_v5 = vsel %vm1655_vm1, %v4277_v28, %v4279_v3  ;;  %v8285_v28 = vld [vmem:[%s12563_s24 + $0x110] sm:$0xe]  ;;  %v4291_v43 = vrot.slane %v16022_v13, 2 }
  0xc2   : > { %10477 = vmatprep.mubr.f32.mxu1 %v16334_v45  ;;  %11091 = vmatprep.mubr.f32.mxu0 %v4273_v31  ;;  %v11634_v31 = vpack.c.bf16 %v8058_v61, %v8057_v53  ;;  %v16338_v53 = vunpack.c.l.bf16 %v13884_v56  ;;  %v8286_v56 = vld [vmem:[%s12563_s24 + $0x120] sm:$0xe] }
  0xc3   : > { %11631 = vmatprep.subr.bf16.mxu1 %v11630_v26  ;;  %v4286_v29 = vrot.slane %v16018_v27, 2 }
  0xc4   : > { %10478 = vmatmul.mubr.f32.gmra.mrb[2].mxu1 %v16337_v18  ;;  %v4284_v61 = vrot.slane %v16338_v53, 2  ;;  %v4283_v18 = vsel %vm1655_vm1, %v4281_v42, %v13903_v8  ;;  %v13943_v42 = vrot.slane %v13481_v46, 2  ;;  %v16027_v53 = vunpack.c.l.bf16 %v13928_v12 }
  0xc5   : > { %11092 = vmatmul.mubr.f32.gmra.mrb[38].mxu0 %v4276_v62  ;;  %10480 = vmatprep.mubr.f32.mxu1 %v12593_v33  ;;  %v11638_v33 = vpack.c.bf16 %v8060_v48, %v8059_v36  ;;  %v16341_v62 = vld [vmem:[#allocation13_spill] sm:$0xff]  ;;  %v4288_v36 = vrot.slane %v4150_v16, 2 }
  0xc6   : > { %11094 = vmatprep.mubr.f32.mxu0 %v4278_v19  ;;  %11633 = vmatpush3.bf16.msra.mxu1 %v11630_v26  ;;  %v16340_v19 = vld [vmem:[#allocation17_spill] sm:$0xff]  ;;  %v8062_v26 = vld [vmem:[%s15845_s1 + $0x148] sm:$0xff]  ;;  %v16342_v3 = vunpack.c.l.bf16 %v16341_v62  ;;  %v4285_v48 = vsel %vm1655_vm1, %v13903_v8, %v4284_v61  ;;  %v4287_v27 = vsel %vm1655_vm1, %v4284_v61, %v4286_v29  ;;  %16344 = vst [vmem:[#allocation13_spill] sm:$0xff] %v13950_v1 }
  0xc7   : > { %11635 = vmatprep.subr.bf16.mxu1 %v11634_v31  ;;  %16343 = vst [vmem:[#allocation17_spill] sm:$0xff] %v13943_v42  ;;  %v16345_v62 = vld [vmem:[#allocation15_spill] sm:$0xff]  ;;  %v13954_v16 = vld [vmem:[%s12563_s24 + $0x11c] sm:$0x1]  ;;  %v4290_v61 = vsel %vm1655_vm1, %v4288_v36, %v13943_v42  ;;  %v16348_v36 = vld [vmem:[#allocation18_spill] sm:$0xff] }
  0xc8   : > { %10481 = vmatmul.mubr.f32.gmra.mrb[4].mxu1 %v16340_v19  ;;  %16346 = vst [vmem:[#allocation15_spill] sm:$0xff] %v13954_v16  ;;  %v8064_v29 = vld [vmem:[%s15845_s1 + $0x158] sm:$0xff]  ;;  %v16349_v8 = vunpack.c.l.bf16 %v16348_v36  ;;  %v16351_v36 = vunpack.c.l.bf16 %v13954_v16  ;;  %16356 = vst [vmem:[#allocation18_spill] sm:$0xff] %v14015_v17 }
  0xc9   : > { %11095 = vmatmul.mubr.f32.gmra.mrb[40].mxu0 %v4280_v5  ;;  %10483 = vmatprep.mubr.f32.mxu1 %v16342_v3  ;;  %v4151_v5 = vunpack.c.l.bf16 %v8285_v28  ;;  %v8063_v3 = vld [vmem:[%s15845_s1 + $0x150] sm:$0xff]  ;;  %v4293_v28 = vrot.slane %v16027_v53, 2  ;;  %v8065_v53 = vld [vmem:[%s15845_s1 + $0x160] sm:$0xff] }
  0xca   : > { %11097 = vmatprep.mubr.f32.mxu0 %v4283_v18  ;;  %11637 = vmatpush3.bf16.msra.mxu1 %v11634_v31  ;;  %v11642_v18 = vpack.c.bf16 %v8062_v26, %v8061_v63  ;;  %v16347_v31 = vld [vmem:[#allocation21_spill] sm:$0xff]  ;;  %v13968_v63 = vrot.slane %v13545_v57, 2  ;;  %v16033_v26 = vunpack.c.l.bf16 %v13950_v1  ;;  %v4300_v12 = vrot.slane %v16351_v36, 2 }
  0xcb   : > { %11639 = vmatprep.subr.bf16.mxu1 %v11638_v33  ;;  %v4295_v13 = vrot.slane %v4151_v5, 2  ;;  %v16350_v5 = vld [vmem:[#allocation19_spill] sm:$0xff]  ;;  %16352 = vst [vmem:[#allocation21_spill] sm:$0xff] %v13993_v55  ;;  %v16038_v36 = vunpack.c.l.bf16 %v13993_v55 }
  0xcc   : > { %10484 = vmatmul.mubr.f32.gmra.mrb[6].mxu1 %v16345_v62  ;;  %v4292_v62 = vsel %vm1655_vm1, %v13943_v42, %v4291_v43  ;;  %v16037_v42 = vunpack.c.h.bf16 %v13950_v1 }
  0xcd   : > { %11098 = vmatmul.mubr.f32.gmra.mrb[42].mxu0 %v4285_v48  ;;  %10486 = vmatprep.mubr.f32.mxu1 %v16347_v31  ;;  %v4294_v48 = vsel %vm1655_vm1, %v4291_v43, %v4293_v28  ;;  %v8287_v43 = vld [vmem:[%s12563_s24 + $0x130] sm:$0xe] }
  0xce   : > { %11100 = vmatprep.mubr.f32.mxu0 %v4287_v27  ;;  %11641 = vmatpush3.bf16.msra.mxu1 %v11638_v33  ;;  %v11646_v27 = vpack.c.bf16 %v8064_v29, %v8063_v3  ;;  %v8066_v33 = vld [vmem:[%s15845_s1 + $0x168] sm:$0xff]  ;;  %v4298_v3 = vrot.slane %v16033_v26, 2  ;;  %v4152_v29 = vunpack.c.l.bf16 %v8286_v56  ;;  %v8067_v56 = vld [vmem:[%s15845_s1 + $0x170] sm:$0xff]  ;;  %v4305_v16 = vrot.slane %v16037_v42, 2  ;;  %v16360_v42 = vld [vmem:[#allocation25_spill] sm:$0xff] }
  0xcf   : > { %11643 = vmatprep.subr.bf16.mxu1 %v11642_v18 }
  0xd0   : > { %10487 = vmatmul.mubr.f32.gmra.mrb[8].mxu1 %v16349_v8  ;;  %v4297_v8 = vsel %vm1655_vm1, %v4295_v13, %v13968_v63  ;;  %v8068_v13 = vld [vmem:[%s15845_s1 + $0x178] sm:$0xff]  ;;  %v4301_v26 = vsel %vm1655_vm1, %v4298_v3, %v4300_v12  ;;  %v8142_v12 = vld [vmem:[%s15845_s1 + $0x188] sm:$0xff] }
  0xd1   : > { %11101 = vmatmul.mubr.f32.gmra.mrb[44].mxu0 %v4290_v61  ;;  %10489 = vmatprep.mubr.f32.mxu1 %v16350_v5  ;;  %v11650_v61 = vpack.c.bf16 %v8066_v33, %v8065_v53  ;;  %v4299_v53 = vsel %vm1655_vm1, %v13968_v63, %v4298_v3  ;;  %v4302_v33 = vrot.slane %v4152_v29, 2  ;;  %v14008_v5 = vrot.slane %v13589_v15, 2  ;;  %v14019_v29 = vld [vmem:[%s12563_s24 + $0x13c] sm:$0x1] }
  0xd2   : > { %11103 = vmatprep.mubr.f32.mxu0 %v4292_v62  ;;  %11645 = vmatpush3.bf16.msra.mxu1 %v11642_v18  ;;  %v16353_v62 = vld [vmem:[#allocation24_spill] sm:$0xff]  ;;  %v16354_v18 = vld [vmem:[#allocation22_spill] sm:$0xff]  ;;  %16357 = vst [vmem:[#allocation19_spill] sm:$0xff] %v14019_v29 }
  0xd3   : > { %11647 = vmatprep.subr.bf16.mxu1 %v11646_v27  ;;  %v16355_v28 = vunpack.c.l.bf16 %v16354_v18  ;;  %v8141_v18 = vld [vmem:[%s15845_s1 + $0x180] sm:$0xff]  ;;  %v4304_v3 = vsel %vm1655_vm1, %v4302_v33, %v14008_v5 }
  0xd4   : > { %10490 = vmatmul.mubr.f32.gmra.mrb[10].mxu1 %v16353_v62  ;;  %v14040_v33 = vpack.c.bf16 %v8142_v12, %v8141_v18  ;;  %v16362_v18 = vunpack.c.l.bf16 %v14019_v29  ;;  %v14071_v29 = vld [vmem:[%s12563_s24 + $0x158] ss:$16 sps:$4 sm:$0xff]  }
  0xd5   : > { %11104 = vmatmul.mubr.f32.gmra.mrb[46].mxu0 %v4294_v48  ;;  %10492 = vmatprep.mubr.f32.mxu1 %v16355_v28  ;;  %v4153_v48 = vunpack.c.l.bf16 %v8287_v43  ;;  %v14033_v43 = vrot.slane %v13630_v6, 2  ;;  %16368 = vst [vmem:[#allocation25_spill] sm:$0xff] %v14071_v29 }
  0xd6   : > { %11106 = vmatprep.mubr.f32.mxu0 %v4297_v8  ;;  %11649 = vmatpush3.bf16.msra.mxu1 %v11646_v27  ;;  %v11654_v8 = vpack.c.bf16 %v8068_v13, %v8067_v56  ;;  %v16358_v27 = vld [vmem:[#allocation27_spill] sm:$0xff]  ;;  %v16040_v56 = vunpack.c.l.bf16 %v14015_v17  ;;  %v4306_v13 = vsel %vm1655_vm1, %v14008_v5, %v4305_v16  ;;  %v4314_v12 = vrot.slane %v16362_v18, 2 }
  0xd7   : > { %11651 = vmatprep.subr.bf16.mxu1 %v11650_v61  ;;  %16359 = vst [vmem:[#allocation24_spill] sm:$0xff] %v14033_v43  ;;  %v4309_v28 = vrot.slane %v4153_v48, 2 }
  0xd8   : > { %10493 = vmatmul.mubr.f32.gmra.mrb[12].mxu1 %v12817_v44  ;;  %v4307_v44 = vrot.slane %v16038_v36, 2  ;;  %v16361_v36 = vunpack.c.l.bf16 %v16360_v42  ;;  %v4312_v48 = vrot.slane %v16040_v56, 2  ;;  %v16042_v42 = vunpack.c.h.bf16 %v14015_v17 }
  0xd9   : > { %11107 = vmatmul.mubr.f32.gmra.mrb[48].mxu0 %v4299_v53  ;;  %10495 = vmatprep.mubr.f32.mxu1 %v16358_v27  ;;  %v4311_v53 = vsel %vm1655_vm1, %v4309_v28, %v14033_v43  ;;  %v14064_v28 = vrot.slane %v13674_v30, 2 }
  0xda   : > { %11109 = vmatprep.mubr.f32.mxu0 %v4301_v26  ;;  %11653 = vmatpush3.bf16.msra.mxu1 %v11650_v61  ;;  %v8288_v26 = vld [vmem:[%s12563_s24 + $0x140] sm:$0xe]  ;;  %v4308_v61 = vsel %vm1655_vm1, %v4305_v16, %v4307_v44  ;;  %v8289_v16 = vld [vmem:[%s12563_s24 + $0x150] sm:$0xe]  ;;  %v4313_v44 = vsel %vm1655_vm1, %v14033_v43, %v4312_v48  ;;  %v4315_v18 = vsel %vm1655_vm1, %v4312_v48, %v4314_v12  ;;  %v4319_v56 = vrot.slane %v16042_v42, 2  ;;  %v16372_v42 = vld [vmem:[#allocation31_spill] sm:$0xff] }
  0xdb   : > { %11655 = vmatprep.subr.bf16.mxu1 %v11654_v8  ;;  %v4154_v55 = vunpack.c.l.bf16 %v8288_v26  ;;  %16367 = vst [vmem:[#allocation27_spill] sm:$0xff] %v14064_v28  ;;  %v16050_v12 = vunpack.c.l.bf16 %v14071_v29  ;;  %v16373_v17 = vunpack.c.l.bf16 %v16372_v42  ;;  %v16052_v42 = vunpack.c.h.bf16 %v14071_v29  ;;  %v14137_v29 = vld [vmem:[%s12563_s24 + $0x180] sm:$0xff]   ;;  %v9432_v43 = vld [vmem:[%s12563_s24 + $0x70] sm:$0xff]  }
  0xdc   : > { %10496 = vmatmul.mubr.f32.gmra.mrb[14].mxu1 %v16361_v36  ;;  %v14054_v36 = vld [vmem:[%s12563_s24 + $0x14c] sm:$0x1] }
  0xdd   : > { %11110 = vmatmul.mubr.f32.gmra.mrb[50].mxu0 %v4304_v3  ;;  %10498 = vmatprep.mubr.f32.mxu1 %v12866_v10  ;;  %16363 = vst [vmem:[#allocation22_spill] sm:$0xff] %v14054_v36  ;;  %v16364_v10 = vld [vmem:[#allocation29_spill] sm:$0xff]  ;;  %v16365_v3 = vld [vmem:[#allocation28_spill] sm:$0xff]  ;;  %v16045_v26 = vunpack.c.l.bf16 %v14054_v36 }
  0xde   : > { %11112 = vmatprep.mubr.f32.mxu0 %v4306_v13  ;;  %11657 = vmatpush3.bf16.msra.mxu1 %v11654_v8  ;;  %v16366_v8 = vunpack.c.l.bf16 %v16365_v3  ;;  %v4316_v13 = vrot.slane %v4154_v55, 2  ;;  %v16370_v55 = vld [vmem:[#allocation33_spill] sm:$0xff] }
  0xdf   : > { %11659 = vmatprep.subr.bf16.mxu1 %v14040_v33  ;;  %v4321_v48 = vrot.slane %v16045_v26, 2  ;;  %v4326_v26 = vrot.slane %v16050_v12, 2 }
  0xe0   : > { %10499 = vmatmul.mubr.f32.gmra.mrb[16].mxu1 %v16364_v10  ;;  %v4318_v3 = vsel %vm1655_vm1, %v4316_v13, %v14064_v28 }
  0xe1   : > { %11113 = vmatmul.mubr.f32.gmra.mrb[52].mxu0 %v4308_v61  ;;  %10501 = vmatprep.mubr.f32.mxu1 %v16366_v8  ;;  %v4155_v61 = vunpack.c.l.bf16 %v8289_v16  ;;  %v4320_v16 = vsel %vm1655_vm1, %v14064_v28, %v4319_v56  ;;  %v4322_v13 = vsel %vm1655_vm1, %v4319_v56, %v4321_v48  ;;  %v16376_v56 = vld [vmem:[#allocation34_spill] sm:$0xff] }
  0xe2   : > { %11115 = vmatprep.mubr.f32.mxu0 %v4311_v53  ;;  %v14075_v53 = vld [vmem:[%s12563_s24 + $0x15c] sm:$0x1]  ;;  %v16377_v48 = vunpack.c.l.bf16 %v16376_v56  ;;  %v14118_v56 = vld [vmem:[%s12563_s24 + $0x178] ss:$16 sps:$4 sm:$0xff]  }
  0xe3   : > { %16369 = vst [vmem:[#allocation29_spill] sm:$0xff] %v14075_v53  ;;  %v4323_v8 = vrot.slane %v4155_v61, 2 }
  0xe4   : > { %10502 = vmatmul.mubr.f32.gmra.mrb[18].mxu1 %v12928_v54  ;;  %v14086_v54 = vrot.slane %v13715_v51, 2 }
  0xe5   : > { %11116 = vmatmul.mubr.f32.gmra.mrb[54].mxu0 %v4313_v44  ;;  %10504 = vmatprep.mubr.f32.mxu1 %v16370_v55  ;;  %v16049_v44 = vunpack.c.l.bf16 %v14075_v53  ;;  %v4333_v53 = vrot.slane %v16052_v42, 2 }
  0xe6   : > { %11118 = vmatprep.mubr.f32.mxu0 %v4315_v18  ;;  %16371 = vst [vmem:[#allocation28_spill] sm:$0xff] %v14086_v54  ;;  %v8290_v18 = vld [vmem:[%s12563_s24 + $0x160] sm:$0xe]  ;;  %v4325_v36 = vsel %vm1655_vm1, %v4323_v8, %v14086_v54 }
  0xe7   : > { %v4156_v61 = vunpack.c.l.bf16 %v8290_v18  ;;  %v4328_v1 = vrot.slane %v16049_v44, 2  ;;  %v14111_v18 = vrot.slane %v13752_v0, 2 }
  0xe8   : > { %10505 = vmatmul.mubr.f32.gmra.mrb[20].mxu1 %v16373_v17  ;;  %v14102_v17 = vld [vmem:[%s12563_s24 + $0x16c] sm:$0x1] }
  0xe9   : > { %11119 = vmatmul.mubr.f32.gmra.mrb[56].mxu0 %v4318_v3  ;;  %10507 = vmatprep.mubr.f32.mxu1 %v12972_v23  ;;  %16374 = vst [vmem:[#allocation33_spill] sm:$0xff] %v14102_v17  ;;  %v16375_v23 = vld [vmem:[#allocation36_spill] sm:$0xff]  ;;  %v4330_v8 = vrot.slane %v4156_v61, 2  ;;  %16378 = vst [vmem:[#allocation31_spill] sm:$0xff] %v14111_v18  ;;  %v16057_v44 = vunpack.c.l.bf16 %v14102_v17  ;;  %v4329_v12 = vsel %vm1655_vm1, %v4326_v26, %v4328_v1  ;;  %v16381_v61 = vld [vmem:[#allocation39_spill] sm:$0xff]  ;;  %v14147_v17 = vunpack.c.h.bf16 %v14137_v29 }
  0xea   : > { %11121 = vmatprep.mubr.f32.mxu0 %v4320_v16  ;;  %v8291_v3 = vld [vmem:[%s12563_s24 + $0x170] sm:$0xe]  ;;  %v4327_v16 = vsel %vm1655_vm1, %v14086_v54, %v4326_v26  ;;  %16379 = vst [vmem:[#allocation36_spill] sm:$0xff] %v14118_v56  ;;  %v16063_v26 = vunpack.c.l.bf16 %v14118_v56  ;;  %v16383_v54 = vld [vmem:[#allocation37_spill] sm:$0xff] }
  0xeb   : > { %v4335_v1 = vrot.slane %v16057_v44, 2  ;;  %16385 = vst [vmem:[#allocation37_spill] sm:$0xff] %v14147_v17 }
  0xec   : > { %10508 = vmatmul.mubr.f32.gmra.mrb[22].mxu1 %v16375_v23 }
  0xed   : > { %11122 = vmatmul.mubr.f32.gmra.mrb[58].mxu0 %v4322_v13  ;;  %10510 = vmatprep.mubr.f32.mxu1 %v16377_v48  ;;  %v4157_v13 = vunpack.c.l.bf16 %v8291_v3  ;;  %v4332_v48 = vsel %vm1655_vm1, %v4330_v8, %v14111_v18  ;;  %v4334_v3 = vsel %vm1655_vm1, %v14111_v18, %v4333_v53  ;;  %v16384_v8 = vunpack.c.l.bf16 %v16383_v54 }
  0xee   : > { %11124 = vmatprep.mubr.f32.mxu0 %v4325_v36  ;;  %v14122_v36 = vld [vmem:[%s12563_s24 + $0x17c] sm:$0x1]  ;;  %v4336_v44 = vsel %vm1655_vm1, %v4333_v53, %v4335_v1  ;;  %v16389_v53 = vld [vmem:[#allocation40_spill] sm:$0xff] }
  0xef   : > { %16380 = vst [vmem:[#allocation34_spill] sm:$0xff] %v14122_v36  ;;  %v4337_v42 = vrot.slane %v4157_v13, 2  ;;  %v4340_v13 = vrot.slane %v16063_v26, 2  ;;  %v16386_v28 = vunpack.c.l.bf16 %v14122_v36  ;;  %v16390_v1 = vunpack.c.l.bf16 %v16389_v53 }
  0xf0   : > { %10511 = vmatmul.mubr.f32.gmra.mrb[24].mxu1 %v13011_v35  ;;  %v14133_v35 = vrot.slane %v13798_v49, 2 }
  0xf1   : > { %11125 = vmatmul.mubr.f32.gmra.mrb[60].mxu0 %v4327_v16  ;;  %10513 = vmatprep.mubr.f32.mxu1 %v16381_v61  ;;  %v4342_v54 = vrot.slane %v16386_v28, 2 }
  0xf2   : > { %11127 = vmatprep.mubr.f32.mxu0 %v4329_v12  ;;  %16382 = vst [vmem:[#allocation39_spill] sm:$0xff] %v14133_v35  ;;  %v8292_v12 = vld [vmem:[%s12563_s24 + $0x180] sm:$0xe]  ;;  %v4339_v16 = vsel %vm1655_vm1, %v4337_v42, %v14133_v35  ;;  %v4345_v42 = vrot.slane %v14147_v17, 2 }
  0xf3   : > { %v4158_v18 = vunpack.c.l.bf16 %v8292_v12  ;;  %v4343_v26 = vsel %vm1655_vm1, %v4340_v13, %v4342_v54 }
  0xf4   : > { %10514 = vmatmul.mubr.f32.gmra.mrb[26].mxu1 %v16384_v8  ;;  %v14155_v8 = vld [vmem:[%s12563_s24 + $0x18c] sm:$0x1] }
  0xf5   : > { %11128 = vmatmul.mubr.f32.gmra.mrb[62].mxu0 %v4332_v48  ;;  %10516 = vmatprep.mubr.f32.mxu1 %v13074_v7  ;;  %v16066_v48 = vunpack.c.h.bf16 %v14118_v56  ;;  %16387 = vst [vmem:[#allocation98_spill] sm:$0xff] %v14155_v8  ;;  %v16388_v7 = vld [vmem:[#allocation42_spill] sm:$0xff]  ;;  %v4344_v12 = vrot.slane %v4158_v18, 2  ;;  %v16065_v28 = vunpack.c.l.bf16 %v14155_v8  ;;  %v8499_v8 = vld [vmem:[%s15845_s1 + $0x3b0] sm:$0xff] }
  0xf6   : > { %11130 = vmatprep.mubr.f32.mxu0 %v4334_v3  ;;  %v4341_v3 = vsel %vm1655_vm1, %v14133_v35, %v4340_v13  ;;  %v16392_v13 = vld [vmem:[#allocation43_spill] sm:$0xff]  ;;  %v8501_v56 = vld [vmem:[%s15845_s1 + $0x3c0] sm:$0xff] }
  0xf7   : > { %v4347_v36 = vrot.slane %v16066_v48, 2  ;;  %v4349_v18 = vrot.slane %v16065_v28, 2  ;;  %v16393_v54 = vunpack.c.l.bf16 %v16392_v13  ;;  %v8496_v13 = vld [vmem:[%s15845_s1 + $0x398] sm:$0xff]  ;;  %v16398_v48 = vld [vmem:[#allocation51_spill] sm:$0xff] }
  0xf8   : > { %10517 = vmatmul.mubr.f32.gmra.mrb[28].mxu1 %v16388_v7  ;;  %v8500_v28 = vld [vmem:[%s15845_s1 + $0x3b8] sm:$0xff] }
  0xf9   : > { %11131 = vmatmul.mubr.f32.gmra.mrb[64].mxu0 %v4336_v44  ;;  %10519 = vmatprep.mubr.f32.mxu1 %v16390_v1  ;;  %v16391_v44 = vld [vmem:[#allocation45_spill] sm:$0xff]  ;;  %v4348_v53 = vsel %vm1655_vm1, %v4345_v42, %v4347_v36  ;;  %v14174_v1 = vld [vmem:[%s12563_s24 + $0x20] sm:$0xff]  }
  0xfa   : > { %11133 = vmatprep.mubr.f32.mxu0 %v4339_v16  ;;  %v4346_v16 = vsel %vm1655_vm1, %v4344_v12, %v4345_v42  ;;  %v16394_v12 = vld [vmem:[#allocation47_spill] sm:$0xff]  ;;  %v8495_v42 = vld [vmem:[%s15845_s1 + $0x390] sm:$0xff] }
  0xfc   : > { %10520 = vmatmul.mubr.f32.gmra.mrb[30].mxu1 %v13126_v59  ;;  %v4350_v59 = vsel %vm1655_vm1, %v4347_v36, %v4349_v18  ;;  %v14197_v18 = vld [vmem:[%s12563_s24 + $0x30] sm:$0xff]  }
  0xfd   : > { %11134 = vmatmul.mubr.f32.gmra.mrb[66].mxu0 %v4341_v3  ;;  %10522 = vmatprep.mubr.f32.mxu1 %v16391_v44  ;;  %v8311_v3 = vld [vmem:[%s12563_s24 + $0x28] ss:$16 sps:$4 sm:$0xff]  }
  0xfe   : > { %11136 = vmatprep.mubr.f32.mxu0 %v4343_v26  ;;  %v16067_v26 = vunpack.c.l.bf16 %v14174_v1  ;;  %v5012_v36 = vunpack.c.l.bf16 %v8311_v3 }
 0x100   : > { %10523 = vmatmul.mubr.f32.gmra.mrb[32].mxu1 %v16393_v54 }
 0x101   : > { %11137 = vmatmul.mubr.f32.gmra.mrb[68].mxu0 %v4346_v16  ;;  %10525 = vmatprep.mubr.f32.mxu1 %v13177_v14  ;;  %v16395_v16 = vld [vmem:[#allocation46_spill] sm:$0xff]  ;;  %v14192_v14 = vunpack.c.h.bf16 %v14174_v1 }
 0x102   : > { %11139 = vmatprep.mubr.f32.mxu0 %v4348_v53  ;;  %v16396_v54 = vunpack.c.l.bf16 %v16395_v16  ;;  %v11790_v53 = vpack.c.bf16 %v8496_v13, %v8495_v42  ;;  %v8498_v16 = vld [vmem:[%s15845_s1 + $0x3a8] sm:$0xff]  ;;  %v14214_v42 = vld [vmem:[%s12563_s24 + $0x40] sm:$0xff]  }
 0x104   : > { %10526 = vmatmul.mubr.f32.gmra.mrb[34].mxu1 %v16394_v12 }
 0x105   : > { %11140 = vmatmul.mubr.f32.gmra.mrb[70].mxu0 %v4350_v59  ;;  %10528 = vmatprep.mubr.f32.mxu1 %v16396_v54  ;;  %v8497_v59 = vld [vmem:[%s15845_s1 + $0x3a0] sm:$0xff] }
 0x106   : > { %11174 = vmatprep.mubr.f32.mxu0 %v16067_v26  ;;  %v16397_v54 = vld [vmem:[#allocation50_spill] sm:$0xff]  ;;  %v11794_v13 = vpack.c.bf16 %v8498_v16, %v8497_v59  ;;  %v16399_v26 = vunpack.c.l.bf16 %v16398_v48  ;;  %v11798_v59 = vpack.c.bf16 %v8500_v28, %v8499_v8  ;;  %v16401_v16 = vld [vmem:[#allocation53_spill] sm:$0xff]  ;;  %v14240_v48 = vunpack.c.h.bf16 %v14214_v42  ;;  %v14245_v28 = vld [vmem:[%s12563_s24 + $0x50] sm:$0xff]  }
 0x108   : > { %10529 = vmatmul.mubr.f32.gmra.mrb[36].mxu1 %v13221_v21  ;;  %v14211_v21 = vunpack.c.h.bf16 %v14197_v18 }
 0x109   : > { %11175 = vmatmul.mubr.f32.vlgmr.msra.gmra.mrb[0].mxu0 %v14192_v14  ;;  %10531 = vmatprep.mubr.f32.mxu1 %v16397_v54 }
 0x10a   : > { %11789 = vmatpush3.bf16.msra.mxu0 %v13784_v22  ;;  %11177 = vmatprep.mubr.f32.mxu0 %v5012_v36  ;;  %v16400_v22 = vunpack.c.l.bf16 %v14197_v18  ;;  %v5015_v36 = vunpack.c.h.bf16 %v8311_v3  ;;  %v16402_v3 = vld [vmem:[#allocation55_spill] sm:$0xff] }
 0x10b   : > { %11791 = vmatprep.subr.bf16.mxu0 %v11790_v53 }
 0x10c   : > { %10532 = vmatmul.mubr.f32.gmra.mrb[38].mxu1 %v16399_v26  ;;  %v8317_v26 = vld [vmem:[%s12563_s24 + $0x48] ss:$16 sps:$4 sm:$0xff]  }
 0x10d   : > { %11178 = vmatmul.mubr.f32.gmra.mrb[2].mxu0 %v16400_v22  ;;  %10534 = vmatprep.mubr.f32.mxu1 %v13310_v24  ;;  %v8502_v24 = vld [vmem:[%s15845_s1 + $0x3c8] sm:$0xff]  ;;  %v16403_v22 = vunpack.c.l.bf16 %v16402_v3  ;;  %v5018_v8 = vunpack.c.l.bf16 %v8317_v26  ;;  %v8504_v3 = vld [vmem:[%s15845_s1 + $0x3d8] sm:$0xff] }
 0x10e   : > { %11180 = vmatprep.mubr.f32.mxu0 %v14211_v21  ;;  %11793 = vmatpush3.bf16.msra.mxu0 %v11790_v53  ;;  %v16404_v53 = vunpack.c.l.bf16 %v14214_v42  ;;  %v11802_v35 = vpack.c.bf16 %v8502_v24, %v8501_v56  ;;  %v14258_v56 = vunpack.c.h.bf16 %v14245_v28  ;;  %v16405_v24 = vunpack.c.l.bf16 %v13397_v9  ;;  %v8323_v9 = vld [vmem:[%s12563_s24 + $0x68] ss:$16 sps:$4 sm:$0xff]  }
 0x10f   : > { %11795 = vmatprep.subr.bf16.mxu0 %v11794_v13 }
 0x110   : > { %10535 = vmatmul.mubr.f32.gmra.mrb[40].mxu1 %v16401_v16 }
 0x111   : > { %11181 = vmatmul.mubr.f32.gmra.mrb[4].mxu0 %v5015_v36  ;;  %10537 = vmatprep.mubr.f32.mxu1 %v16403_v22  ;;  %v8503_v36 = vld [vmem:[%s15845_s1 + $0x3d0] sm:$0xff]  ;;  %v8506_v22 = vld [vmem:[%s15845_s1 + $0x3e8] sm:$0xff] }
 0x112   : > { %11183 = vmatprep.mubr.f32.mxu0 %v16404_v53  ;;  %11797 = vmatpush3.bf16.msra.mxu0 %v11794_v13  ;;  %v11806_v13 = vpack.c.bf16 %v8504_v3, %v8503_v36  ;;  %v8505_v53 = vld [vmem:[%s15845_s1 + $0x3e0] sm:$0xff] }
 0x113   : > { %11799 = vmatprep.subr.bf16.mxu0 %v11798_v59  ;;  %v11810_v3 = vpack.c.bf16 %v8506_v22, %v8505_v53  ;;  %v8533_v53 = vld [vmem:[%s15845_s1 + $0x400] sm:$0xff] }
 0x114   : > { %10538 = vmatmul.mubr.f32.gmra.mrb[42].mxu1 %v13370_v40  ;;  %v9431_v40 = vld [vmem:[%s12563_s24 + $0x60] sm:$0xff]  }
 0x115   : > { %11184 = vmatmul.mubr.f32.gmra.mrb[6].mxu0 %v14240_v48  ;;  %10540 = vmatprep.mubr.f32.mxu1 %v13373_v2  ;;  %v9002_v36 = vunpack.c.l.bf16 %v9431_v40 }
 0x116   : > { %11186 = vmatprep.mubr.f32.mxu0 %v5018_v8  ;;  %11801 = vmatpush3.bf16.msra.mxu0 %v11798_v59  ;;  %v16406_v8 = vunpack.c.l.bf16 %v14245_v28  ;;  %v5021_v59 = vunpack.c.h.bf16 %v8317_v26  ;;  %v9003_v26 = vunpack.c.h.bf16 %v9431_v40  ;;  %v9007_v40 = vunpack.c.h.bf16 %v9432_v43 }
 0x117   : > { %11803 = vmatprep.subr.bf16.mxu0 %v11802_v35 }
 0x118   : > { %10541 = vmatmul.mubr.f32.gmra.mrb[44].mxu1 %v16405_v24  ;;  %v8507_v24 = vld [vmem:[%s15845_s1 + $0x3f0] sm:$0xff] }
 0x119   : > { %11187 = vmatmul.mubr.f32.gmra.mrb[8].mxu0 %v16406_v8  ;;  %10543 = vmatprep.mubr.f32.mxu1 %v13435_v41  ;;  %v8508_v8 = vld [vmem:[%s15845_s1 + $0x3f8] sm:$0xff]  ;;  %v16407_v41 = vunpack.c.l.bf16 %v13453_v47  ;;  %v9006_v47 = vunpack.c.l.bf16 %v9432_v43  ;;  %v16409_v43 = vunpack.c.l.bf16 %v13565_v4 }
 0x11a   : > { %11189 = vmatprep.mubr.f32.mxu0 %v14258_v56  ;;  %11805 = vmatpush3.bf16.msra.mxu0 %v11802_v35  ;;  %v5024_v35 = vunpack.c.l.bf16 %v8323_v9  ;;  %v11814_v22 = vpack.c.bf16 %v8508_v8, %v8507_v24  ;;  %v5027_v24 = vunpack.c.h.bf16 %v8323_v9 }
 0x11b   : > { %11807 = vmatprep.subr.bf16.mxu0 %v11806_v13 }
 0x11c   : > { %10544 = vmatmul.mubr.f32.gmra.mrb[46].mxu1 %v13450_v37 }
 0x11d   : > { %11190 = vmatmul.mubr.f32.gmra.mrb[10].mxu0 %v5021_v59  ;;  %10546 = vmatprep.mubr.f32.mxu1 %v16407_v41  ;;  %v8534_v59 = vld [vmem:[%s15845_s1 + $0x408] sm:$0xff] }
 0x11e   : > { %11192 = vmatprep.mubr.f32.mxu0 %v9002_v36  ;;  %11809 = vmatpush3.bf16.msra.mxu0 %v11806_v13  ;;  %v9433_v13 = vld [vmem:[%s12563_s24 + $0x80] sm:$0xff]   ;;  %v14293_v36 = vpack.c.bf16 %v8534_v59, %v8533_v53  ;;  %v8329_v41 = vld [vmem:[%s12563_s24 + $0x88] ss:$16 sps:$4 sm:$0xff]  }
 0x11f   : > { %11811 = vmatprep.subr.bf16.mxu0 %v11810_v3  ;;  %v9010_v8 = vunpack.c.l.bf16 %v9433_v13  ;;  %v5033_v4 = vunpack.c.h.bf16 %v8329_v41 }
 0x120   : > { %10547 = vmatmul.mubr.f32.gmra.mrb[48].mxu1 %v13481_v46  ;;  %v16408_v46 = vunpack.c.l.bf16 %v13507_v38  ;;  %v9011_v38 = vunpack.c.h.bf16 %v9433_v13 }
 0x121   : > { %11193 = vmatmul.mubr.f32.gmra.mrb[12].mxu0 %v9003_v26  ;;  %10549 = vmatprep.mubr.f32.mxu1 %v13494_v32  ;;  %v9434_v26 = vld [vmem:[%s12563_s24 + $0x90] sm:$0xff]  }
 0x122   : > { %11195 = vmatprep.mubr.f32.mxu0 %v5024_v35  ;;  %11813 = vmatpush3.bf16.msra.mxu0 %v11810_v3  ;;  %v5030_v3 = vunpack.c.l.bf16 %v8329_v41  ;;  %v9015_v9 = vunpack.c.h.bf16 %v9434_v26  ;;  %v9435_v35 = vld [vmem:[%s12563_s24 + $0xa0] sm:$0xff]  }
 0x123   : > { %11815 = vmatprep.subr.bf16.mxu0 %v11814_v22  ;;  %v9018_v59 = vunpack.c.l.bf16 %v9435_v35 }
 0x124   : > { %10550 = vmatmul.mubr.f32.gmra.mrb[50].mxu1 %v16408_v46  ;;  %v9019_v46 = vunpack.c.h.bf16 %v9435_v35  ;;  %v1583_v35 = vld [vmem:[%s12563_s24] sm:$0xe] }
 0x125   : > { %11196 = vmatmul.mubr.f32.gmra.mrb[14].mxu0 %v9006_v47  ;;  %10552 = vmatprep.mubr.f32.mxu1 %v13545_v57  ;;  %v9014_v57 = vunpack.c.l.bf16 %v9434_v26  ;;  %v8335_v47 = vld [vmem:[%s12563_s24 + $0xa8] ss:$16 sps:$4 sm:$0xff]  }
 0x126   : > { %11198 = vmatprep.mubr.f32.mxu0 %v9007_v40  ;;  %11817 = vmatpush3.bf16.msra.mxu0 %v11814_v22  ;;  %v16410_v22 = vld [vmem:[#allocation71_spill] sm:$0xff]  ;;  %v16413_v40 = vld [vmem:[#allocation76_spill] sm:$0xff]  ;;  %v5039_v26 = vunpack.c.h.bf16 %v8335_v47 }
 0x127   : > { %11819 = vmatprep.subr.bf16.mxu0 %v14293_v36  ;;  %v16411_v53 = vunpack.c.l.bf16 %v16410_v22  ;;  %v16414_v13 = vunpack.c.l.bf16 %v16413_v40  ;;  %v1584_v40 = vld [vmem:[%s12563_s24 + $0x10] sm:$0xe] }
 0x128   : > { %10553 = vmatmul.mubr.f32.gmra.mrb[52].mxu1 %v13557_v34 }
 0x129   : > { %11199 = vmatmul.mubr.f32.gmra.mrb[16].mxu0 %v5027_v24  ;;  %10555 = vmatprep.mubr.f32.mxu1 %v16409_v43  ;;  %v5036_v24 = vunpack.c.l.bf16 %v8335_v47 }
 0x12a   : > { %11201 = vmatprep.mubr.f32.mxu0 %v9010_v8  ;;  %v9436_v8 = vld [vmem:[%s12563_s24 + $0xb0] sm:$0xff]  }
 0x12b   : > { %v9022_v41 = vunpack.c.l.bf16 %v9436_v8  ;;  %v9023_v43 = vunpack.c.h.bf16 %v9436_v8  ;;  %v1608_v8 = vunpack.c.l.bf16 %v1584_v40 }
 0x12c   : > { %10556 = vmatmul.mubr.f32.gmra.mrb[54].mxu1 %v13589_v15  ;;  %v16412_v15 = vld [vmem:[#allocation74_spill] sm:$0xff] }
 0x12d   : > { %11202 = vmatmul.mubr.f32.gmra.mrb[18].mxu0 %v9011_v38  ;;  %10558 = vmatprep.mubr.f32.mxu1 %v13600_v25  ;;  %v9437_v38 = vld [vmem:[%s12563_s24 + $0xc0] sm:$0xff]  }
 0x12e   : > { %11204 = vmatprep.mubr.f32.mxu0 %v5030_v3  ;;  %v16416_v3 = vunpack.c.l.bf16 %v13688_v11  ;;  %v9027_v22 = vunpack.c.h.bf16 %v9437_v38 }
 0x130   : > { %10559 = vmatmul.mubr.f32.gmra.mrb[56].mxu1 %v16411_v53  ;;  %v9438_v53 = vld [vmem:[%s12563_s24 + $0xd0] sm:$0xff]  }
 0x131   : > { %11205 = vmatmul.mubr.f32.gmra.mrb[20].mxu0 %v9014_v57  ;;  %10561 = vmatprep.mubr.f32.mxu1 %v13630_v6  ;;  %v16415_v6 = vld [vmem:[#allocation80_spill] sm:$0xff]  ;;  %v9026_v57 = vunpack.c.l.bf16 %v9437_v38  ;;  %v16419_v38 = vld [vmem:[#allocation11_spill] sm:$0xff] }
 0x132   : > { %11207 = vmatprep.mubr.f32.mxu0 %v9015_v9  ;;  %v8341_v9 = vld [vmem:[%s12563_s24 + $0xc8] ss:$16 sps:$4 sm:$0xff]  }
 0x133   : > { %v5042_v11 = vunpack.c.l.bf16 %v8341_v9 }
 0x134   : > { %10562 = vmatmul.mubr.f32.gmra.mrb[58].mxu1 %v16412_v15 }
 0x135   : > { %11208 = vmatmul.mubr.f32.gmra.mrb[22].mxu0 %v5033_v4  ;;  %10564 = vmatprep.mubr.f32.mxu1 %v16414_v13  ;;  %v1607_v4 = vunpack.c.l.bf16 %v1583_v35  ;;  %v9439_v13 = vld [vmem:[%s12563_s24 + $0xe0] sm:$0xff]   ;;  %v1663_v35 = vrot.slane %v1608_v8, 2 }
 0x136   : > { %11210 = vmatprep.mubr.f32.mxu0 %v9018_v59  ;;  %v9031_v59 = vunpack.c.h.bf16 %v9438_v53 }
 0x137   : > { %v1656_v47 = vrot.slane %v1607_v4, 2 }
 0x138   : > { %10565 = vmatmul.mubr.f32.gmra.mrb[60].mxu1 %v13674_v30  ;;  %v16417_v30 = vunpack.c.l.bf16 %v13730_v50  ;;  %v1657_v50 = vrot.slane %v16332_v58, 2 }
 0x139   : > { %11211 = vmatmul.mubr.f32.gmra.mrb[24].mxu0 %v9019_v46  ;;  %10567 = vmatprep.mubr.f32.mxu1 %v16415_v6  ;;  %v16418_v46 = vunpack.c.l.bf16 %v13782_v20  ;;  %v8143_v20 = vld [vmem:[%s15845_s1 + $0x190] sm:$0xff] }
 0x13a   : > { %11213 = vmatprep.mubr.f32.mxu0 %v5036_v24  ;;  %v1659_v24 = vrot.slane %v16334_v45, 2 }
 0x13c   : > { %10568 = vmatmul.mubr.f32.gmra.mrb[62].mxu1 %v16416_v3  ;;  %v16420_v3 = vunpack.c.l.bf16 %v16419_v38  ;;  %v1660_v45 = vsel %vm1655_vm1, %v1657_v50, %v1659_v24  ;;  %v9441_v38 = vld [vmem:[%s12563_s24 + $0x100] sm:$0xff]  }
 0x13d   : > { %11214 = vmatmul.mubr.f32.gmra.mrb[26].mxu0 %v9022_v41  ;;  %10570 = vmatprep.mubr.f32.mxu1 %v13715_v51  ;;  %v9030_v51 = vunpack.c.l.bf16 %v9438_v53  ;;  %v1658_v41 = vsel %vm1655_vm1, %v1656_v47, %v1657_v50  ;;  %v8146_v47 = vld [vmem:[%s15845_s1 + $0x1a8] sm:$0xff]  ;;  %v16421_v50 = vld [vmem:[#allocation52_spill] sm:$0xff] }
 0x13e   : > { %11216 = vmatprep.mubr.f32.mxu0 %v9023_v43  ;;  %v9034_v43 = vunpack.c.l.bf16 %v9439_v13  ;;  %v1661_v58 = vrot.slane %v16420_v3, 2 }
 0x140   : > { %10571 = vmatmul.mubr.f32.gmra.mrb[64].mxu1 %v13718_v39  ;;  %v1662_v4 = vsel %vm1655_vm1, %v1659_v24, %v1661_v58  ;;  %v8148_v58 = vld [vmem:[%s15845_s1 + $0x1b8] sm:$0xff] }
 0x141   : > { %11217 = vmatmul.mubr.f32.gmra.mrb[28].mxu0 %v5039_v26  ;;  %10573 = vmatprep.mubr.f32.mxu1 %v16417_v30  ;;  %v8347_v26 = vld [vmem:[%s12563_s24 + $0xe8] ss:$16 sps:$4 sm:$0xff]  }
 0x142   : > { %11219 = vmatprep.mubr.f32.mxu0 %v9026_v57  ;;  %v1585_v57 = vld [vmem:[%s12563_s24 + $0x20] sm:$0xe]  ;;  %v5048_v30 = vunpack.c.l.bf16 %v8347_v26 }
 0x143   : > { %v1609_v53 = vunpack.c.l.bf16 %v1585_v57 }
 0x144   : > { %10574 = vmatmul.mubr.f32.gmra.mrb[66].mxu1 %v13752_v0  ;;  %v5045_v0 = vunpack.c.h.bf16 %v8341_v9  ;;  %v9035_v9 = vunpack.c.h.bf16 %v9439_v13  ;;  %v16422_v13 = vld [vmem:[#allocation16_spill] sm:$0xff] }
 0x145   : > { %11220 = vmatmul.mubr.f32.gmra.mrb[30].mxu0 %v9027_v22  ;;  %10576 = vmatprep.mubr.f32.mxu1 %v13772_v52  ;;  %v9440_v22 = vld [vmem:[%s12563_s24 + $0xf0] sm:$0xff]  }
 0x146   : > { %11222 = vmatprep.mubr.f32.mxu0 %v5042_v11  ;;  %v1666_v11 = vrot.slane %v16340_v19, 2  ;;  %v1665_v19 = vsel %vm1655_vm1, %v1663_v35, %v16421_v50  ;;  %v9038_v40 = vunpack.c.l.bf16 %v9440_v22  ;;  %v9039_v8 = vunpack.c.h.bf16 %v9440_v22  ;;  %v16425_v22 = vld [vmem:[#allocation20_spill] sm:$0xff] }
 0x148   : > { %10577 = vmatmul.mubr.f32.gmra.mrb[68].mxu1 %v16418_v46  ;;  %v16423_v46 = vunpack.c.l.bf16 %v16422_v13  ;;  %v1667_v24 = vsel %vm1655_vm1, %v16421_v50, %v1666_v11 }
 0x149   : > { %11223 = vmatmul.mubr.f32.gmra.mrb[32].mxu0 %v9030_v51  ;;  %10579 = vmatprep.mubr.f32.mxu1 %v13798_v49  ;;  %v8144_v49 = vld [vmem:[%s15845_s1 + $0x198] sm:$0xff] }
 0x14a   : > { %11225 = vmatprep.mubr.f32.mxu0 %v9031_v59  ;;  %v11662_v51 = vpack.c.bf16 %v8144_v49, %v8143_v20  ;;  %v8145_v59 = vld [vmem:[%s15845_s1 + $0x1a0] sm:$0xff]  ;;  %v5051_v20 = vunpack.c.h.bf16 %v8347_v26  ;;  %v1673_v49 = vrot.slane %v16347_v31, 2  ;;  %v8150_v26 = vld [vmem:[%s15845_s1 + $0x1c8] sm:$0xff] }
 0x14b   : > { %v11666_v3 = vpack.c.bf16 %v8146_v47, %v8145_v59  ;;  %v8353_v59 = vld [vmem:[%s12563_s24 + $0x108] ss:$16 sps:$4 sm:$0xff]   ;;  %v1587_v47 = vld [vmem:[%s12563_s24 + $0x40] sm:$0xe] }
 0x14c   : > { %10580 = vmatmul.mubr.f32.gmra.mrb[70].mxu1 %v13804_v60  ;;  %v8149_v31 = vld [vmem:[%s15845_s1 + $0x1c0] sm:$0xff]  ;;  %v5054_v13 = vunpack.c.l.bf16 %v8353_v59 }
 0x14d   : > { %11226 = vmatmul.mubr.f32.gmra.mrb[34].mxu0 %v5045_v0  ;;  %10614 = vmatprep.mubr.f32.mxu1 %v1658_v41  ;;  %v1668_v0 = vrot.slane %v16423_v46, 2  ;;  %v1670_v41 = vrot.slane %v1609_v53, 2  ;;  %v16426_v53 = vunpack.c.l.bf16 %v16425_v22  ;;  %v9442_v46 = vld [vmem:[%s12563_s24 + $0x110] sm:$0xff]   ;;  %v8153_v22 = vld [vmem:[%s15845_s1 + $0x1e0] sm:$0xff] }
 0x14e   : > { %11228 = vmatprep.mubr.f32.mxu0 %v9034_v43  ;;  %v1586_v43 = vld [vmem:[%s12563_s24 + $0x30] sm:$0xe] }
 0x14f   : > { %v1669_v57 = vsel %vm1655_vm1, %v1666_v11, %v1668_v0  ;;  %v1680_v0 = vrot.slane %v16353_v62, 2 }
 0x150   : > { %10615 = vmatmul.mubr.f32.vlgmr.msra.gmra.mrb[0].mxu1 %v1660_v45  ;;  %v1610_v45 = vunpack.c.l.bf16 %v1586_v43  ;;  %v8152_v43 = vld [vmem:[%s15845_s1 + $0x1d8] sm:$0xff] }
 0x151   : > { %11229 = vmatmul.mubr.f32.gmra.mrb[36].mxu0 %v9035_v9  ;;  %11661 = vmatpush3.bf16.msra.mxu1 %v14040_v33  ;;  %v8147_v33 = vld [vmem:[%s15845_s1 + $0x1b0] sm:$0xff]  ;;  %v16424_v9 = vld [vmem:[#allocation57_spill] sm:$0xff] }
 0x152   : > { %10617 = vmatprep.mubr.f32.mxu1 %v1662_v4  ;;  %11231 = vmatprep.mubr.f32.mxu0 %v5048_v30  ;;  %v1672_v35 = vsel %vm1655_vm1, %v1670_v41, %v16424_v9  ;;  %v9042_v30 = vunpack.c.l.bf16 %v9441_v38  ;;  %v1675_v4 = vrot.slane %v16426_v53, 2  ;;  %v11670_v50 = vpack.c.bf16 %v8148_v58, %v8147_v33  ;;  %v8151_v41 = vld [vmem:[%s15845_s1 + $0x1d0] sm:$0xff]  ;;  %v16428_v58 = vld [vmem:[#allocation23_spill] sm:$0xff] }
 0x153   : > { %11663 = vmatprep.subr.bf16.mxu1 %v11662_v51  ;;  %v1674_v11 = vsel %vm1655_vm1, %v16424_v9, %v1673_v49  ;;  %v9046_v33 = vunpack.c.l.bf16 %v9442_v46  ;;  %v1588_v9 = vld [vmem:[%s12563_s24 + $0x50] sm:$0xe]  ;;  %v8154_v53 = vld [vmem:[%s15845_s1 + $0x1e8] sm:$0xff] }
 0x154   : > { %10618 = vmatmul.mubr.f32.gmra.mrb[2].mxu1 %v1665_v19  ;;  %v1677_v19 = vrot.slane %v1610_v45, 2 }
 0x155   : > { %11232 = vmatmul.mubr.f32.gmra.mrb[38].mxu0 %v9038_v40  ;;  %10620 = vmatprep.mubr.f32.mxu1 %v1667_v24  ;;  %v1676_v40 = vsel %vm1655_vm1, %v1673_v49, %v1675_v4  ;;  %v1611_v24 = vunpack.c.l.bf16 %v1587_v47  ;;  %v9047_v49 = vunpack.c.h.bf16 %v9442_v46  ;;  %v5057_v47 = vunpack.c.h.bf16 %v8353_v59  ;;  %v8359_v46 = vld [vmem:[%s12563_s24 + $0x128] ss:$16 sps:$4 sm:$0xff]  }
 0x156   : > { %11234 = vmatprep.mubr.f32.mxu0 %v9039_v8  ;;  %11665 = vmatpush3.bf16.msra.mxu1 %v11662_v51  ;;  %v9043_v51 = vunpack.c.h.bf16 %v9441_v38  ;;  %v11674_v8 = vpack.c.bf16 %v8150_v26, %v8149_v31  ;;  %v16427_v38 = vld [vmem:[#allocation60_spill] sm:$0xff]  ;;  %v1612_v31 = vunpack.c.l.bf16 %v1588_v9  ;;  %v16430_v26 = vld [vmem:[#allocation63_spill] sm:$0xff]  ;;  %v8156_v59 = vld [vmem:[%s15845_s1 + $0x1f8] sm:$0xff] }
 0x157   : > { %11667 = vmatprep.subr.bf16.mxu1 %v11666_v3  ;;  %v1679_v62 = vsel %vm1655_vm1, %v1677_v19, %v16427_v38  ;;  %v1684_v45 = vrot.slane %v1611_v24, 2  ;;  %v16431_v19 = vld [vmem:[#allocation26_spill] sm:$0xff] }
 0x158   : > { %10621 = vmatmul.mubr.f32.gmra.mrb[4].mxu1 %v1669_v57  ;;  %v1589_v24 = vld [vmem:[%s12563_s24 + $0x60] sm:$0xe] }
 0x159   : > { %11235 = vmatmul.mubr.f32.gmra.mrb[40].mxu0 %v5051_v20  ;;  %10623 = vmatprep.mubr.f32.mxu1 %v1672_v35  ;;  %v1681_v20 = vsel %vm1655_vm1, %v16427_v38, %v1680_v0  ;;  %v9443_v35 = vld [vmem:[%s12563_s24 + $0x120] sm:$0xff]  }
 0x15a   : > { %11237 = vmatprep.mubr.f32.mxu0 %v9042_v30  ;;  %11669 = vmatpush3.bf16.msra.mxu1 %v11666_v3  ;;  %v16429_v3 = vunpack.c.l.bf16 %v16428_v58  ;;  %v11678_v30 = vpack.c.bf16 %v8152_v43, %v8151_v41  ;;  %v11682_v41 = vpack.c.bf16 %v8154_v53, %v8153_v22  ;;  %v1691_v43 = vrot.slane %v1612_v31, 2  ;;  %v16434_v9 = vld [vmem:[#allocation30_spill] sm:$0xff] }
 0x15b   : > { %11671 = vmatprep.subr.bf16.mxu1 %v11670_v50  ;;  %v1694_v58 = vrot.slane %v16364_v10, 2  ;;  %v5063_v31 = vunpack.c.h.bf16 %v8359_v46 }
 0x15c   : > { %10624 = vmatmul.mubr.f32.gmra.mrb[6].mxu1 %v1674_v11  ;;  %v1682_v57 = vrot.slane %v16429_v3, 2  ;;  %v1686_v11 = vsel %vm1655_vm1, %v1684_v45, %v16430_v26  ;;  %v1613_v3 = vunpack.c.l.bf16 %v1589_v24 }
 0x15d   : > { %11238 = vmatmul.mubr.f32.gmra.mrb[42].mxu0 %v9043_v51  ;;  %10626 = vmatprep.mubr.f32.mxu1 %v1676_v40  ;;  %v9050_v51 = vunpack.c.l.bf16 %v9443_v35  ;;  %v16432_v40 = vunpack.c.l.bf16 %v16431_v19 }
 0x15e   : > { %11240 = vmatprep.mubr.f32.mxu0 %v5054_v13  ;;  %11673 = vmatpush3.bf16.msra.mxu1 %v11670_v50  ;;  %v1683_v4 = vsel %vm1655_vm1, %v1680_v0, %v1682_v57  ;;  %v1687_v50 = vrot.slane %v16358_v27, 2  ;;  %v8155_v27 = vld [vmem:[%s15845_s1 + $0x1f0] sm:$0xff] }
 0x15f   : > { %11675 = vmatprep.subr.bf16.mxu1 %v11674_v8  ;;  %v1689_v13 = vrot.slane %v16432_v40, 2  ;;  %v11686_v57 = vpack.c.bf16 %v8156_v59, %v8155_v27  ;;  %v8365_v27 = vld [vmem:[%s12563_s24 + $0x148] ss:$16 sps:$4 sm:$0xff]   ;;  %v1591_v59 = vld [vmem:[%s12563_s24 + $0x80] sm:$0xe] }
 0x160   : > { %10627 = vmatmul.mubr.f32.gmra.mrb[8].mxu1 %v1679_v62  ;;  %v1688_v0 = vsel %vm1655_vm1, %v16430_v26, %v1687_v50  ;;  %v5060_v62 = vunpack.c.l.bf16 %v8359_v46  ;;  %v1701_v26 = vrot.slane %v16370_v55, 2 }
 0x161   : > { %11241 = vmatmul.mubr.f32.gmra.mrb[44].mxu0 %v9046_v33  ;;  %10629 = vmatprep.mubr.f32.mxu1 %v1681_v20  ;;  %v1690_v38 = vsel %vm1655_vm1, %v1687_v50, %v1689_v13  ;;  %v9444_v33 = vld [vmem:[%s12563_s24 + $0x130] sm:$0xff]   ;;  %v16433_v20 = vld [vmem:[#allocation66_spill] sm:$0xff] }
 0x162   : > { %11243 = vmatprep.mubr.f32.mxu0 %v9047_v49  ;;  %11677 = vmatpush3.bf16.msra.mxu1 %v11674_v8  ;;  %v9051_v8 = vunpack.c.h.bf16 %v9443_v35  ;;  %v1693_v49 = vsel %vm1655_vm1, %v1691_v43, %v16433_v20  ;;  %v9054_v45 = vunpack.c.l.bf16 %v9444_v33  ;;  %v16435_v35 = vunpack.c.l.bf16 %v16434_v9  ;;  %v16437_v13 = vld [vmem:[#allocation32_spill] sm:$0xff] }
 0x163   : > { %11679 = vmatprep.subr.bf16.mxu1 %v11678_v30  ;;  %v1695_v53 = vsel %vm1655_vm1, %v16433_v20, %v1694_v58  ;;  %v9055_v10 = vunpack.c.h.bf16 %v9444_v33  ;;  %v16438_v24 = vunpack.c.l.bf16 %v16437_v13  ;;  %v1708_v33 = vrot.slane %v16375_v23, 2  ;;  %v1592_v23 = vld [vmem:[%s12563_s24 + $0x90] sm:$0xe]  ;;  %v8371_v13 = vld [vmem:[%s12563_s24 + $0x168] ss:$16 sps:$4 sm:$0xff]  }
 0x164   : > { %10630 = vmatmul.mubr.f32.gmra.mrb[10].mxu1 %v1683_v4  ;;  %v1696_v22 = vrot.slane %v16435_v35, 2  ;;  %v1698_v4 = vrot.slane %v1613_v3, 2  ;;  %v16440_v3 = vld [vmem:[#allocation73_spill] sm:$0xff] }
 0x165   : > { %11244 = vmatmul.mubr.f32.gmra.mrb[46].mxu0 %v5057_v47  ;;  %10632 = vmatprep.mubr.f32.mxu1 %v1686_v11  ;;  %v1590_v47 = vld [vmem:[%s12563_s24 + $0x70] sm:$0xe]  ;;  %v1709_v35 = vsel %vm1655_vm1, %v16440_v3, %v1708_v33 }
 0x166   : > { %11246 = vmatprep.mubr.f32.mxu0 %v9050_v51  ;;  %11681 = vmatpush3.bf16.msra.mxu1 %v11678_v30  ;;  %v9445_v30 = vld [vmem:[%s12563_s24 + $0x140] sm:$0xff]   ;;  %v1697_v50 = vsel %vm1655_vm1, %v1694_v58, %v1696_v22  ;;  %v1614_v11 = vunpack.c.l.bf16 %v1590_v47  ;;  %v16436_v51 = vld [vmem:[#allocation69_spill] sm:$0xff]  ;;  %v1615_v58 = vunpack.c.l.bf16 %v1591_v59  ;;  %v5069_v47 = vunpack.c.h.bf16 %v8365_v27 }
 0x167   : > { %11683 = vmatprep.subr.bf16.mxu1 %v11682_v41  ;;  %v1700_v19 = vsel %vm1655_vm1, %v1698_v4, %v16436_v51  ;;  %v9058_v40 = vunpack.c.l.bf16 %v9445_v30  ;;  %v1702_v55 = vsel %vm1655_vm1, %v16436_v51, %v1701_v26  ;;  %v9059_v46 = vunpack.c.h.bf16 %v9445_v30  ;;  %v16444_v51 = vld [vmem:[#allocation38_spill] sm:$0xff] }
 0x168   : > { %10633 = vmatmul.mubr.f32.gmra.mrb[12].mxu1 %v1688_v0  ;;  %v16439_v0 = vld [vmem:[#allocation2_spill] sm:$0xff]  ;;  %v1715_v30 = vrot.slane %v16381_v61, 2 }
 0x169   : > { %11247 = vmatmul.mubr.f32.gmra.mrb[48].mxu0 %v9051_v8  ;;  %10635 = vmatprep.mubr.f32.mxu1 %v1690_v38  ;;  %v1705_v8 = vrot.slane %v1614_v11, 2  ;;  %v5066_v38 = vunpack.c.l.bf16 %v8365_v27 }
 0x16a   : > { %11249 = vmatprep.mubr.f32.mxu0 %v5060_v62  ;;  %11685 = vmatpush3.bf16.msra.mxu1 %v11682_v41  ;;  %v1703_v41 = vrot.slane %v16438_v24, 2  ;;  %v9446_v62 = vld [vmem:[%s12563_s24 + $0x150] sm:$0xff]   ;;  %v1593_v24 = vld [vmem:[%s12563_s24 + $0xa0] sm:$0xe] }
 0x16b   : > { %11687 = vmatprep.subr.bf16.mxu1 %v11686_v57  ;;  %v9062_v20 = vunpack.c.l.bf16 %v9446_v62  ;;  %v9063_v22 = vunpack.c.h.bf16 %v9446_v62 }
 0x16c   : > { %10636 = vmatmul.mubr.f32.gmra.mrb[14].mxu1 %v1693_v49  ;;  %v1704_v43 = vsel %vm1655_vm1, %v1701_v26, %v1703_v41  ;;  %v16441_v49 = vld [vmem:[#allocation35_spill] sm:$0xff] }
 0x16d   : > { %11250 = vmatmul.mubr.f32.gmra.mrb[50].mxu0 %v9054_v45  ;;  %10638 = vmatprep.mubr.f32.mxu1 %v1695_v53  ;;  %v16442_v45 = vunpack.c.l.bf16 %v16441_v49  ;;  %v1712_v53 = vrot.slane %v1615_v58, 2  ;;  %v16447_v58 = vld [vmem:[#allocation41_spill] sm:$0xff] }
 0x16e   : > { %11252 = vmatprep.mubr.f32.mxu0 %v9055_v10  ;;  %11689 = vmatpush3.bf16.msra.mxu1 %v11686_v57  ;;  %v1707_v57 = vsel %vm1655_vm1, %v1705_v8, %v16440_v3  ;;  %v9447_v10 = vld [vmem:[%s12563_s24 + $0x160] sm:$0xff]   ;;  %v1722_v8 = vrot.slane %v16388_v7, 2  ;;  %v16448_v3 = vunpack.c.l.bf16 %v16447_v58  ;;  %v1594_v7 = vld [vmem:[%s12563_s24 + $0xb0] sm:$0xe]  ;;  %v16455_v58 = vunpack.c.l.bf16 %v14174_v1 }
 0x16f   : > { %11850 = vmatprep.subr.bf16.mxu1 %v16439_v0  ;;  %v1710_v9 = vrot.slane %v16442_v45, 2  ;;  %v9066_v11 = vunpack.c.l.bf16 %v9447_v10  ;;  %v9067_v27 = vunpack.c.h.bf16 %v9447_v10 }
 0x170   : > { %10639 = vmatmul.mubr.f32.gmra.mrb[16].mxu1 %v1697_v50  ;;  %v1616_v50 = vunpack.c.l.bf16 %v1592_v23  ;;  %v16449_v23 = vld [vmem:[#allocation85_spill] sm:$0xff] }
 0x171   : > { %11253 = vmatmul.mubr.f32.gmra.mrb[52].mxu0 %v5063_v31  ;;  %10641 = vmatprep.mubr.f32.mxu1 %v1700_v19  ;;  %v1711_v4 = vsel %vm1655_vm1, %v1708_v33, %v1710_v9  ;;  %v16443_v31 = vld [vmem:[#allocation78_spill] sm:$0xff]  ;;  %v16445_v19 = vunpack.c.l.bf16 %v16444_v51 }
 0x172   : > { %11255 = vmatprep.mubr.f32.mxu0 %v9058_v40  ;;  %v1714_v26 = vsel %vm1655_vm1, %v1712_v53, %v16443_v31  ;;  %v1716_v41 = vsel %vm1655_vm1, %v16443_v31, %v1715_v30  ;;  %v1719_v61 = vrot.slane %v1616_v50, 2  ;;  %v1618_v53 = vunpack.c.l.bf16 %v1594_v7  ;;  %v8377_v31 = vld [vmem:[%s12563_s24 + $0x188] ss:$16 sps:$4 sm:$0xff]  }
 0x173   : > { %v1717_v40 = vrot.slane %v16445_v19, 2  ;;  %v5078_v19 = vunpack.c.l.bf16 %v8377_v31 }
 0x174   : > { %10642 = vmatmul.mubr.f32.gmra.mrb[18].mxu1 %v1702_v55  ;;  %v5072_v55 = vunpack.c.l.bf16 %v8371_v13 }
 0x175   : > { %11256 = vmatmul.mubr.f32.gmra.mrb[54].mxu0 %v9059_v46  ;;  %10644 = vmatprep.mubr.f32.mxu1 %v1704_v43  ;;  %v1718_v59 = vsel %vm1655_vm1, %v1715_v30, %v1717_v40  ;;  %v9448_v46 = vld [vmem:[%s12563_s24 + $0x170] sm:$0xff]   ;;  %v1617_v43 = vunpack.c.l.bf16 %v1593_v24  ;;  %v14496_v24 = vld [vmem:[%s12563_s24 + $0x28] ss:$16 sps:$4 sm:$0xff]  }
 0x176   : > { %11258 = vmatprep.mubr.f32.mxu0 %v5066_v38  ;;  %v16446_v38 = vld [vmem:[#allocation82_spill] sm:$0xff]  ;;  %v9070_v33 = vunpack.c.l.bf16 %v9448_v46  ;;  %v9071_v49 = vunpack.c.h.bf16 %v9448_v46  ;;  %v9450_v40 = vld [vmem:[%s12563_s24 + $0x190] sm:$0xff]  }
 0x177   : > { %v1721_v62 = vsel %vm1655_vm1, %v1719_v61, %v16446_v38  ;;  %v1726_v45 = vrot.slane %v1617_v43, 2  ;;  %v16453_v46 = vld [vmem:[#allocation48_spill] sm:$0xff] }
 0x178   : > { %10645 = vmatmul.mubr.f32.gmra.mrb[20].mxu1 %v1707_v57  ;;  %v1724_v57 = vrot.slane %v16448_v3, 2  ;;  %v5884_v3 = vrot.slane %v16455_v58, 1 }
 0x179   : > { %11259 = vmatmul.mubr.f32.gmra.mrb[56].mxu0 %v9062_v20  ;;  %10647 = vmatprep.mubr.f32.mxu1 %v1709_v35  ;;  %v1723_v20 = vsel %vm1655_vm1, %v16446_v38, %v1722_v8  ;;  %v5075_v35 = vunpack.c.h.bf16 %v8371_v13  ;;  %v1728_v10 = vsel %vm1655_vm1, %v1726_v45, %v16449_v23  ;;  %v1596_v38 = vld [vmem:[%s12563_s24 + $0xd0] sm:$0xe] }
 0x17a   : > { %11261 = vmatprep.mubr.f32.mxu0 %v9063_v22  ;;  %v1725_v9 = vsel %vm1655_vm1, %v1722_v8, %v1724_v57  ;;  %v1729_v22 = vrot.slane %v16391_v44, 2  ;;  %v16454_v8 = vunpack.c.l.bf16 %v16453_v46  ;;  %v5885_v57 = vrot.slane %v14192_v14, 1 }
 0x17b   : > { %v1620_v45 = vunpack.c.l.bf16 %v1596_v38 }
 0x17c   : > { %10648 = vmatmul.mubr.f32.gmra.mrb[22].mxu1 %v1711_v4  ;;  %v9074_v4 = vunpack.c.l.bf16 %v14137_v29  ;;  %v1730_v44 = vsel %vm1655_vm1, %v16449_v23, %v1729_v22  ;;  %v1736_v29 = vrot.slane %v16394_v12, 2  ;;  %v1738_v43 = vrot.slane %v16454_v8, 2  ;;  %v14552_v8 = vld [vmem:[%s12563_s24 + $0x4c] sm:$0x1] }
 0x17d   : > { %11262 = vmatmul.mubr.f32.gmra.mrb[58].mxu0 %v5069_v47  ;;  %10650 = vmatprep.mubr.f32.mxu1 %v1714_v26  ;;  %v16450_v47 = vld [vmem:[#allocation44_spill] sm:$0xff]  ;;  %v1595_v26 = vld [vmem:[%s12563_s24 + $0xc0] sm:$0xe] }
 0x17e   : > { %11264 = vmatprep.mubr.f32.mxu0 %v9066_v11  ;;  %v16451_v30 = vunpack.c.l.bf16 %v16450_v47  ;;  %v1733_v11 = vrot.slane %v1618_v53, 2  ;;  %v1619_v13 = vunpack.c.l.bf16 %v1595_v26  ;;  %v1739_v7 = vsel %vm1655_vm1, %v1736_v29, %v1738_v43  ;;  %v16457_v53 = vld [vmem:[#allocation49_spill] sm:$0xff] }
 0x17f   : > { %v16458_v23 = vunpack.c.l.bf16 %v16457_v53  ;;  %v1747_v26 = vrot.slane %v1620_v45, 2 }
 0x180   : > { %10651 = vmatmul.mubr.f32.gmra.mrb[24].mxu1 %v1716_v41  ;;  %v1731_v50 = vrot.slane %v16451_v30, 2  ;;  %v14499_v41 = vld [vmem:[%s12563_s24 + $0x2c] sm:$0x1]  ;;  %v16088_v30 = vunpack.c.h.bf16 %v14496_v24 }
 0x181   : > { %11265 = vmatmul.mubr.f32.gmra.mrb[60].mxu0 %v9067_v27  ;;  %10653 = vmatprep.mubr.f32.mxu1 %v1718_v59  ;;  %v16452_v27 = vld [vmem:[#allocation88_spill] sm:$0xff]  ;;  %v9078_v59 = vunpack.c.l.bf16 %v9450_v40 }
 0x182   : > { %11267 = vmatprep.mubr.f32.mxu0 %v5072_v55  ;;  %v1732_v51 = vsel %vm1655_vm1, %v1729_v22, %v1731_v50  ;;  %v1735_v61 = vsel %vm1655_vm1, %v1733_v11, %v16452_v27  ;;  %v9079_v55 = vunpack.c.h.bf16 %v9450_v40  ;;  %v1737_v12 = vsel %vm1655_vm1, %v16452_v27, %v1736_v29  ;;  %v1597_v50 = vld [vmem:[%s12563_s24 + $0xe0] sm:$0xe]  ;;  %v8536_v11 = vld [vmem:[%s15845_s1 + $0x418] sm:$0xff] }
 0x183   : > { %v5892_v40 = vrot.slane %v14211_v21, 1 }
 0x184   : > { %10654 = vmatmul.mubr.f32.gmra.mrb[26].mxu1 %v1721_v62  ;;  %v1740_v62 = vrot.slane %v1619_v13, 2  ;;  %v14543_v13 = vld [vmem:[%s12563_s24 + $0x48] ss:$16 sps:$4 sm:$0xff]  }
 0x185   : > { %11268 = vmatmul.mubr.f32.gmra.mrb[62].mxu0 %v9070_v33  ;;  %10656 = vmatprep.mubr.f32.mxu1 %v1723_v20  ;;  %v16092_v33 = vunpack.c.l.bf16 %v14496_v24  ;;  %v16089_v20 = vunpack.c.l.bf16 %v14499_v41  ;;  %v16085_v38 = vunpack.c.l.bf16 %v14543_v13 }
 0x186   : > { %11270 = vmatprep.mubr.f32.mxu0 %v9071_v49  ;;  %v1743_v49 = vrot.slane %v16397_v54, 2  ;;  %v5886_v54 = vsel %vm475_vm0, %v5884_v3, %v5885_v57 }
 0x187   : > { %v5887_v1 = vrot.slane %v16092_v33, 1  ;;  %v5889_v47 = vrot.slane %v16089_v20, 1 }
 0x188   : > { %10657 = vmatmul.mubr.f32.gmra.mrb[28].mxu1 %v1725_v9  ;;  %v5081_v9 = vunpack.c.h.bf16 %v8377_v31 }
 0x189   : > { %11271 = vmatmul.mubr.f32.gmra.mrb[64].mxu0 %v5075_v35  ;;  %10659 = vmatprep.mubr.f32.mxu1 %v1728_v10  ;;  %v16456_v35 = vld [vmem:[#allocation91_spill] sm:$0xff]  ;;  %v1745_v10 = vrot.slane %v16458_v23, 2  ;;  %v5888_v27 = vsel %vm475_vm0, %v5885_v57, %v5887_v1  ;;  %v5890_v46 = vsel %vm475_vm0, %v5887_v1, %v5889_v47  ;;  %v16461_v57 = vld [vmem:[#allocation54_spill] sm:$0xff]  ;;  %v16084_v1 = vunpack.c.l.bf16 %v14552_v8 }
 0x18a   : > { %11273 = vmatprep.mubr.f32.mxu0 %v9074_v4  ;;  %v1742_v22 = vsel %vm1655_vm1, %v1740_v62, %v16456_v35  ;;  %v14523_v4 = vld [vmem:[%s12563_s24 + $0x3c] sm:$0x1]  ;;  %v1744_v31 = vsel %vm1655_vm1, %v16456_v35, %v1743_v49  ;;  %v16460_v62 = vld [vmem:[#allocation94_spill] sm:$0xff]  ;;  %v16463_v23 = vunpack.c.l.bf16 %v14214_v42 }
 0x18b   : > { %v16086_v29 = vunpack.c.l.bf16 %v14523_v4  ;;  %v1749_v58 = vsel %vm1655_vm1, %v1747_v26, %v16460_v62  ;;  %v8539_v26 = vld [vmem:[%s15845_s1 + $0x430] sm:$0xff]  ;;  %v8540_v42 = vld [vmem:[%s15845_s1 + $0x438] sm:$0xff] }
 0x18c   : > { %10660 = vmatmul.mubr.f32.gmra.mrb[30].mxu1 %v1730_v44  ;;  %v8535_v44 = vld [vmem:[%s15845_s1 + $0x410] sm:$0xff] }
 0x18d   : > { %11274 = vmatmul.mubr.f32.gmra.mrb[66].mxu0 %v14147_v17  ;;  %10662 = vmatprep.mubr.f32.mxu1 %v1732_v51  ;;  %v16459_v51 = vunpack.c.l.bf16 %v14197_v18  ;;  %v5894_v18 = vrot.slane %v16088_v30, 1  ;;  %v11822_v43 = vpack.c.bf16 %v8536_v11, %v8535_v44  ;;  %v16464_v11 = vld [vmem:[#allocation96_spill] sm:$0xff]  ;;  %v16485_v30 = vld [vmem:[#allocation79_spill] sm:$0xff] }
 0x18e   : > { %11276 = vmatprep.mubr.f32.mxu0 %v5078_v19  ;;  %v16486_v20 = vunpack.c.l.bf16 %v16485_v30 }
 0x18f   : > { %v5891_v19 = vrot.slane %v16459_v51, 1  ;;  %v5895_v53 = vsel %vm475_vm0, %v5892_v40, %v5894_v18 }
 0x190   : > { %10663 = vmatmul.mubr.f32.gmra.mrb[32].mxu1 %v1735_v61  ;;  %v1746_v61 = vsel %vm1655_vm1, %v1743_v49, %v1745_v10  ;;  %v16462_v49 = vunpack.c.l.bf16 %v16461_v57  ;;  %v5898_v10 = vrot.slane %v16463_v23, 1  ;;  %v8542_v57 = vld [vmem:[%s15845_s1 + $0x448] sm:$0xff]  ;;  %v1764_v23 = vrot.slane %v13450_v37, 2  ;;  %v8543_v37 = vld [vmem:[%s15845_s1 + $0x450] sm:$0xff] }
 0x191   : > { %11277 = vmatmul.mubr.f32.gmra.mrb[68].mxu0 %v9078_v59  ;;  %10665 = vmatprep.mubr.f32.mxu1 %v1737_v12  ;;  %v1750_v59 = vrot.slane %v16401_v16, 2  ;;  %v8537_v12 = vld [vmem:[%s15845_s1 + $0x420] sm:$0xff]  ;;  %v8538_v16 = vld [vmem:[%s15845_s1 + $0x428] sm:$0xff]  ;;  %v5893_v3 = vsel %vm475_vm0, %v5891_v19, %v5892_v40 }
 0x192   : > { %11279 = vmatprep.mubr.f32.mxu0 %v9079_v55  ;;  %v1621_v55 = vunpack.c.l.bf16 %v1597_v50  ;;  %v1752_v45 = vrot.slane %v16462_v49, 2  ;;  %v11826_v47 = vpack.c.bf16 %v8538_v16, %v8537_v12  ;;  %v5901_v50 = vrot.slane %v16085_v38, 1  ;;  %v16465_v19 = vld [vmem:[#allocation58_spill] sm:$0xff]  ;;  %v1604_v38 = vld [vmem:[%s12563_s24 + $0x150] sm:$0xe] }
 0x193   : > { %v1751_v35 = vsel %vm1655_vm1, %v16460_v62, %v1750_v59  ;;  %v16466_v40 = vunpack.c.l.bf16 %v16465_v19  ;;  %v1599_v12 = vld [vmem:[%s12563_s24 + $0x100] sm:$0xe]  ;;  %v16467_v49 = vunpack.c.l.bf16 %v14245_v28 }
 0x194   : > { %10666 = vmatmul.mubr.f32.gmra.mrb[34].mxu1 %v1739_v7  ;;  %v5896_v7 = vrot.slane %v16086_v29, 1  ;;  %v1753_v44 = vsel %vm1655_vm1, %v1750_v59, %v1752_v45  ;;  %v16083_v59 = vunpack.c.h.bf16 %v14543_v13  ;;  %v14791_v29 = vld [vmem:[%s12563_s24 + $0xb0] sm:$0xff]  }
 0x195   : > { %11280 = vmatmul.mubr.f32.gmra.mrb[70].mxu0 %v5081_v9  ;;  %10668 = vmatprep.mubr.f32.mxu1 %v1742_v22  ;;  %v1598_v9 = vld [vmem:[%s12563_s24 + $0xf0] sm:$0xe]  ;;  %v1754_v22 = vrot.slane %v1621_v55, 2  ;;  %v14595_v55 = vld [vmem:[%s12563_s24 + $0x5c] sm:$0x1]  ;;  %v5905_v45 = vrot.slane %v16467_v49, 1 }
 0x196   : > { %11314 = vmatprep.mubr.f32.mxu0 %v5886_v54  ;;  %v5899_v54 = vrot.slane %v14240_v48, 1  ;;  %v1771_v49 = vrot.slane %v13494_v32, 2 }
 0x197   : > { %v1756_v51 = vsel %vm1655_vm1, %v1754_v22, %v16464_v11 }
 0x198   : > { %10669 = vmatmul.mubr.f32.gmra.mrb[36].mxu1 %v1744_v31  ;;  %v1622_v31 = vunpack.c.l.bf16 %v1598_v9  ;;  %v5902_v62 = vsel %vm475_vm0, %v5899_v54, %v5901_v50  ;;  %v16078_v9 = vunpack.c.l.bf16 %v14595_v55 }
 0x199   : > { %11315 = vmatmul.mubr.f32.vlgmr.msra.gmra.mrb[0].mxu0 %v5888_v27  ;;  %10671 = vmatprep.mubr.f32.mxu1 %v1746_v61  ;;  %v1759_v27 = vrot.slane %v16466_v40, 2  ;;  %v5903_v61 = vrot.slane %v16084_v1, 1 }
 0x19a   : > { %11821 = vmatpush3.bf16.msra.mxu0 %v14293_v36  ;;  %11317 = vmatprep.mubr.f32.mxu0 %v5890_v46  ;;  %v1757_v36 = vrot.slane %v13373_v2, 2  ;;  %v5897_v2 = vsel %vm475_vm0, %v5894_v18, %v5896_v7  ;;  %v5900_v46 = vsel %vm475_vm0, %v5898_v10, %v5899_v54  ;;  %v11830_v18 = vpack.c.bf16 %v8540_v42, %v8539_v26  ;;  %v14629_v26 = vld [vmem:[%s12563_s24 + $0x6c] sm:$0x1] }
 0x19b   : > { %11823 = vmatprep.subr.bf16.mxu0 %v11822_v43  ;;  %v5906_v7 = vrot.slane %v14258_v56, 1  ;;  %v1623_v10 = vunpack.c.l.bf16 %v1599_v12  ;;  %v5908_v54 = vrot.slane %v16083_v59, 1  ;;  %v5910_v40 = vrot.slane %v16078_v9, 1  ;;  %v14726_v9 = vld [vmem:[%s12563_s24 + $0x90] sm:$0xff]  }
 0x19c   : > { %10672 = vmatmul.mubr.f32.gmra.mrb[38].mxu1 %v1749_v58  ;;  %v1758_v16 = vsel %vm1655_vm1, %v16464_v11, %v1757_v36  ;;  %v1761_v58 = vrot.slane %v1622_v31, 2  ;;  %v1760_v22 = vsel %vm1655_vm1, %v1757_v36, %v1759_v27  ;;  %v16469_v11 = vld [vmem:[#allocation61_spill] sm:$0xff]  ;;  %v1600_v27 = vld [vmem:[%s12563_s24 + $0x110] sm:$0xe]  ;;  %v16075_v12 = vunpack.c.l.bf16 %v14629_v26 }
 0x19d   : > { %11318 = vmatmul.mubr.f32.gmra.mrb[2].mxu0 %v5893_v3  ;;  %10674 = vmatprep.mubr.f32.mxu1 %v1751_v35  ;;  %v14604_v3 = vld [vmem:[%s12563_s24 + $0x60] sm:$0xff]   ;;  %v14617_v35 = vld [vmem:[%s12563_s24 + $0x68] ss:$16 sps:$4 sm:$0xff]  }
 0x19e   : > { %11320 = vmatprep.mubr.f32.mxu0 %v5895_v53  ;;  %11825 = vmatpush3.bf16.msra.mxu0 %v11822_v43  ;;  %v8541_v43 = vld [vmem:[%s15845_s1 + $0x440] sm:$0xff]  ;;  %v5904_v53 = vsel %vm475_vm0, %v5901_v50, %v5903_v61  ;;  %v16107_v28 = vunpack.c.l.bf16 %v14604_v3  ;;  %v14626_v31 = vunpack.c.h.bf16 %v14604_v3  ;;  %v16077_v36 = vunpack.c.l.bf16 %v14617_v35  ;;  %v16468_v50 = vld [vmem:[#allocation12_spill] sm:$0xff] }
 0x19f   : > { %11827 = vmatprep.subr.bf16.mxu0 %v11826_v47  ;;  %v11834_v42 = vpack.c.bf16 %v8542_v57, %v8541_v43  ;;  %v1765_v61 = vsel %vm1655_vm1, %v16468_v50, %v1764_v23 }
 0x1a0   : > { %10675 = vmatmul.mubr.f32.gmra.mrb[40].mxu1 %v1753_v44  ;;  %v1763_v44 = vsel %vm1655_vm1, %v1761_v58, %v16468_v50  ;;  %v5912_v58 = vrot.slane %v16107_v28, 1  ;;  %v5913_v43 = vrot.slane %v14626_v31, 1 }
 0x1a1   : > { %11321 = vmatmul.mubr.f32.gmra.mrb[4].mxu0 %v5897_v2  ;;  %10677 = vmatprep.mubr.f32.mxu1 %v1756_v51  ;;  %v5907_v2 = vsel %vm475_vm0, %v5905_v45, %v5906_v7  ;;  %v16470_v51 = vunpack.c.l.bf16 %v16469_v11  ;;  %v5915_v45 = vrot.slane %v16077_v36, 1  ;;  %v16473_v11 = vld [vmem:[#allocation17_spill] sm:$0xff] }
 0x1a2   : > { %11323 = vmatprep.mubr.f32.mxu0 %v5900_v46  ;;  %11829 = vmatpush3.bf16.msra.mxu0 %v11826_v47  ;;  %v8544_v47 = vld [vmem:[%s15845_s1 + $0x458] sm:$0xff]  ;;  %v1768_v46 = vrot.slane %v1623_v10, 2  ;;  %v16471_v10 = vld [vmem:[#allocation64_spill] sm:$0xff] }
 0x1a3   : > { %11831 = vmatprep.subr.bf16.mxu0 %v11830_v18  ;;  %v1766_v19 = vrot.slane %v16470_v51, 2  ;;  %v11838_v57 = vpack.c.bf16 %v8544_v47, %v8543_v37  ;;  %v16472_v32 = vunpack.c.l.bf16 %v16471_v10 }
 0x1a4   : > { %10678 = vmatmul.mubr.f32.gmra.mrb[42].mxu1 %v1758_v16  ;;  %v14650_v16 = vld [vmem:[%s12563_s24 + $0x70] sm:$0xff]   ;;  %v1770_v51 = vsel %vm1655_vm1, %v1768_v46, %v16473_v11 }
 0x1a5   : > { %11324 = vmatmul.mubr.f32.gmra.mrb[6].mxu0 %v5902_v62  ;;  %10680 = vmatprep.mubr.f32.mxu1 %v1760_v22  ;;  %v5909_v62 = vsel %vm475_vm0, %v5906_v7, %v5908_v54  ;;  %v1624_v22 = vunpack.c.l.bf16 %v1600_v27  ;;  %v8546_v7 = vld [vmem:[%s15845_s1 + $0x468] sm:$0xff]  ;;  %v1773_v37 = vrot.slane %v16472_v32, 2  ;;  %v16100_v47 = vunpack.c.l.bf16 %v14650_v16  ;;  %v14680_v27 = vld [vmem:[%s12563_s24 + $0x7c] sm:$0x1] }
 0x1a6   : > { %11326 = vmatprep.mubr.f32.mxu0 %v5904_v53  ;;  %11833 = vmatpush3.bf16.msra.mxu0 %v11830_v18  ;;  %v8545_v18 = vld [vmem:[%s15845_s1 + $0x460] sm:$0xff]  ;;  %v1767_v53 = vsel %vm1655_vm1, %v1764_v23, %v1766_v19  ;;  %v14670_v50 = vunpack.c.h.bf16 %v14650_v16  ;;  %v5914_v23 = vsel %vm475_vm0, %v5912_v58, %v5913_v43  ;;  %v16076_v19 = vunpack.c.h.bf16 %v14617_v35  ;;  %v8548_v58 = vld [vmem:[%s15845_s1 + $0x478] sm:$0xff] }
 0x1a7   : > { %11835 = vmatprep.subr.bf16.mxu0 %v11834_v42  ;;  %v11842_v10 = vpack.c.bf16 %v8546_v7, %v8545_v18  ;;  %v1775_v46 = vrot.slane %v1624_v22, 2  ;;  %v1774_v18 = vsel %vm1655_vm1, %v1771_v49, %v1773_v37  ;;  %v5919_v7 = vrot.slane %v16100_v47, 1  ;;  %v14700_v22 = vld [vmem:[%s12563_s24 + $0x88] ss:$16 sps:$4 sm:$0xff]  }
 0x1a8   : > { %10681 = vmatmul.mubr.f32.gmra.mrb[44].mxu1 %v1763_v44  ;;  %v5911_v44 = vsel %vm475_vm0, %v5908_v54, %v5910_v40  ;;  %v1772_v54 = vsel %vm1655_vm1, %v16473_v11, %v1771_v49  ;;  %v5916_v40 = vsel %vm475_vm0, %v5913_v43, %v5915_v45  ;;  %v5920_v43 = vrot.slane %v14670_v50, 1 }
 0x1a9   : > { %11327 = vmatmul.mubr.f32.gmra.mrb[8].mxu0 %v5907_v2  ;;  %10683 = vmatprep.mubr.f32.mxu1 %v1765_v61  ;;  %v5917_v2 = vrot.slane %v16075_v12, 1  ;;  %v1601_v61 = vld [vmem:[%s12563_s24 + $0x120] sm:$0xe]  ;;  %v1778_v32 = vrot.slane %v13557_v34, 2  ;;  %v16080_v11 = vunpack.c.l.bf16 %v14680_v27  ;;  %v5922_v49 = vrot.slane %v16076_v19, 1 }
 0x1aa   : > { %11329 = vmatprep.mubr.f32.mxu0 %v5909_v62  ;;  %11837 = vmatpush3.bf16.msra.mxu0 %v11834_v42  ;;  %v14687_v62 = vld [vmem:[%s12563_s24 + $0x80] sm:$0xff]   ;;  %v8547_v42 = vld [vmem:[%s15845_s1 + $0x470] sm:$0xff]  ;;  %v1625_v12 = vunpack.c.l.bf16 %v1601_v61  ;;  %v14713_v34 = vld [vmem:[%s12563_s24 + $0x8c] sm:$0x1] }
 0x1ab   : > { %11839 = vmatprep.subr.bf16.mxu0 %v11838_v57  ;;  %v16099_v37 = vunpack.c.l.bf16 %v14687_v62  ;;  %v1779_v36 = vsel %vm1655_vm1, %v13968_v63, %v1778_v32 }
 0x1ac   : > { %10684 = vmatmul.mubr.f32.gmra.mrb[46].mxu1 %v1767_v53  ;;  %v5918_v53 = vsel %vm475_vm0, %v5915_v45, %v5917_v2  ;;  %v16079_v45 = vunpack.c.l.bf16 %v14700_v22  ;;  %v5921_v2 = vsel %vm475_vm0, %v5919_v7, %v5920_v43  ;;  %v16081_v7 = vunpack.c.l.bf16 %v14713_v34 }
 0x1ad   : > { %11330 = vmatmul.mubr.f32.gmra.mrb[10].mxu0 %v5911_v44  ;;  %10686 = vmatprep.mubr.f32.mxu1 %v1770_v51  ;;  %v14709_v44 = vunpack.c.h.bf16 %v14687_v62  ;;  %v11846_v51 = vpack.c.bf16 %v8548_v58, %v8547_v42  ;;  %v1782_v42 = vrot.slane %v1625_v12, 2  ;;  %v1602_v58 = vld [vmem:[%s12563_s24 + $0x130] sm:$0xe] }
 0x1ae   : > { %11332 = vmatprep.mubr.f32.mxu0 %v5914_v23  ;;  %11841 = vmatpush3.bf16.msra.mxu0 %v11838_v57  ;;  %v1777_v57 = vsel %vm1655_vm1, %v1775_v46, %v13968_v63  ;;  %v16474_v23 = vld [vmem:[#allocation67_spill] sm:$0xff]  ;;  %v5926_v46 = vrot.slane %v16099_v37, 1  ;;  %v1785_v63 = vrot.slane %v13600_v25, 2  ;;  %v5929_v12 = vrot.slane %v16079_v45, 1  ;;  %v16494_v37 = vld [vmem:[#allocation86_spill] sm:$0xff] }
 0x1af   : > { %11843 = vmatprep.subr.bf16.mxu0 %v11842_v10  ;;  %v16475_v61 = vunpack.c.l.bf16 %v16474_v23  ;;  %v14739_v23 = vunpack.c.h.bf16 %v14726_v9  ;;  %v1784_v25 = vsel %vm1655_vm1, %v1782_v42, %v14008_v5  ;;  %v14758_v42 = vld [vmem:[%s12563_s24 + $0xa0] sm:$0xff]   ;;  %v16495_v47 = vunpack.c.l.bf16 %v16494_v37 }
 0x1b0   : > { %10687 = vmatmul.mubr.f32.gmra.mrb[48].mxu1 %v1772_v54  ;;  %v5924_v54 = vrot.slane %v16080_v11, 1 }
 0x1b1   : > { %11333 = vmatmul.mubr.f32.gmra.mrb[12].mxu0 %v5916_v40  ;;  %10689 = vmatprep.mubr.f32.mxu1 %v1774_v18  ;;  %v1780_v19 = vrot.slane %v16475_v61, 2  ;;  %v5923_v40 = vsel %vm475_vm0, %v5920_v43, %v5922_v49  ;;  %v5927_v18 = vrot.slane %v14709_v44, 1  ;;  %v1626_v43 = vunpack.c.l.bf16 %v1602_v58  ;;  %v16476_v61 = vld [vmem:[#allocation70_spill] sm:$0xff] }
 0x1b2   : > { %11335 = vmatprep.mubr.f32.mxu0 %v5918_v53  ;;  %11845 = vmatpush3.bf16.msra.mxu0 %v11842_v10  ;;  %v16098_v53 = vunpack.c.l.bf16 %v14726_v9  ;;  %v16477_v45 = vunpack.c.l.bf16 %v16476_v61  ;;  %v1603_v58 = vld [vmem:[%s12563_s24 + $0x140] sm:$0xe] }
 0x1b3   : > { %11847 = vmatprep.subr.bf16.mxu0 %v11846_v51  ;;  %v1781_v10 = vsel %vm1655_vm1, %v1778_v32, %v1780_v19  ;;  %v5931_v19 = vrot.slane %v16081_v7, 1  ;;  %v16082_v32 = vunpack.c.h.bf16 %v14700_v22  ;;  %v1627_v61 = vunpack.c.l.bf16 %v1603_v58 }
 0x1b4   : > { %10690 = vmatmul.mubr.f32.gmra.mrb[50].mxu1 %v1777_v57  ;;  %v5925_v57 = vsel %vm475_vm0, %v5922_v49, %v5924_v54  ;;  %v1787_v11 = vrot.slane %v16477_v45, 2  ;;  %v1786_v49 = vsel %vm1655_vm1, %v14008_v5, %v1785_v63  ;;  %v5930_v54 = vsel %vm475_vm0, %v5927_v18, %v5929_v12 }
 0x1b5   : > { %11336 = vmatmul.mubr.f32.gmra.mrb[14].mxu0 %v5921_v2  ;;  %10692 = vmatprep.mubr.f32.mxu1 %v1779_v36  ;;  %v5928_v36 = vsel %vm475_vm0, %v5926_v46, %v5927_v18  ;;  %v14751_v2 = vld [vmem:[%s12563_s24 + $0x9c] sm:$0x1]  ;;  %v5933_v45 = vrot.slane %v16098_v53, 1  ;;  %v14764_v46 = vld [vmem:[%s12563_s24 + $0xa8] ss:$16 sps:$4 sm:$0xff]   ;;  %v1792_v5 = vrot.slane %v16412_v15, 2  ;;  %v14774_v7 = vunpack.c.h.bf16 %v14758_v42 }
 0x1b6   : > { %11338 = vmatprep.mubr.f32.mxu0 %v5923_v40  ;;  %11849 = vmatpush3.bf16.msra.mxu0 %v11846_v51  ;;  %16478 = vst [vmem:[#allocation42_spill] sm:$0xff] %v14751_v2  ;;  %v1789_v51 = vrot.slane %v1626_v43, 2  ;;  %v5934_v40 = vrot.slane %v14739_v23, 1  ;;  %16479 = vst [vmem:[#allocation40_spill] sm:$0xff] %v14764_v46  ;;  %v16087_v18 = vunpack.c.l.bf16 %v14751_v2  ;;  %v5936_v43 = vrot.slane %v16082_v32, 1  ;;  %v16481_v15 = vld [vmem:[#allocation24_spill] sm:$0xff] }
 0x1b7   : > { %v1793_v59 = vsel %vm1655_vm1, %v16481_v15, %v1792_v5  ;;  %v1796_v1 = vrot.slane %v1627_v61, 2  ;;  %v16493_v53 = vld [vmem:[#allocation31_spill] sm:$0xff] }
 0x1b8   : > { %10693 = vmatmul.mubr.f32.gmra.mrb[52].mxu1 %v1781_v10  ;;  %v1788_v10 = vsel %vm1655_vm1, %v1785_v63, %v1787_v11  ;;  %v16090_v11 = vunpack.c.l.bf16 %v14764_v46  ;;  %v14778_v63 = vld [vmem:[%s12563_s24 + $0xac] sm:$0x1] }
 0x1b9   : > { %11339 = vmatmul.mubr.f32.gmra.mrb[16].mxu0 %v5925_v57  ;;  %10695 = vmatprep.mubr.f32.mxu1 %v1784_v25  ;;  %v5932_v57 = vsel %vm475_vm0, %v5929_v12, %v5931_v19  ;;  %v16095_v25 = vunpack.c.l.bf16 %v14758_v42  ;;  %16480 = vst [vmem:[#allocation45_spill] sm:$0xff] %v14778_v63  ;;  %v1791_v12 = vsel %vm1655_vm1, %v1789_v51, %v16481_v15  ;;  %v16482_v19 = vld [vmem:[#allocation75_spill] sm:$0xff] }
 0x1ba   : > { %11341 = vmatprep.mubr.f32.mxu0 %v5928_v36  ;;  %v5935_v36 = vsel %vm475_vm0, %v5933_v45, %v5934_v40  ;;  %v16483_v58 = vunpack.c.l.bf16 %v16482_v19  ;;  %v5941_v45 = vrot.slane %v14774_v7, 1  ;;  %v5943_v61 = vrot.slane %v16090_v11, 1 }
 0x1bb   : > { %v5940_v51 = vrot.slane %v16095_v25, 1  ;;  %v16094_v19 = vunpack.c.l.bf16 %v14791_v29  ;;  %v1801_v11 = vrot.slane %v16486_v20, 2 }
 0x1bc   : > { %10696 = vmatmul.mubr.f32.gmra.mrb[54].mxu1 %v1786_v49  ;;  %v1794_v32 = vrot.slane %v16483_v58, 2  ;;  %v5938_v49 = vrot.slane %v16087_v18, 1  ;;  %v14804_v58 = vunpack.c.h.bf16 %v14791_v29  ;;  %v16484_v18 = vld [vmem:[#allocation27_spill] sm:$0xff] }
 0x1bd   : > { %11342 = vmatmul.mubr.f32.gmra.mrb[18].mxu0 %v5930_v54  ;;  %10698 = vmatprep.mubr.f32.mxu1 %v1788_v10  ;;  %v5937_v54 = vsel %vm475_vm0, %v5934_v40, %v5936_v43  ;;  %v16091_v10 = vunpack.c.l.bf16 %v14778_v63  ;;  %v1628_v40 = vunpack.c.l.bf16 %v1604_v38  ;;  %v16093_v38 = vunpack.c.h.bf16 %v14764_v46 }
 0x1be   : > { %11344 = vmatprep.mubr.f32.mxu0 %v5932_v57  ;;  %v1799_v57 = vrot.slane %v16415_v6, 2  ;;  %v1795_v15 = vsel %vm1655_vm1, %v1792_v5, %v1794_v32  ;;  %v1798_v6 = vsel %vm1655_vm1, %v1796_v1, %v16484_v18  ;;  %v14816_v5 = vld [vmem:[%s12563_s24 + $0xbc] sm:$0x1]  ;;  %v5944_v1 = vsel %vm475_vm0, %v5941_v45, %v5943_v61 }
 0x1bf   : > { %v5945_v32 = vrot.slane %v16091_v10, 1  ;;  %16487 = vst [vmem:[#allocation43_spill] sm:$0xff] %v14816_v5  ;;  %v1803_v20 = vrot.slane %v1628_v40, 2  ;;  %v5947_v30 = vrot.slane %v16094_v19, 1  ;;  %v5950_v40 = vrot.slane %v16093_v38, 1 }
 0x1c0   : > { %10699 = vmatmul.mubr.f32.gmra.mrb[56].mxu1 %v1791_v12  ;;  %v5939_v12 = vsel %vm475_vm0, %v5936_v43, %v5938_v49  ;;  %v1800_v43 = vsel %vm1655_vm1, %v16484_v18, %v1799_v57  ;;  %v14823_v49 = vld [vmem:[%s12563_s24 + $0xc0] sm:$0xff]   ;;  %v16096_v18 = vunpack.c.l.bf16 %v14816_v5 }
 0x1c1   : > { %11345 = vmatmul.mubr.f32.gmra.mrb[20].mxu0 %v5935_v36  ;;  %10701 = vmatprep.mubr.f32.mxu1 %v1793_v59  ;;  %v5942_v59 = vsel %vm475_vm0, %v5940_v51, %v5941_v45  ;;  %v1605_v36 = vld [vmem:[%s12563_s24 + $0x160] sm:$0xe]  ;;  %v1802_v51 = vsel %vm1655_vm1, %v1799_v57, %v1801_v11  ;;  %v14832_v45 = vld [vmem:[%s12563_s24 + $0xc8] ss:$16 sps:$4 sm:$0xff]   ;;  %v14842_v11 = vld [vmem:[%s12563_s24 + $0xcc] sm:$0x1] }
 0x1c2   : > { %11347 = vmatprep.mubr.f32.mxu0 %v5937_v54  ;;  %v5948_v54 = vrot.slane %v14804_v58, 1  ;;  %v1629_v10 = vunpack.c.l.bf16 %v1605_v36  ;;  %16488 = vst [vmem:[#allocation47_spill] sm:$0xff] %v14832_v45  ;;  %16489 = vst [vmem:[#allocation46_spill] sm:$0xff] %v14842_v11  ;;  %v16103_v38 = vunpack.c.l.bf16 %v14832_v45 }
 0x1c4   : > { %10702 = vmatmul.mubr.f32.gmra.mrb[58].mxu1 %v1795_v15  ;;  %v1806_v15 = vrot.slane %v13718_v39, 2  ;;  %v16490_v39 = vld [vmem:[#allocation28_spill] sm:$0xff]  ;;  %v1810_v25 = vrot.slane %v1629_v10, 2 }
 0x1c5   : > { %11348 = vmatmul.mubr.f32.gmra.mrb[22].mxu0 %v5939_v12  ;;  %10704 = vmatprep.mubr.f32.mxu1 %v1798_v6  ;;  %v5946_v12 = vsel %vm475_vm0, %v5943_v61, %v5945_v32  ;;  %v16097_v6 = vunpack.c.l.bf16 %v14823_v49  ;;  %v1805_v57 = vsel %vm1655_vm1, %v1803_v20, %v16490_v39  ;;  %v5949_v61 = vsel %vm475_vm0, %v5947_v30, %v5948_v54  ;;  %v16491_v32 = vld [vmem:[#allocation83_spill] sm:$0xff] }
 0x1c6   : > { %11350 = vmatprep.mubr.f32.mxu0 %v5942_v59  ;;  %v14839_v59 = vunpack.c.h.bf16 %v14823_v49  ;;  %v16492_v36 = vunpack.c.l.bf16 %v16491_v32  ;;  %v1807_v19 = vsel %vm1655_vm1, %v16490_v39, %v1806_v15  ;;  %v5951_v20 = vsel %vm475_vm0, %v5948_v54, %v5950_v40 }
 0x1c7   : > { %v5954_v30 = vrot.slane %v16097_v6, 1  ;;  %v5957_v39 = vrot.slane %v16103_v38, 1 }
 0x1c8   : > { %10705 = vmatmul.mubr.f32.gmra.mrb[60].mxu1 %v1800_v43  ;;  %v1808_v33 = vrot.slane %v16492_v36, 2  ;;  %v5952_v43 = vrot.slane %v16096_v18, 1  ;;  %v5955_v32 = vrot.slane %v14839_v59, 1  ;;  %v16101_v36 = vunpack.c.l.bf16 %v14842_v11 }
 0x1c9   : > { %11351 = vmatmul.mubr.f32.gmra.mrb[24].mxu0 %v5944_v1  ;;  %10707 = vmatprep.mubr.f32.mxu1 %v1802_v51  ;;  %v1606_v1 = vld [vmem:[%s12563_s24 + $0x170] sm:$0xe] }
 0x1ca   : > { %11353 = vmatprep.mubr.f32.mxu0 %v5946_v12  ;;  %v14856_v51 = vld [vmem:[%s12563_s24 + $0xd0] sm:$0xff]   ;;  %v1813_v12 = vrot.slane %v13772_v52, 2  ;;  %v1809_v10 = vsel %vm1655_vm1, %v1806_v15, %v1808_v33  ;;  %v1630_v54 = vunpack.c.l.bf16 %v1606_v1  ;;  %v5953_v6 = vsel %vm475_vm0, %v5950_v40, %v5952_v43  ;;  %v14881_v1 = vld [vmem:[%s12563_s24 + $0xdc] sm:$0x1]  ;;  %v14886_v40 = vld [vmem:[%s12563_s24 + $0xe0] sm:$0xff]  }
 0x1cb   : > { %v16104_v18 = vunpack.c.l.bf16 %v14856_v51  ;;  %v1815_v52 = vrot.slane %v16495_v47, 2  ;;  %v5956_v33 = vsel %vm475_vm0, %v5954_v30, %v5955_v32  ;;  %v5959_v15 = vrot.slane %v16101_v36, 1  ;;  %16496 = vst [vmem:[#allocation50_spill] sm:$0xff] %v14881_v1  ;;  %v14896_v36 = vld [vmem:[%s12563_s24 + $0x18] ss:$208 sps:$4 sm:$0xff]  }
 0x1cc   : > { %10708 = vmatmul.mubr.f32.gmra.mrb[62].mxu1 %v1805_v57  ;;  %v1812_v57 = vsel %vm1655_vm1, %v1810_v25, %v16493_v53  ;;  %v1814_v25 = vsel %vm1655_vm1, %v16493_v53, %v1813_v12  ;;  %v5958_v47 = vsel %vm475_vm0, %v5955_v32, %v5957_v39  ;;  %v1817_v37 = vrot.slane %v1630_v54, 2  ;;  %16497 = vst [vmem:[#allocation51_spill] sm:$0xff] %v14896_v36 }
 0x1cd   : > { %11354 = vmatmul.mubr.f32.gmra.mrb[26].mxu0 %v5949_v61  ;;  %10710 = vmatprep.mubr.f32.mxu1 %v1807_v19  ;;  %v14874_v19 = vunpack.c.h.bf16 %v14856_v51  ;;  %v16102_v61 = vunpack.c.h.bf16 %v14832_v45  ;;  %v5961_v43 = vrot.slane %v16104_v18, 1  ;;  %v16105_v53 = vunpack.c.l.bf16 %v14881_v1  ;;  %v15026_v45 = vld [vmem:[%s12563_s24 + $0x12c] sm:$0x1] }
 0x1ce   : > { %11356 = vmatprep.mubr.f32.mxu0 %v5951_v20  ;;  %v1816_v20 = vsel %vm1655_vm1, %v1813_v12, %v1815_v52  ;;  %v16106_v54 = vunpack.c.l.bf16 %v14886_v40  ;;  %v14906_v12 = vld [vmem:[%s12563_s24 + $0xec] sm:$0x1]  ;;  %16517 = vst [vmem:[#allocation16_spill] sm:$0xff] %v15026_v45 }
 0x1cf   : > { %v5962_v30 = vrot.slane %v14874_v19, 1  ;;  %v5964_v32 = vrot.slane %v16102_v61, 1  ;;  %16498 = vst [vmem:[#allocation53_spill] sm:$0xff] %v14906_v12  ;;  %v16108_v61 = vunpack.c.h.bf16 %v14896_v36  ;;  %v5966_v18 = vrot.slane %v16105_v53, 1 }
 0x1d0   : > { %10711 = vmatmul.mubr.f32.gmra.mrb[64].mxu1 %v1809_v10  ;;  %v1820_v10 = vrot.slane %v13804_v60, 2  ;;  %v16499_v60 = vld [vmem:[#allocation39_spill] sm:$0xff] }
 0x1d1   : > { %11357 = vmatmul.mubr.f32.gmra.mrb[28].mxu0 %v5953_v6  ;;  %10713 = vmatprep.mubr.f32.mxu1 %v1812_v57  ;;  %v5960_v6 = vsel %vm475_vm0, %v5957_v39, %v5959_v15  ;;  %v14903_v57 = vunpack.c.h.bf16 %v14886_v40  ;;  %v1819_v52 = vsel %vm1655_vm1, %v1817_v37, %v16499_v60  ;;  %v5963_v38 = vsel %vm475_vm0, %v5961_v43, %v5962_v30  ;;  %v14928_v43 = vld [vmem:[%s12563_s24 + $0x28] ss:$208 sps:$4 sm:$0xff]  }
 0x1d2   : > { %11359 = vmatprep.mubr.f32.mxu0 %v5956_v33  ;;  %v16500_v33 = vld [vmem:[#allocation89_spill] sm:$0xff]  ;;  %v5968_v37 = vrot.slane %v16106_v54, 1  ;;  %16502 = vst [vmem:[#allocation55_spill] sm:$0xff] %v14928_v43  ;;  %v5967_v54 = vsel %vm475_vm0, %v5964_v32, %v5966_v18 }
 0x1d3   : > { %v16501_v39 = vunpack.c.l.bf16 %v16500_v33  ;;  %v5969_v33 = vrot.slane %v14903_v57, 1 }
 0x1d4   : > { %10714 = vmatmul.mubr.f32.gmra.mrb[66].mxu1 %v1814_v25  ;;  %v1821_v25 = vsel %vm1655_vm1, %v16499_v60, %v1820_v10 }
 0x1d5   : > { %11360 = vmatmul.mubr.f32.gmra.mrb[30].mxu0 %v5958_v47  ;;  %10716 = vmatprep.mubr.f32.mxu1 %v1816_v20  ;;  %v1822_v15 = vrot.slane %v16501_v39, 2  ;;  %v9379_v47 = vld [vmem:[%s12563_s24 + $0x10] sm:$0xff]   ;;  %v5965_v20 = vsel %vm475_vm0, %v5962_v30, %v5964_v32  ;;  %v5971_v30 = vrot.slane %v16108_v61, 1  ;;  %v9380_v32 = vld [vmem:[%s12563_s24 + $0x20] sm:$0xff]  }
 0x1d6   : > { %11362 = vmatprep.mubr.f32.mxu0 %v5960_v6  ;;  %v14925_v6 = vld [vmem:[%s12563_s24 + $0xf0] sm:$0xff]   ;;  %v8794_v53 = vunpack.c.l.bf16 %v9379_v47  ;;  %v8795_v61 = vunpack.c.h.bf16 %v9379_v47 }
 0x1d7   : > { %v1823_v60 = vsel %vm1655_vm1, %v1820_v10, %v1822_v15  ;;  %v16110_v28 = vunpack.c.l.bf16 %v14925_v6  ;;  %v14936_v39 = vunpack.c.h.bf16 %v14925_v6  ;;  %v14943_v15 = vld [vmem:[%s12563_s24 + $0xfc] sm:$0x1]  ;;  %v5972_v18 = vsel %vm475_vm0, %v5969_v33, %v5971_v30 }
 0x1d8   : > { %10717 = vmatmul.mubr.f32.gmra.mrb[68].mxu1 %v1819_v52  ;;  %v5970_v52 = vsel %vm475_vm0, %v5968_v37, %v5969_v33  ;;  %16504 = vst [vmem:[#allocation71_spill] sm:$0xff] %v14943_v15  ;;  %v2485_v37 = vunpack.c.l.bf16 %v14896_v36 }
 0x1d9   : > { %11363 = vmatmul.mubr.f32.gmra.mrb[32].mxu0 %v5963_v38  ;;  %10719 = vmatprep.mubr.f32.mxu1 %v1821_v25  ;;  %v16503_v38 = vunpack.c.l.bf16 %v14906_v12  ;;  %v5976_v10 = vrot.slane %v14936_v39, 1  ;;  %v14966_v12 = vld [vmem:[%s12563_s24 + $0x10c] sm:$0x1] }
 0x1da   : > { %11365 = vmatprep.mubr.f32.mxu0 %v5965_v20  ;;  %v14946_v20 = vld [vmem:[%s12563_s24 + $0x100] sm:$0xff]   ;;  %16507 = vst [vmem:[#allocation76_spill] sm:$0xff] %v14966_v12 }
 0x1db   : > { %v5973_v25 = vrot.slane %v16503_v38, 1  ;;  %v5975_v38 = vrot.slane %v16110_v28, 1  ;;  %v14960_v33 = vunpack.c.h.bf16 %v14946_v20  ;;  %v8798_v28 = vunpack.c.l.bf16 %v9380_v32 }
 0x1dc   : > { %10720 = vmatmul.mubr.f32.gmra.mrb[70].mxu1 %v1823_v60  ;;  %v16115_v60 = vunpack.c.l.bf16 %v14943_v15  ;;  %v16508_v1 = vunpack.c.l.bf16 %v14946_v20 }
 0x1dd   : > { %11366 = vmatmul.mubr.f32.gmra.mrb[34].mxu0 %v5967_v54  ;;  %10754 = vmatprep.mubr.f32.mxu1 %v8794_v53  ;;  %v5974_v47 = vsel %vm475_vm0, %v5971_v30, %v5973_v25  ;;  %v16505_v54 = vunpack.c.h.bf16 %v14928_v43  ;;  %v8799_v30 = vunpack.c.h.bf16 %v9380_v32  ;;  %v5977_v25 = vsel %vm475_vm0, %v5975_v38, %v5976_v10  ;;  %v9381_v53 = vld [vmem:[%s12563_s24 + $0x30] sm:$0xff]  }
 0x1de   : > { %11368 = vmatprep.mubr.f32.mxu0 %v5970_v52  ;;  %v14963_v52 = vld [vmem:[%s12563_s24 + $0x38] ss:$208 sps:$4 sm:$0xff]   ;;  %v5982_v11 = vrot.slane %v16508_v1, 1  ;;  %v14980_v32 = vld [vmem:[%s12563_s24 + $0x110] sm:$0xff]   ;;  %v2488_v38 = vunpack.c.l.bf16 %v14928_v43  ;;  %v15000_v43 = vld [vmem:[%s12563_s24 + $0x11c] sm:$0x1] }
 0x1df   : > { %v5978_v17 = vrot.slane %v16505_v54, 1  ;;  %16506 = vst [vmem:[#allocation74_spill] sm:$0xff] %v14963_v52  ;;  %v5980_v54 = vrot.slane %v16115_v60, 1  ;;  %v16118_v36 = vunpack.c.h.bf16 %v14963_v52  ;;  %v14992_v15 = vunpack.c.h.bf16 %v14980_v32  ;;  %16512 = vst [vmem:[#allocation11_spill] sm:$0xff] %v15000_v43 }
 0x1e0   : > { %10755 = vmatmul.mubr.f32.vlgmr.msra.gmra.mrb[0].mxu1 %v8795_v61 }
 0x1e1   : > { %11369 = vmatmul.mubr.f32.gmra.mrb[36].mxu0 %v5972_v18  ;;  %11858 = vmatpush3.bf16.msra.mxu1 %v16439_v0  ;;  %v5979_v61 = vsel %vm475_vm0, %v5976_v10, %v5978_v17  ;;  %v5983_v18 = vrot.slane %v14960_v33, 1  ;;  %v8802_v10 = vunpack.c.l.bf16 %v9381_v53  ;;  %v5981_v1 = vsel %vm475_vm0, %v5978_v17, %v5980_v54  ;;  %v16513_v17 = vld [vmem:[#allocation4_spill] sm:$0xff] }
 0x1e2   : > { %10757 = vmatprep.mubr.f32.mxu1 %v2485_v37  ;;  %11371 = vmatprep.mubr.f32.mxu0 %v5974_v47  ;;  %v16509_v37 = vld [vmem:[#allocation3_spill] sm:$0xff]  ;;  %v5985_v60 = vrot.slane %v16118_v36, 1  ;;  %v16121_v0 = vunpack.c.l.bf16 %v14980_v32  ;;  %v8803_v54 = vunpack.c.h.bf16 %v9381_v53  ;;  %v15004_v36 = vld [vmem:[%s12563_s24 + $0x120] sm:$0xff]  }
 0x1e3   : > { %11851 = vmatprep.subr.bf16.mxu1 %v16509_v37  ;;  %v14985_v47 = vld [vmem:[%s12563_s24 + $0x48] ss:$208 sps:$4 sm:$0xff]   ;;  %v16519_v63 = vunpack.c.l.bf16 %v15004_v36 }
 0x1e4   : > { %10758 = vmatmul.mubr.f32.gmra.mrb[2].mxu1 %v8798_v28  ;;  %16510 = vst [vmem:[#allocation80_spill] sm:$0xff] %v14985_v47  ;;  %v5984_v28 = vsel %vm475_vm0, %v5982_v11, %v5983_v18  ;;  %v9382_v11 = vld [vmem:[%s12563_s24 + $0x40] sm:$0xff]  }
 0x1e5   : > { %11372 = vmatmul.mubr.f32.gmra.mrb[38].mxu0 %v5977_v25  ;;  %10760 = vmatprep.mubr.f32.mxu1 %v8799_v30  ;;  %v16511_v25 = vunpack.c.l.bf16 %v14966_v12  ;;  %v5990_v12 = vrot.slane %v14992_v15, 1  ;;  %v5996_v46 = vrot.slane %v16519_v63, 1 }
 0x1e6   : > { %11374 = vmatprep.mubr.f32.mxu0 %v5979_v61  ;;  %11859 = vmatpush3.bf16.msra.mxu1 %v16509_v37  ;;  %v2491_v37 = vunpack.c.l.bf16 %v14963_v52  ;;  %v5989_v61 = vrot.slane %v16121_v0, 1  ;;  %v16516_v0 = vld [vmem:[#allocation5_spill] sm:$0xff]  ;;  %v9383_v52 = vld [vmem:[%s12563_s24 + $0x50] sm:$0xff]  }
 0x1e7   : > { %v5987_v30 = vrot.slane %v16511_v25, 1  ;;  %11852 = vmatprep.subr.bf16.mxu1 %v16513_v17  ;;  %v5986_v25 = vsel %vm475_vm0, %v5983_v18, %v5985_v60  ;;  %v15022_v18 = vld [vmem:[%s12563_s24 + $0x58] ss:$208 sps:$4 sm:$0xff]  }
 0x1e8   : > { %10761 = vmatmul.mubr.f32.gmra.mrb[4].mxu1 %v2488_v38  ;;  %16515 = vst [vmem:[#allocation52_spill] sm:$0xff] %v15022_v18  ;;  %v8806_v38 = vunpack.c.l.bf16 %v9382_v11  ;;  %v16130_v5 = vunpack.c.h.bf16 %v15022_v18 }
 0x1e9   : > { %11375 = vmatmul.mubr.f32.gmra.mrb[40].mxu0 %v5981_v1  ;;  %10763 = vmatprep.mubr.f32.mxu1 %v8802_v10  ;;  %v5988_v53 = vsel %vm475_vm0, %v5985_v60, %v5987_v30  ;;  %v16514_v10 = vunpack.c.h.bf16 %v14985_v47  ;;  %v8807_v60 = vunpack.c.h.bf16 %v9382_v11  ;;  %v5991_v30 = vsel %vm475_vm0, %v5989_v61, %v5990_v12  ;;  %v16520_v61 = vld [vmem:[#allocation8_spill] sm:$0xff] }
 0x1ea   : > { %11377 = vmatprep.mubr.f32.mxu0 %v5984_v28  ;;  %11860 = vmatpush3.bf16.msra.mxu1 %v16513_v17  ;;  %v15019_v28 = vunpack.c.h.bf16 %v15004_v36  ;;  %v16518_v17 = vunpack.c.l.bf16 %v15000_v43 }
 0x1eb   : > { %v5992_v1 = vrot.slane %v16514_v10, 1  ;;  %11853 = vmatprep.subr.bf16.mxu1 %v16516_v0 }
 0x1ec   : > { %10764 = vmatmul.mubr.f32.gmra.mrb[6].mxu1 %v8803_v54  ;;  %v5994_v10 = vrot.slane %v16518_v17, 1  ;;  %v15045_v17 = vld [vmem:[%s12563_s24 + $0x68] ss:$208 sps:$4 sm:$0xff]  }
 0x1ed   : > { %11378 = vmatmul.mubr.f32.gmra.mrb[42].mxu0 %v5986_v25  ;;  %10766 = vmatprep.mubr.f32.mxu1 %v2491_v37  ;;  %v5993_v54 = vsel %vm475_vm0, %v5990_v12, %v5992_v1  ;;  %v5997_v37 = vrot.slane %v15019_v28, 1  ;;  %v15040_v25 = vld [vmem:[%s12563_s24 + $0x130] sm:$0xff]   ;;  %16521 = vst [vmem:[#allocation57_spill] sm:$0xff] %v15045_v17  ;;  %v8810_v12 = vunpack.c.l.bf16 %v9383_v52 }
 0x1ee   : > { %11380 = vmatprep.mubr.f32.mxu0 %v5988_v53  ;;  %11861 = vmatpush3.bf16.msra.mxu1 %v16516_v0  ;;  %v2494_v53 = vunpack.c.l.bf16 %v14985_v47  ;;  %v5995_v63 = vsel %vm475_vm0, %v5992_v1, %v5994_v10  ;;  %v5999_v0 = vrot.slane %v16130_v5, 1  ;;  %v16132_v11 = vunpack.c.l.bf16 %v15040_v25  ;;  %v16524_v1 = vld [vmem:[#allocation9_spill] sm:$0xff]  ;;  %v15064_v5 = vld [vmem:[%s12563_s24 + $0x140] sm:$0xff]  }
 0x1ef   : > { %11854 = vmatprep.subr.bf16.mxu1 %v16520_v61  ;;  %v15052_v43 = vunpack.c.h.bf16 %v15040_v25  ;;  %v8811_v10 = vunpack.c.h.bf16 %v9383_v52 }
 0x1f0   : > { %10767 = vmatmul.mubr.f32.gmra.mrb[8].mxu1 %v8806_v38  ;;  %v5998_v38 = vsel %vm475_vm0, %v5996_v46, %v5997_v37  ;;  %v6000_v46 = vsel %vm475_vm0, %v5997_v37, %v5999_v0  ;;  %v15081_v37 = vld [vmem:[%s12563_s24 + $0x78] ss:$208 sps:$4 sm:$0xff]  }
 0x1f1   : > { %11381 = vmatmul.mubr.f32.gmra.mrb[44].mxu0 %v5991_v30  ;;  %10769 = vmatprep.mubr.f32.mxu1 %v8807_v60  ;;  %v16522_v30 = vunpack.c.l.bf16 %v15026_v45  ;;  %v6004_v60 = vrot.slane %v15052_v43, 1  ;;  %16526 = vst [vmem:[#allocation60_spill] sm:$0xff] %v15081_v37 }
 0x1f2   : > { %11383 = vmatprep.mubr.f32.mxu0 %v5993_v54  ;;  %11862 = vmatpush3.bf16.msra.mxu1 %v16520_v61  ;;  %v15060_v54 = vld [vmem:[%s12563_s24 + $0x13c] sm:$0x1]  ;;  %v2497_v61 = vunpack.c.l.bf16 %v15022_v18  ;;  %v15085_v18 = vld [vmem:[%s12563_s24 + $0x14c] sm:$0x1] }
 0x1f3   : > { %v6001_v47 = vrot.slane %v16522_v30, 1  ;;  %16523 = vst [vmem:[#allocation20_spill] sm:$0xff] %v15060_v54  ;;  %11855 = vmatprep.subr.bf16.mxu1 %v16524_v1  ;;  %v6003_v30 = vrot.slane %v16132_v11, 1  ;;  %v16135_v45 = vunpack.c.l.bf16 %v15060_v54  ;;  %v16527_v11 = vld [vmem:[#allocation10_spill] sm:$0xff]  ;;  %16528 = vst [vmem:[#allocation23_spill] sm:$0xff] %v15085_v18 }
 0x1f4   : > { %10770 = vmatmul.mubr.f32.gmra.mrb[10].mxu1 %v2494_v53  ;;  %v16525_v53 = vunpack.c.h.bf16 %v15045_v17 }
 0x1f5   : > { %11384 = vmatmul.mubr.f32.gmra.mrb[46].mxu0 %v5995_v63  ;;  %10772 = vmatprep.mubr.f32.mxu1 %v8810_v12  ;;  %v6002_v52 = vsel %vm475_vm0, %v5999_v0, %v6001_v47  ;;  %v16136_v12 = vunpack.c.l.bf16 %v15064_v5  ;;  %v6005_v47 = vsel %vm475_vm0, %v6003_v30, %v6004_v60  ;;  %v6008_v0 = vrot.slane %v16135_v45, 1  ;;  %v15105_v45 = vld [vmem:[%s12563_s24 + $0x88] ss:$208 sps:$4 sm:$0xff]  }
 0x1f6   : > { %11386 = vmatprep.mubr.f32.mxu0 %v5998_v38  ;;  %11863 = vmatpush3.bf16.msra.mxu1 %v16524_v1  ;;  %v6006_v63 = vrot.slane %v16525_v53, 1  ;;  %v15078_v38 = vunpack.c.h.bf16 %v15064_v5  ;;  %v16139_v1 = vunpack.c.h.bf16 %v15081_v37  ;;  %v16531_v30 = vunpack.c.l.bf16 %v14604_v3  ;;  %16532 = vst [vmem:[#allocation26_spill] sm:$0xff] %v15105_v45 }
 0x1f7   : > { %11856 = vmatprep.subr.bf16.mxu1 %v16527_v11 }
 0x1f8   : > { %10773 = vmatmul.mubr.f32.gmra.mrb[12].mxu1 %v8811_v10  ;;  %v6007_v53 = vsel %vm475_vm0, %v6004_v60, %v6006_v63  ;;  %v6010_v10 = vrot.slane %v16136_v12, 1  ;;  %v6011_v2 = vrot.slane %v15078_v38, 1  ;;  %v6009_v60 = vsel %vm475_vm0, %v6006_v63, %v6008_v0  ;;  %v15124_v63 = vld [vmem:[%s12563_s24 + $0x160] sm:$0xff]  }
 0x1f9   : > { %11387 = vmatmul.mubr.f32.gmra.mrb[48].mxu0 %v6000_v46  ;;  %10775 = vmatprep.mubr.f32.mxu1 %v2497_v61  ;;  %v15098_v61 = vld [vmem:[%s12563_s24 + $0x150] sm:$0xff]   ;;  %v6013_v12 = vrot.slane %v16139_v1, 1  ;;  %v16536_v0 = vunpack.c.l.bf16 %v14650_v16  ;;  %v16147_v16 = vunpack.c.l.bf16 %v15124_v63 }
 0x1fa   : > { %11389 = vmatprep.mubr.f32.mxu0 %v6002_v52  ;;  %11864 = vmatpush3.bf16.msra.mxu1 %v16527_v11  ;;  %16529 = vst [vmem:[#allocation63_spill] sm:$0xff] %v15098_v61  ;;  %v16530_v52 = vld [vmem:[#allocation14_spill] sm:$0xff]  ;;  %v2500_v11 = vunpack.c.l.bf16 %v15045_v17  ;;  %v16141_v46 = vunpack.c.l.bf16 %v15098_v61  ;;  %v15113_v54 = vunpack.c.h.bf16 %v15098_v61  ;;  %v6012_v3 = vsel %vm475_vm0, %v6010_v10, %v6011_v2 }
 0x1fb   : > { %11857 = vmatprep.subr.bf16.mxu1 %v16530_v52  ;;  %v6014_v10 = vsel %vm475_vm0, %v6011_v2, %v6013_v12  ;;  %v15146_v2 = vld [vmem:[%s12563_s24 + $0x16c] sm:$0x1] }
 0x1fc   : > { %10776 = vmatmul.mubr.f32.gmra.mrb[14].mxu1 %v16531_v30  ;;  %16533 = vst [vmem:[#allocation66_spill] sm:$0xff] %v15113_v54  ;;  %v16534_v30 = vunpack.c.l.bf16 %v15085_v18  ;;  %v6018_v1 = vrot.slane %v15113_v54, 1  ;;  %v16537_v18 = vunpack.c.h.bf16 %v15105_v45  ;;  %16539 = vst [vmem:[#allocation32_spill] sm:$0xff] %v15146_v2 }
 0x1fd   : > { %11390 = vmatmul.mubr.f32.gmra.mrb[50].mxu0 %v6005_v47  ;;  %10778 = vmatprep.mubr.f32.mxu1 %v14626_v31 }
 0x1fe   : > { %11392 = vmatprep.mubr.f32.mxu0 %v6007_v53  ;;  %11865 = vmatpush3.bf16.msra.mxu1 %v16530_v52  ;;  %v6015_v47 = vrot.slane %v16534_v30, 1  ;;  %v15121_v53 = vld [vmem:[%s12563_s24 + $0x15c] sm:$0x1]  ;;  %v2503_v52 = vunpack.c.l.bf16 %v15081_v37  ;;  %v6017_v30 = vrot.slane %v16141_v46, 1  ;;  %v6024_v37 = vrot.slane %v16147_v16, 1 }
 0x1ff   : > { %16535 = vst [vmem:[#allocation30_spill] sm:$0xff] %v15121_v53  ;;  %v16146_v17 = vunpack.c.l.bf16 %v15121_v53 }
 0x200   : > { %10779 = vmatmul.mubr.f32.gmra.mrb[16].mxu1 %v2500_v11  ;;  %v6016_v11 = vsel %vm475_vm0, %v6013_v12, %v6015_v47  ;;  %v6019_v12 = vsel %vm475_vm0, %v6017_v30, %v6018_v1  ;;  %v2506_v30 = vunpack.c.l.bf16 %v15105_v45  ;;  %v15179_v45 = vld [vmem:[%s12563_s24 + $0x17c] sm:$0x1] }
 0x201   : > { %11393 = vmatmul.mubr.f32.gmra.mrb[52].mxu0 %v6009_v60  ;;  %10781 = vmatprep.mubr.f32.mxu1 %v16536_v0  ;;  %v6020_v60 = vrot.slane %v16537_v18, 1  ;;  %v15139_v0 = vunpack.c.h.bf16 %v15124_v63  ;;  %v6022_v18 = vrot.slane %v16146_v17, 1  ;;  %16545 = vst [vmem:[#allocation78_spill] sm:$0xff] %v15179_v45 }
 0x202   : > { %11395 = vmatprep.mubr.f32.mxu0 %v6012_v3  ;;  %v15142_v3 = vld [vmem:[%s12563_s24 + $0x98] ss:$208 sps:$4 sm:$0xff]  }
 0x203   : > { %16538 = vst [vmem:[#allocation69_spill] sm:$0xff] %v15142_v3  ;;  %v16150_v47 = vunpack.c.h.bf16 %v15142_v3  ;;  %v6021_v46 = vsel %vm475_vm0, %v6018_v1, %v6020_v60  ;;  %v6025_v54 = vrot.slane %v15139_v0, 1  ;;  %v6023_v1 = vsel %vm475_vm0, %v6020_v60, %v6022_v18 }
 0x204   : > { %10782 = vmatmul.mubr.f32.gmra.mrb[18].mxu1 %v14670_v50  ;;  %v16546_v60 = vunpack.c.l.bf16 %v14726_v9  ;;  %v2509_v18 = vunpack.c.l.bf16 %v15142_v3 }
 0x205   : > { %11396 = vmatmul.mubr.f32.gmra.mrb[54].mxu0 %v6014_v10  ;;  %10784 = vmatprep.mubr.f32.mxu1 %v2503_v52  ;;  %v15158_v10 = vld [vmem:[%s12563_s24 + $0x170] sm:$0xff]   ;;  %v16541_v52 = vunpack.c.l.bf16 %v14687_v62  ;;  %v6027_v17 = vrot.slane %v16150_v47, 1  ;;  %v6026_v62 = vsel %vm475_vm0, %v6024_v37, %v6025_v54 }
 0x206   : > { %11398 = vmatprep.mubr.f32.mxu0 %v6016_v11  ;;  %16540 = vst [vmem:[#allocation2_spill] sm:$0xff] %v15158_v10  ;;  %v15164_v11 = vld [vmem:[%s12563_s24 + $0xa8] ss:$208 sps:$4 sm:$0xff]   ;;  %v16152_v16 = vunpack.c.l.bf16 %v15158_v10  ;;  %v15172_v61 = vunpack.c.h.bf16 %v15158_v10 }
 0x207   : > { %16542 = vst [vmem:[#allocation73_spill] sm:$0xff] %v15164_v11  ;;  %v6028_v37 = vsel %vm475_vm0, %v6025_v54, %v6027_v17  ;;  %v15204_v54 = vld [vmem:[%s12563_s24 + $0x18c] sm:$0x1] }
 0x208   : > { %10785 = vmatmul.mubr.f32.gmra.mrb[20].mxu1 %v16541_v52  ;;  %16543 = vst [vmem:[#allocation35_spill] sm:$0xff] %v15172_v61  ;;  %v16544_v52 = vunpack.c.l.bf16 %v15146_v2  ;;  %v6032_v47 = vrot.slane %v15172_v61, 1  ;;  %v16547_v2 = vunpack.c.h.bf16 %v15164_v11  ;;  %16549 = vst [vmem:[#allocation82_spill] sm:$0xff] %v15204_v54 }
 0x209   : > { %11399 = vmatmul.mubr.f32.gmra.mrb[56].mxu0 %v6019_v12  ;;  %10787 = vmatprep.mubr.f32.mxu1 %v14709_v44  ;;  %v16157_v12 = vunpack.c.l.bf16 %v15179_v45 }
 0x20a   : > { %11401 = vmatprep.mubr.f32.mxu0 %v6021_v46  ;;  %v6029_v53 = vrot.slane %v16544_v52, 1  ;;  %v15182_v46 = vld [vmem:[%s12563_s24 + $0x180] sm:$0xff]   ;;  %v6031_v52 = vrot.slane %v16152_v16, 1 }
 0x20b   : > { %v16158_v9 = vunpack.c.l.bf16 %v15182_v46 }
 0x20c   : > { %10788 = vmatmul.mubr.f32.gmra.mrb[22].mxu1 %v2506_v30  ;;  %v6030_v30 = vsel %vm475_vm0, %v6027_v17, %v6029_v53  ;;  %v6033_v17 = vsel %vm475_vm0, %v6031_v52, %v6032_v47  ;;  %v6036_v53 = vrot.slane %v16157_v12, 1  ;;  %v2512_v52 = vunpack.c.l.bf16 %v15164_v11 }
 0x20d   : > { %11402 = vmatmul.mubr.f32.gmra.mrb[58].mxu0 %v6023_v1  ;;  %10790 = vmatprep.mubr.f32.mxu1 %v16546_v60  ;;  %v6034_v1 = vrot.slane %v16547_v2, 1  ;;  %v15197_v60 = vunpack.c.h.bf16 %v15182_v46  ;;  %v6038_v3 = vrot.slane %v16158_v9, 1 }
 0x20e   : > { %11404 = vmatprep.mubr.f32.mxu0 %v6026_v62  ;;  %v15200_v62 = vld [vmem:[%s12563_s24 + $0xb8] ss:$208 sps:$4 sm:$0xff]  }
 0x20f   : > { %16548 = vst [vmem:[#allocation38_spill] sm:$0xff] %v15197_v60  ;;  %v16161_v2 = vunpack.c.h.bf16 %v15200_v62  ;;  %v6035_v16 = vsel %vm475_vm0, %v6032_v47, %v6034_v1  ;;  %v6039_v61 = vrot.slane %v15197_v60, 1  ;;  %v6037_v47 = vsel %vm475_vm0, %v6034_v1, %v6036_v53 }
 0x210   : > { %10791 = vmatmul.mubr.f32.gmra.mrb[24].mxu1 %v14739_v23  ;;  %v16552_v1 = vunpack.c.l.bf16 %v14791_v29  ;;  %v2515_v53 = vunpack.c.l.bf16 %v15200_v62 }
 0x211   : > { %11405 = vmatmul.mubr.f32.gmra.mrb[60].mxu0 %v6028_v37  ;;  %10793 = vmatprep.mubr.f32.mxu1 %v2509_v18  ;;  %v15216_v37 = vld [vmem:[%s12563_s24 + $0x190] sm:$0xff]   ;;  %v16550_v18 = vunpack.c.l.bf16 %v14758_v42  ;;  %v6041_v12 = vrot.slane %v16161_v2, 1  ;;  %v6040_v42 = vsel %vm475_vm0, %v6038_v3, %v6039_v61 }
 0x212   : > { %11407 = vmatprep.mubr.f32.mxu0 %v6030_v30  ;;  %v15222_v30 = vld [vmem:[%s12563_s24 + $0xc8] ss:$208 sps:$4 sm:$0xff]   ;;  %v9174_v9 = vunpack.c.l.bf16 %v15216_v37  ;;  %v9175_v10 = vunpack.c.h.bf16 %v15216_v37 }
 0x213   : > { %v6042_v2 = vsel %vm475_vm0, %v6039_v61, %v6041_v12 }
 0x214   : > { %10794 = vmatmul.mubr.f32.gmra.mrb[26].mxu1 %v16550_v18  ;;  %v16551_v18 = vunpack.c.l.bf16 %v15204_v54  ;;  %v6045_v3 = vrot.slane %v9174_v9, 1 }
 0x215   : > { %11408 = vmatmul.mubr.f32.gmra.mrb[62].mxu0 %v6033_v17  ;;  %10796 = vmatprep.mubr.f32.mxu1 %v14774_v7  ;;  %v15235_v17 = vld [vmem:[%s12563_s24 + $0x19c] sm:$0x1] }
 0x216   : > { %11410 = vmatprep.mubr.f32.mxu0 %v6035_v16  ;;  %v6043_v45 = vrot.slane %v16551_v18, 1  ;;  %v8509_v16 = vld [vmem:[%s12563_s24 + $0x20] sm:$0xe]  ;;  %v6046_v18 = vrot.slane %v9175_v10, 1  ;;  %v5787_v11 = vunpack.c.l.bf16 %v15235_v17 }
 0x217   : > { %v6662_v60 = vunpack.c.l.bf16 %v8509_v16  ;;  %v16554_v16 = vunpack.c.l.bf16 %v14823_v49  ;;  %v8511_v49 = vld [vmem:[%s12563_s24 + $0x40] sm:$0xe] }
 0x218   : > { %10797 = vmatmul.mubr.f32.gmra.mrb[28].mxu1 %v2512_v52  ;;  %v6044_v54 = vsel %vm475_vm0, %v6041_v12, %v6043_v45  ;;  %v16553_v52 = vunpack.c.h.bf16 %v15222_v30  ;;  %v6047_v29 = vsel %vm475_vm0, %v6045_v3, %v6046_v18  ;;  %v6050_v61 = vrot.slane %v5787_v11, 1  ;;  %v8510_v12 = vld [vmem:[%s12563_s24 + $0x30] sm:$0xe]  ;;  %v8107_v3 = vld [vmem:[%s12563_s24 + $0xd8] ss:$16 sps:$4 sm:$0xff]  }
 0x219   : > { %11411 = vmatmul.mubr.f32.gmra.mrb[64].mxu0 %v6037_v47  ;;  %10799 = vmatprep.mubr.f32.mxu1 %v16552_v1  ;;  %v6711_v45 = vrot.slane %v14192_v14, 2  ;;  %v16555_v1 = vunpack.c.l.bf16 %v14496_v24  ;;  %v16556_v14 = vunpack.c.l.bf16 %v14499_v41 }
 0x21a   : > { %11413 = vmatprep.mubr.f32.mxu0 %v6040_v42  ;;  %v6048_v47 = vrot.slane %v16553_v52, 1  ;;  %v6710_v42 = vrot.slane %v6662_v60, 2 }
 0x21b   : > { %v6715_v52 = vrot.slane %v16556_v14, 2 }
 0x21c   : > { %10800 = vmatmul.mubr.f32.gmra.mrb[30].mxu1 %v14804_v58  ;;  %v6049_v9 = vsel %vm475_vm0, %v6046_v18, %v6048_v47  ;;  %v6663_v18 = vunpack.c.l.bf16 %v8510_v12  ;;  %v6712_v60 = vsel %vm1655_vm1, %v6710_v42, %v6711_v45  ;;  %v16558_v42 = vunpack.c.h.bf16 %v14496_v24  ;;  %v8512_v24 = vld [vmem:[%s12563_s24 + $0x50] sm:$0xe] }
 0x21d   : > { %11414 = vmatmul.mubr.f32.gmra.mrb[66].mxu0 %v6042_v2  ;;  %10802 = vmatprep.mubr.f32.mxu1 %v2515_v53  ;;  %v2518_v2 = vunpack.c.l.bf16 %v15222_v30  ;;  %v6713_v53 = vrot.slane %v16555_v1, 2  ;;  %v6664_v1 = vunpack.c.l.bf16 %v8511_v49  ;;  %v8113_v49 = vld [vmem:[%s12563_s24 + $0xf8] ss:$16 sps:$4 sm:$0xff]  }
 0x21e   : > { %11416 = vmatprep.mubr.f32.mxu0 %v6044_v54  ;;  %v6051_v54 = vsel %vm475_vm0, %v6048_v47, %v6050_v61  ;;  %v6717_v61 = vrot.slane %v6663_v18, 2  ;;  %v6720_v41 = vrot.slane %v16558_v42, 2  ;;  %v16560_v18 = vunpack.c.l.bf16 %v14886_v40  ;;  %v8513_v40 = vld [vmem:[%s12563_s24 + $0x60] sm:$0xe] }
 0x21f   : > { %v6714_v47 = vsel %vm1655_vm1, %v6711_v45, %v6713_v53  ;;  %v6716_v12 = vsel %vm1655_vm1, %v6713_v53, %v6715_v52  ;;  %v6725_v53 = vrot.slane %v14240_v48, 2  ;;  %v16562_v48 = vunpack.c.l.bf16 %v14552_v8 }
 0x220   : > { %10803 = vmatmul.mubr.f32.gmra.mrb[32].mxu1 %v16554_v16  ;;  %v2521_v16 = vunpack.c.l.bf16 %v8107_v3  ;;  %v6732_v42 = vrot.slane %v14258_v56, 2 }
 0x221   : > { %11417 = vmatmul.mubr.f32.gmra.mrb[68].mxu0 %v6047_v29  ;;  %10805 = vmatprep.mubr.f32.mxu1 %v14839_v59  ;;  %v16557_v29 = vunpack.c.l.bf16 %v14856_v51 }
 0x222   : > { %11419 = vmatprep.mubr.f32.mxu0 %v6049_v9  ;;  %v6718_v9 = vrot.slane %v14211_v21, 2  ;;  %v6724_v21 = vrot.slane %v6664_v1, 2  ;;  %v16564_v1 = vunpack.c.h.bf16 %v14543_v13 }
 0x224   : > { %10806 = vmatmul.mubr.f32.gmra.mrb[34].mxu1 %v2518_v2  ;;  %v6719_v51 = vsel %vm1655_vm1, %v6717_v61, %v6718_v9  ;;  %v16559_v2 = vunpack.c.l.bf16 %v14523_v4  ;;  %v16561_v4 = vunpack.c.l.bf16 %v14543_v13  ;;  %v2527_v61 = vunpack.c.l.bf16 %v8113_v49  ;;  %v8514_v13 = vld [vmem:[%s12563_s24 + $0x70] sm:$0xe] }
 0x225   : > { %11420 = vmatmul.mubr.f32.gmra.mrb[70].mxu0 %v6051_v54  ;;  %10808 = vmatprep.mubr.f32.mxu1 %v16557_v29  ;;  %v6721_v54 = vsel %vm1655_vm1, %v6718_v9, %v6720_v41  ;;  %v6665_v29 = vunpack.c.l.bf16 %v8512_v24  ;;  %v6734_v8 = vrot.slane %v16564_v1, 2  ;;  %v2530_v24 = vunpack.c.h.bf16 %v8113_v49 }
 0x226   : > { %11454 = vmatprep.mubr.f32.mxu0 %v6712_v60  ;;  %v6722_v45 = vrot.slane %v16559_v2, 2  ;;  %v2524_v60 = vunpack.c.h.bf16 %v8107_v3  ;;  %v6727_v52 = vrot.slane %v16561_v4, 2  ;;  %v16563_v3 = vunpack.c.l.bf16 %v14925_v6 }
 0x227   : > { %v16565_v2 = vunpack.c.l.bf16 %v14595_v55  ;;  %v16567_v55 = vunpack.c.l.bf16 %v14617_v35  ;;  %v6667_v4 = vunpack.c.l.bf16 %v8514_v13  ;;  %v16569_v49 = vunpack.c.l.bf16 %v14980_v32 }
 0x228   : > { %10809 = vmatmul.mubr.f32.gmra.mrb[36].mxu1 %v14874_v19  ;;  %v6723_v14 = vsel %vm1655_vm1, %v6720_v41, %v6722_v45  ;;  %v6728_v9 = vsel %vm1655_vm1, %v6725_v53, %v6727_v52  ;;  %v6753_v1 = vrot.slane %v14709_v44, 2  ;;  %v16574_v44 = vunpack.c.l.bf16 %v14713_v34 }
 0x229   : > { %11455 = vmatmul.mubr.f32.vlgmr.msra.gmra.mrb[0].mxu0 %v6714_v47  ;;  %10811 = vmatprep.mubr.f32.mxu1 %v2521_v16  ;;  %v6726_v16 = vsel %vm1655_vm1, %v6724_v21, %v6725_v53  ;;  %v6729_v47 = vrot.slane %v16562_v48, 2  ;;  %v6736_v45 = vrot.slane %v16565_v2, 2  ;;  %v6739_v21 = vrot.slane %v14626_v31, 2 }
 0x22a   : > { %11457 = vmatprep.mubr.f32.mxu0 %v6716_v12  ;;  %v6731_v12 = vrot.slane %v6665_v29, 2  ;;  %v16566_v53 = vunpack.c.l.bf16 %v14946_v20  ;;  %v16568_v31 = vunpack.c.l.bf16 %v14629_v26  ;;  %v8515_v20 = vld [vmem:[%s12563_s24 + $0x80] sm:$0xe]  ;;  %v16575_v13 = vunpack.c.l.bf16 %v15040_v25 }
 0x22b   : > { %v6730_v41 = vsel %vm1655_vm1, %v6727_v52, %v6729_v47  ;;  %v6745_v47 = vrot.slane %v6667_v4, 2 }
 0x22c   : > { %10812 = vmatmul.mubr.f32.gmra.mrb[38].mxu1 %v16560_v18  ;;  %v6733_v6 = vsel %vm1655_vm1, %v6731_v12, %v6732_v42  ;;  %v6737_v18 = vsel %vm1655_vm1, %v6734_v8, %v6736_v45  ;;  %v6743_v29 = vrot.slane %v16568_v31, 2  ;;  %v16571_v12 = vunpack.c.l.bf16 %v14680_v27  ;;  %v8125_v45 = vld [vmem:[%s12563_s24 + $0x138] ss:$16 sps:$4 sm:$0xff]  }
 0x22d   : > { %11458 = vmatmul.mubr.f32.gmra.mrb[2].mxu0 %v6719_v51  ;;  %10814 = vmatprep.mubr.f32.mxu1 %v14903_v57  ;;  %v6666_v51 = vunpack.c.l.bf16 %v8513_v40  ;;  %v6746_v40 = vrot.slane %v14670_v50, 2  ;;  %v16573_v27 = vunpack.c.l.bf16 %v14700_v22 }
 0x22e   : > { %11460 = vmatprep.mubr.f32.mxu0 %v6721_v54  ;;  %v6735_v54 = vsel %vm1655_vm1, %v6732_v42, %v6734_v8  ;;  %v6750_v42 = vrot.slane %v16571_v12, 2  ;;  %v16572_v8 = vunpack.c.l.bf16 %v15004_v36  ;;  %v8517_v36 = vld [vmem:[%s12563_s24 + $0xa0] sm:$0xe]  ;;  %v16582_v12 = vld [vmem:[#allocation45_spill] sm:$0xff] }
 0x22f   : > { %v6738_v56 = vrot.slane %v6666_v51, 2  ;;  %v6747_v32 = vsel %vm1655_vm1, %v6745_v47, %v6746_v40  ;;  %v6755_v2 = vrot.slane %v16573_v27, 2  ;;  %v6670_v4 = vunpack.c.l.bf16 %v8517_v36 }
 0x230   : > { %10815 = vmatmul.mubr.f32.gmra.mrb[40].mxu1 %v2524_v60  ;;  %v6741_v60 = vrot.slane %v16567_v55, 2  ;;  %v6760_v55 = vrot.slane %v14739_v23, 2 }
 0x231   : > { %11461 = vmatmul.mubr.f32.gmra.mrb[4].mxu0 %v6723_v14  ;;  %10817 = vmatprep.mubr.f32.mxu1 %v16563_v3  ;;  %v8119_v14 = vld [vmem:[%s12563_s24 + $0x118] ss:$16 sps:$4 sm:$0xff]   ;;  %v6740_v52 = vsel %vm1655_vm1, %v6738_v56, %v6739_v21  ;;  %v6766_v23 = vrot.slane %v6670_v4, 2 }
 0x232   : > { %11463 = vmatprep.mubr.f32.mxu0 %v6726_v16  ;;  %v2533_v16 = vunpack.c.l.bf16 %v8119_v14  ;;  %v6742_v48 = vsel %vm1655_vm1, %v6739_v21, %v6741_v60  ;;  %v6744_v3 = vsel %vm1655_vm1, %v6741_v60, %v6743_v29  ;;  %v2536_v51 = vunpack.c.h.bf16 %v8119_v14 }
 0x233   : > { %v6757_v21 = vrot.slane %v16574_v44, 2  ;;  %v16576_v14 = vunpack.c.h.bf16 %v14700_v22  ;;  %v8518_v22 = vld [vmem:[%s12563_s24 + $0xb0] sm:$0xe]  ;;  %v16588_v44 = vld [vmem:[#allocation43_spill] sm:$0xff] }
 0x234   : > { %10818 = vmatmul.mubr.f32.gmra.mrb[42].mxu1 %v14936_v39 }
 0x235   : > { %11464 = vmatmul.mubr.f32.gmra.mrb[6].mxu0 %v6728_v9  ;;  %10820 = vmatprep.mubr.f32.mxu1 %v2527_v61  ;;  %v16570_v61 = vunpack.c.h.bf16 %v14617_v35  ;;  %v6668_v9 = vunpack.c.l.bf16 %v8515_v20  ;;  %v8516_v35 = vld [vmem:[%s12563_s24 + $0x90] sm:$0xe]  ;;  %v6758_v60 = vsel %vm1655_vm1, %v6755_v2, %v6757_v21  ;;  %v6762_v34 = vrot.slane %v16576_v14, 2  ;;  %v16591_v14 = vld [vmem:[#allocation47_spill] sm:$0xff] }
 0x236   : > { %11466 = vmatprep.mubr.f32.mxu0 %v6730_v41  ;;  %v16589_v21 = vunpack.c.l.bf16 %v16588_v44  ;;  %v12453_v44 = vld [vmem:[%s12563_s24 + $0xe0] sm:$0xff]  }
 0x237   : > { %v6748_v26 = vrot.slane %v16570_v61, 2  ;;  %v6752_v50 = vrot.slane %v6668_v9, 2  ;;  %v6763_v20 = vsel %vm1655_vm1, %v6760_v55, %v6762_v34  ;;  %v6671_v9 = vunpack.c.l.bf16 %v8518_v22 }
 0x238   : > { %10821 = vmatmul.mubr.f32.gmra.mrb[44].mxu1 %v16566_v53  ;;  %v2539_v53 = vunpack.c.l.bf16 %v8125_v45  ;;  %v6778_v36 = vrot.slane %v16589_v21, 2  ;;  %v8942_v21 = vunpack.c.l.bf16 %v12453_v44 }
 0x239   : > { %11467 = vmatmul.mubr.f32.gmra.mrb[8].mxu0 %v6733_v6  ;;  %10823 = vmatprep.mubr.f32.mxu1 %v14960_v33  ;;  %v6749_v41 = vsel %vm1655_vm1, %v6746_v40, %v6748_v26  ;;  %v6751_v6 = vsel %vm1655_vm1, %v6748_v26, %v6750_v42  ;;  %v6754_v56 = vsel %vm1655_vm1, %v6752_v50, %v6753_v1  ;;  %v16580_v40 = vld [vmem:[#allocation40_spill] sm:$0xff]  ;;  %v8131_v26 = vld [vmem:[%s12563_s24 + $0x158] ss:$16 sps:$4 sm:$0xff]  }
 0x23a   : > { %11469 = vmatprep.mubr.f32.mxu0 %v6735_v54  ;;  %v6669_v54 = vunpack.c.l.bf16 %v8516_v35  ;;  %v16586_v27 = vunpack.c.h.bf16 %v16580_v40 }
 0x23c   : > { %10824 = vmatmul.mubr.f32.gmra.mrb[46].mxu1 %v2530_v24  ;;  %v6756_v24 = vsel %vm1655_vm1, %v6753_v1, %v6755_v2  ;;  %v2545_v1 = vunpack.c.l.bf16 %v8131_v26  ;;  %v6776_v2 = vrot.slane %v16586_v27, 2  ;;  %v16602_v27 = vld [vmem:[#allocation92_spill] sm:$0xff] }
 0x23d   : > { %11470 = vmatmul.mubr.f32.gmra.mrb[10].mxu0 %v6737_v18  ;;  %10826 = vmatprep.mubr.f32.mxu1 %v16569_v49  ;;  %v6759_v18 = vrot.slane %v6669_v54, 2  ;;  %v6767_v49 = vrot.slane %v14774_v7, 2  ;;  %v16583_v7 = vunpack.c.l.bf16 %v16582_v12  ;;  %v16587_v54 = vld [vmem:[#allocation66_spill] sm:$0xff]  ;;  %v16598_v12 = vld [vmem:[#allocation35_spill] sm:$0xff] }
 0x23e   : > { %11472 = vmatprep.mubr.f32.mxu0 %v6740_v52  ;;  %v16577_v52 = vld [vmem:[#allocation42_spill] sm:$0xff] }
 0x23f   : > { %v6761_v25 = vsel %vm1655_vm1, %v6759_v18, %v6760_v55  ;;  %v16578_v31 = vunpack.c.l.bf16 %v16577_v52  ;;  %v6771_v42 = vrot.slane %v16583_v7, 2  ;;  %v16590_v18 = vunpack.c.l.bf16 %v15124_v63  ;;  %v8521_v63 = vld [vmem:[%s12563_s24 + $0xe0] sm:$0xe] }
 0x240   : > { %10827 = vmatmul.mubr.f32.gmra.mrb[48].mxu1 %v14992_v15  ;;  %v2548_v55 = vunpack.c.h.bf16 %v8131_v26  ;;  %v16597_v26 = vunpack.c.h.bf16 %v16591_v14 }
 0x241   : > { %11473 = vmatmul.mubr.f32.gmra.mrb[12].mxu0 %v6742_v48  ;;  %10829 = vmatprep.mubr.f32.mxu1 %v2533_v16  ;;  %v6764_v29 = vrot.slane %v16578_v31, 2  ;;  %v16579_v16 = vunpack.c.l.bf16 %v15064_v5  ;;  %v2542_v48 = vunpack.c.h.bf16 %v8125_v45  ;;  %v8519_v5 = vld [vmem:[%s12563_s24 + $0xc0] sm:$0xe] }
 0x242   : > { %11475 = vmatprep.mubr.f32.mxu0 %v6744_v3  ;;  %v16581_v3 = vunpack.c.l.bf16 %v16580_v40  ;;  %v6672_v45 = vunpack.c.l.bf16 %v8519_v5  ;;  %v12452_v40 = vld [vmem:[%s12563_s24 + $0xd0] sm:$0xff]  }
 0x243   : > { %v6765_v47 = vsel %vm1655_vm1, %v6762_v34, %v6764_v29  ;;  %v16592_v34 = vunpack.c.l.bf16 %v16591_v14 }
 0x244   : > { %10830 = vmatmul.mubr.f32.gmra.mrb[50].mxu1 %v16572_v8  ;;  %v6769_v61 = vrot.slane %v16581_v3, 2  ;;  %v6773_v8 = vrot.slane %v6671_v9, 2  ;;  %v8938_v3 = vunpack.c.l.bf16 %v12452_v40  ;;  %v6790_v9 = vrot.slane %v16597_v26, 2  ;;  %v16613_v40 = vld [vmem:[#allocation55_spill] sm:$0xff] }
 0x245   : > { %11476 = vmatmul.mubr.f32.gmra.mrb[14].mxu0 %v6747_v32  ;;  %10832 = vmatprep.mubr.f32.mxu1 %v15019_v28  ;;  %v6768_v32 = vsel %vm1655_vm1, %v6766_v23, %v6767_v49  ;;  %v6783_v4 = vrot.slane %v16592_v34, 2  ;;  %v16595_v23 = vld [vmem:[#allocation2_spill] sm:$0xff]  ;;  %v16610_v34 = vld [vmem:[#allocation53_spill] sm:$0xff] }
 0x246   : > { %11478 = vmatprep.mubr.f32.mxu0 %v6749_v41  ;;  %v16584_v41 = vld [vmem:[#allocation63_spill] sm:$0xff]  ;;  %v6770_v35 = vsel %vm1655_vm1, %v6767_v49, %v6769_v61  ;;  %v16596_v49 = vunpack.c.l.bf16 %v16595_v23 }
 0x247   : > { %v16585_v50 = vunpack.c.l.bf16 %v16584_v41 }
 0x248   : > { %10833 = vmatmul.mubr.f32.gmra.mrb[52].mxu1 %v2536_v51  ;;  %v6774_v51 = vrot.slane %v14804_v58, 2  ;;  %v6780_v58 = vrot.slane %v6672_v45, 2 }
 0x249   : > { %11479 = vmatmul.mubr.f32.gmra.mrb[16].mxu0 %v6751_v6  ;;  %10835 = vmatprep.mubr.f32.mxu1 %v16575_v13  ;;  %v6772_v6 = vsel %vm1655_vm1, %v6769_v61, %v6771_v42  ;;  %v16599_v42 = vld [vmem:[#allocation50_spill] sm:$0xff] }
 0x24a   : > { %11481 = vmatprep.mubr.f32.mxu0 %v6754_v56  ;;  %v6775_v56 = vsel %vm1655_vm1, %v6773_v8, %v6774_v51  ;;  %v6777_v13 = vsel %vm1655_vm1, %v6774_v51, %v6776_v2  ;;  %v16600_v5 = vunpack.c.l.bf16 %v16599_v42  ;;  %v6795_v8 = vrot.slane %v14903_v57, 2 }
 0x24b   : > { %v16601_v51 = vunpack.c.l.bf16 %v15182_v46 }
 0x24c   : > { %10836 = vmatmul.mubr.f32.gmra.mrb[54].mxu1 %v15052_v43  ;;  %v6792_v41 = vrot.slane %v16600_v5, 2 }
 0x24d   : > { %11482 = vmatmul.mubr.f32.gmra.mrb[18].mxu0 %v6756_v24  ;;  %10838 = vmatprep.mubr.f32.mxu1 %v2539_v53  ;;  %v6781_v53 = vrot.slane %v14839_v59, 2  ;;  %v8520_v24 = vld [vmem:[%s12563_s24 + $0xd0] sm:$0xe]  ;;  %v16593_v59 = vld [vmem:[#allocation46_spill] sm:$0xff] }
 0x24e   : > { %11484 = vmatprep.mubr.f32.mxu0 %v6758_v60  ;;  %v6779_v60 = vsel %vm1655_vm1, %v6776_v2, %v6778_v36  ;;  %v6673_v52 = vunpack.c.l.bf16 %v8520_v24  ;;  %v16594_v29 = vunpack.c.l.bf16 %v16593_v59  ;;  %v16603_v2 = vunpack.c.l.bf16 %v16602_v27 }
 0x24f   : > { %v6782_v31 = vsel %vm1655_vm1, %v6780_v58, %v6781_v53  ;;  %v16605_v58 = vld [vmem:[#allocation56_spill] sm:$0xff]  ;;  %v3448_v59 = vrot.slane %v8942_v21, 1 }
 0x250   : > { %10839 = vmatmul.mubr.f32.gmra.mrb[56].mxu1 %v16579_v16  ;;  %v6784_v16 = vsel %vm1655_vm1, %v6781_v53, %v6783_v4  ;;  %v3444_v45 = vrot.slane %v16603_v2, 1  ;;  %v16606_v53 = vld [vmem:[#allocation51_spill] sm:$0xff]  ;;  %v16620_v2 = vld [vmem:[#allocation97_spill] sm:$0xff] }
 0x251   : > { %11485 = vmatmul.mubr.f32.gmra.mrb[20].mxu0 %v6761_v25  ;;  %10841 = vmatprep.mubr.f32.mxu1 %v15078_v38  ;;  %v8137_v25 = vld [vmem:[%s12563_s24 + $0x178] ss:$16 sps:$4 sm:$0xff]   ;;  %v16607_v46 = vunpack.c.h.bf16 %v16606_v53  ;;  %v16622_v53 = vld [vmem:[#allocation62_spill] sm:$0xff] }
 0x252   : > { %11487 = vmatprep.mubr.f32.mxu0 %v6763_v20  ;;  %v6785_v20 = vrot.slane %v16594_v29, 2  ;;  %v2551_v22 = vunpack.c.l.bf16 %v8137_v25 }
 0x253   : > { %v6797_v24 = vrot.slane %v16607_v46, 2 }
 0x254   : > { %10842 = vmatmul.mubr.f32.gmra.mrb[58].mxu1 %v2542_v48  ;;  %v6787_v48 = vrot.slane %v6673_v52, 2  ;;  %v6786_v61 = vsel %vm1655_vm1, %v6783_v4, %v6785_v20  ;;  %v16611_v4 = vunpack.c.l.bf16 %v16610_v34  ;;  %v3445_v52 = vsel %vm475_vm0, %v16605_v58, %v3444_v45 }
 0x255   : > { %11488 = vmatmul.mubr.f32.gmra.mrb[22].mxu0 %v6765_v47  ;;  %10844 = vmatprep.mubr.f32.mxu1 %v16585_v50  ;;  %v6788_v47 = vrot.slane %v14874_v19, 2  ;;  %v3441_v19 = vrot.slane %v8938_v3, 1  ;;  %v8522_v50 = vld [vmem:[%s12563_s24 + $0xf0] sm:$0xe]  ;;  %v6802_v20 = vrot.slane %v14936_v39, 2  ;;  %v16614_v3 = vunpack.c.h.bf16 %v16613_v40  ;;  %v16615_v39 = vld [vmem:[#allocation59_spill] sm:$0xff] }
 0x256   : > { %11490 = vmatprep.mubr.f32.mxu0 %v6768_v32  ;;  %v6674_v32 = vunpack.c.l.bf16 %v8521_v63  ;;  %v6675_v36 = vunpack.c.l.bf16 %v8522_v50  ;;  %v6798_v63 = vsel %vm1655_vm1, %v6795_v8, %v6797_v24 }
 0x257   : > { %v6789_v7 = vsel %vm1655_vm1, %v6787_v48, %v6788_v47  ;;  %v3443_v57 = vsel %vm475_vm0, %v3441_v19, %v16605_v58  ;;  %v16618_v19 = vld [vmem:[#allocation71_spill] sm:$0xff] }
 0x258   : > { %10845 = vmatmul.mubr.f32.gmra.mrb[60].mxu1 %v16587_v54  ;;  %v6801_v29 = vrot.slane %v6675_v36, 2  ;;  %v16619_v50 = vunpack.c.l.bf16 %v16618_v19  ;;  %v12455_v36 = vld [vmem:[%s12563_s24 + $0x100] sm:$0xff]   ;;  %v16635_v19 = vld [vmem:[#allocation11_spill] sm:$0xff] }
 0x259   : > { %11491 = vmatmul.mubr.f32.gmra.mrb[24].mxu0 %v6770_v35  ;;  %10847 = vmatprep.mubr.f32.mxu1 %v2545_v1  ;;  %v6791_v1 = vsel %vm1655_vm1, %v6788_v47, %v6790_v9  ;;  %v6794_v35 = vrot.slane %v6674_v32, 2 }
 0x25a   : > { %11493 = vmatprep.mubr.f32.mxu0 %v6772_v6  ;;  %v2554_v6 = vunpack.c.h.bf16 %v8137_v25  ;;  %v6799_v25 = vrot.slane %v16611_v4, 2  ;;  %v6803_v32 = vsel %vm1655_vm1, %v6801_v29, %v6802_v20  ;;  %v16627_v4 = vld [vmem:[#allocation76_spill] sm:$0xff] }
 0x25b   : > { %v6796_v14 = vsel %vm1655_vm1, %v6794_v35, %v6795_v8  ;;  %v8524_v8 = vld [vmem:[%s12563_s24 + $0x110] sm:$0xe] }
 0x25c   : > { %10848 = vmatmul.mubr.f32.gmra.mrb[62].mxu1 %v16590_v18  ;;  %v16608_v18 = vld [vmem:[#allocation93_spill] sm:$0xff]  ;;  %v6800_v47 = vsel %vm1655_vm1, %v6797_v24, %v6799_v25  ;;  %v6677_v58 = vunpack.c.l.bf16 %v8524_v8  ;;  %v16623_v24 = vld [vmem:[#allocation74_spill] sm:$0xff]  ;;  %v16628_v25 = vunpack.c.l.bf16 %v16627_v4  ;;  %v8526_v8 = vld [vmem:[%s12563_s24 + $0x130] sm:$0xe] }
 0x25d   : > { %11494 = vmatmul.mubr.f32.gmra.mrb[26].mxu0 %v6775_v56  ;;  %10850 = vmatprep.mubr.f32.mxu1 %v15139_v0  ;;  %v16604_v56 = vld [vmem:[#allocation38_spill] sm:$0xff] }
 0x25e   : > { %11496 = vmatprep.mubr.f32.mxu0 %v6777_v13  ;;  %v6793_v13 = vsel %vm1655_vm1, %v6790_v9, %v6792_v41  ;;  %v3450_v9 = vsel %vm475_vm0, %v3448_v59, %v16615_v39  ;;  %v8525_v59 = vld [vmem:[%s12563_s24 + $0x120] sm:$0xe] }
 0x260   : > { %10851 = vmatmul.mubr.f32.gmra.mrb[64].mxu1 %v2548_v55  ;;  %v16609_v55 = vunpack.c.l.bf16 %v16608_v18 }
 0x261   : > { %11497 = vmatmul.mubr.f32.gmra.mrb[28].mxu0 %v6779_v60  ;;  %10853 = vmatprep.mubr.f32.mxu1 %v16596_v49  ;;  %v16612_v49 = vunpack.c.h.bf16 %v16602_v27  ;;  %v6809_v27 = vrot.slane %v14960_v33, 2  ;;  %v16624_v33 = vunpack.c.h.bf16 %v16623_v24  ;;  %v16640_v24 = vld [vmem:[#allocation52_spill] sm:$0xff] }
 0x262   : > { %11499 = vmatprep.mubr.f32.mxu0 %v6782_v31  ;;  %v3446_v60 = vrot.slane %v16609_v55, 1  ;;  %v8523_v31 = vld [vmem:[%s12563_s24 + $0x100] sm:$0xe] }
 0x263   : > { %v6676_v26 = vunpack.c.l.bf16 %v8523_v31  ;;  %v6811_v18 = vrot.slane %v16624_v33, 2  ;;  %v16625_v55 = vld [vmem:[#allocation6_spill] sm:$0xff] }
 0x264   : > { %10854 = vmatmul.mubr.f32.gmra.mrb[66].mxu1 %v16598_v12  ;;  %v3447_v23 = vsel %vm475_vm0, %v3444_v45, %v3446_v60  ;;  %v16621_v45 = vunpack.c.l.bf16 %v16620_v2  ;;  %v16626_v60 = vunpack.c.l.bf16 %v16625_v55 }
 0x265   : > { %11500 = vmatmul.mubr.f32.gmra.mrb[30].mxu0 %v6784_v16  ;;  %10856 = vmatprep.mubr.f32.mxu1 %v2551_v22  ;;  %v3451_v22 = vrot.slane %v16612_v49, 1  ;;  %v12454_v16 = vld [vmem:[%s12563_s24 + $0xf0] sm:$0xff]  }
 0x266   : > { %11502 = vmatprep.mubr.f32.mxu0 %v6786_v61  ;;  %v8946_v48 = vunpack.c.l.bf16 %v12454_v16  ;;  %v6804_v61 = vrot.slane %v16614_v3, 2  ;;  %v3458_v44 = vrot.slane %v16621_v45, 1  ;;  %v16630_v3 = vld [vmem:[#allocation80_spill] sm:$0xff] }
 0x267   : > { %v3452_v41 = vsel %vm475_vm0, %v16615_v39, %v3451_v22  ;;  %v6678_v39 = vunpack.c.l.bf16 %v8525_v59 }
 0x268   : > { %10857 = vmatmul.mubr.f32.gmra.mrb[68].mxu1 %v16601_v51  ;;  %v3455_v35 = vrot.slane %v8946_v48, 1  ;;  %v6805_v51 = vsel %vm1655_vm1, %v6802_v20, %v6804_v61  ;;  %v3459_v31 = vsel %vm475_vm0, %v16622_v53, %v3458_v44  ;;  %v6815_v20 = vrot.slane %v6677_v58, 2  ;;  %v12456_v48 = vld [vmem:[%s12563_s24 + $0x110] sm:$0xff]  }
 0x269   : > { %11503 = vmatmul.mubr.f32.gmra.mrb[32].mxu0 %v6789_v7  ;;  %10859 = vmatprep.mubr.f32.mxu1 %v16604_v56  ;;  %v16616_v7 = vld [vmem:[#allocation95_spill] sm:$0xff]  ;;  %v6679_v58 = vunpack.c.l.bf16 %v8526_v8 }
 0x26a   : > { %11505 = vmatprep.mubr.f32.mxu0 %v6791_v1  ;;  %v16617_v42 = vunpack.c.l.bf16 %v16616_v7  ;;  %v6806_v1 = vrot.slane %v16619_v50, 2  ;;  %v3457_v46 = vsel %vm475_vm0, %v3455_v35, %v16622_v53  ;;  %v16633_v7 = vld [vmem:[#allocation7_spill] sm:$0xff]  ;;  %v16636_v50 = vunpack.c.l.bf16 %v16635_v19  ;;  %v16639_v53 = vld [vmem:[#allocation68_spill] sm:$0xff] }
 0x26c   : > { %10860 = vmatmul.mubr.f32.gmra.mrb[70].mxu1 %v2554_v6  ;;  %v3453_v5 = vrot.slane %v16617_v42, 1  ;;  %v6808_v6 = vrot.slane %v6676_v26, 2  ;;  %v16634_v42 = vunpack.c.l.bf16 %v16633_v7 }
 0x26d   : > { %11506 = vmatmul.mubr.f32.gmra.mrb[34].mxu0 %v6793_v13  ;;  %10948 = vmatprep.mubr.f32.mxu1 %v3443_v57  ;;  %v8950_v13 = vunpack.c.l.bf16 %v12455_v36  ;;  %v6807_v57 = vsel %vm1655_vm1, %v6804_v61, %v6806_v1  ;;  %v16631_v61 = vunpack.c.h.bf16 %v16630_v3  ;;  %v6820_v1 = vrot.slane %v16636_v50, 2  ;;  %v12457_v36 = vld [vmem:[%s12563_s24 + $0x120] sm:$0xff]  }
 0x26e   : > { %11508 = vmatprep.mubr.f32.mxu0 %v6796_v14  ;;  %v3454_v21 = vsel %vm475_vm0, %v3451_v22, %v3453_v5  ;;  %v3460_v14 = vrot.slane %v16626_v60, 1  ;;  %v6810_v34 = vsel %vm1655_vm1, %v6808_v6, %v6809_v27  ;;  %v16629_v22 = vunpack.c.h.bf16 %v16620_v2  ;;  %v16637_v2 = vld [vmem:[#allocation13_spill] sm:$0xff] }
 0x26f   : > { %v3462_v29 = vrot.slane %v8950_v13, 1  ;;  %v6818_v26 = vrot.slane %v16631_v61, 2  ;;  %v3467_v5 = vrot.slane %v16634_v42, 1  ;;  %v6822_v6 = vrot.slane %v6678_v39, 2 }
 0x270   : > { %10949 = vmatmul.mubr.f32.vlgmr.msra.gmra.mrb[36].mxu1 %v3445_v52  ;;  %v6813_v52 = vrot.slane %v16628_v25, 2  ;;  %v3461_v49 = vsel %vm475_vm0, %v3458_v44, %v3460_v14  ;;  %v3465_v16 = vrot.slane %v16629_v22, 1  ;;  %v16638_v45 = vunpack.c.l.bf16 %v16637_v2 }
 0x271   : > { %11509 = vmatmul.mubr.f32.gmra.mrb[36].mxu0 %v6798_v63  ;;  %10951 = vmatprep.mubr.f32.mxu1 %v3447_v23  ;;  %v6816_v63 = vrot.slane %v14992_v15, 2  ;;  %v6812_v23 = vsel %vm1655_vm1, %v6809_v27, %v6811_v18  ;;  %v16632_v15 = vld [vmem:[#allocation65_spill] sm:$0xff]  ;;  %v6823_v27 = vrot.slane %v15019_v28, 2  ;;  %v8958_v13 = vunpack.c.l.bf16 %v12457_v36 }
 0x272   : > { %11511 = vmatprep.mubr.f32.mxu0 %v6800_v47  ;;  %v8954_v47 = vunpack.c.l.bf16 %v12456_v48  ;;  %v6814_v40 = vsel %vm1655_vm1, %v6811_v18, %v6813_v52  ;;  %v3472_v44 = vrot.slane %v16638_v45, 1  ;;  %v16641_v28 = vunpack.c.h.bf16 %v16640_v24  ;;  %v16642_v18 = vld [vmem:[#allocation15_spill] sm:$0xff] }
 0x273   : > { %v16643_v55 = vunpack.c.l.bf16 %v16642_v18  ;;  %v6824_v14 = vsel %vm1655_vm1, %v6822_v6, %v6823_v27  ;;  %v3476_v59 = vrot.slane %v8958_v13, 1  ;;  %v16654_v6 = vld [vmem:[#allocation18_spill] sm:$0xff]  ;;  %v16659_v24 = vld [vmem:[#allocation19_spill] sm:$0xff] }
 0x274   : > { %10952 = vmatmul.mubr.f32.gmra.mrb[38].mxu1 %v3450_v9  ;;  %v3464_v9 = vsel %vm475_vm0, %v3462_v29, %v16632_v15  ;;  %v3469_v35 = vrot.slane %v8954_v47, 1  ;;  %v6825_v33 = vrot.slane %v16641_v28, 2  ;;  %v3473_v52 = vsel %vm475_vm0, %v16639_v53, %v3472_v44 }
 0x275   : > { %11512 = vmatmul.mubr.f32.gmra.mrb[38].mxu0 %v6803_v32  ;;  %10954 = vmatprep.mubr.f32.mxu1 %v3452_v41  ;;  %v6817_v32 = vsel %vm1655_vm1, %v6815_v20, %v6816_v63  ;;  %v3466_v41 = vsel %vm475_vm0, %v16632_v15, %v3465_v16  ;;  %v3474_v60 = vrot.slane %v16643_v55, 1  ;;  %v6829_v29 = vrot.slane %v6679_v58, 2  ;;  %v16656_v58 = vld [vmem:[#allocation77_spill] sm:$0xff]  ;;  %v16661_v55 = vld [vmem:[#allocation23_spill] sm:$0xff] }
 0x276   : > { %11514 = vmatprep.mubr.f32.mxu0 %v6805_v51  ;;  %v6819_v51 = vsel %vm1655_vm1, %v6816_v63, %v6818_v26  ;;  %v6830_v20 = vrot.slane %v15052_v43, 2  ;;  %v6826_v63 = vsel %vm1655_vm1, %v6823_v27, %v6825_v33  ;;  %v16649_v43 = vld [vmem:[#allocation72_spill] sm:$0xff]  ;;  %v16655_v27 = vunpack.c.l.bf16 %v16654_v6 }
 0x277   : > { %v3478_v39 = vsel %vm475_vm0, %v3476_v59, %v16649_v43  ;;  %v16660_v28 = vunpack.c.l.bf16 %v16659_v24 }
 0x278   : > { %10955 = vmatmul.mubr.f32.gmra.mrb[40].mxu1 %v3454_v21  ;;  %v3468_v21 = vsel %vm475_vm0, %v3465_v16, %v3467_v5  ;;  %v12458_v16 = vld [vmem:[%s12563_s24 + $0x130] sm:$0xff]   ;;  %v6831_v15 = vsel %vm1655_vm1, %v6829_v29, %v6830_v20 }
 0x279   : > { %11515 = vmatmul.mubr.f32.gmra.mrb[40].mxu0 %v6807_v57  ;;  %10957 = vmatprep.mubr.f32.mxu1 %v3457_v46  ;;  %v6821_v57 = vsel %vm1655_vm1, %v6818_v26, %v6820_v1  ;;  %v3471_v46 = vsel %vm475_vm0, %v3469_v35, %v16639_v53  ;;  %v8962_v48 = vunpack.c.l.bf16 %v12458_v16  ;;  %v16652_v5 = vld [vmem:[#allocation20_spill] sm:$0xff]  ;;  %v16664_v16 = vld [vmem:[#allocation26_spill] sm:$0xff] }
 0x27a   : > { %11517 = vmatprep.mubr.f32.mxu0 %v6810_v34  ;;  %v16644_v34 = vld [vmem:[#allocation16_spill] sm:$0xff] }
 0x27b   : > { %v16645_v4 = vunpack.c.l.bf16 %v16644_v34  ;;  %v3483_v50 = vrot.slane %v8962_v48, 1  ;;  %v8528_v1 = vld [vmem:[%s12563_s24 + $0x150] sm:$0xe]  ;;  %v16665_v48 = vunpack.c.h.bf16 %v16664_v16 }
 0x27c   : > { %10958 = vmatmul.mubr.f32.gmra.mrb[42].mxu1 %v3459_v31  ;;  %v8527_v31 = vld [vmem:[%s12563_s24 + $0x140] sm:$0xe]  ;;  %v6681_v36 = vunpack.c.l.bf16 %v8528_v1  ;;  %v16657_v53 = vld [vmem:[#allocation60_spill] sm:$0xff]  ;;  %v16671_v1 = vld [vmem:[#allocation25_spill] sm:$0xff] }
 0x27d   : > { %11518 = vmatmul.mubr.f32.gmra.mrb[42].mxu0 %v6812_v23  ;;  %10960 = vmatprep.mubr.f32.mxu1 %v3461_v49  ;;  %v6827_v25 = vrot.slane %v16645_v4, 2  ;;  %v3475_v23 = vsel %vm475_vm0, %v3472_v44, %v3474_v60  ;;  %v16646_v49 = vunpack.c.h.bf16 %v16637_v2  ;;  %v6680_v26 = vunpack.c.l.bf16 %v8527_v31  ;;  %v12459_v44 = vld [vmem:[%s12563_s24 + $0x140] sm:$0xff]  }
 0x27e   : > { %11520 = vmatprep.mubr.f32.mxu0 %v6814_v40  ;;  %v16647_v40 = vld [vmem:[#allocation57_spill] sm:$0xff]  ;;  %v3486_v2 = vrot.slane %v16655_v27, 1  ;;  %v16662_v60 = vunpack.c.l.bf16 %v16661_v55  ;;  %v8529_v4 = vld [vmem:[%s12563_s24 + $0x160] sm:$0xe]  ;;  %v6844_v31 = vrot.slane %v16587_v54, 2 }
 0x27f   : > { %v3479_v22 = vrot.slane %v16646_v49, 1  ;;  %v6828_v47 = vsel %vm1655_vm1, %v6825_v33, %v6827_v25  ;;  %v16648_v3 = vunpack.c.h.bf16 %v16647_v40  ;;  %v6836_v8 = vrot.slane %v6680_v26, 2  ;;  %v16666_v54 = vld [vmem:[#allocation81_spill] sm:$0xff]  ;;  %v16667_v26 = vld [vmem:[#allocation22_spill] sm:$0xff] }
 0x280   : > { %10961 = vmatmul.mubr.f32.gmra.mrb[44].mxu1 %v3464_v9  ;;  %v16650_v9 = vld [vmem:[#allocation21_spill] sm:$0xff]  ;;  %v3488_v33 = vrot.slane %v16660_v28, 1  ;;  %v3487_v34 = vsel %vm475_vm0, %v16656_v58, %v3486_v2  ;;  %v6682_v40 = vunpack.c.l.bf16 %v8529_v4 }
 0x281   : > { %11521 = vmatmul.mubr.f32.gmra.mrb[44].mxu0 %v6817_v32  ;;  %10963 = vmatprep.mubr.f32.mxu1 %v3466_v41  ;;  %v6832_v61 = vrot.slane %v16648_v3, 2  ;;  %v16651_v32 = vunpack.c.l.bf16 %v16650_v9  ;;  %v3480_v42 = vsel %vm475_vm0, %v16649_v43, %v3479_v22  ;;  %v16653_v41 = vunpack.c.l.bf16 %v16652_v5  ;;  %v16669_v9 = vld [vmem:[#allocation30_spill] sm:$0xff]  ;;  %v8530_v5 = vld [vmem:[%s12563_s24 + $0x170] sm:$0xe] }
 0x282   : > { %11523 = vmatprep.mubr.f32.mxu0 %v6819_v51  ;;  %v6837_v51 = vrot.slane %v15078_v38, 2  ;;  %v16658_v38 = vunpack.c.h.bf16 %v16657_v53  ;;  %v3489_v29 = vsel %vm475_vm0, %v3486_v2, %v3488_v33  ;;  %v16668_v43 = vunpack.c.l.bf16 %v16667_v26 }
 0x283   : > { %v3481_v7 = vrot.slane %v16651_v32, 1  ;;  %v6834_v19 = vrot.slane %v16653_v41, 2  ;;  %v6833_v35 = vsel %vm1655_vm1, %v6830_v20, %v6832_v61  ;;  %v16663_v20 = vunpack.c.h.bf16 %v16654_v6  ;;  %v12461_v6 = vld [vmem:[%s12563_s24 + $0x160] sm:$0xff]  }
 0x284   : > { %10964 = vmatmul.mubr.f32.gmra.mrb[46].mxu1 %v3468_v21  ;;  %v8966_v21 = vunpack.c.l.bf16 %v12459_v44  ;;  %v6838_v18 = vsel %vm1655_vm1, %v6836_v8, %v6837_v51  ;;  %v16670_v32 = vunpack.c.l.bf16 %v16669_v9  ;;  %v8974_v27 = vunpack.c.l.bf16 %v12461_v6  ;;  %v16673_v44 = vld [vmem:[#allocation84_spill] sm:$0xff]  ;;  %v16692_v6 = vld [vmem:[#allocation34_spill] sm:$0xff] }
 0x285   : > { %11524 = vmatmul.mubr.f32.gmra.mrb[46].mxu0 %v6821_v57  ;;  %10966 = vmatprep.mubr.f32.mxu1 %v3471_v46  ;;  %v3482_v45 = vsel %vm475_vm0, %v3479_v22, %v3481_v7  ;;  %v6835_v13 = vsel %vm1655_vm1, %v6832_v61, %v6834_v19  ;;  %v3485_v57 = vsel %vm475_vm0, %v3483_v50, %v16656_v58  ;;  %v6839_v46 = vrot.slane %v16658_v38, 2  ;;  %v16676_v58 = vld [vmem:[#allocation29_spill] sm:$0xff] }
 0x286   : > { %11526 = vmatprep.mubr.f32.mxu0 %v6824_v14  ;;  %v6841_v14 = vrot.slane %v16662_v60, 2  ;;  %v3490_v25 = vrot.slane %v8966_v21, 1  ;;  %v6848_v7 = vrot.slane %v16670_v32, 2  ;;  %v6850_v19 = vrot.slane %v6682_v40, 2  ;;  %v8532_v32 = vld [vmem:[%s12563_s24 + $0x190] sm:$0xe] }
 0x287   : > { %v6840_v59 = vsel %vm1655_vm1, %v6837_v51, %v6839_v46  ;;  %v6851_v50 = vrot.slane %v15139_v0, 2  ;;  %v6683_v2 = vunpack.c.l.bf16 %v8530_v5  ;;  %v3504_v55 = vrot.slane %v8974_v27, 1 }
 0x288   : > { %10967 = vmatmul.mubr.f32.gmra.mrb[48].mxu1 %v3473_v52  ;;  %v6843_v52 = vrot.slane %v6681_v36, 2  ;;  %v6842_v22 = vsel %vm1655_vm1, %v6839_v46, %v6841_v14  ;;  %v3492_v3 = vsel %vm475_vm0, %v3490_v25, %v16666_v54  ;;  %v16674_v36 = vld [vmem:[#allocation69_spill] sm:$0xff]  ;;  %v16678_v46 = vld [vmem:[#allocation32_spill] sm:$0xff]  ;;  %v6858_v14 = vrot.slane %v16598_v12, 2  ;;  %v16683_v12 = vld [vmem:[#allocation87_spill] sm:$0xff] }
 0x289   : > { %11527 = vmatmul.mubr.f32.gmra.mrb[48].mxu0 %v6826_v63  ;;  %10969 = vmatprep.mubr.f32.mxu1 %v3475_v23  ;;  %v3493_v63 = vrot.slane %v16663_v20, 1  ;;  %v12460_v23 = vld [vmem:[%s12563_s24 + $0x150] sm:$0xff]   ;;  %v16675_v0 = vunpack.c.h.bf16 %v16674_v36  ;;  %v6852_v38 = vsel %vm1655_vm1, %v6850_v19, %v6851_v50  ;;  %v16679_v24 = vunpack.c.l.bf16 %v16678_v46  ;;  %v16681_v20 = vld [vmem:[#allocation73_spill] sm:$0xff] }
 0x28a   : > { %11529 = vmatprep.mubr.f32.mxu0 %v6828_v47  ;;  %v8970_v49 = vunpack.c.l.bf16 %v12460_v23  ;;  %v6846_v47 = vrot.slane %v16665_v48, 2  ;;  %v6845_v61 = vsel %vm1655_vm1, %v6843_v52, %v6844_v31  ;;  %v6857_v60 = vrot.slane %v6683_v2, 2  ;;  %v16684_v48 = vld [vmem:[#allocation33_spill] sm:$0xff] }
 0x28b   : > { %v6855_v28 = vrot.slane %v16679_v24, 2  ;;  %v16680_v25 = vunpack.c.h.bf16 %v16671_v1  ;;  %v6865_v9 = vrot.slane %v16604_v56, 2  ;;  %v16690_v19 = vunpack.c.h.bf16 %v15200_v62 }
 0x28c   : > { %10970 = vmatmul.mubr.f32.gmra.mrb[50].mxu1 %v3478_v39  ;;  %v3495_v39 = vrot.slane %v16668_v43, 1  ;;  %v6847_v41 = vsel %vm1655_vm1, %v6844_v31, %v6846_v47  ;;  %v12462_v31 = vld [vmem:[%s12563_s24 + $0x170] sm:$0xff]   ;;  %v6859_v16 = vsel %vm1655_vm1, %v6857_v60, %v6858_v14  ;;  %v16693_v27 = vunpack.c.l.bf16 %v16692_v6 }
 0x28d   : > { %11530 = vmatmul.mubr.f32.gmra.mrb[50].mxu0 %v6831_v15  ;;  %10972 = vmatprep.mubr.f32.mxu1 %v3480_v42  ;;  %v3494_v15 = vsel %vm475_vm0, %v16666_v54, %v3493_v63  ;;  %v3497_v42 = vrot.slane %v8970_v49, 1  ;;  %v3507_v52 = vrot.slane %v16680_v25, 1  ;;  %v6872_v24 = vrot.slane %v9175_v10, 2 }
 0x28e   : > { %11532 = vmatprep.mubr.f32.mxu0 %v6833_v35  ;;  %v16672_v35 = vunpack.c.l.bf16 %v16671_v1  ;;  %v3496_v51 = vsel %vm475_vm0, %v3493_v63, %v3495_v39  ;;  %v16682_v63 = vunpack.c.h.bf16 %v16681_v20  ;;  %v12463_v1 = vld [vmem:[%s12563_s24 + $0x180] sm:$0xff]   ;;  %v3516_v2 = vrot.slane %v16693_v27, 1 }
 0x28f   : > { %v3499_v21 = vsel %vm475_vm0, %v3497_v42, %v16673_v44  ;;  %v3508_v54 = vsel %vm475_vm0, %v16683_v12, %v3507_v52  ;;  %v16688_v42 = vld [vmem:[#allocation36_spill] sm:$0xff] }
 0x290   : > { %10973 = vmatmul.mubr.f32.gmra.mrb[52].mxu1 %v3482_v45  ;;  %v3500_v8 = vrot.slane %v16672_v35, 1  ;;  %v6849_v45 = vsel %vm1655_vm1, %v6846_v47, %v6848_v7  ;;  %v6860_v23 = vrot.slane %v16682_v63, 2  ;;  %v16685_v47 = vunpack.c.l.bf16 %v16684_v48 }
 0x291   : > { %11533 = vmatmul.mubr.f32.gmra.mrb[52].mxu0 %v6835_v13  ;;  %10975 = vmatprep.mubr.f32.mxu1 %v3485_v57  ;;  %v6853_v13 = vrot.slane %v16675_v0, 2  ;;  %v16677_v57 = vunpack.c.l.bf16 %v16676_v58  ;;  %v16689_v5 = vunpack.c.l.bf16 %v16688_v42  ;;  %v8982_v35 = vunpack.c.l.bf16 %v12463_v1 }
 0x292   : > { %11535 = vmatprep.mubr.f32.mxu0 %v6838_v18  ;;  %v3501_v33 = vsel %vm475_vm0, %v16673_v44, %v3500_v8  ;;  %v8531_v18 = vld [vmem:[%s12563_s24 + $0x180] sm:$0xe]  ;;  %v3509_v40 = vrot.slane %v16685_v47, 1  ;;  %v6861_v39 = vsel %vm1655_vm1, %v6858_v14, %v6860_v23 }
 0x293   : > { %v3502_v53 = vrot.slane %v16677_v57, 1  ;;  %v6684_v49 = vunpack.c.l.bf16 %v8531_v18  ;;  %v3518_v58 = vrot.slane %v8982_v35, 1  ;;  %v16696_v57 = vld [vmem:[#allocation37_spill] sm:$0xff] }
 0x294   : > { %10976 = vmatmul.mubr.f32.gmra.mrb[54].mxu1 %v3487_v34  ;;  %v6854_v34 = vsel %vm1655_vm1, %v6851_v50, %v6853_v13  ;;  %v3510_v7 = vsel %vm475_vm0, %v3507_v52, %v3509_v40  ;;  %v6867_v50 = vrot.slane %v16690_v19, 2  ;;  %v6876_v52 = vrot.slane %v5787_v11, 2 }
 0x295   : > { %11536 = vmatmul.mubr.f32.gmra.mrb[54].mxu0 %v6840_v59  ;;  %10978 = vmatprep.mubr.f32.mxu1 %v3489_v29  ;;  %v3503_v4 = vsel %vm475_vm0, %v3500_v8, %v3502_v53  ;;  %v8978_v59 = vunpack.c.l.bf16 %v12462_v31  ;;  %v6856_v29 = vsel %vm1655_vm1, %v6853_v13, %v6855_v28  ;;  %v3519_v53 = vrot.slane %v16696_v57, 1 }
 0x296   : > { %11538 = vmatprep.mubr.f32.mxu0 %v6842_v22  ;;  %v3506_v22 = vsel %vm475_vm0, %v3504_v55, %v16683_v12  ;;  %v6868_v13 = vsel %vm1655_vm1, %v6865_v9, %v6867_v50  ;;  %v16697_v28 = vunpack.c.h.bf16 %v16688_v42  ;;  %v16698_v55 = vunpack.c.h.bf16 %v15222_v30 }
 0x297   : > { %v3511_v43 = vrot.slane %v8978_v59, 1  ;;  %v3520_v14 = vsel %vm475_vm0, %v3518_v58, %v3519_v53 }
 0x298   : > { %10979 = vmatmul.mubr.f32.gmra.mrb[56].mxu1 %v3492_v3  ;;  %v16686_v3 = vld [vmem:[#allocation78_spill] sm:$0xff]  ;;  %v6874_v60 = vrot.slane %v16698_v55, 2 }
 0x299   : > { %11539 = vmatmul.mubr.f32.gmra.mrb[56].mxu0 %v6845_v61  ;;  %10981 = vmatprep.mubr.f32.mxu1 %v3494_v15  ;;  %v16687_v61 = vunpack.c.l.bf16 %v16686_v3  ;;  %v6864_v15 = vrot.slane %v6684_v49, 2 }
 0x29a   : > { %11541 = vmatprep.mubr.f32.mxu0 %v6847_v41  ;;  %v3514_v41 = vrot.slane %v16689_v5, 1  ;;  %v6875_v31 = vsel %vm1655_vm1, %v6872_v24, %v6874_v60  ;;  %v6877_v59 = vsel %vm1655_vm1, %v6874_v60, %v6876_v52 }
 0x29b   : > { %v6862_v26 = vrot.slane %v16687_v61, 2  ;;  %v6866_v44 = vsel %vm1655_vm1, %v6864_v15, %v6865_v9 }
 0x29c   : > { %10982 = vmatmul.mubr.f32.gmra.mrb[58].mxu1 %v3496_v51  ;;  %v16691_v51 = vld [vmem:[#allocation90_spill] sm:$0xff] }
 0x29d   : > { %11542 = vmatmul.mubr.f32.gmra.mrb[58].mxu0 %v6849_v45  ;;  %10984 = vmatprep.mubr.f32.mxu1 %v3499_v21  ;;  %v6863_v8 = vsel %vm1655_vm1, %v6860_v23, %v6862_v26  ;;  %v3513_v56 = vsel %vm475_vm0, %v3511_v43, %v16691_v51  ;;  %v6685_v45 = vunpack.c.l.bf16 %v8532_v32  ;;  %v16694_v21 = vld [vmem:[#allocation82_spill] sm:$0xff]  ;;  %v3515_v62 = vsel %vm475_vm0, %v16691_v51, %v3514_v41 }
 0x29e   : > { %11544 = vmatprep.mubr.f32.mxu0 %v6852_v38  ;;  %v16695_v36 = vunpack.c.l.bf16 %v16694_v21  ;;  %v3517_v38 = vsel %vm475_vm0, %v3514_v41, %v3516_v2 }
 0x29f   : > { %v6871_v46 = vrot.slane %v6685_v45, 2 }
 0x2a0   : > { %10985 = vmatmul.mubr.f32.gmra.mrb[60].mxu1 %v3501_v33  ;;  %v6869_v0 = vrot.slane %v16695_v36, 2  ;;  %v3521_v33 = vrot.slane %v16697_v28, 1 }
 0x2a1   : > { %11545 = vmatmul.mubr.f32.gmra.mrb[60].mxu0 %v6854_v34  ;;  %10987 = vmatprep.mubr.f32.mxu1 %v3503_v4  ;;  %v16699_v34 = vld [vmem:[#allocation98_spill] sm:$0xff]  ;;  %v6873_v37 = vsel %vm1655_vm1, %v6871_v46, %v6872_v24 }
 0x2a2   : > { %11547 = vmatprep.mubr.f32.mxu0 %v6856_v29  ;;  %v6870_v18 = vsel %vm1655_vm1, %v6867_v50, %v6869_v0  ;;  %v16700_v4 = vunpack.c.l.bf16 %v16699_v34  ;;  %v3522_v10 = vsel %vm475_vm0, %v3519_v53, %v3521_v33 }
 0x2a4   : > { %10988 = vmatmul.mubr.f32.gmra.mrb[62].mxu1 %v3506_v22  ;;  %v3523_v25 = vrot.slane %v16700_v4, 1 }
 0x2a5   : > { %11548 = vmatmul.mubr.f32.gmra.mrb[62].mxu0 %v6859_v16  ;;  %10990 = vmatprep.mubr.f32.mxu1 %v3508_v54 }
 0x2a6   : > { %11550 = vmatprep.mubr.f32.mxu0 %v6861_v39  ;;  %v3524_v30 = vsel %vm475_vm0, %v3521_v33, %v3523_v25 }
 0x2a8   : > { %10991 = vmatmul.mubr.f32.gmra.mrb[64].mxu1 %v3510_v7 }
 0x2a9   : > { %11551 = vmatmul.mubr.f32.gmra.mrb[64].mxu0 %v6863_v8  ;;  %10993 = vmatprep.mubr.f32.mxu1 %v3513_v56 }
 0x2aa   : > { %11553 = vmatprep.mubr.f32.mxu0 %v6866_v44  ;;  %v15696_v44 = vld [vmem:[%s15846_s2] ss:$0 sm:$0xff] }
 0x2ac   : > { %10994 = vmatmul.mubr.f32.gmra.mrb[66].mxu1 %v3515_v62 }
 0x2ad   : > { %11554 = vmatmul.mubr.f32.gmra.mrb[66].mxu0 %v6868_v13  ;;  %10996 = vmatprep.mubr.f32.mxu1 %v3517_v38 }
 0x2ae   : > { %11556 = vmatprep.mubr.f32.mxu0 %v6870_v18 }
 0x2b0   : > { %10997 = vmatmul.mubr.f32.gmra.mrb[68].mxu1 %v3520_v14 }
 0x2b1   : > { %11557 = vmatmul.mubr.f32.gmra.mrb[68].mxu0 %v6873_v37  ;;  %10999 = vmatprep.mubr.f32.mxu1 %v3522_v10 }
 0x2b2   : > { %11559 = vmatprep.mubr.f32.mxu0 %v6875_v31 }
 0x2b3   : > { %v10756_v29 = vpop.f32.mrb[0].mxu1 }
 0x2b4   : > { %v2638_v20 = vpop.f32.mrb[1].mxu1  ;;  %11000 = vmatmul.mubr.f32.gmra.mrb[70].mxu1 %v3524_v30 }
 0x2b5   : > { %11560 = vmatmul.mubr.f32.gmra.mrb[70].mxu0 %v6877_v59 }
 0x2b7   : > { %v10759_v63 = vpop.f32.mrb[2].mxu1 }
 0x2b8   : > { %v2648_v23 = vpop.f32.mrb[3].mxu1 }
 0x2bb   : > { %v10762_v49 = vpop.f32.mrb[4].mxu1 }
 0x2bc   : > { %v2658_v12 = vpop.f32.mrb[5].mxu1 }
 0x2bf   : > { %v10765_v17 = vpop.f32.mrb[6].mxu1 }
 0x2c0   : > { %v15635_v11 = vpop.f32.mrb[7].mxu1 }
 0x2c3   : > { %v15637_v22 = vpop.f32.mrb[8].mxu1 }
 0x2c4   : > { %v15639_v16 = vpop.f32.mrb[9].mxu1 }
 0x2c7   : > { %v15641_v48 = vpop.f32.mrb[10].mxu1 }
 0x2c8   : > { %v15643_v47 = vpop.f32.mrb[11].mxu1 }
 0x2cb   : > { %v15645_v40 = vpop.f32.mrb[12].mxu1 }
 0x2cc   : > { %v15647_v54 = vpop.f32.mrb[13].mxu1 }
 0x2cf   : > { %v15649_v3 = vpop.f32.mrb[14].mxu1 }
 0x2d0   : > { %v15651_v61 = vpop.f32.mrb[15].mxu1 }
 0x2d3   : > { %v15653_v26 = vpop.f32.mrb[16].mxu1 }
 0x2d4   : > { %v15655_v43 = vpop.f32.mrb[17].mxu1 }
 0x2d7   : > { %v15657_v39 = vpop.f32.mrb[18].mxu1 }
 0x2d8   : > { %v15659_v15 = vpop.f32.mrb[19].mxu1 }
 0x2db   : > { %v15661_v9 = vpop.f32.mrb[20].mxu1 }
 0x2dc   : > { %v15663_v32 = vpop.f32.mrb[21].mxu1 }
 0x2df   : > { %v15665_v7 = vpop.f32.mrb[22].mxu1 }
 0x2e0   : > { %v15667_v42 = vpop.f32.mrb[23].mxu1 }
 0x2e3   : > { %v15669_v5 = vpop.f32.mrb[24].mxu1 }
 0x2e4   : > { %v15671_v41 = vpop.f32.mrb[25].mxu1 }
 0x2e7   : > { %v15673_v19 = vpop.f32.mrb[26].mxu1 }
 0x2e8   : > { %v15675_v50 = vpop.f32.mrb[27].mxu1 }
 0x2eb   : > { %v15677_v1 = vpop.f32.mrb[28].mxu1 }
 0x2ec   : > { %v15679_v35 = vpop.f32.mrb[29].mxu1 }
 0x2ef   : > { %v15681_v8 = vpop.f32.mrb[30].mxu1 }
 0x2f0   : > { %v15683_v51 = vpop.f32.mrb[31].mxu1 }
 0x2f3   : > { %v15685_v56 = vpop.f32.mrb[32].mxu1 }
 0x2f4   : > { %v15687_v6 = vpop.f32.mrb[33].mxu1 }
 0x2f7   : > { %v15689_v27 = vpop.f32.mrb[34].mxu1 }
 0x2f8   : > { %v15691_v2 = vpop.f32.mrb[35].mxu1 }
 0x2fc   : > { %v11456_v45 = vpop.f32.mrb[0].mxu0 }
 0x2fd   : > { %v11866_v21 = vadd.f32 %v11456_v45, %v10756_v29  ;;  %v7033_v36 = vpop.f32.mrb[1].mxu0 }
 0x2fe   : > { %v11867_v0 = vadd.f32 %v7033_v36, %v2638_v20 }
 0x2ff   : > { %v7472_v62 = vadd.f32 %v11866_v21, %v15696_v44 }
 0x300   : > { %v7471_v13 = vadd.f32 %v11867_v0, %v15696_v44  ;;  %v11459_v58 = vpop.f32.mrb[2].mxu0 }
 0x301   : > { %v7544_v57 = vmax.f32 %v7472_v62, 0.0  ;;  %v11868_v53 = vadd.f32 %v11459_v58, %v10759_v63  ;;  %v7043_v38 = vpop.f32.mrb[3].mxu0 }
 0x302   : > { %v7543_v46 = vmax.f32 %v7471_v13, 0.0  ;;  %v11869_v24 = vadd.f32 %v7043_v38, %v2648_v23 }
 0x303   : > { %v7474_v28 = vadd.f32 %v11868_v53, %v15696_v44 }
 0x304   : > { %v9179_v33 = vpack.c.bf16 %v7544_v57, %v7543_v46  ;;  %v7473_v18 = vadd.f32 %v11869_v24, %v15696_v44  ;;  %v11462_v55 = vpop.f32.mrb[4].mxu0 }
 0x305   : > { %v7546_v60 = vmax.f32 %v7474_v28, 0.0  ;;  %v11870_v14 = vadd.f32 %v11462_v55, %v10762_v49  ;;  %v7053_v34 = vpop.f32.mrb[5].mxu0 }
 0x306   : > { %9180 = vst [vmem:[%s15704_s20] sm:$0xff] %v9179_v33   ;;  %v7545_v4 = vmax.f32 %v7473_v18, 0.0  ;;  %v11871_v25 = vadd.f32 %v7053_v34, %v2658_v12 }
 0x307   : > { %v7476_v37 = vadd.f32 %v11870_v14, %v15696_v44 }
 0x308   : > { %v9184_v10 = vpack.c.bf16 %v7546_v60, %v7545_v4  ;;  %v7475_v52 = vadd.f32 %v11871_v25, %v15696_v44  ;;  %v11465_v31 = vpop.f32.mrb[6].mxu0 }
 0x309   : > { %v7548_v30 = vmax.f32 %v7476_v37, 0.0  ;;  %v11872_v59 = vadd.f32 %v11465_v31, %v10765_v17  ;;  %v7063_v29 = vpop.f32.mrb[7].mxu0 }
 0x30a   : > { %9475 = vst [vmem:[%s15704_s20 + $0x8] sm:$0xff] %v9184_v10   ;;  %v7547_v20 = vmax.f32 %v7475_v52, 0.0  ;;  %v11873_v63 = vadd.f32 %v7063_v29, %v15635_v11 }
 0x30b   : > { %v7478_v23 = vadd.f32 %v11872_v59, %v15696_v44 }
 0x30c   : > { %v9189_v49 = vpack.c.bf16 %v7548_v30, %v7547_v20  ;;  %v7477_v12 = vadd.f32 %v11873_v63, %v15696_v44  ;;  %v11468_v45 = vpop.f32.mrb[8].mxu0 }
 0x30d   : > { %v7550_v21 = vmax.f32 %v7478_v23, 0.0  ;;  %v11874_v36 = vadd.f32 %v11468_v45, %v15637_v22  ;;  %v7073_v0 = vpop.f32.mrb[9].mxu0 }
 0x30e   : > { %9476 = vst [vmem:[%s15704_s20 + $0x10] sm:$0xff] %v9189_v49   ;;  %v7549_v62 = vmax.f32 %v7477_v12, 0.0  ;;  %v11875_v17 = vadd.f32 %v7073_v0, %v15639_v16 }
 0x30f   : > { %v7480_v13 = vadd.f32 %v11874_v36, %v15696_v44 }
 0x310   : > { %v9194_v58 = vpack.c.bf16 %v7550_v21, %v7549_v62  ;;  %v7479_v11 = vadd.f32 %v11875_v17, %v15696_v44  ;;  %v11471_v57 = vpop.f32.mrb[10].mxu0 }
 0x311   : > { %v7552_v53 = vmax.f32 %v7480_v13, 0.0  ;;  %v11876_v38 = vadd.f32 %v11471_v57, %v15641_v48  ;;  %v7083_v46 = vpop.f32.mrb[11].mxu0 }
 0x312   : > { %9477 = vst [vmem:[%s15704_s20 + $0x18] sm:$0xff] %v9194_v58   ;;  %v7551_v24 = vmax.f32 %v7479_v11, 0.0  ;;  %v11877_v22 = vadd.f32 %v7083_v46, %v15643_v47 }
 0x313   : > { %v7482_v28 = vadd.f32 %v11876_v38, %v15696_v44 }
 0x314   : > { %v9199_v33 = vpack.c.bf16 %v7552_v53, %v7551_v24  ;;  %v7481_v16 = vadd.f32 %v11877_v22, %v15696_v44  ;;  %v11474_v18 = vpop.f32.mrb[12].mxu0 }
 0x315   : > { %v7554_v55 = vmax.f32 %v7482_v28, 0.0  ;;  %v11878_v60 = vadd.f32 %v11474_v18, %v15645_v40  ;;  %v7093_v14 = vpop.f32.mrb[13].mxu0 }
 0x316   : > { %9478 = vst [vmem:[%s15704_s20 + $0x20] sm:$0xff] %v9199_v33   ;;  %v7553_v34 = vmax.f32 %v7481_v16, 0.0  ;;  %v11879_v48 = vadd.f32 %v7093_v14, %v15647_v54 }
 0x317   : > { %v7484_v4 = vadd.f32 %v11878_v60, %v15696_v44 }
 0x318   : > { %v9204_v25 = vpack.c.bf16 %v7554_v55, %v7553_v34  ;;  %v7483_v47 = vadd.f32 %v11879_v48, %v15696_v44  ;;  %v11477_v37 = vpop.f32.mrb[14].mxu0 }
 0x319   : > { %v7556_v10 = vmax.f32 %v7484_v4, 0.0  ;;  %v11880_v52 = vadd.f32 %v11477_v37, %v15649_v3  ;;  %v7103_v31 = vpop.f32.mrb[15].mxu0 }
 0x31a   : > { %9479 = vst [vmem:[%s15704_s20 + $0x28] sm:$0xff] %v9204_v25   ;;  %v7555_v30 = vmax.f32 %v7483_v47, 0.0  ;;  %v11881_v40 = vadd.f32 %v7103_v31, %v15651_v61 }
 0x31b   : > { %v7486_v59 = vadd.f32 %v11880_v52, %v15696_v44 }
 0x31c   : > { %v9209_v29 = vpack.c.bf16 %v7556_v10, %v7555_v30  ;;  %v7485_v54 = vadd.f32 %v11881_v40, %v15696_v44  ;;  %v11480_v20 = vpop.f32.mrb[16].mxu0 }
 0x31d   : > { %v7558_v63 = vmax.f32 %v7486_v59, 0.0  ;;  %v11882_v23 = vadd.f32 %v11480_v20, %v15653_v26  ;;  %v7113_v49 = vpop.f32.mrb[17].mxu0 }
 0x31e   : > { %9480 = vst [vmem:[%s15704_s20 + $0x30] sm:$0xff] %v9209_v29   ;;  %v7557_v12 = vmax.f32 %v7485_v54, 0.0  ;;  %v11883_v3 = vadd.f32 %v7113_v49, %v15655_v43 }
 0x31f   : > { %v7488_v45 = vadd.f32 %v11882_v23, %v15696_v44 }
 0x320   : > { %v9214_v21 = vpack.c.bf16 %v7558_v63, %v7557_v12  ;;  %v7487_v61 = vadd.f32 %v11883_v3, %v15696_v44  ;;  %v11483_v36 = vpop.f32.mrb[18].mxu0 }
 0x321   : > { %v7560_v0 = vmax.f32 %v7488_v45, 0.0  ;;  %v11884_v62 = vadd.f32 %v11483_v36, %v15657_v39  ;;  %v7123_v17 = vpop.f32.mrb[19].mxu0 }
 0x322   : > { %9481 = vst [vmem:[%s15704_s20 + $0x38] sm:$0xff] %v9214_v21   ;;  %v7559_v13 = vmax.f32 %v7487_v61, 0.0  ;;  %v11885_v26 = vadd.f32 %v7123_v17, %v15659_v15 }
 0x323   : > { %v7490_v58 = vadd.f32 %v11884_v62, %v15696_v44 }
 0x324   : > { %v9219_v11 = vpack.c.bf16 %v7560_v0, %v7559_v13  ;;  %v7489_v43 = vadd.f32 %v11885_v26, %v15696_v44  ;;  %v11486_v57 = vpop.f32.mrb[20].mxu0 }
 0x325   : > { %v7562_v53 = vmax.f32 %v7490_v58, 0.0  ;;  %v11886_v38 = vadd.f32 %v11486_v57, %v15661_v9  ;;  %v7133_v46 = vpop.f32.mrb[21].mxu0 }
 0x326   : > { %9482 = vst [vmem:[%s15704_s20 + $0x40] sm:$0xff] %v9219_v11   ;;  %v7561_v24 = vmax.f32 %v7489_v43, 0.0  ;;  %v11887_v39 = vadd.f32 %v7133_v46, %v15663_v32 }
 0x327   : > { %v7492_v22 = vadd.f32 %v11886_v38, %v15696_v44 }
 0x328   : > { %v9224_v28 = vpack.c.bf16 %v7562_v53, %v7561_v24  ;;  %v7491_v15 = vadd.f32 %v11887_v39, %v15696_v44  ;;  %v11489_v33 = vpop.f32.mrb[22].mxu0 }
 0x329   : > { %v7564_v16 = vmax.f32 %v7492_v22, 0.0  ;;  %v11888_v18 = vadd.f32 %v11489_v33, %v15665_v7  ;;  %v7143_v55 = vpop.f32.mrb[23].mxu0 }
 0x32a   : > { %9483 = vst [vmem:[%s15704_s20 + $0x48] sm:$0xff] %v9224_v28   ;;  %v7563_v60 = vmax.f32 %v7491_v15, 0.0  ;;  %v11889_v9 = vadd.f32 %v7143_v55, %v15667_v42 }
 0x32b   : > { %v7494_v14 = vadd.f32 %v11888_v18, %v15696_v44 }
 0x32c   : > { %v9229_v34 = vpack.c.bf16 %v7564_v16, %v7563_v60  ;;  %v7493_v32 = vadd.f32 %v11889_v9, %v15696_v44  ;;  %v11492_v48 = vpop.f32.mrb[24].mxu0 }
 0x32d   : > { %v7566_v4 = vmax.f32 %v7494_v14, 0.0  ;;  %v11890_v25 = vadd.f32 %v11492_v48, %v15669_v5  ;;  %v7153_v47 = vpop.f32.mrb[25].mxu0 }
 0x32e   : > { %9484 = vst [vmem:[%s15704_s20 + $0x50] sm:$0xff] %v9229_v34   ;;  %v7565_v37 = vmax.f32 %v7493_v32, 0.0  ;;  %v11891_v7 = vadd.f32 %v7153_v47, %v15671_v41 }
 0x32f   : > { %v7496_v10 = vadd.f32 %v11890_v25, %v15696_v44 }
 0x330   : > { %v9234_v52 = vpack.c.bf16 %v7566_v4, %v7565_v37  ;;  %v7495_v42 = vadd.f32 %v11891_v7, %v15696_v44  ;;  %v11495_v31 = vpop.f32.mrb[26].mxu0 }
 0x331   : > { %v7568_v30 = vmax.f32 %v7496_v10, 0.0  ;;  %v11892_v40 = vadd.f32 %v11495_v31, %v15673_v19  ;;  %v7163_v59 = vpop.f32.mrb[27].mxu0 }
 0x332   : > { %9485 = vst [vmem:[%s15704_s20 + $0x58] sm:$0xff] %v9234_v52   ;;  %v7567_v29 = vmax.f32 %v7495_v42, 0.0  ;;  %v11893_v5 = vadd.f32 %v7163_v59, %v15675_v50 }
 0x333   : > { %v7498_v54 = vadd.f32 %v11892_v40, %v15696_v44 }
 0x334   : > { %v9239_v20 = vpack.c.bf16 %v7568_v30, %v7567_v29  ;;  %v7497_v41 = vadd.f32 %v11893_v5, %v15696_v44  ;;  %v11498_v63 = vpop.f32.mrb[28].mxu0 }
 0x335   : > { %v7570_v23 = vmax.f32 %v7498_v54, 0.0  ;;  %v11894_v49 = vadd.f32 %v11498_v63, %v15677_v1  ;;  %v7173_v12 = vpop.f32.mrb[29].mxu0 }
 0x336   : > { %9486 = vst [vmem:[%s15704_s20 + $0x60] sm:$0xff] %v9239_v20   ;;  %v7569_v3 = vmax.f32 %v7497_v41, 0.0  ;;  %v11895_v19 = vadd.f32 %v7173_v12, %v15679_v35 }
 0x337   : > { %v7500_v45 = vadd.f32 %v11894_v49, %v15696_v44 }
 0x338   : > { %v9244_v21 = vpack.c.bf16 %v7570_v23, %v7569_v3  ;;  %v7499_v50 = vadd.f32 %v11895_v19, %v15696_v44  ;;  %v11501_v61 = vpop.f32.mrb[30].mxu0 }
 0x339   : > { %v7572_v36 = vmax.f32 %v7500_v45, 0.0  ;;  %v11896_v0 = vadd.f32 %v11501_v61, %v15681_v8  ;;  %v7183_v62 = vpop.f32.mrb[31].mxu0 }
 0x33a   : > { %9487 = vst [vmem:[%s15704_s20 + $0x68] sm:$0xff] %v9244_v21   ;;  %v7571_v17 = vmax.f32 %v7499_v50, 0.0  ;;  %v11897_v1 = vadd.f32 %v7183_v62, %v15683_v51 }
 0x33b   : > { %v7502_v13 = vadd.f32 %v11896_v0, %v15696_v44 }
 0x33c   : > { %v9249_v26 = vpack.c.bf16 %v7572_v36, %v7571_v17  ;;  %v7501_v35 = vadd.f32 %v11897_v1, %v15696_v44  ;;  %v11504_v58 = vpop.f32.mrb[32].mxu0 }
 0x33d   : > { %v7574_v11 = vmax.f32 %v7502_v13, 0.0  ;;  %v11898_v43 = vadd.f32 %v11504_v58, %v15685_v56  ;;  %v7193_v57 = vpop.f32.mrb[33].mxu0 }
 0x33e   : > { %9488 = vst [vmem:[%s15704_s20 + $0x70] sm:$0xff] %v9249_v26   ;;  %v7573_v53 = vmax.f32 %v7501_v35, 0.0  ;;  %v11899_v8 = vadd.f32 %v7193_v57, %v15687_v6 }
 0x33f   : > { %v7504_v38 = vadd.f32 %v11898_v43, %v15696_v44 }
 0x340   : > { %v9254_v46 = vpack.c.bf16 %v7574_v11, %v7573_v53  ;;  %v7503_v51 = vadd.f32 %v11899_v8, %v15696_v44  ;;  %v11507_v24 = vpop.f32.mrb[34].mxu0 }
 0x341   : > { %v7576_v39 = vmax.f32 %v7504_v38, 0.0  ;;  %v11900_v22 = vadd.f32 %v11507_v24, %v15689_v27  ;;  %v7203_v28 = vpop.f32.mrb[35].mxu0 }
 0x342   : > { %9489 = vst [vmem:[%s15704_s20 + $0x78] sm:$0xff] %v9254_v46   ;;  %v7575_v15 = vmax.f32 %v7503_v51, 0.0  ;;  %v11901_v56 = vadd.f32 %v7203_v28, %v15691_v2 }
 0x343   : > { %v7506_v33 = vadd.f32 %v11900_v22, %v15696_v44  ;;  %v10950_v16 = vpop.f32.mrb[36].mxu1 }
 0x344   : > { %v9259_v18 = vpack.c.bf16 %v7576_v39, %v7575_v15  ;;  %v7505_v6 = vadd.f32 %v11901_v56, %v15696_v44  ;;  %v11510_v55 = vpop.f32.mrb[36].mxu0  ;;  %v3860_v60 = vpop.f32.mrb[37].mxu1 }
 0x345   : > { %v7578_v9 = vmax.f32 %v7506_v33, 0.0  ;;  %v11902_v14 = vadd.f32 %v11510_v55, %v10950_v16  ;;  %v7213_v34 = vpop.f32.mrb[37].mxu0 }
 0x346   : > { %9490 = vst [vmem:[%s15704_s20 + $0x80] sm:$0xff] %v9259_v18   ;;  %v7577_v32 = vmax.f32 %v7505_v6, 0.0  ;;  %v11903_v27 = vadd.f32 %v7213_v34, %v3860_v60 }
 0x347   : > { %v7508_v48 = vadd.f32 %v11902_v14, %v15696_v44  ;;  %v10953_v4 = vpop.f32.mrb[38].mxu1 }
 0x348   : > { %v9264_v25 = vpack.c.bf16 %v7578_v9, %v7577_v32  ;;  %v7507_v2 = vadd.f32 %v11903_v27, %v15696_v44  ;;  %v11513_v47 = vpop.f32.mrb[38].mxu0  ;;  %v3870_v37 = vpop.f32.mrb[39].mxu1 }
 0x349   : > { %v7580_v7 = vmax.f32 %v7508_v48, 0.0  ;;  %v11904_v10 = vadd.f32 %v11513_v47, %v10953_v4  ;;  %v7223_v52 = vpop.f32.mrb[39].mxu0 }
 0x34a   : > { %9491 = vst [vmem:[%s15704_s20 + $0x88] sm:$0xff] %v9264_v25   ;;  %v7579_v42 = vmax.f32 %v7507_v2, 0.0  ;;  %v11905_v31 = vadd.f32 %v7223_v52, %v3870_v37 }
 0x34b   : > { %v7510_v30 = vadd.f32 %v11904_v10, %v15696_v44  ;;  %v10956_v40 = vpop.f32.mrb[40].mxu1 }
 0x34c   : > { %v9269_v59 = vpack.c.bf16 %v7580_v7, %v7579_v42  ;;  %v7509_v29 = vadd.f32 %v11905_v31, %v15696_v44  ;;  %v11516_v5 = vpop.f32.mrb[40].mxu0  ;;  %v3880_v54 = vpop.f32.mrb[41].mxu1 }
 0x34d   : > { %v7582_v20 = vmax.f32 %v7510_v30, 0.0  ;;  %v11906_v41 = vadd.f32 %v11516_v5, %v10956_v40  ;;  %v7233_v63 = vpop.f32.mrb[41].mxu0 }
 0x34e   : > { %9492 = vst [vmem:[%s15704_s20 + $0x90] sm:$0xff] %v9269_v59   ;;  %v7581_v23 = vmax.f32 %v7509_v29, 0.0  ;;  %v11907_v49 = vadd.f32 %v7233_v63, %v3880_v54 }
 0x34f   : > { %v7512_v12 = vadd.f32 %v11906_v41, %v15696_v44  ;;  %v10959_v3 = vpop.f32.mrb[42].mxu1 }
 0x350   : > { %v9274_v19 = vpack.c.bf16 %v7582_v20, %v7581_v23  ;;  %v7511_v45 = vadd.f32 %v11907_v49, %v15696_v44  ;;  %v11519_v21 = vpop.f32.mrb[42].mxu0  ;;  %v3890_v50 = vpop.f32.mrb[43].mxu1 }
 0x351   : > { %v7584_v61 = vmax.f32 %v7512_v12, 0.0  ;;  %v11908_v36 = vadd.f32 %v11519_v21, %v10959_v3  ;;  %v7243_v0 = vpop.f32.mrb[43].mxu0 }
 0x352   : > { %9493 = vst [vmem:[%s15704_s20 + $0x98] sm:$0xff] %v9274_v19   ;;  %v7583_v62 = vmax.f32 %v7511_v45, 0.0  ;;  %v11909_v17 = vadd.f32 %v7243_v0, %v3890_v50 }
 0x353   : > { %v7514_v1 = vadd.f32 %v11908_v36, %v15696_v44  ;;  %v10962_v13 = vpop.f32.mrb[44].mxu1 }
 0x354   : > { %v9279_v26 = vpack.c.bf16 %v7584_v61, %v7583_v62  ;;  %v7513_v35 = vadd.f32 %v11909_v17, %v15696_v44  ;;  %v11522_v58 = vpop.f32.mrb[44].mxu0  ;;  %v3900_v11 = vpop.f32.mrb[45].mxu1 }
 0x355   : > { %v7586_v43 = vmax.f32 %v7514_v1, 0.0  ;;  %v11910_v57 = vadd.f32 %v11522_v58, %v10962_v13  ;;  %v7253_v53 = vpop.f32.mrb[45].mxu0 }
 0x356   : > { %9494 = vst [vmem:[%s15704_s20 + $0xa0] sm:$0xff] %v9279_v26   ;;  %v7585_v8 = vmax.f32 %v7513_v35, 0.0  ;;  %v11911_v38 = vadd.f32 %v7253_v53, %v3900_v11 }
 0x357   : > { %v7516_v46 = vadd.f32 %v11910_v57, %v15696_v44  ;;  %v10965_v51 = vpop.f32.mrb[46].mxu1 }
 0x358   : > { %v9284_v24 = vpack.c.bf16 %v7586_v43, %v7585_v8  ;;  %v7515_v39 = vadd.f32 %v11911_v38, %v15696_v44  ;;  %v11525_v22 = vpop.f32.mrb[46].mxu0  ;;  %v3910_v28 = vpop.f32.mrb[47].mxu1 }
 0x359   : > { %v7588_v15 = vmax.f32 %v7516_v46, 0.0  ;;  %v11912_v56 = vadd.f32 %v11525_v22, %v10965_v51  ;;  %v7263_v33 = vpop.f32.mrb[47].mxu0 }
 0x35a   : > { %9495 = vst [vmem:[%s15704_s20 + $0xa8] sm:$0xff] %v9284_v24   ;;  %v7587_v16 = vmax.f32 %v7515_v39, 0.0  ;;  %v11913_v18 = vadd.f32 %v7263_v33, %v3910_v28 }
 0x35b   : > { %v7518_v6 = vadd.f32 %v11912_v56, %v15696_v44  ;;  %v10968_v55 = vpop.f32.mrb[48].mxu1 }
 0x35c   : > { %v9289_v60 = vpack.c.bf16 %v7588_v15, %v7587_v16  ;;  %v7517_v9 = vadd.f32 %v11913_v18, %v15696_v44  ;;  %v11528_v14 = vpop.f32.mrb[48].mxu0  ;;  %v3920_v34 = vpop.f32.mrb[49].mxu1 }
 0x35d   : > { %v7590_v32 = vmax.f32 %v7518_v6, 0.0  ;;  %v11914_v27 = vadd.f32 %v11528_v14, %v10968_v55  ;;  %v7273_v48 = vpop.f32.mrb[49].mxu0 }
 0x35e   : > { %9496 = vst [vmem:[%s15704_s20 + $0xb0] sm:$0xff] %v9289_v60   ;;  %v7589_v4 = vmax.f32 %v7517_v9, 0.0  ;;  %v11915_v25 = vadd.f32 %v7273_v48, %v3920_v34 }
 0x35f   : > { %v7520_v2 = vadd.f32 %v11914_v27, %v15696_v44  ;;  %v10971_v47 = vpop.f32.mrb[50].mxu1 }
 0x360   : > { %v9294_v37 = vpack.c.bf16 %v7590_v32, %v7589_v4  ;;  %v7519_v7 = vadd.f32 %v11915_v25, %v15696_v44  ;;  %v11531_v10 = vpop.f32.mrb[50].mxu0  ;;  %v3930_v52 = vpop.f32.mrb[51].mxu1 }
 0x361   : > { %v7592_v42 = vmax.f32 %v7520_v2, 0.0  ;;  %v11916_v31 = vadd.f32 %v11531_v10, %v10971_v47  ;;  %v7283_v30 = vpop.f32.mrb[51].mxu0 }
 0x362   : > { %9497 = vst [vmem:[%s15704_s20 + $0xb8] sm:$0xff] %v9294_v37   ;;  %v7591_v40 = vmax.f32 %v7519_v7, 0.0  ;;  %v11917_v59 = vadd.f32 %v7283_v30, %v3930_v52 }
 0x363   : > { %v7522_v29 = vadd.f32 %v11916_v31, %v15696_v44  ;;  %v10974_v5 = vpop.f32.mrb[52].mxu1 }
 0x364   : > { %v9299_v54 = vpack.c.bf16 %v7592_v42, %v7591_v40  ;;  %v7521_v20 = vadd.f32 %v11917_v59, %v15696_v44  ;;  %v11534_v41 = vpop.f32.mrb[52].mxu0  ;;  %v3940_v63 = vpop.f32.mrb[53].mxu1 }
 0x365   : > { %v7594_v23 = vmax.f32 %v7522_v29, 0.0  ;;  %v11918_v49 = vadd.f32 %v11534_v41, %v10974_v5  ;;  %v7293_v12 = vpop.f32.mrb[53].mxu0 }
 0x366   : > { %9498 = vst [vmem:[%s15704_s20 + $0xc0] sm:$0xff] %v9299_v54   ;;  %v7593_v3 = vmax.f32 %v7521_v20, 0.0  ;;  %v11919_v19 = vadd.f32 %v7293_v12, %v3940_v63 }
 0x367   : > { %v7524_v45 = vadd.f32 %v11918_v49, %v15696_v44  ;;  %v10977_v21 = vpop.f32.mrb[54].mxu1 }
 0x368   : > { %v9304_v50 = vpack.c.bf16 %v7594_v23, %v7593_v3  ;;  %v7523_v61 = vadd.f32 %v11919_v19, %v15696_v44  ;;  %v11537_v36 = vpop.f32.mrb[54].mxu0  ;;  %v3950_v0 = vpop.f32.mrb[55].mxu1 }
 0x369   : > { %v7596_v62 = vmax.f32 %v7524_v45, 0.0  ;;  %v11920_v17 = vadd.f32 %v11537_v36, %v10977_v21  ;;  %v7303_v1 = vpop.f32.mrb[55].mxu0 }
 0x36a   : > { %9499 = vst [vmem:[%s15704_s20 + $0xc8] sm:$0xff] %v9304_v50   ;;  %v7595_v13 = vmax.f32 %v7523_v61, 0.0  ;;  %v11921_v26 = vadd.f32 %v7303_v1, %v3950_v0 }
 0x36b   : > { %v7526_v35 = vadd.f32 %v11920_v17, %v15696_v44  ;;  %v10980_v58 = vpop.f32.mrb[56].mxu1 }
 0x36c   : > { %v9309_v11 = vpack.c.bf16 %v7596_v62, %v7595_v13  ;;  %v7525_v43 = vadd.f32 %v11921_v26, %v15696_v44  ;;  %v11540_v57 = vpop.f32.mrb[56].mxu0  ;;  %v3960_v53 = vpop.f32.mrb[57].mxu1 }
 0x36d   : > { %v7598_v8 = vmax.f32 %v7526_v35, 0.0  ;;  %v11922_v38 = vadd.f32 %v11540_v57, %v10980_v58  ;;  %v7313_v46 = vpop.f32.mrb[57].mxu0 }
 0x36e   : > { %9500 = vst [vmem:[%s15704_s20 + $0xd0] sm:$0xff] %v9309_v11   ;;  %v7597_v51 = vmax.f32 %v7525_v43, 0.0  ;;  %v11923_v24 = vadd.f32 %v7313_v46, %v3960_v53 }
 0x36f   : > { %v7528_v39 = vadd.f32 %v11922_v38, %v15696_v44  ;;  %v10983_v22 = vpop.f32.mrb[58].mxu1 }
 0x370   : > { %v9314_v28 = vpack.c.bf16 %v7598_v8, %v7597_v51  ;;  %v7527_v15 = vadd.f32 %v11923_v24, %v15696_v44  ;;  %v11543_v56 = vpop.f32.mrb[58].mxu0  ;;  %v3970_v33 = vpop.f32.mrb[59].mxu1 }
 0x371   : > { %v7600_v16 = vmax.f32 %v7528_v39, 0.0  ;;  %v11924_v18 = vadd.f32 %v11543_v56, %v10983_v22  ;;  %v7323_v6 = vpop.f32.mrb[59].mxu0 }
 0x372   : > { %9501 = vst [vmem:[%s15704_s20 + $0xd8] sm:$0xff] %v9314_v28   ;;  %v7599_v55 = vmax.f32 %v7527_v15, 0.0  ;;  %v11925_v60 = vadd.f32 %v7323_v6, %v3970_v33 }
 0x373   : > { %v7530_v9 = vadd.f32 %v11924_v18, %v15696_v44  ;;  %v10986_v14 = vpop.f32.mrb[60].mxu1 }
 0x374   : > { %v9319_v34 = vpack.c.bf16 %v7600_v16, %v7599_v55  ;;  %v7529_v32 = vadd.f32 %v11925_v60, %v15696_v44  ;;  %v11546_v27 = vpop.f32.mrb[60].mxu0  ;;  %v3980_v48 = vpop.f32.mrb[61].mxu1 }
 0x375   : > { %v7602_v4 = vmax.f32 %v7530_v9, 0.0  ;;  %v11926_v25 = vadd.f32 %v11546_v27, %v10986_v14  ;;  %v7333_v2 = vpop.f32.mrb[61].mxu0 }
 0x376   : > { %9502 = vst [vmem:[%s15704_s20 + $0xe0] sm:$0xff] %v9319_v34   ;;  %v7601_v47 = vmax.f32 %v7529_v32, 0.0  ;;  %v11927_v37 = vadd.f32 %v7333_v2, %v3980_v48 }
 0x377   : > { %v7532_v7 = vadd.f32 %v11926_v25, %v15696_v44  ;;  %v10989_v10 = vpop.f32.mrb[62].mxu1 }
 0x378   : > { %v9324_v52 = vpack.c.bf16 %v7602_v4, %v7601_v47  ;;  %v7531_v42 = vadd.f32 %v11927_v37, %v15696_v44  ;;  %v11549_v31 = vpop.f32.mrb[62].mxu0  ;;  %v3990_v30 = vpop.f32.mrb[63].mxu1 }
 0x379   : > { %v7604_v40 = vmax.f32 %v7532_v7, 0.0  ;;  %v11928_v59 = vadd.f32 %v11549_v31, %v10989_v10  ;;  %v7343_v29 = vpop.f32.mrb[63].mxu0 }
 0x37a   : > { %9503 = vst [vmem:[%s15704_s20 + $0xe8] sm:$0xff] %v9324_v52   ;;  %v7603_v5 = vmax.f32 %v7531_v42, 0.0  ;;  %v11929_v54 = vadd.f32 %v7343_v29, %v3990_v30 }
 0x37b   : > { %v7534_v20 = vadd.f32 %v11928_v59, %v15696_v44  ;;  %v10992_v41 = vpop.f32.mrb[64].mxu1 }
 0x37c   : > { %v9329_v63 = vpack.c.bf16 %v7604_v40, %v7603_v5  ;;  %v7533_v23 = vadd.f32 %v11929_v54, %v15696_v44  ;;  %v11552_v49 = vpop.f32.mrb[64].mxu0  ;;  %v4000_v12 = vpop.f32.mrb[65].mxu1 }
 0x37d   : > { %v7606_v3 = vmax.f32 %v7534_v20, 0.0  ;;  %v11930_v19 = vadd.f32 %v11552_v49, %v10992_v41  ;;  %v7353_v45 = vpop.f32.mrb[65].mxu0 }
 0x37e   : > { %9504 = vst [vmem:[%s15704_s20 + $0xf0] sm:$0xff] %v9329_v63   ;;  %v7605_v21 = vmax.f32 %v7533_v23, 0.0  ;;  %v11931_v50 = vadd.f32 %v7353_v45, %v4000_v12 }
 0x37f   : > { %v7536_v61 = vadd.f32 %v11930_v19, %v15696_v44  ;;  %v10995_v36 = vpop.f32.mrb[66].mxu1 }
 0x380   : > { %v9334_v0 = vpack.c.bf16 %v7606_v3, %v7605_v21  ;;  %v7535_v62 = vadd.f32 %v11931_v50, %v15696_v44  ;;  %v11555_v17 = vpop.f32.mrb[66].mxu0  ;;  %v4010_v1 = vpop.f32.mrb[67].mxu1 }
 0x381   : > { %v7608_v13 = vmax.f32 %v7536_v61, 0.0  ;;  %v11932_v26 = vadd.f32 %v11555_v17, %v10995_v36  ;;  %v7363_v35 = vpop.f32.mrb[67].mxu0 }
 0x382   : > { %9505 = vst [vmem:[%s15704_s20 + $0xf8] sm:$0xff] %v9334_v0   ;;  %v7607_v58 = vmax.f32 %v7535_v62, 0.0  ;;  %v11933_v11 = vadd.f32 %v7363_v35, %v4010_v1 }
 0x383   : > { %v7538_v43 = vadd.f32 %v11932_v26, %v15696_v44  ;;  %v10998_v57 = vpop.f32.mrb[68].mxu1 }
 0x384   : > { %v9339_v53 = vpack.c.bf16 %v7608_v13, %v7607_v58  ;;  %v7537_v8 = vadd.f32 %v11933_v11, %v15696_v44  ;;  %v11558_v38 = vpop.f32.mrb[68].mxu0  ;;  %v4020_v46 = vpop.f32.mrb[69].mxu1 }
 0x385   : > { %v7610_v51 = vmax.f32 %v7538_v43, 0.0  ;;  %v11934_v24 = vadd.f32 %v11558_v38, %v10998_v57  ;;  %v7373_v39 = vpop.f32.mrb[69].mxu0 }
 0x386   : > { %9506 = vst [vmem:[%s15704_s20 + $0x100] sm:$0xff] %v9339_v53   ;;  %v7609_v22 = vmax.f32 %v7537_v8, 0.0  ;;  %v11935_v28 = vadd.f32 %v7373_v39, %v4020_v46 }
 0x387   : > { %v7540_v15 = vadd.f32 %v11934_v24, %v15696_v44  ;;  %v11001_v56 = vpop.f32.mrb[70].mxu1 }
 0x388   : > { %v9344_v33 = vpack.c.bf16 %v7610_v51, %v7609_v22  ;;  %v7539_v16 = vadd.f32 %v11935_v28, %v15696_v44  ;;  %v11561_v18 = vpop.f32.mrb[70].mxu0  ;;  %v4030_v6 = vpop.f32.mrb[71].mxu1 }
 0x389   : > { %v7612_v55 = vmax.f32 %v7540_v15, 0.0  ;;  %v11936_v60 = vadd.f32 %v11561_v18, %v11001_v56  ;;  %v7383_v9 = vpop.f32.mrb[71].mxu0 }
 0x38a   : > { %9507 = vst [vmem:[%s15704_s20 + $0x108] sm:$0xff] %v9344_v33   ;;  %v7611_v14 = vmax.f32 %v7539_v16, 0.0  ;;  %v11937_v34 = vadd.f32 %v7383_v9, %v4030_v6 }
 0x38b   : > { %v7542_v32 = vadd.f32 %v11936_v60, %v15696_v44 }
 0x38c   : > { %v9349_v27 = vpack.c.bf16 %v7612_v55, %v7611_v14  ;;  %v7541_v48 = vadd.f32 %v11937_v34, %v15696_v44 }
 0x38d   : > { %v7614_v4 = vmax.f32 %v7542_v32, 0.0 }
 0x38e   : > { %9508 = vst [vmem:[%s15704_s20 + $0x110] sm:$0xff] %v9349_v27   ;;  %v7613_v25 = vmax.f32 %v7541_v48, 0.0 }
 0x390   : > { %v9354_v2 = vpack.c.bf16 %v7614_v4, %v7613_v25 }
 0x392   : > { %9509 = vst [vmem:[%s15704_s20 + $0x118] sm:$0xff] %v9354_v2  }
 0x393 PF: > { %s13_s12 = sadd.s32 1, %s12470_s12  }
 0x394   : > { %p10_p4 = scmp.ge.s32.totalorder %s13_s12, 4  }
 0x396   :  { %12 = sbr.rel (!%p10_p4) target bundleno = 1 (0x1), region = 72 }

// kernel: cnn_emnist_forward.5
= control target key start
LH: loop header
LB: loop body
LE: loop exit
PB: predicated region body
PF: predicated region fallthrough
CT: control target
= control target key end

     0   :  { %vm8619_vm0 = vmmov 0   ;;  %s10549_s1 = inlined_call_operand.vmem [shape: bf16[9216,128], index: 1, kind: input, shape index: {}]   ;;  %s10550_s0 = inlined_call_operand.vmem [shape: bf16[8,9216], index: 0, kind: input, shape index: {}]   ;;  %s10551_s2 = inlined_call_operand.vmem [shape: f32[1,128], index: 2, kind: input, shape index: {}]   ;;  %s10552_s3 = inlined_call_operand.vmem [shape: bf16[128,128], index: 3, kind: input, shape index: {}]   ;;  %s10553_s4 = inlined_call_operand.vmem [shape: f32[1,128], index: 4, kind: input, shape index: {}]   ;;  %s10554_s5 = inlined_call_operand.vmem [shape: f32[8,128], index: 5, kind: output, shape index: {}]  }
   0x1   :  { %v7962_v0 = vld [vmem:[%s10549_s1 + $0x40] sm:$0xff]   ;;  %v7966_v4 = vld [vmem:[%s10549_s1 + $0x48] sm:$0xff]   ;;  %v7970_v8 = vld [vmem:[%s10549_s1 + $0x50] sm:$0xff]  }
   0x2   :  { %v7963_v1 = vld [vmem:[%s10549_s1 + $0xc0] sm:$0xff]   ;;  %7139 = vmatprep.subr.bf16.mxu0 %v7962_v0  ;;  %v7967_v5 = vld [vmem:[%s10549_s1 + $0xc8] sm:$0xff]   ;;  %v7971_v9 = vld [vmem:[%s10549_s1 + $0xd0] sm:$0xff]  }
   0x3   :  { %v7964_v2 = vld [vmem:[%s10549_s1] sm:$0xff]   ;;  %7161 = vmatprep.subr.bf16.mxu1 %v7963_v1  ;;  %v7968_v6 = vld [vmem:[%s10549_s1 + $0x8] sm:$0xff]   ;;  %v7972_v10 = vld [vmem:[%s10549_s1 + $0x10] sm:$0xff]  }
   0x4   :  { %v7965_v3 = vld [vmem:[%s10549_s1 + $0x80] sm:$0xff]   ;;  %7140 = vmatpush3.bf16.msra.mxu0 %v7964_v2  ;;  %v7969_v7 = vld [vmem:[%s10549_s1 + $0x88] sm:$0xff]   ;;  %v7973_v11 = vld [vmem:[%s10549_s1 + $0x90] sm:$0xff]  }
   0x5   :  { %7162 = vmatpush3.bf16.msra.mxu1 %v7965_v3  ;;  %7141 = vmatprep.subr.bf16.mxu0 %v7966_v4  ;;  %v7974_v12 = vld [vmem:[%s10549_s1 + $0x58] sm:$0xff]   ;;  %v7978_v16 = vld [vmem:[%s10549_s1 + $0x60] sm:$0xff]   ;;  %v7982_v20 = vld [vmem:[%s10549_s1 + $0x68] sm:$0xff]  }
   0x6   :  { %7163 = vmatprep.subr.bf16.mxu1 %v7967_v5  ;;  %v7975_v13 = vld [vmem:[%s10549_s1 + $0xd8] sm:$0xff]   ;;  %v7979_v17 = vld [vmem:[%s10549_s1 + $0xe0] sm:$0xff]   ;;  %v7983_v21 = vld [vmem:[%s10549_s1 + $0xe8] sm:$0xff]  }
   0x7   :  { %v7976_v14 = vld [vmem:[%s10549_s1 + $0x18] sm:$0xff]   ;;  %v7980_v18 = vld [vmem:[%s10549_s1 + $0x20] sm:$0xff]   ;;  %v7984_v22 = vld [vmem:[%s10549_s1 + $0x28] sm:$0xff]  }
   0x8   :  { %7142 = vmatpush3.bf16.msra.mxu0 %v7968_v6  ;;  %v7977_v15 = vld [vmem:[%s10549_s1 + $0x98] sm:$0xff]   ;;  %v7981_v19 = vld [vmem:[%s10549_s1 + $0xa0] sm:$0xff]   ;;  %v7985_v23 = vld [vmem:[%s10549_s1 + $0xa8] sm:$0xff]  }
   0x9   :  { %7164 = vmatpush3.bf16.msra.mxu1 %v7969_v7  ;;  %7143 = vmatprep.subr.bf16.mxu0 %v7970_v8  ;;  %v7986_v24 = vld [vmem:[%s10549_s1 + $0x70] sm:$0xff]   ;;  %v7990_v28 = vld [vmem:[%s10549_s1 + $0x78] sm:$0xff]   ;;  %v21_v32 = vld [vmem:[%s10550_s0] sm:$0xff] }
   0xa   :  { %7165 = vmatprep.subr.bf16.mxu1 %v7971_v9  ;;  %v7987_v25 = vld [vmem:[%s10549_s1 + $0xf0] sm:$0xff]   ;;  %v7991_v29 = vld [vmem:[%s10549_s1 + $0xf8] sm:$0xff]   ;;  %v22_v33 = vld [vmem:[%s10550_s0 + $0x8] sm:$0xff]  ;;  %v6482_v34 = vcombine.low %v21_v32, %v21_v32  ;;  %v6483_v35 = vcombine.high %v21_v32, %v21_v32 }
   0xb   :  { %v7988_v26 = vld [vmem:[%s10549_s1 + $0x30] sm:$0xff]   ;;  %v7992_v30 = vld [vmem:[%s10549_s1 + $0x38] sm:$0xff]   ;;  %v6484_v36 = vcombine.low %v22_v33, %v22_v33  ;;  %v6485_v37 = vcombine.high %v22_v33, %v22_v33  ;;  %v7998_v38 = vld [vmem:[%s10549_s1 + $0x140] sm:$0xff]  }
   0xc   :  { %7144 = vmatpush3.bf16.msra.mxu0 %v7972_v10  ;;  %v7989_v27 = vld [vmem:[%s10549_s1 + $0xb0] sm:$0xff]   ;;  %v7993_v31 = vld [vmem:[%s10549_s1 + $0xb8] sm:$0xff]   ;;  %v7999_v39 = vld [vmem:[%s10549_s1 + $0x1c0] sm:$0xff]   ;;  %4956 = vmatprep.mubr.bf16.mxu0 %v6483_v35 }
   0xd   :  { %7166 = vmatpush3.bf16.msra.mxu1 %v7973_v11  ;;  %7145 = vmatprep.subr.bf16.mxu0 %v7974_v12  ;;  %v8000_v40 = vld [vmem:[%s10549_s1 + $0x100] sm:$0xff]   ;;  %v8002_v42 = vld [vmem:[%s10549_s1 + $0x148] sm:$0xff]   ;;  %v8006_v46 = vld [vmem:[%s10549_s1 + $0x150] sm:$0xff]  }
   0xe   :  { %7167 = vmatprep.subr.bf16.mxu1 %v7975_v13  ;;  %4996 = vmatprep.mubr.bf16.mxu1 %v6485_v37  ;;  %v8001_v41 = vld [vmem:[%s10549_s1 + $0x180] sm:$0xff]   ;;  %v8003_v43 = vld [vmem:[%s10549_s1 + $0x1c8] sm:$0xff]   ;;  %v8007_v47 = vld [vmem:[%s10549_s1 + $0x1d0] sm:$0xff]  }
   0xf   :  { %v8004_v44 = vld [vmem:[%s10549_s1 + $0x108] sm:$0xff]   ;;  %v8008_v48 = vld [vmem:[%s10549_s1 + $0x110] sm:$0xff]   ;;  %v8010_v50 = vld [vmem:[%s10549_s1 + $0x158] sm:$0xff]  }
  0x10   :  { %7146 = vmatpush3.bf16.msra.mxu0 %v7976_v14  ;;  %v8005_v45 = vld [vmem:[%s10549_s1 + $0x188] sm:$0xff]   ;;  %v8009_v49 = vld [vmem:[%s10549_s1 + $0x190] sm:$0xff]   ;;  %v8011_v51 = vld [vmem:[%s10549_s1 + $0x1d8] sm:$0xff]  }
  0x11   :  { %7168 = vmatpush3.bf16.msra.mxu1 %v7977_v15  ;;  %7147 = vmatprep.subr.bf16.mxu0 %v7978_v16  ;;  %v8012_v52 = vld [vmem:[%s10549_s1 + $0x118] sm:$0xff]   ;;  %v8014_v54 = vld [vmem:[%s10549_s1 + $0x160] sm:$0xff]   ;;  %v8018_v58 = vld [vmem:[%s10549_s1 + $0x168] sm:$0xff]  }
  0x12   :  { %7169 = vmatprep.subr.bf16.mxu1 %v7979_v17  ;;  %v8013_v53 = vld [vmem:[%s10549_s1 + $0x198] sm:$0xff]   ;;  %v8015_v55 = vld [vmem:[%s10549_s1 + $0x1e0] sm:$0xff]   ;;  %v8019_v59 = vld [vmem:[%s10549_s1 + $0x1e8] sm:$0xff]  }
  0x13   :  { %v8016_v56 = vld [vmem:[%s10549_s1 + $0x120] sm:$0xff]   ;;  %v8020_v60 = vld [vmem:[%s10549_s1 + $0x128] sm:$0xff]   ;;  %v8022_v62 = vld [vmem:[%s10549_s1 + $0x170] sm:$0xff]  }
  0x14   :  { %7148 = vmatpush3.bf16.msra.mxu0 %v7980_v18  ;;  %v8017_v57 = vld [vmem:[%s10549_s1 + $0x1a0] sm:$0xff]   ;;  %v8021_v61 = vld [vmem:[%s10549_s1 + $0x1a8] sm:$0xff]   ;;  %v8023_v63 = vld [vmem:[%s10549_s1 + $0x1f0] sm:$0xff]  }
  0x15   :  { %7170 = vmatpush3.bf16.msra.mxu1 %v7981_v19  ;;  %7149 = vmatprep.subr.bf16.mxu0 %v7982_v20  ;;  %v8024_v0 = vld [vmem:[%s10549_s1 + $0x130] sm:$0xff]   ;;  %v8026_v2 = vld [vmem:[%s10549_s1 + $0x178] sm:$0xff]   ;;  %v8034_v12 = vld [vmem:[%s10549_s1 + $0x240] sm:$0xff]  }
  0x16   :  { %7171 = vmatprep.subr.bf16.mxu1 %v7983_v21  ;;  %v8025_v1 = vld [vmem:[%s10549_s1 + $0x1b0] sm:$0xff]   ;;  %v8027_v3 = vld [vmem:[%s10549_s1 + $0x1f8] sm:$0xff]   ;;  %v8035_v13 = vld [vmem:[%s10549_s1 + $0x2c0] sm:$0xff]  }
  0x17   :  { %v8028_v4 = vld [vmem:[%s10549_s1 + $0x138] sm:$0xff]   ;;  %v23_v6 = vld [vmem:[%s10550_s0 + $0x10] sm:$0xff]  ;;  %v8036_v14 = vld [vmem:[%s10549_s1 + $0x200] sm:$0xff]  }
  0x18   :  { %7150 = vmatpush3.bf16.msra.mxu0 %v7984_v22  ;;  %v8029_v5 = vld [vmem:[%s10549_s1 + $0x1b8] sm:$0xff]   ;;  %v6486_v7 = vcombine.low %v23_v6, %v23_v6  ;;  %v6487_v8 = vcombine.high %v23_v6, %v23_v6  ;;  %v8037_v15 = vld [vmem:[%s10549_s1 + $0x280] sm:$0xff]   ;;  %v8038_v16 = vld [vmem:[%s10549_s1 + $0x248] sm:$0xff]  }
  0x19   :  { %7172 = vmatpush3.bf16.msra.mxu1 %v7985_v23  ;;  %7151 = vmatprep.subr.bf16.mxu0 %v7986_v24  ;;  %v24_v9 = vld [vmem:[%s10550_s0 + $0x18] sm:$0xff]  ;;  %v8039_v17 = vld [vmem:[%s10549_s1 + $0x2c8] sm:$0xff]   ;;  %v8042_v20 = vld [vmem:[%s10549_s1 + $0x250] sm:$0xff]  }
  0x1a   :  { %7173 = vmatprep.subr.bf16.mxu1 %v7987_v25  ;;  %v6488_v10 = vcombine.low %v24_v9, %v24_v9  ;;  %v6489_v11 = vcombine.high %v24_v9, %v24_v9  ;;  %v8040_v18 = vld [vmem:[%s10549_s1 + $0x208] sm:$0xff]   ;;  %v8043_v21 = vld [vmem:[%s10549_s1 + $0x2d0] sm:$0xff]   ;;  %v8046_v24 = vld [vmem:[%s10549_s1 + $0x258] sm:$0xff]  }
  0x1b   :  { %v8041_v19 = vld [vmem:[%s10549_s1 + $0x288] sm:$0xff]   ;;  %v8044_v22 = vld [vmem:[%s10549_s1 + $0x210] sm:$0xff]   ;;  %v8047_v25 = vld [vmem:[%s10549_s1 + $0x2d8] sm:$0xff]  }
  0x1c   :  { %7152 = vmatpush3.bf16.msra.mxu0 %v7988_v26  ;;  %v8045_v23 = vld [vmem:[%s10549_s1 + $0x290] sm:$0xff]   ;;  %v8048_v26 = vld [vmem:[%s10549_s1 + $0x218] sm:$0xff]   ;;  %v8054_v32 = vld [vmem:[%s10549_s1 + $0x268] sm:$0xff]  }
  0x1d   :  { %7174 = vmatpush3.bf16.msra.mxu1 %v7989_v27  ;;  %7153 = vmatprep.subr.bf16.mxu0 %v7990_v28  ;;  %v8049_v27 = vld [vmem:[%s10549_s1 + $0x298] sm:$0xff]   ;;  %v8050_v28 = vld [vmem:[%s10549_s1 + $0x260] sm:$0xff]   ;;  %v8055_v33 = vld [vmem:[%s10549_s1 + $0x2e8] sm:$0xff]  }
  0x1e   :  { %7175 = vmatprep.subr.bf16.mxu1 %v7991_v29  ;;  %v8051_v29 = vld [vmem:[%s10549_s1 + $0x2e0] sm:$0xff]   ;;  %v8057_v35 = vld [vmem:[%s10549_s1 + $0x2a8] sm:$0xff]   ;;  %v8059_v37 = vld [vmem:[%s10549_s1 + $0x2f0] sm:$0xff]  }
  0x1f   :  { %v8090_v6 = vld [vmem:[%s10549_s1 + $0x368] sm:$0xff]  }
  0x20   :  { %7154 = vmatpush3.bf16.msra.mxu0 %v7992_v30  ;;  %v8052_v30 = vld [vmem:[%s10549_s1 + $0x220] sm:$0xff]   ;;  %v8093_v9 = vld [vmem:[%s10549_s1 + $0x3a8] sm:$0xff]  }
  0x21   :  { %7176 = vmatpush3.bf16.msra.mxu1 %v7993_v31  ;;  %7183 = vmatprep.subr.bf16.mxu0 %v7998_v38  ;;  %v8053_v31 = vld [vmem:[%s10549_s1 + $0x2a0] sm:$0xff]   ;;  %v8060_v38 = vld [vmem:[%s10549_s1 + $0x230] sm:$0xff]  }
  0x22   :  { %7205 = vmatprep.subr.bf16.mxu1 %v7999_v39  ;;  %v8061_v39 = vld [vmem:[%s10549_s1 + $0x2b0] sm:$0xff]  }
  0x23   :  { %4957 = vmatmul.mubr.bf16.vlgmr.msra.gmra.mrb[0].mxu0 %v6482_v34  ;;  %v8056_v34 = vld [vmem:[%s10549_s1 + $0x228] sm:$0xff]  }
  0x24   :  { %4997 = vmatmul.mubr.bf16.vlgmr.msra.gmra.mrb[0].mxu1 %v6484_v36  ;;  %7184 = vmatpush3.bf16.msra.mxu0 %v8000_v40  ;;  %v8058_v36 = vld [vmem:[%s10549_s1 + $0x270] sm:$0xff]   ;;  %v8062_v40 = vld [vmem:[%s10549_s1 + $0x278] sm:$0xff]  }
  0x25   :  { %7206 = vmatpush3.bf16.msra.mxu1 %v8001_v41  ;;  %7185 = vmatprep.subr.bf16.mxu0 %v8002_v42  ;;  %v8063_v41 = vld [vmem:[%s10549_s1 + $0x2f8] sm:$0xff]  }
  0x26   :  { %7207 = vmatprep.subr.bf16.mxu1 %v8003_v43  ;;  %5036 = vmatprep.mubr.bf16.mxu0 %v6487_v8  ;;  %v8064_v42 = vld [vmem:[%s10549_s1 + $0x238] sm:$0xff]   ;;  %v8092_v8 = vld [vmem:[%s10549_s1 + $0x328] sm:$0xff]  }
  0x27   :  { %5076 = vmatprep.mubr.bf16.mxu1 %v6489_v11  ;;  %v8065_v43 = vld [vmem:[%s10549_s1 + $0x2b8] sm:$0xff]   ;;  %v8095_v11 = vld [vmem:[%s10549_s1 + $0x3f0] sm:$0xff]  }
  0x28   :  { %7186 = vmatpush3.bf16.msra.mxu0 %v8004_v44  ;;  %v25_v44 = vld [vmem:[%s10550_s0 + $0x20] sm:$0xff] }
  0x29   :  { %7208 = vmatpush3.bf16.msra.mxu1 %v8005_v45  ;;  %7187 = vmatprep.subr.bf16.mxu0 %v8006_v46  ;;  %v26_v45 = vld [vmem:[%s10550_s0 + $0x28] sm:$0xff]  ;;  %v6490_v46 = vcombine.low %v25_v44, %v25_v44 }
  0x2a   :  { %7209 = vmatprep.subr.bf16.mxu1 %v8007_v47  ;;  %v6491_v47 = vcombine.high %v25_v44, %v25_v44  ;;  %v8126_v44 = vld [vmem:[%s10549_s1 + $0x468] sm:$0xff]  }
  0x2c   :  { %7188 = vmatpush3.bf16.msra.mxu0 %v8008_v48  ;;  %v6492_v48 = vcombine.low %v26_v45, %v26_v45 }
  0x2d   :  { %7210 = vmatpush3.bf16.msra.mxu1 %v8009_v49  ;;  %7189 = vmatprep.subr.bf16.mxu0 %v8010_v50  ;;  %v6493_v49 = vcombine.high %v26_v45, %v26_v45  ;;  %v8070_v50 = vld [vmem:[%s10549_s1 + $0x340] sm:$0xff]   ;;  %v8127_v45 = vld [vmem:[%s10549_s1 + $0x4e8] sm:$0xff]  }
  0x2e   :  { %7211 = vmatprep.subr.bf16.mxu1 %v8011_v51  ;;  %v8071_v51 = vld [vmem:[%s10549_s1 + $0x3c0] sm:$0xff]  }
  0x30   :  { %7190 = vmatpush3.bf16.msra.mxu0 %v8012_v52  ;;  %v8072_v52 = vld [vmem:[%s10549_s1 + $0x300] sm:$0xff]  }
  0x31   :  { %7212 = vmatpush3.bf16.msra.mxu1 %v8013_v53  ;;  %7191 = vmatprep.subr.bf16.mxu0 %v8014_v54  ;;  %v8073_v53 = vld [vmem:[%s10549_s1 + $0x380] sm:$0xff]   ;;  %v8074_v54 = vld [vmem:[%s10549_s1 + $0x348] sm:$0xff]  }
  0x32   :  { %7213 = vmatprep.subr.bf16.mxu1 %v8015_v55  ;;  %v8075_v55 = vld [vmem:[%s10549_s1 + $0x3c8] sm:$0xff]  }
  0x34   :  { %7192 = vmatpush3.bf16.msra.mxu0 %v8016_v56  ;;  %v8076_v56 = vld [vmem:[%s10549_s1 + $0x308] sm:$0xff]  }
  0x35   :  { %7214 = vmatpush3.bf16.msra.mxu1 %v8017_v57  ;;  %7193 = vmatprep.subr.bf16.mxu0 %v8018_v58  ;;  %v8077_v57 = vld [vmem:[%s10549_s1 + $0x388] sm:$0xff]   ;;  %v8078_v58 = vld [vmem:[%s10549_s1 + $0x350] sm:$0xff]  }
  0x36   :  { %7215 = vmatprep.subr.bf16.mxu1 %v8019_v59  ;;  %v8079_v59 = vld [vmem:[%s10549_s1 + $0x3d0] sm:$0xff]  }
  0x38   :  { %7194 = vmatpush3.bf16.msra.mxu0 %v8020_v60  ;;  %v8080_v60 = vld [vmem:[%s10549_s1 + $0x310] sm:$0xff]  }
  0x39   :  { %7216 = vmatpush3.bf16.msra.mxu1 %v8021_v61  ;;  %7195 = vmatprep.subr.bf16.mxu0 %v8022_v62  ;;  %v8081_v61 = vld [vmem:[%s10549_s1 + $0x390] sm:$0xff]   ;;  %v8082_v62 = vld [vmem:[%s10549_s1 + $0x358] sm:$0xff]  }
  0x3a   :  { %7217 = vmatprep.subr.bf16.mxu1 %v8023_v63  ;;  %v8083_v63 = vld [vmem:[%s10549_s1 + $0x3d8] sm:$0xff]  }
  0x3c   :  { %7196 = vmatpush3.bf16.msra.mxu0 %v8024_v0  ;;  %v8084_v0 = vld [vmem:[%s10549_s1 + $0x318] sm:$0xff]  }
  0x3d   :  { %7218 = vmatpush3.bf16.msra.mxu1 %v8025_v1  ;;  %7197 = vmatprep.subr.bf16.mxu0 %v8026_v2  ;;  %v8085_v1 = vld [vmem:[%s10549_s1 + $0x398] sm:$0xff]   ;;  %v8086_v2 = vld [vmem:[%s10549_s1 + $0x360] sm:$0xff]  }
  0x3e   :  { %7219 = vmatprep.subr.bf16.mxu1 %v8027_v3  ;;  %v8087_v3 = vld [vmem:[%s10549_s1 + $0x3e0] sm:$0xff]  }
  0x40   :  { %7198 = vmatpush3.bf16.msra.mxu0 %v8028_v4  ;;  %v8088_v4 = vld [vmem:[%s10549_s1 + $0x320] sm:$0xff]  }
  0x41   :  { %7220 = vmatpush3.bf16.msra.mxu1 %v8029_v5  ;;  %7227 = vmatprep.subr.bf16.mxu0 %v8034_v12  ;;  %v8089_v5 = vld [vmem:[%s10549_s1 + $0x3a0] sm:$0xff]   ;;  %v8096_v12 = vld [vmem:[%s10549_s1 + $0x330] sm:$0xff]  }
  0x42   :  { %7249 = vmatprep.subr.bf16.mxu1 %v8035_v13  ;;  %v8097_v13 = vld [vmem:[%s10549_s1 + $0x3b0] sm:$0xff]  }
  0x43   :  { %5037 = vmatmul.mubr.bf16.vlgmr.msra.gmra.mrb[4].mxu0 %v6486_v7  ;;  %v8091_v7 = vld [vmem:[%s10549_s1 + $0x3e8] sm:$0xff]  }
  0x44   :  { %5077 = vmatmul.mubr.bf16.vlgmr.msra.gmra.mrb[4].mxu1 %v6488_v10  ;;  %7228 = vmatpush3.bf16.msra.mxu0 %v8036_v14  ;;  %v8094_v10 = vld [vmem:[%s10549_s1 + $0x370] sm:$0xff]   ;;  %v8098_v14 = vld [vmem:[%s10549_s1 + $0x378] sm:$0xff]  }
  0x45   :  { %7250 = vmatpush3.bf16.msra.mxu1 %v8037_v15  ;;  %7229 = vmatprep.subr.bf16.mxu0 %v8038_v16  ;;  %v8099_v15 = vld [vmem:[%s10549_s1 + $0x3f8] sm:$0xff]  }
  0x46   :  { %7251 = vmatprep.subr.bf16.mxu1 %v8039_v17  ;;  %5116 = vmatprep.mubr.bf16.mxu0 %v6491_v47  ;;  %v8100_v16 = vld [vmem:[%s10549_s1 + $0x338] sm:$0xff]   ;;  %v8129_v47 = vld [vmem:[%s10549_s1 + $0x4a8] sm:$0xff]  }
  0x47   :  { %5156 = vmatprep.mubr.bf16.mxu1 %v6493_v49  ;;  %v8101_v17 = vld [vmem:[%s10549_s1 + $0x3b8] sm:$0xff]   ;;  %v8131_v49 = vld [vmem:[%s10549_s1 + $0x4f0] sm:$0xff]  }
  0x48   :  { %7230 = vmatpush3.bf16.msra.mxu0 %v8040_v18  ;;  %v27_v18 = vld [vmem:[%s10550_s0 + $0x30] sm:$0xff] }
  0x49   :  { %7252 = vmatpush3.bf16.msra.mxu1 %v8041_v19  ;;  %7231 = vmatprep.subr.bf16.mxu0 %v8042_v20  ;;  %v28_v19 = vld [vmem:[%s10550_s0 + $0x38] sm:$0xff]  ;;  %v6494_v20 = vcombine.low %v27_v18, %v27_v18 }
  0x4a   :  { %7253 = vmatprep.subr.bf16.mxu1 %v8043_v21  ;;  %v6495_v21 = vcombine.high %v27_v18, %v27_v18  ;;  %v8162_v18 = vld [vmem:[%s10549_s1 + $0x568] sm:$0xff]  }
  0x4c   :  { %7232 = vmatpush3.bf16.msra.mxu0 %v8044_v22  ;;  %v6496_v22 = vcombine.low %v28_v19, %v28_v19 }
  0x4d   :  { %7254 = vmatpush3.bf16.msra.mxu1 %v8045_v23  ;;  %7233 = vmatprep.subr.bf16.mxu0 %v8046_v24  ;;  %v8106_v23 = vld [vmem:[%s10549_s1 + $0x440] sm:$0xff]   ;;  %v6497_v24 = vcombine.high %v28_v19, %v28_v19  ;;  %v8163_v19 = vld [vmem:[%s10549_s1 + $0x5e8] sm:$0xff]  }
  0x4e   :  { %7255 = vmatprep.subr.bf16.mxu1 %v8047_v25  ;;  %v8107_v25 = vld [vmem:[%s10549_s1 + $0x4c0] sm:$0xff]  }
  0x50   :  { %7234 = vmatpush3.bf16.msra.mxu0 %v8048_v26  ;;  %v8108_v26 = vld [vmem:[%s10549_s1 + $0x400] sm:$0xff]  }
  0x51   :  { %7256 = vmatpush3.bf16.msra.mxu1 %v8049_v27  ;;  %7235 = vmatprep.subr.bf16.mxu0 %v8050_v28  ;;  %v8109_v27 = vld [vmem:[%s10549_s1 + $0x480] sm:$0xff]   ;;  %v8110_v28 = vld [vmem:[%s10549_s1 + $0x448] sm:$0xff]  }
  0x52   :  { %7257 = vmatprep.subr.bf16.mxu1 %v8051_v29  ;;  %v8111_v29 = vld [vmem:[%s10549_s1 + $0x4c8] sm:$0xff]  }
  0x54   :  { %7236 = vmatpush3.bf16.msra.mxu0 %v8052_v30  ;;  %v8112_v30 = vld [vmem:[%s10549_s1 + $0x408] sm:$0xff]  }
  0x55   :  { %7258 = vmatpush3.bf16.msra.mxu1 %v8053_v31  ;;  %7237 = vmatprep.subr.bf16.mxu0 %v8054_v32  ;;  %v8113_v31 = vld [vmem:[%s10549_s1 + $0x488] sm:$0xff]   ;;  %v8114_v32 = vld [vmem:[%s10549_s1 + $0x450] sm:$0xff]  }
  0x56   :  { %7259 = vmatprep.subr.bf16.mxu1 %v8055_v33  ;;  %v8115_v33 = vld [vmem:[%s10549_s1 + $0x4d0] sm:$0xff]  }
  0x58   :  { %7238 = vmatpush3.bf16.msra.mxu0 %v8056_v34  ;;  %v8116_v34 = vld [vmem:[%s10549_s1 + $0x410] sm:$0xff]  }
  0x59   :  { %7260 = vmatpush3.bf16.msra.mxu1 %v8057_v35  ;;  %7239 = vmatprep.subr.bf16.mxu0 %v8058_v36  ;;  %v8117_v35 = vld [vmem:[%s10549_s1 + $0x490] sm:$0xff]   ;;  %v8118_v36 = vld [vmem:[%s10549_s1 + $0x458] sm:$0xff]  }
  0x5a   :  { %7261 = vmatprep.subr.bf16.mxu1 %v8059_v37  ;;  %v8119_v37 = vld [vmem:[%s10549_s1 + $0x4d8] sm:$0xff]  }
  0x5c   :  { %7240 = vmatpush3.bf16.msra.mxu0 %v8060_v38  ;;  %v8120_v38 = vld [vmem:[%s10549_s1 + $0x418] sm:$0xff]  }
  0x5d   :  { %7262 = vmatpush3.bf16.msra.mxu1 %v8061_v39  ;;  %7241 = vmatprep.subr.bf16.mxu0 %v8062_v40  ;;  %v8121_v39 = vld [vmem:[%s10549_s1 + $0x498] sm:$0xff]   ;;  %v8122_v40 = vld [vmem:[%s10549_s1 + $0x460] sm:$0xff]  }
  0x5e   :  { %7263 = vmatprep.subr.bf16.mxu1 %v8063_v41  ;;  %v8123_v41 = vld [vmem:[%s10549_s1 + $0x4e0] sm:$0xff]  }
  0x60   :  { %7242 = vmatpush3.bf16.msra.mxu0 %v8064_v42  ;;  %v8124_v42 = vld [vmem:[%s10549_s1 + $0x420] sm:$0xff]  }
  0x61   :  { %7264 = vmatpush3.bf16.msra.mxu1 %v8065_v43  ;;  %7271 = vmatprep.subr.bf16.mxu0 %v8070_v50  ;;  %v8125_v43 = vld [vmem:[%s10549_s1 + $0x4a0] sm:$0xff]   ;;  %v8132_v50 = vld [vmem:[%s10549_s1 + $0x430] sm:$0xff]  }
  0x62   :  { %7293 = vmatprep.subr.bf16.mxu1 %v8071_v51  ;;  %v8133_v51 = vld [vmem:[%s10549_s1 + $0x4b0] sm:$0xff]  }
  0x63   :  { %5117 = vmatmul.mubr.bf16.vlgmr.msra.gmra.mrb[8].mxu0 %v6490_v46  ;;  %v8128_v46 = vld [vmem:[%s10549_s1 + $0x428] sm:$0xff]  }
  0x64   :  { %5157 = vmatmul.mubr.bf16.vlgmr.msra.gmra.mrb[8].mxu1 %v6492_v48  ;;  %7272 = vmatpush3.bf16.msra.mxu0 %v8072_v52  ;;  %v8130_v48 = vld [vmem:[%s10549_s1 + $0x470] sm:$0xff]   ;;  %v8134_v52 = vld [vmem:[%s10549_s1 + $0x478] sm:$0xff]  }
  0x65   :  { %7294 = vmatpush3.bf16.msra.mxu1 %v8073_v53  ;;  %7273 = vmatprep.subr.bf16.mxu0 %v8074_v54  ;;  %v8135_v53 = vld [vmem:[%s10549_s1 + $0x4f8] sm:$0xff]  }
  0x66   :  { %7295 = vmatprep.subr.bf16.mxu1 %v8075_v55  ;;  %5196 = vmatprep.mubr.bf16.mxu0 %v6495_v21  ;;  %v8136_v54 = vld [vmem:[%s10549_s1 + $0x438] sm:$0xff]   ;;  %v8165_v21 = vld [vmem:[%s10549_s1 + $0x5a8] sm:$0xff]  }
  0x67   :  { %5236 = vmatprep.mubr.bf16.mxu1 %v6497_v24  ;;  %v8137_v55 = vld [vmem:[%s10549_s1 + $0x4b8] sm:$0xff]   ;;  %v8168_v24 = vld [vmem:[%s10549_s1 + $0x530] sm:$0xff]  }
  0x68   :  { %7274 = vmatpush3.bf16.msra.mxu0 %v8076_v56  ;;  %v29_v56 = vld [vmem:[%s10550_s0 + $0x40] sm:$0xff] }
  0x69   :  { %7296 = vmatpush3.bf16.msra.mxu1 %v8077_v57  ;;  %7275 = vmatprep.subr.bf16.mxu0 %v8078_v58  ;;  %v6498_v57 = vcombine.low %v29_v56, %v29_v56  ;;  %v6499_v58 = vcombine.high %v29_v56, %v29_v56  ;;  %v8198_v56 = vld [vmem:[%s10549_s1 + $0x668] sm:$0xff]  }
  0x6a   :  { %7297 = vmatprep.subr.bf16.mxu1 %v8079_v59  ;;  %v30_v59 = vld [vmem:[%s10550_s0 + $0x48] sm:$0xff] }
  0x6c   :  { %7276 = vmatpush3.bf16.msra.mxu0 %v8080_v60  ;;  %v6500_v60 = vcombine.low %v30_v59, %v30_v59 }
  0x6d   :  { %7298 = vmatpush3.bf16.msra.mxu1 %v8081_v61  ;;  %7277 = vmatprep.subr.bf16.mxu0 %v8082_v62  ;;  %v6501_v61 = vcombine.high %v30_v59, %v30_v59  ;;  %v8142_v62 = vld [vmem:[%s10549_s1 + $0x540] sm:$0xff]   ;;  %v8201_v59 = vld [vmem:[%s10549_s1 + $0x6a8] sm:$0xff]  }
  0x6e   :  { %7299 = vmatprep.subr.bf16.mxu1 %v8083_v63  ;;  %v8143_v63 = vld [vmem:[%s10549_s1 + $0x5c0] sm:$0xff]  }
  0x70   :  { %7278 = vmatpush3.bf16.msra.mxu0 %v8084_v0  ;;  %v8144_v0 = vld [vmem:[%s10549_s1 + $0x500] sm:$0xff]  }
  0x71   :  { %7300 = vmatpush3.bf16.msra.mxu1 %v8085_v1  ;;  %7279 = vmatprep.subr.bf16.mxu0 %v8086_v2  ;;  %v8145_v1 = vld [vmem:[%s10549_s1 + $0x580] sm:$0xff]   ;;  %v8146_v2 = vld [vmem:[%s10549_s1 + $0x548] sm:$0xff]  }
  0x72   :  { %7301 = vmatprep.subr.bf16.mxu1 %v8087_v3  ;;  %v8147_v3 = vld [vmem:[%s10549_s1 + $0x5c8] sm:$0xff]  }
  0x74   :  { %7280 = vmatpush3.bf16.msra.mxu0 %v8088_v4  ;;  %v8148_v4 = vld [vmem:[%s10549_s1 + $0x508] sm:$0xff]  }
  0x75   :  { %7302 = vmatpush3.bf16.msra.mxu1 %v8089_v5  ;;  %7281 = vmatprep.subr.bf16.mxu0 %v8090_v6  ;;  %v8149_v5 = vld [vmem:[%s10549_s1 + $0x588] sm:$0xff]   ;;  %v8150_v6 = vld [vmem:[%s10549_s1 + $0x550] sm:$0xff]  }
  0x76   :  { %7303 = vmatprep.subr.bf16.mxu1 %v8091_v7  ;;  %v8151_v7 = vld [vmem:[%s10549_s1 + $0x5d0] sm:$0xff]  }
  0x78   :  { %7282 = vmatpush3.bf16.msra.mxu0 %v8092_v8  ;;  %v8152_v8 = vld [vmem:[%s10549_s1 + $0x510] sm:$0xff]  }
  0x79   :  { %7304 = vmatpush3.bf16.msra.mxu1 %v8093_v9  ;;  %7283 = vmatprep.subr.bf16.mxu0 %v8094_v10  ;;  %v8153_v9 = vld [vmem:[%s10549_s1 + $0x590] sm:$0xff]   ;;  %v8154_v10 = vld [vmem:[%s10549_s1 + $0x558] sm:$0xff]  }
  0x7a   :  { %7305 = vmatprep.subr.bf16.mxu1 %v8095_v11  ;;  %v8155_v11 = vld [vmem:[%s10549_s1 + $0x5d8] sm:$0xff]  }
  0x7c   :  { %7284 = vmatpush3.bf16.msra.mxu0 %v8096_v12  ;;  %v8156_v12 = vld [vmem:[%s10549_s1 + $0x518] sm:$0xff]  }
  0x7d   :  { %7306 = vmatpush3.bf16.msra.mxu1 %v8097_v13  ;;  %7285 = vmatprep.subr.bf16.mxu0 %v8098_v14  ;;  %v8157_v13 = vld [vmem:[%s10549_s1 + $0x598] sm:$0xff]   ;;  %v8158_v14 = vld [vmem:[%s10549_s1 + $0x560] sm:$0xff]  }
  0x7e   :  { %7307 = vmatprep.subr.bf16.mxu1 %v8099_v15  ;;  %v8159_v15 = vld [vmem:[%s10549_s1 + $0x5e0] sm:$0xff]  }
  0x80   :  { %7286 = vmatpush3.bf16.msra.mxu0 %v8100_v16  ;;  %v8160_v16 = vld [vmem:[%s10549_s1 + $0x520] sm:$0xff]  }
  0x81   :  { %7308 = vmatpush3.bf16.msra.mxu1 %v8101_v17  ;;  %7315 = vmatprep.subr.bf16.mxu0 %v8106_v23  ;;  %v8161_v17 = vld [vmem:[%s10549_s1 + $0x5a0] sm:$0xff]   ;;  %v8167_v23 = vld [vmem:[%s10549_s1 + $0x5f0] sm:$0xff]  }
  0x82   :  { %7337 = vmatprep.subr.bf16.mxu1 %v8107_v25  ;;  %v8169_v25 = vld [vmem:[%s10549_s1 + $0x5b0] sm:$0xff]  }
  0x83   :  { %5197 = vmatmul.mubr.bf16.vlgmr.msra.gmra.mrb[12].mxu0 %v6494_v20  ;;  %v8164_v20 = vld [vmem:[%s10549_s1 + $0x528] sm:$0xff]  }
  0x84   :  { %5237 = vmatmul.mubr.bf16.vlgmr.msra.gmra.mrb[12].mxu1 %v6496_v22  ;;  %7316 = vmatpush3.bf16.msra.mxu0 %v8108_v26  ;;  %v8166_v22 = vld [vmem:[%s10549_s1 + $0x570] sm:$0xff]   ;;  %v8170_v26 = vld [vmem:[%s10549_s1 + $0x578] sm:$0xff]  }
  0x85   :  { %7338 = vmatpush3.bf16.msra.mxu1 %v8109_v27  ;;  %7317 = vmatprep.subr.bf16.mxu0 %v8110_v28  ;;  %v8171_v27 = vld [vmem:[%s10549_s1 + $0x5f8] sm:$0xff]  }
  0x86   :  { %7339 = vmatprep.subr.bf16.mxu1 %v8111_v29  ;;  %5276 = vmatprep.mubr.bf16.mxu0 %v6499_v58  ;;  %v8172_v28 = vld [vmem:[%s10549_s1 + $0x538] sm:$0xff]   ;;  %v8200_v58 = vld [vmem:[%s10549_s1 + $0x628] sm:$0xff]  }
  0x87   :  { %5316 = vmatprep.mubr.bf16.mxu1 %v6501_v61  ;;  %v8173_v29 = vld [vmem:[%s10549_s1 + $0x5b8] sm:$0xff]   ;;  %v8203_v61 = vld [vmem:[%s10549_s1 + $0x6f0] sm:$0xff]  }
  0x88   :  { %7318 = vmatpush3.bf16.msra.mxu0 %v8112_v30  ;;  %v31_v30 = vld [vmem:[%s10550_s0 + $0x50] sm:$0xff] }
  0x89   :  { %7340 = vmatpush3.bf16.msra.mxu1 %v8113_v31  ;;  %7319 = vmatprep.subr.bf16.mxu0 %v8114_v32  ;;  %v32_v31 = vld [vmem:[%s10550_s0 + $0x58] sm:$0xff]  ;;  %v6502_v32 = vcombine.low %v31_v30, %v31_v30 }
  0x8a   :  { %7341 = vmatprep.subr.bf16.mxu1 %v8115_v33  ;;  %v6503_v33 = vcombine.high %v31_v30, %v31_v30  ;;  %v8233_v30 = vld [vmem:[%s10549_s1 + $0x7a0] sm:$0xff]  }
  0x8c   :  { %7320 = vmatpush3.bf16.msra.mxu0 %v8116_v34  ;;  %v6504_v34 = vcombine.low %v32_v31, %v32_v31 }
  0x8d   :  { %7342 = vmatpush3.bf16.msra.mxu1 %v8117_v35  ;;  %7321 = vmatprep.subr.bf16.mxu0 %v8118_v36  ;;  %v6505_v35 = vcombine.high %v32_v31, %v32_v31  ;;  %v8178_v36 = vld [vmem:[%s10549_s1 + $0x640] sm:$0xff]  }
  0x8e   :  { %7343 = vmatprep.subr.bf16.mxu1 %v8119_v37  ;;  %v8179_v37 = vld [vmem:[%s10549_s1 + $0x6c0] sm:$0xff]  }
  0x90   :  { %7322 = vmatpush3.bf16.msra.mxu0 %v8120_v38  ;;  %v8180_v38 = vld [vmem:[%s10549_s1 + $0x600] sm:$0xff]  }
  0x91   :  { %7344 = vmatpush3.bf16.msra.mxu1 %v8121_v39  ;;  %7323 = vmatprep.subr.bf16.mxu0 %v8122_v40  ;;  %v8181_v39 = vld [vmem:[%s10549_s1 + $0x680] sm:$0xff]   ;;  %v8182_v40 = vld [vmem:[%s10549_s1 + $0x648] sm:$0xff]  }
  0x92   :  { %7345 = vmatprep.subr.bf16.mxu1 %v8123_v41  ;;  %v8183_v41 = vld [vmem:[%s10549_s1 + $0x6c8] sm:$0xff]  }
  0x94   :  { %7324 = vmatpush3.bf16.msra.mxu0 %v8124_v42  ;;  %v8184_v42 = vld [vmem:[%s10549_s1 + $0x608] sm:$0xff]  }
  0x95   :  { %7346 = vmatpush3.bf16.msra.mxu1 %v8125_v43  ;;  %7325 = vmatprep.subr.bf16.mxu0 %v8126_v44  ;;  %v8185_v43 = vld [vmem:[%s10549_s1 + $0x688] sm:$0xff]   ;;  %v8186_v44 = vld [vmem:[%s10549_s1 + $0x650] sm:$0xff]  }
  0x96   :  { %7347 = vmatprep.subr.bf16.mxu1 %v8127_v45  ;;  %v8187_v45 = vld [vmem:[%s10549_s1 + $0x6d0] sm:$0xff]  }
  0x98   :  { %7326 = vmatpush3.bf16.msra.mxu0 %v8128_v46  ;;  %v8188_v46 = vld [vmem:[%s10549_s1 + $0x610] sm:$0xff]  }
  0x99   :  { %7348 = vmatpush3.bf16.msra.mxu1 %v8129_v47  ;;  %7327 = vmatprep.subr.bf16.mxu0 %v8130_v48  ;;  %v8189_v47 = vld [vmem:[%s10549_s1 + $0x690] sm:$0xff]   ;;  %v8190_v48 = vld [vmem:[%s10549_s1 + $0x658] sm:$0xff]  }
  0x9a   :  { %7349 = vmatprep.subr.bf16.mxu1 %v8131_v49  ;;  %v8191_v49 = vld [vmem:[%s10549_s1 + $0x6d8] sm:$0xff]  }
  0x9c   :  { %7328 = vmatpush3.bf16.msra.mxu0 %v8132_v50  ;;  %v8192_v50 = vld [vmem:[%s10549_s1 + $0x618] sm:$0xff]  }
  0x9d   :  { %7350 = vmatpush3.bf16.msra.mxu1 %v8133_v51  ;;  %7329 = vmatprep.subr.bf16.mxu0 %v8134_v52  ;;  %v8193_v51 = vld [vmem:[%s10549_s1 + $0x698] sm:$0xff]   ;;  %v8194_v52 = vld [vmem:[%s10549_s1 + $0x660] sm:$0xff]  }
  0x9e   :  { %7351 = vmatprep.subr.bf16.mxu1 %v8135_v53  ;;  %v8195_v53 = vld [vmem:[%s10549_s1 + $0x6e0] sm:$0xff]  }
  0xa0   :  { %7330 = vmatpush3.bf16.msra.mxu0 %v8136_v54  ;;  %v8196_v54 = vld [vmem:[%s10549_s1 + $0x620] sm:$0xff]  }
  0xa1   :  { %7352 = vmatpush3.bf16.msra.mxu1 %v8137_v55  ;;  %7359 = vmatprep.subr.bf16.mxu0 %v8142_v62  ;;  %v8197_v55 = vld [vmem:[%s10549_s1 + $0x6a0] sm:$0xff]   ;;  %v8204_v62 = vld [vmem:[%s10549_s1 + $0x630] sm:$0xff]  }
  0xa2   :  { %7381 = vmatprep.subr.bf16.mxu1 %v8143_v63  ;;  %v8205_v63 = vld [vmem:[%s10549_s1 + $0x6b0] sm:$0xff]  }
  0xa3   :  { %5277 = vmatmul.mubr.bf16.vlgmr.msra.gmra.mrb[16].mxu0 %v6498_v57  ;;  %v8199_v57 = vld [vmem:[%s10549_s1 + $0x6e8] sm:$0xff]  }
  0xa4   :  { %5317 = vmatmul.mubr.bf16.vlgmr.msra.gmra.mrb[16].mxu1 %v6500_v60  ;;  %7360 = vmatpush3.bf16.msra.mxu0 %v8144_v0  ;;  %v8202_v60 = vld [vmem:[%s10549_s1 + $0x670] sm:$0xff]   ;;  %v8206_v0 = vld [vmem:[%s10549_s1 + $0x678] sm:$0xff]  }
  0xa5   :  { %7382 = vmatpush3.bf16.msra.mxu1 %v8145_v1  ;;  %7361 = vmatprep.subr.bf16.mxu0 %v8146_v2  ;;  %v8207_v1 = vld [vmem:[%s10549_s1 + $0x6f8] sm:$0xff]  }
  0xa6   :  { %7383 = vmatprep.subr.bf16.mxu1 %v8147_v3  ;;  %5356 = vmatprep.mubr.bf16.mxu0 %v6503_v33  ;;  %v8208_v2 = vld [vmem:[%s10549_s1 + $0x638] sm:$0xff]  }
  0xa7   :  { %5396 = vmatprep.mubr.bf16.mxu1 %v6505_v35  ;;  %v8209_v3 = vld [vmem:[%s10549_s1 + $0x6b8] sm:$0xff]  }
  0xa8   :  { %7362 = vmatpush3.bf16.msra.mxu0 %v8148_v4  ;;  %v33_v4 = vld [vmem:[%s10550_s0 + $0x60] sm:$0xff] }
  0xa9   :  { %7384 = vmatpush3.bf16.msra.mxu1 %v8149_v5  ;;  %7363 = vmatprep.subr.bf16.mxu0 %v8150_v6  ;;  %v34_v5 = vld [vmem:[%s10550_s0 + $0x68] sm:$0xff]  ;;  %v6506_v6 = vcombine.low %v33_v4, %v33_v4 }
  0xaa   :  { %7385 = vmatprep.subr.bf16.mxu1 %v8151_v7  ;;  %v6507_v7 = vcombine.high %v33_v4, %v33_v4  ;;  %v8257_v4 = vld [vmem:[%s10549_s1 + $0x888] sm:$0xff]  }
  0xac   :  { %7364 = vmatpush3.bf16.msra.mxu0 %v8152_v8  ;;  %v6508_v8 = vcombine.low %v34_v5, %v34_v5 }
  0xad   :  { %7386 = vmatpush3.bf16.msra.mxu1 %v8153_v9  ;;  %7365 = vmatprep.subr.bf16.mxu0 %v8154_v10  ;;  %v8214_v9 = vld [vmem:[%s10549_s1 + $0x740] sm:$0xff]   ;;  %v6509_v10 = vcombine.high %v34_v5, %v34_v5  ;;  %v8258_v5 = vld [vmem:[%s10549_s1 + $0x850] sm:$0xff]  }
  0xae   :  { %7387 = vmatprep.subr.bf16.mxu1 %v8155_v11  ;;  %v8215_v11 = vld [vmem:[%s10549_s1 + $0x7c0] sm:$0xff]  }
  0xb0   :  { %7366 = vmatpush3.bf16.msra.mxu0 %v8156_v12  ;;  %v8216_v12 = vld [vmem:[%s10549_s1 + $0x700] sm:$0xff]  }
  0xb1   :  { %7388 = vmatpush3.bf16.msra.mxu1 %v8157_v13  ;;  %7367 = vmatprep.subr.bf16.mxu0 %v8158_v14  ;;  %v8217_v13 = vld [vmem:[%s10549_s1 + $0x780] sm:$0xff]   ;;  %v8218_v14 = vld [vmem:[%s10549_s1 + $0x748] sm:$0xff]  }
  0xb2   :  { %7389 = vmatprep.subr.bf16.mxu1 %v8159_v15  ;;  %v8219_v15 = vld [vmem:[%s10549_s1 + $0x7c8] sm:$0xff]  }
  0xb4   :  { %7368 = vmatpush3.bf16.msra.mxu0 %v8160_v16  ;;  %v8220_v16 = vld [vmem:[%s10549_s1 + $0x708] sm:$0xff]  }
  0xb5   :  { %7390 = vmatpush3.bf16.msra.mxu1 %v8161_v17  ;;  %7369 = vmatprep.subr.bf16.mxu0 %v8162_v18  ;;  %v8221_v17 = vld [vmem:[%s10549_s1 + $0x788] sm:$0xff]   ;;  %v8222_v18 = vld [vmem:[%s10549_s1 + $0x750] sm:$0xff]  }
  0xb6   :  { %7391 = vmatprep.subr.bf16.mxu1 %v8163_v19  ;;  %v8223_v19 = vld [vmem:[%s10549_s1 + $0x7d0] sm:$0xff]  }
  0xb8   :  { %7370 = vmatpush3.bf16.msra.mxu0 %v8164_v20  ;;  %v8224_v20 = vld [vmem:[%s10549_s1 + $0x710] sm:$0xff]  }
  0xb9   :  { %7392 = vmatpush3.bf16.msra.mxu1 %v8165_v21  ;;  %7371 = vmatprep.subr.bf16.mxu0 %v8166_v22  ;;  %v8225_v21 = vld [vmem:[%s10549_s1 + $0x790] sm:$0xff]   ;;  %v8226_v22 = vld [vmem:[%s10549_s1 + $0x758] sm:$0xff]  }
  0xba   :  { %7393 = vmatprep.subr.bf16.mxu1 %v8167_v23  ;;  %v8227_v23 = vld [vmem:[%s10549_s1 + $0x7d8] sm:$0xff]  }
  0xbc   :  { %7372 = vmatpush3.bf16.msra.mxu0 %v8168_v24  ;;  %v8228_v24 = vld [vmem:[%s10549_s1 + $0x718] sm:$0xff]  }
  0xbd   :  { %7394 = vmatpush3.bf16.msra.mxu1 %v8169_v25  ;;  %7373 = vmatprep.subr.bf16.mxu0 %v8170_v26  ;;  %v8229_v25 = vld [vmem:[%s10549_s1 + $0x798] sm:$0xff]   ;;  %v8230_v26 = vld [vmem:[%s10549_s1 + $0x760] sm:$0xff]  }
  0xbe   :  { %7395 = vmatprep.subr.bf16.mxu1 %v8171_v27  ;;  %v8231_v27 = vld [vmem:[%s10549_s1 + $0x7e0] sm:$0xff]  }
  0xc0   :  { %7374 = vmatpush3.bf16.msra.mxu0 %v8172_v28  ;;  %v8232_v28 = vld [vmem:[%s10549_s1 + $0x720] sm:$0xff]  }
  0xc1   :  { %7396 = vmatpush3.bf16.msra.mxu1 %v8173_v29  ;;  %7403 = vmatprep.subr.bf16.mxu0 %v8178_v36 }
  0xc2   :  { %7425 = vmatprep.subr.bf16.mxu1 %v8179_v37  ;;  %v8234_v37 = vld [vmem:[%s10549_s1 + $0x768] sm:$0xff]  }
  0xc3   :  { %5357 = vmatmul.mubr.bf16.vlgmr.msra.gmra.mrb[20].mxu0 %v6502_v32  ;;  %v6481_v32 = vld [vmem:[%s10551_s2] ss:$0 sm:$0xff] }
  0xc4   :  { %5397 = vmatmul.mubr.bf16.vlgmr.msra.gmra.mrb[20].mxu1 %v6504_v34  ;;  %7404 = vmatpush3.bf16.msra.mxu0 %v8180_v38 }
  0xc5   :  { %7426 = vmatpush3.bf16.msra.mxu1 %v8181_v39  ;;  %7405 = vmatprep.subr.bf16.mxu0 %v8182_v40  ;;  %v8235_v39 = vld [vmem:[%s10549_s1 + $0x7e8] sm:$0xff]  }
  0xc6   :  { %7427 = vmatprep.subr.bf16.mxu1 %v8183_v41  ;;  %5436 = vmatprep.mubr.bf16.mxu0 %v6507_v7  ;;  %v8260_v7 = vld [vmem:[%s10549_s1 + $0x810] sm:$0xff]  }
  0xc7   :  { %5476 = vmatprep.mubr.bf16.mxu1 %v6509_v10  ;;  %v8263_v10 = vld [vmem:[%s10549_s1 + $0x8d8] sm:$0xff]  }
  0xc8   :  { %7406 = vmatpush3.bf16.msra.mxu0 %v8184_v42  ;;  %v8236_v42 = vld [vmem:[%s10549_s1 + $0x728] sm:$0xff]  }
  0xc9   :  { %7428 = vmatpush3.bf16.msra.mxu1 %v8185_v43  ;;  %7407 = vmatprep.subr.bf16.mxu0 %v8186_v44  ;;  %v8237_v44 = vld [vmem:[%s10549_s1 + $0x7a8] sm:$0xff]  }
  0xca   :  { %7429 = vmatprep.subr.bf16.mxu1 %v8187_v45 }
  0xcc   :  { %7408 = vmatpush3.bf16.msra.mxu0 %v8188_v46 }
  0xcd   :  { %7430 = vmatpush3.bf16.msra.mxu1 %v8189_v47  ;;  %7409 = vmatprep.subr.bf16.mxu0 %v8190_v48  ;;  %v8238_v47 = vld [vmem:[%s10549_s1 + $0x770] sm:$0xff]  }
  0xce   :  { %7431 = vmatprep.subr.bf16.mxu1 %v8191_v49  ;;  %v8239_v48 = vld [vmem:[%s10549_s1 + $0x7f0] sm:$0xff]  }
  0xcf   :  { %v8240_v49 = vld [vmem:[%s10549_s1 + $0x730] sm:$0xff]  }
  0xd0   :  { %7410 = vmatpush3.bf16.msra.mxu0 %v8192_v50  ;;  %v8241_v50 = vld [vmem:[%s10549_s1 + $0x7b0] sm:$0xff]  }
  0xd1   :  { %7432 = vmatpush3.bf16.msra.mxu1 %v8193_v51  ;;  %7411 = vmatprep.subr.bf16.mxu0 %v8194_v52  ;;  %v8242_v51 = vld [vmem:[%s10549_s1 + $0x778] sm:$0xff]  }
  0xd2   :  { %7433 = vmatprep.subr.bf16.mxu1 %v8195_v53  ;;  %v8243_v52 = vld [vmem:[%s10549_s1 + $0x7f8] sm:$0xff]  }
  0xd3   :  { %v8244_v53 = vld [vmem:[%s10549_s1 + $0x738] sm:$0xff]  }
  0xd4   :  { %7412 = vmatpush3.bf16.msra.mxu0 %v8196_v54  ;;  %v8245_v54 = vld [vmem:[%s10549_s1 + $0x7b8] sm:$0xff]  }
  0xd5   :  { %7434 = vmatpush3.bf16.msra.mxu1 %v8197_v55  ;;  %7413 = vmatprep.subr.bf16.mxu0 %v8198_v56  ;;  %v35_v55 = vld [vmem:[%s10550_s0 + $0x70] sm:$0xff]  ;;  %v36_v56 = vld [vmem:[%s10550_s0 + $0x78] sm:$0xff] }
  0xd6   :  { %7435 = vmatprep.subr.bf16.mxu1 %v8199_v57  ;;  %v6510_v57 = vcombine.low %v35_v55, %v35_v55 }
  0xd8   :  { %7414 = vmatpush3.bf16.msra.mxu0 %v8200_v58  ;;  %v6511_v58 = vcombine.high %v35_v55, %v35_v55  ;;  %v8294_v55 = vld [vmem:[%s10549_s1 + $0x950] sm:$0xff]  }
  0xd9   :  { %7436 = vmatpush3.bf16.msra.mxu1 %v8201_v59  ;;  %7415 = vmatprep.subr.bf16.mxu0 %v8202_v60  ;;  %v6512_v59 = vcombine.low %v36_v56, %v36_v56  ;;  %v6513_v60 = vcombine.high %v36_v56, %v36_v56  ;;  %v8295_v56 = vld [vmem:[%s10549_s1 + $0x9d0] sm:$0xff]  }
  0xda   :  { %7437 = vmatprep.subr.bf16.mxu1 %v8203_v61  ;;  %v8250_v61 = vld [vmem:[%s10549_s1 + $0x840] sm:$0xff]  }
  0xdc   :  { %7416 = vmatpush3.bf16.msra.mxu0 %v8204_v62  ;;  %v8251_v62 = vld [vmem:[%s10549_s1 + $0x8c0] sm:$0xff]  }
  0xdd   :  { %7438 = vmatpush3.bf16.msra.mxu1 %v8205_v63  ;;  %7417 = vmatprep.subr.bf16.mxu0 %v8206_v0  ;;  %v8252_v63 = vld [vmem:[%s10549_s1 + $0x800] sm:$0xff]  }
  0xde   :  { %7439 = vmatprep.subr.bf16.mxu1 %v8207_v1  ;;  %v8253_v0 = vld [vmem:[%s10549_s1 + $0x880] sm:$0xff]   ;;  %v8254_v1 = vld [vmem:[%s10549_s1 + $0x848] sm:$0xff]  }
  0xe0   :  { %7418 = vmatpush3.bf16.msra.mxu0 %v8208_v2  ;;  %v8255_v2 = vld [vmem:[%s10549_s1 + $0x8c8] sm:$0xff]  }
  0xe1   :  { %7440 = vmatpush3.bf16.msra.mxu1 %v8209_v3  ;;  %7447 = vmatprep.subr.bf16.mxu0 %v8214_v9  ;;  %v8256_v3 = vld [vmem:[%s10549_s1 + $0x808] sm:$0xff]   ;;  %v8262_v9 = vld [vmem:[%s10549_s1 + $0x858] sm:$0xff]  }
  0xe2   :  { %7469 = vmatprep.subr.bf16.mxu1 %v8215_v11  ;;  %v8264_v11 = vld [vmem:[%s10549_s1 + $0x818] sm:$0xff]  }
  0xe3   :  { %5437 = vmatmul.mubr.bf16.vlgmr.msra.gmra.mrb[24].mxu0 %v6506_v6  ;;  %v8259_v6 = vld [vmem:[%s10549_s1 + $0x8d0] sm:$0xff]  }
  0xe4   :  { %5477 = vmatmul.mubr.bf16.vlgmr.msra.gmra.mrb[24].mxu1 %v6508_v8  ;;  %7448 = vmatpush3.bf16.msra.mxu0 %v8216_v12  ;;  %v8261_v8 = vld [vmem:[%s10549_s1 + $0x890] sm:$0xff]   ;;  %v8265_v12 = vld [vmem:[%s10549_s1 + $0x898] sm:$0xff]  }
  0xe5   :  { %7470 = vmatpush3.bf16.msra.mxu1 %v8217_v13  ;;  %7449 = vmatprep.subr.bf16.mxu0 %v8218_v14  ;;  %v8266_v13 = vld [vmem:[%s10549_s1 + $0x860] sm:$0xff]  }
  0xe6   :  { %7471 = vmatprep.subr.bf16.mxu1 %v8219_v15  ;;  %5516 = vmatprep.mubr.bf16.mxu0 %v6511_v58  ;;  %v8267_v14 = vld [vmem:[%s10549_s1 + $0x8e0] sm:$0xff]   ;;  %v8297_v58 = vld [vmem:[%s10549_s1 + $0x990] sm:$0xff]  }
  0xe7   :  { %5556 = vmatprep.mubr.bf16.mxu1 %v6513_v60  ;;  %v8268_v15 = vld [vmem:[%s10549_s1 + $0x820] sm:$0xff]   ;;  %v8299_v60 = vld [vmem:[%s10549_s1 + $0x9d8] sm:$0xff]  }
  0xe8   :  { %7450 = vmatpush3.bf16.msra.mxu0 %v8220_v16 }
  0xe9   :  { %7472 = vmatpush3.bf16.msra.mxu1 %v8221_v17  ;;  %7451 = vmatprep.subr.bf16.mxu0 %v8222_v18  ;;  %v8269_v17 = vld [vmem:[%s10549_s1 + $0x8a0] sm:$0xff]  }
  0xea   :  { %7473 = vmatprep.subr.bf16.mxu1 %v8223_v19 }
  0xec   :  { %7452 = vmatpush3.bf16.msra.mxu0 %v8224_v20 }
  0xed   :  { %7474 = vmatpush3.bf16.msra.mxu1 %v8225_v21  ;;  %7453 = vmatprep.subr.bf16.mxu0 %v8226_v22 }
  0xee   :  { %7475 = vmatprep.subr.bf16.mxu1 %v8227_v23  ;;  %v8270_v23 = vld [vmem:[%s10549_s1 + $0x868] sm:$0xff]  }
  0xf0   :  { %7454 = vmatpush3.bf16.msra.mxu0 %v8228_v24 }
  0xf1   :  { %7476 = vmatpush3.bf16.msra.mxu1 %v8229_v25  ;;  %7455 = vmatprep.subr.bf16.mxu0 %v8230_v26  ;;  %v8271_v25 = vld [vmem:[%s10549_s1 + $0x8e8] sm:$0xff]  }
  0xf2   :  { %7477 = vmatprep.subr.bf16.mxu1 %v8231_v27 }
  0xf4   :  { %7456 = vmatpush3.bf16.msra.mxu0 %v8232_v28  ;;  %v8272_v28 = vld [vmem:[%s10549_s1 + $0x828] sm:$0xff]  }
  0xf5   :  { %7478 = vmatpush3.bf16.msra.mxu1 %v8233_v30  ;;  %7457 = vmatprep.subr.bf16.mxu0 %v8234_v37  ;;  %v8273_v30 = vld [vmem:[%s10549_s1 + $0x8a8] sm:$0xff]   ;;  %v8278_v37 = vld [vmem:[%s10549_s1 + $0x878] sm:$0xff]  }
  0xf6   :  { %v7155_v29 = vpop.f32.mrb[0].mxu0  ;;  %7479 = vmatprep.subr.bf16.mxu1 %v8235_v39  ;;  %v8280_v39 = vld [vmem:[%s10549_s1 + $0x838] sm:$0xff]  }
  0xf7   :  { %v7177_v31 = vpop.f32.mrb[0].mxu1  ;;  %v7156_v33 = vpop.f32.mrb[1].mxu0 }
  0xf8   :  { %v7178_v34 = vpop.f32.mrb[1].mxu1  ;;  %v7157_v35 = vadd.f32 %v7156_v33, %v7155_v29  ;;  %v7158_v38 = vpop.f32.mrb[2].mxu0  ;;  %7458 = vmatpush3.bf16.msra.mxu0 %v8236_v42  ;;  %v8274_v33 = vld [vmem:[%s10549_s1 + $0x870] sm:$0xff]   ;;  %v38_v42 = vld [vmem:[%s10550_s0 + $0x88] sm:$0xff] }
  0xf9   :  { %v7179_v36 = vadd.f32 %v7178_v34, %v7177_v31  ;;  %v7180_v40 = vpop.f32.mrb[2].mxu1  ;;  %v7159_v43 = vpop.f32.mrb[3].mxu0  ;;  %7480 = vmatpush3.bf16.msra.mxu1 %v8237_v44  ;;  %7459 = vmatprep.subr.bf16.mxu0 %v8238_v47  ;;  %v8275_v34 = vld [vmem:[%s10549_s1 + $0x8f0] sm:$0xff]   ;;  %v8279_v38 = vld [vmem:[%s10549_s1 + $0x8f8] sm:$0xff]   ;;  %v8286_v47 = vld [vmem:[%s10549_s1 + $0x940] sm:$0xff]  }
  0xfa   :  { %v4959_v41 = vadd.f32 %v7157_v35, %v6481_v32  ;;  %v7181_v45 = vpop.f32.mrb[3].mxu1  ;;  %7481 = vmatprep.subr.bf16.mxu1 %v8239_v48  ;;  %v8276_v35 = vld [vmem:[%s10549_s1 + $0x830] sm:$0xff]   ;;  %v8281_v40 = vld [vmem:[%s10549_s1 + $0x8b8] sm:$0xff]   ;;  %v8287_v48 = vld [vmem:[%s10549_s1 + $0x9c0] sm:$0xff]  }
  0xfb   :  { %v6516_v45 = vcombine.low %v38_v42, %v38_v42 }
  0xfc   :  { %v9439_v46 = vadd.f32 %v7179_v36, %v4959_v41  ;;  %7460 = vmatpush3.bf16.msra.mxu0 %v8240_v49  ;;  %v8277_v36 = vld [vmem:[%s10549_s1 + $0x8b0] sm:$0xff]   ;;  %v37_v41 = vld [vmem:[%s10550_s0 + $0x80] sm:$0xff] }
  0xfd   :  { %7482 = vmatpush3.bf16.msra.mxu1 %v8241_v50  ;;  %7461 = vmatprep.subr.bf16.mxu0 %v8242_v51  ;;  %v6514_v43 = vcombine.low %v37_v41, %v37_v41  ;;  %v6515_v44 = vcombine.high %v37_v41, %v37_v41  ;;  %v8288_v49 = vld [vmem:[%s10549_s1 + $0x900] sm:$0xff]   ;;  %v8290_v51 = vld [vmem:[%s10549_s1 + $0x948] sm:$0xff]   ;;  %v8330_v41 = vld [vmem:[%s10549_s1 + $0xa50] sm:$0xff]  }
  0xfe   :  { %7483 = vmatprep.subr.bf16.mxu1 %v8243_v52  ;;  %v8289_v50 = vld [vmem:[%s10549_s1 + $0x980] sm:$0xff]   ;;  %v8291_v52 = vld [vmem:[%s10549_s1 + $0x9c8] sm:$0xff]  }
 0x100   :  { %7462 = vmatpush3.bf16.msra.mxu0 %v8244_v53  ;;  %v8292_v53 = vld [vmem:[%s10549_s1 + $0x908] sm:$0xff]  }
 0x101   :  { %7484 = vmatpush3.bf16.msra.mxu1 %v8245_v54  ;;  %7491 = vmatprep.subr.bf16.mxu0 %v8250_v61  ;;  %v8293_v54 = vld [vmem:[%s10549_s1 + $0x988] sm:$0xff]   ;;  %v8300_v61 = vld [vmem:[%s10549_s1 + $0x918] sm:$0xff]  }
 0x102   :  { %7513 = vmatprep.subr.bf16.mxu1 %v8251_v62  ;;  %v8301_v62 = vld [vmem:[%s10549_s1 + $0x998] sm:$0xff]  }
 0x103   :  { %5517 = vmatmul.mubr.bf16.vlgmr.msra.gmra.mrb[28].mxu0 %v6510_v57  ;;  %v8296_v57 = vld [vmem:[%s10549_s1 + $0x910] sm:$0xff]  }
 0x104   :  { %5557 = vmatmul.mubr.bf16.vlgmr.msra.gmra.mrb[28].mxu1 %v6512_v59  ;;  %7492 = vmatpush3.bf16.msra.mxu0 %v8252_v63  ;;  %v8298_v59 = vld [vmem:[%s10549_s1 + $0x958] sm:$0xff]   ;;  %v8302_v63 = vld [vmem:[%s10549_s1 + $0x960] sm:$0xff]  }
 0x105   :  { %7514 = vmatpush3.bf16.msra.mxu1 %v8253_v0  ;;  %7493 = vmatprep.subr.bf16.mxu0 %v8254_v1  ;;  %v8303_v0 = vld [vmem:[%s10549_s1 + $0x9e0] sm:$0xff]  }
 0x106   :  { %7515 = vmatprep.subr.bf16.mxu1 %v8255_v2  ;;  %5596 = vmatprep.mubr.bf16.mxu0 %v6515_v44  ;;  %v8304_v2 = vld [vmem:[%s10549_s1 + $0x920] sm:$0xff]   ;;  %v8333_v44 = vld [vmem:[%s10549_s1 + $0xa90] sm:$0xff]  }
 0x108   :  { %7494 = vmatpush3.bf16.msra.mxu0 %v8256_v3 }
 0x109   :  { %7516 = vmatpush3.bf16.msra.mxu1 %v8257_v4  ;;  %7495 = vmatprep.subr.bf16.mxu0 %v8258_v5  ;;  %v8305_v4 = vld [vmem:[%s10549_s1 + $0x9a0] sm:$0xff]  }
 0x10a   :  { %7517 = vmatprep.subr.bf16.mxu1 %v8259_v6 }
 0x10c   :  { %7496 = vmatpush3.bf16.msra.mxu0 %v8260_v7 }
 0x10d   :  { %7518 = vmatpush3.bf16.msra.mxu1 %v8261_v8  ;;  %7497 = vmatprep.subr.bf16.mxu0 %v8262_v9  ;;  %v8306_v8 = vld [vmem:[%s10549_s1 + $0x968] sm:$0xff]  }
 0x10e   :  { %7519 = vmatprep.subr.bf16.mxu1 %v8263_v10  ;;  %v8307_v10 = vld [vmem:[%s10549_s1 + $0x9e8] sm:$0xff]  }
 0x110   :  { %7498 = vmatpush3.bf16.msra.mxu0 %v8264_v11 }
 0x111   :  { %7520 = vmatpush3.bf16.msra.mxu1 %v8265_v12  ;;  %7499 = vmatprep.subr.bf16.mxu0 %v8266_v13 }
 0x112   :  { %7521 = vmatprep.subr.bf16.mxu1 %v8267_v14  ;;  %v8308_v14 = vld [vmem:[%s10549_s1 + $0x928] sm:$0xff]  }
 0x114   :  { %7500 = vmatpush3.bf16.msra.mxu0 %v8268_v15  ;;  %v8309_v15 = vld [vmem:[%s10549_s1 + $0x9a8] sm:$0xff]  }
 0x115   :  { %7522 = vmatpush3.bf16.msra.mxu1 %v8269_v17  ;;  %7501 = vmatprep.subr.bf16.mxu0 %v8270_v23  ;;  %v8314_v23 = vld [vmem:[%s10549_s1 + $0x978] sm:$0xff]  }
 0x116   :  { %v7199_v16 = vpop.f32.mrb[4].mxu0  ;;  %7523 = vmatprep.subr.bf16.mxu1 %v8271_v25  ;;  %v8316_v25 = vld [vmem:[%s10549_s1 + $0x938] sm:$0xff]  }
 0x117   :  { %v7221_v18 = vpop.f32.mrb[4].mxu1  ;;  %v7200_v19 = vpop.f32.mrb[5].mxu0 }
 0x118   :  { %v7222_v20 = vpop.f32.mrb[5].mxu1  ;;  %v7201_v21 = vadd.f32 %v7200_v19, %v7199_v16  ;;  %v7202_v24 = vpop.f32.mrb[6].mxu0  ;;  %7502 = vmatpush3.bf16.msra.mxu0 %v8272_v28  ;;  %v8310_v19 = vld [vmem:[%s10549_s1 + $0x970] sm:$0xff]   ;;  %v40_v28 = vld [vmem:[%s10550_s0 + $0x98] sm:$0xff] }
 0x119   :  { %v7223_v22 = vadd.f32 %v7222_v20, %v7221_v18  ;;  %v7224_v26 = vpop.f32.mrb[6].mxu1  ;;  %v7203_v29 = vpop.f32.mrb[7].mxu0  ;;  %7524 = vmatpush3.bf16.msra.mxu1 %v8273_v30  ;;  %7503 = vmatprep.subr.bf16.mxu0 %v8274_v33  ;;  %v8311_v20 = vld [vmem:[%s10549_s1 + $0x9f0] sm:$0xff]   ;;  %v8315_v24 = vld [vmem:[%s10549_s1 + $0x9f8] sm:$0xff]   ;;  %v6521_v33 = vcombine.high %v40_v28, %v40_v28 }
 0x11a   :  { %v5039_v27 = vadd.f32 %v7201_v21, %v9439_v46  ;;  %v7225_v31 = vpop.f32.mrb[7].mxu1  ;;  %7525 = vmatprep.subr.bf16.mxu1 %v8275_v34  ;;  %v6517_v46 = vcombine.high %v38_v42, %v38_v42  ;;  %v8312_v21 = vld [vmem:[%s10549_s1 + $0x930] sm:$0xff]   ;;  %v8317_v26 = vld [vmem:[%s10549_s1 + $0x9b8] sm:$0xff]   ;;  %v8323_v34 = vld [vmem:[%s10549_s1 + $0xac0] sm:$0xff]  }
 0x11b   :  { %v6520_v31 = vcombine.low %v40_v28, %v40_v28  ;;  %v8331_v42 = vld [vmem:[%s10549_s1 + $0xad0] sm:$0xff]  }
 0x11c   :  { %v9544_v32 = vadd.f32 %v7223_v22, %v5039_v27  ;;  %7504 = vmatpush3.bf16.msra.mxu0 %v8276_v35  ;;  %5636 = vmatprep.mubr.bf16.mxu1 %v6517_v46  ;;  %v8313_v22 = vld [vmem:[%s10549_s1 + $0x9b0] sm:$0xff]   ;;  %v8324_v35 = vld [vmem:[%s10549_s1 + $0xa00] sm:$0xff]   ;;  %v8335_v46 = vld [vmem:[%s10549_s1 + $0xad8] sm:$0xff]  }
 0x11d   :  { %7526 = vmatpush3.bf16.msra.mxu1 %v8277_v36  ;;  %7505 = vmatprep.subr.bf16.mxu0 %v8278_v37  ;;  %v39_v27 = vld [vmem:[%s10550_s0 + $0x90] sm:$0xff]  ;;  %v8325_v36 = vld [vmem:[%s10549_s1 + $0xa80] sm:$0xff]   ;;  %v8326_v37 = vld [vmem:[%s10549_s1 + $0xa48] sm:$0xff]  }
 0x11e   :  { %7527 = vmatprep.subr.bf16.mxu1 %v8279_v38  ;;  %v6518_v29 = vcombine.low %v39_v27, %v39_v27  ;;  %v6519_v30 = vcombine.high %v39_v27, %v39_v27  ;;  %v8327_v38 = vld [vmem:[%s10549_s1 + $0xac8] sm:$0xff]   ;;  %v8366_v27 = vld [vmem:[%s10549_s1 + $0xb50] sm:$0xff]  }
 0x11f   :  { %v8367_v28 = vld [vmem:[%s10549_s1 + $0xbd0] sm:$0xff]  }
 0x120   :  { %7506 = vmatpush3.bf16.msra.mxu0 %v8280_v39  ;;  %v8328_v39 = vld [vmem:[%s10549_s1 + $0xa08] sm:$0xff]  }
 0x121   :  { %7528 = vmatpush3.bf16.msra.mxu1 %v8281_v40  ;;  %7535 = vmatprep.subr.bf16.mxu0 %v8286_v47  ;;  %v8329_v40 = vld [vmem:[%s10549_s1 + $0xa88] sm:$0xff]   ;;  %v8336_v47 = vld [vmem:[%s10549_s1 + $0xa18] sm:$0xff]  }
 0x122   :  { %7557 = vmatprep.subr.bf16.mxu1 %v8287_v48  ;;  %v8337_v48 = vld [vmem:[%s10549_s1 + $0xa98] sm:$0xff]  }
 0x123   :  { %5597 = vmatmul.mubr.bf16.vlgmr.msra.gmra.mrb[32].mxu0 %v6514_v43  ;;  %v8332_v43 = vld [vmem:[%s10549_s1 + $0xa10] sm:$0xff]  }
 0x124   :  { %5637 = vmatmul.mubr.bf16.vlgmr.msra.gmra.mrb[32].mxu1 %v6516_v45  ;;  %7536 = vmatpush3.bf16.msra.mxu0 %v8288_v49  ;;  %v8334_v45 = vld [vmem:[%s10549_s1 + $0xa58] sm:$0xff]   ;;  %v8338_v49 = vld [vmem:[%s10549_s1 + $0xa60] sm:$0xff]  }
 0x125   :  { %7558 = vmatpush3.bf16.msra.mxu1 %v8289_v50  ;;  %7537 = vmatprep.subr.bf16.mxu0 %v8290_v51  ;;  %v8339_v50 = vld [vmem:[%s10549_s1 + $0xae0] sm:$0xff]  }
 0x126   :  { %7559 = vmatprep.subr.bf16.mxu1 %v8291_v52  ;;  %5676 = vmatprep.mubr.bf16.mxu0 %v6519_v30  ;;  %v8340_v52 = vld [vmem:[%s10549_s1 + $0xa20] sm:$0xff]   ;;  %v8369_v30 = vld [vmem:[%s10549_s1 + $0xb90] sm:$0xff]  }
 0x127   :  { %5716 = vmatprep.mubr.bf16.mxu1 %v6521_v33  ;;  %v8372_v33 = vld [vmem:[%s10549_s1 + $0xb18] sm:$0xff]  }
 0x128   :  { %7538 = vmatpush3.bf16.msra.mxu0 %v8292_v53 }
 0x129   :  { %7560 = vmatpush3.bf16.msra.mxu1 %v8293_v54  ;;  %7539 = vmatprep.subr.bf16.mxu0 %v8294_v55  ;;  %v8341_v54 = vld [vmem:[%s10549_s1 + $0xaa0] sm:$0xff]  }
 0x12a   :  { %7561 = vmatprep.subr.bf16.mxu1 %v8295_v56 }
 0x12c   :  { %7540 = vmatpush3.bf16.msra.mxu0 %v8296_v57  ;;  %v8342_v57 = vld [vmem:[%s10549_s1 + $0xa68] sm:$0xff]  }
 0x12d   :  { %7562 = vmatpush3.bf16.msra.mxu1 %v8297_v58  ;;  %7541 = vmatprep.subr.bf16.mxu0 %v8298_v59 }
 0x12e   :  { %7563 = vmatprep.subr.bf16.mxu1 %v8299_v60  ;;  %v8343_v60 = vld [vmem:[%s10549_s1 + $0xae8] sm:$0xff]  }
 0x130   :  { %7542 = vmatpush3.bf16.msra.mxu0 %v8300_v61 }
 0x131   :  { %7564 = vmatpush3.bf16.msra.mxu1 %v8301_v62  ;;  %7543 = vmatprep.subr.bf16.mxu0 %v8302_v63  ;;  %v8344_v63 = vld [vmem:[%s10549_s1 + $0xa28] sm:$0xff]  }
 0x132   :  { %7565 = vmatprep.subr.bf16.mxu1 %v8303_v0 }
 0x134   :  { %7544 = vmatpush3.bf16.msra.mxu0 %v8304_v2 }
 0x135   :  { %7566 = vmatpush3.bf16.msra.mxu1 %v8305_v4  ;;  %7545 = vmatprep.subr.bf16.mxu0 %v8306_v8  ;;  %v8346_v4 = vld [vmem:[%s10549_s1 + $0xa70] sm:$0xff]  }
 0x136   :  { %v7243_v1 = vpop.f32.mrb[8].mxu0  ;;  %7567 = vmatprep.subr.bf16.mxu1 %v8307_v10  ;;  %v8349_v8 = vld [vmem:[%s10549_s1 + $0xab0] sm:$0xff]   ;;  %v8351_v10 = vld [vmem:[%s10549_s1 + $0xaf8] sm:$0xff]  }
 0x137   :  { %v7265_v3 = vpop.f32.mrb[8].mxu1  ;;  %v7244_v5 = vpop.f32.mrb[9].mxu0 }
 0x138   :  { %v7245_v6 = vadd.f32 %v7244_v5, %v7243_v1  ;;  %v7266_v7 = vpop.f32.mrb[9].mxu1  ;;  %v7246_v11 = vpop.f32.mrb[10].mxu0  ;;  %7546 = vmatpush3.bf16.msra.mxu0 %v8308_v14  ;;  %v8345_v1 = vld [vmem:[%s10549_s1 + $0xaa8] sm:$0xff]  }
 0x139   :  { %v7267_v9 = vadd.f32 %v7266_v7, %v7265_v3  ;;  %v7268_v13 = vpop.f32.mrb[10].mxu1  ;;  %v7247_v16 = vpop.f32.mrb[11].mxu0  ;;  %7568 = vmatpush3.bf16.msra.mxu1 %v8309_v15  ;;  %7547 = vmatprep.subr.bf16.mxu0 %v8310_v19  ;;  %v8348_v7 = vld [vmem:[%s10549_s1 + $0xa30] sm:$0xff]   ;;  %v8352_v11 = vld [vmem:[%s10549_s1 + $0xa38] sm:$0xff]   ;;  %v8358_v19 = vld [vmem:[%s10549_s1 + $0xb40] sm:$0xff]  }
 0x13a   :  { %v5119_v12 = vadd.f32 %v7245_v6, %v9544_v32  ;;  %v7269_v18 = vpop.f32.mrb[11].mxu1  ;;  %7569 = vmatprep.subr.bf16.mxu1 %v8311_v20  ;;  %v8322_v32 = vld [vmem:[%s10549_s1 + $0xa40] sm:$0xff]   ;;  %v8347_v6 = vld [vmem:[%s10549_s1 + $0xaf0] sm:$0xff]   ;;  %v42_v16 = vld [vmem:[%s10550_s0 + $0xa8] sm:$0xff] }
 0x13b   :  { %v41_v13 = vld [vmem:[%s10550_s0 + $0xa0] sm:$0xff]  ;;  %v6525_v18 = vcombine.high %v42_v16, %v42_v16 }
 0x13c   :  { %v9649_v17 = vadd.f32 %v7267_v9, %v5119_v12  ;;  %7548 = vmatpush3.bf16.msra.mxu0 %v8312_v21  ;;  %v8350_v9 = vld [vmem:[%s10549_s1 + $0xa78] sm:$0xff]   ;;  %v6522_v14 = vcombine.low %v41_v13, %v41_v13  ;;  %v6523_v15 = vcombine.high %v41_v13, %v41_v13  ;;  %v8359_v20 = vld [vmem:[%s10549_s1 + $0xbc0] sm:$0xff]   ;;  %v8402_v13 = vld [vmem:[%s10549_s1 + $0xc50] sm:$0xff]  }
 0x13d   :  { %7570 = vmatpush3.bf16.msra.mxu1 %v8313_v22  ;;  %7549 = vmatprep.subr.bf16.mxu0 %v8314_v23  ;;  %v8353_v12 = vld [vmem:[%s10549_s1 + $0xab8] sm:$0xff]   ;;  %v8360_v21 = vld [vmem:[%s10549_s1 + $0xb00] sm:$0xff]   ;;  %v8362_v23 = vld [vmem:[%s10549_s1 + $0xb48] sm:$0xff]  }
 0x13e   :  { %7571 = vmatprep.subr.bf16.mxu1 %v8315_v24  ;;  %v8361_v22 = vld [vmem:[%s10549_s1 + $0xb80] sm:$0xff]   ;;  %v8363_v24 = vld [vmem:[%s10549_s1 + $0xbc8] sm:$0xff]  }
 0x140   :  { %7550 = vmatpush3.bf16.msra.mxu0 %v8316_v25  ;;  %v8364_v25 = vld [vmem:[%s10549_s1 + $0xb08] sm:$0xff]  }
 0x141   :  { %7572 = vmatpush3.bf16.msra.mxu1 %v8317_v26  ;;  %7579 = vmatprep.subr.bf16.mxu0 %v8322_v32  ;;  %v8365_v26 = vld [vmem:[%s10549_s1 + $0xb88] sm:$0xff]   ;;  %v8371_v32 = vld [vmem:[%s10549_s1 + $0xbd8] sm:$0xff]  }
 0x142   :  { %7601 = vmatprep.subr.bf16.mxu1 %v8323_v34  ;;  %v8373_v34 = vld [vmem:[%s10549_s1 + $0xb98] sm:$0xff]  }
 0x143   :  { %5677 = vmatmul.mubr.bf16.vlgmr.msra.gmra.mrb[36].mxu0 %v6518_v29  ;;  %v8368_v29 = vld [vmem:[%s10549_s1 + $0xb10] sm:$0xff]  }
 0x144   :  { %5717 = vmatmul.mubr.bf16.vlgmr.msra.gmra.mrb[36].mxu1 %v6520_v31  ;;  %7580 = vmatpush3.bf16.msra.mxu0 %v8324_v35  ;;  %v8370_v31 = vld [vmem:[%s10549_s1 + $0xb58] sm:$0xff]   ;;  %v8374_v35 = vld [vmem:[%s10549_s1 + $0xb60] sm:$0xff]  }
 0x145   :  { %7602 = vmatpush3.bf16.msra.mxu1 %v8325_v36  ;;  %7581 = vmatprep.subr.bf16.mxu0 %v8326_v37  ;;  %v8375_v36 = vld [vmem:[%s10549_s1 + $0xbe0] sm:$0xff]  }
 0x146   :  { %7603 = vmatprep.subr.bf16.mxu1 %v8327_v38  ;;  %5756 = vmatprep.mubr.bf16.mxu0 %v6523_v15  ;;  %v8376_v38 = vld [vmem:[%s10549_s1 + $0xb20] sm:$0xff]   ;;  %v8404_v15 = vld [vmem:[%s10549_s1 + $0xc10] sm:$0xff]  }
 0x147   :  { %5796 = vmatprep.mubr.bf16.mxu1 %v6525_v18  ;;  %v8407_v18 = vld [vmem:[%s10549_s1 + $0xcd8] sm:$0xff]  }
 0x148   :  { %7582 = vmatpush3.bf16.msra.mxu0 %v8328_v39 }
 0x149   :  { %7604 = vmatpush3.bf16.msra.mxu1 %v8329_v40  ;;  %7583 = vmatprep.subr.bf16.mxu0 %v8330_v41  ;;  %v8377_v40 = vld [vmem:[%s10549_s1 + $0xba0] sm:$0xff]  }
 0x14a   :  { %7605 = vmatprep.subr.bf16.mxu1 %v8331_v42 }
 0x14c   :  { %7584 = vmatpush3.bf16.msra.mxu0 %v8332_v43  ;;  %v8378_v43 = vld [vmem:[%s10549_s1 + $0xb68] sm:$0xff]  }
 0x14d   :  { %7606 = vmatpush3.bf16.msra.mxu1 %v8333_v44  ;;  %7585 = vmatprep.subr.bf16.mxu0 %v8334_v45 }
 0x14e   :  { %7607 = vmatprep.subr.bf16.mxu1 %v8335_v46  ;;  %v8379_v46 = vld [vmem:[%s10549_s1 + $0xbe8] sm:$0xff]  }
 0x150   :  { %7586 = vmatpush3.bf16.msra.mxu0 %v8336_v47 }
 0x151   :  { %7608 = vmatpush3.bf16.msra.mxu1 %v8337_v48  ;;  %7587 = vmatprep.subr.bf16.mxu0 %v8338_v49  ;;  %v8380_v49 = vld [vmem:[%s10549_s1 + $0xb28] sm:$0xff]  }
 0x152   :  { %7609 = vmatprep.subr.bf16.mxu1 %v8339_v50 }
 0x154   :  { %7588 = vmatpush3.bf16.msra.mxu0 %v8340_v52 }
 0x155   :  { %7610 = vmatpush3.bf16.msra.mxu1 %v8341_v54  ;;  %7589 = vmatprep.subr.bf16.mxu0 %v8342_v57  ;;  %v8382_v54 = vld [vmem:[%s10549_s1 + $0xb70] sm:$0xff]  }
 0x156   :  { %v7287_v51 = vpop.f32.mrb[12].mxu0  ;;  %7611 = vmatprep.subr.bf16.mxu1 %v8343_v60  ;;  %v8384_v57 = vld [vmem:[%s10549_s1 + $0xb30] sm:$0xff]   ;;  %v8387_v60 = vld [vmem:[%s10549_s1 + $0xbf8] sm:$0xff]  }
 0x157   :  { %v7309_v53 = vpop.f32.mrb[12].mxu1  ;;  %v7288_v55 = vpop.f32.mrb[13].mxu0 }
 0x158   :  { %v7310_v56 = vpop.f32.mrb[13].mxu1  ;;  %v7289_v58 = vadd.f32 %v7288_v55, %v7287_v51  ;;  %v7290_v61 = vpop.f32.mrb[14].mxu0  ;;  %7590 = vmatpush3.bf16.msra.mxu0 %v8344_v63  ;;  %v8381_v51 = vld [vmem:[%s10549_s1 + $0xba8] sm:$0xff]   ;;  %v43_v63 = vld [vmem:[%s10550_s0 + $0xb0] sm:$0xff] }
 0x159   :  { %v7311_v59 = vadd.f32 %v7310_v56, %v7309_v53  ;;  %v7312_v62 = vpop.f32.mrb[14].mxu1  ;;  %v7291_v2 = vpop.f32.mrb[15].mxu0  ;;  %7612 = vmatpush3.bf16.msra.mxu1 %v8345_v1  ;;  %7591 = vmatprep.subr.bf16.mxu0 %v8346_v4  ;;  %v8383_v56 = vld [vmem:[%s10549_s1 + $0xbf0] sm:$0xff]   ;;  %v8388_v61 = vld [vmem:[%s10549_s1 + $0xb38] sm:$0xff]   ;;  %v6526_v1 = vcombine.low %v43_v63, %v43_v63 }
 0x15a   :  { %v5199_v0 = vadd.f32 %v7289_v58, %v9649_v17  ;;  %v7313_v3 = vpop.f32.mrb[15].mxu1  ;;  %7613 = vmatprep.subr.bf16.mxu1 %v8347_v6  ;;  %v6524_v17 = vcombine.low %v42_v16, %v42_v16  ;;  %v8385_v58 = vld [vmem:[%s10549_s1 + $0xbb0] sm:$0xff]   ;;  %v8389_v62 = vld [vmem:[%s10549_s1 + $0xbb8] sm:$0xff]   ;;  %v6527_v2 = vcombine.high %v43_v63, %v43_v63  ;;  %v8395_v6 = vld [vmem:[%s10549_s1 + $0xcc0] sm:$0xff]  }
 0x15b   :  { %v8405_v16 = vld [vmem:[%s10549_s1 + $0xc90] sm:$0xff]  }
 0x15c   :  { %v9757_v5 = vadd.f32 %v7311_v59, %v5199_v0  ;;  %7592 = vmatpush3.bf16.msra.mxu0 %v8348_v7  ;;  %v8386_v59 = vld [vmem:[%s10549_s1 + $0xb78] sm:$0xff]   ;;  %v8396_v7 = vld [vmem:[%s10549_s1 + $0xc00] sm:$0xff]   ;;  %v8438_v63 = vld [vmem:[%s10549_s1 + $0xd50] sm:$0xff]  }
 0x15d   :  { %7614 = vmatpush3.bf16.msra.mxu1 %v8349_v8  ;;  %7593 = vmatprep.subr.bf16.mxu0 %v8350_v9  ;;  %v44_v0 = vld [vmem:[%s10550_s0 + $0xb8] sm:$0xff]  ;;  %v8397_v8 = vld [vmem:[%s10549_s1 + $0xc80] sm:$0xff]   ;;  %v8398_v9 = vld [vmem:[%s10549_s1 + $0xc48] sm:$0xff]  }
 0x15e   :  { %7615 = vmatprep.subr.bf16.mxu1 %v8351_v10  ;;  %v6528_v3 = vcombine.low %v44_v0, %v44_v0  ;;  %v6529_v4 = vcombine.high %v44_v0, %v44_v0  ;;  %v8399_v10 = vld [vmem:[%s10549_s1 + $0xcc8] sm:$0xff]   ;;  %v8439_v0 = vld [vmem:[%s10549_s1 + $0xdd0] sm:$0xff]  }
 0x160   :  { %7594 = vmatpush3.bf16.msra.mxu0 %v8352_v11  ;;  %v8400_v11 = vld [vmem:[%s10549_s1 + $0xc08] sm:$0xff]  }
 0x161   :  { %7616 = vmatpush3.bf16.msra.mxu1 %v8353_v12  ;;  %7623 = vmatprep.subr.bf16.mxu0 %v8358_v19  ;;  %v8401_v12 = vld [vmem:[%s10549_s1 + $0xc88] sm:$0xff]   ;;  %v8408_v19 = vld [vmem:[%s10549_s1 + $0xc18] sm:$0xff]  }
 0x162   :  { %7645 = vmatprep.subr.bf16.mxu1 %v8359_v20  ;;  %v8409_v20 = vld [vmem:[%s10549_s1 + $0xc98] sm:$0xff]  }
 0x163   :  { %5757 = vmatmul.mubr.bf16.vlgmr.msra.gmra.mrb[40].mxu0 %v6522_v14  ;;  %v8403_v14 = vld [vmem:[%s10549_s1 + $0xcd0] sm:$0xff]  }
 0x164   :  { %5797 = vmatmul.mubr.bf16.vlgmr.msra.gmra.mrb[40].mxu1 %v6524_v17  ;;  %7624 = vmatpush3.bf16.msra.mxu0 %v8360_v21  ;;  %v8406_v17 = vld [vmem:[%s10549_s1 + $0xc58] sm:$0xff]   ;;  %v8410_v21 = vld [vmem:[%s10549_s1 + $0xc60] sm:$0xff]  }
 0x165   :  { %7646 = vmatpush3.bf16.msra.mxu1 %v8361_v22  ;;  %7625 = vmatprep.subr.bf16.mxu0 %v8362_v23  ;;  %v8411_v22 = vld [vmem:[%s10549_s1 + $0xce0] sm:$0xff]  }
 0x166   :  { %7647 = vmatprep.subr.bf16.mxu1 %v8363_v24  ;;  %5836 = vmatprep.mubr.bf16.mxu0 %v6527_v2  ;;  %v8412_v24 = vld [vmem:[%s10549_s1 + $0xc20] sm:$0xff]   ;;  %v8441_v2 = vld [vmem:[%s10549_s1 + $0xd90] sm:$0xff]  }
 0x167   :  { %5876 = vmatprep.mubr.bf16.mxu1 %v6529_v4  ;;  %v8443_v4 = vld [vmem:[%s10549_s1 + $0xdd8] sm:$0xff]  }
 0x168   :  { %7626 = vmatpush3.bf16.msra.mxu0 %v8364_v25 }
 0x169   :  { %7648 = vmatpush3.bf16.msra.mxu1 %v8365_v26  ;;  %7627 = vmatprep.subr.bf16.mxu0 %v8366_v27  ;;  %v8413_v26 = vld [vmem:[%s10549_s1 + $0xca0] sm:$0xff]  }
 0x16a   :  { %7649 = vmatprep.subr.bf16.mxu1 %v8367_v28 }
 0x16c   :  { %7628 = vmatpush3.bf16.msra.mxu0 %v8368_v29 }
 0x16d   :  { %7650 = vmatpush3.bf16.msra.mxu1 %v8369_v30  ;;  %7629 = vmatprep.subr.bf16.mxu0 %v8370_v31  ;;  %v8414_v30 = vld [vmem:[%s10549_s1 + $0xc68] sm:$0xff]  }
 0x16e   :  { %7651 = vmatprep.subr.bf16.mxu1 %v8371_v32  ;;  %v8415_v32 = vld [vmem:[%s10549_s1 + $0xce8] sm:$0xff]  }
 0x170   :  { %7630 = vmatpush3.bf16.msra.mxu0 %v8372_v33 }
 0x171   :  { %7652 = vmatpush3.bf16.msra.mxu1 %v8373_v34  ;;  %7631 = vmatprep.subr.bf16.mxu0 %v8374_v35 }
 0x172   :  { %7653 = vmatprep.subr.bf16.mxu1 %v8375_v36  ;;  %v8416_v36 = vld [vmem:[%s10549_s1 + $0xc28] sm:$0xff]  }
 0x174   :  { %7632 = vmatpush3.bf16.msra.mxu0 %v8376_v38 }
 0x175   :  { %7654 = vmatpush3.bf16.msra.mxu1 %v8377_v40  ;;  %7633 = vmatprep.subr.bf16.mxu0 %v8378_v43  ;;  %v8420_v43 = vld [vmem:[%s10549_s1 + $0xc30] sm:$0xff]  }
 0x176   :  { %v7331_v37 = vpop.f32.mrb[16].mxu0  ;;  %7655 = vmatprep.subr.bf16.mxu1 %v8379_v46  ;;  %v8423_v46 = vld [vmem:[%s10549_s1 + $0xcf8] sm:$0xff]  }
 0x177   :  { %v7353_v39 = vpop.f32.mrb[16].mxu1  ;;  %v7332_v41 = vpop.f32.mrb[17].mxu0 }
 0x178   :  { %v7354_v42 = vpop.f32.mrb[17].mxu1  ;;  %v7333_v44 = vadd.f32 %v7332_v41, %v7331_v37  ;;  %v7334_v47 = vpop.f32.mrb[18].mxu0  ;;  %7634 = vmatpush3.bf16.msra.mxu0 %v8380_v49  ;;  %v8417_v37 = vld [vmem:[%s10549_s1 + $0xca8] sm:$0xff]   ;;  %v8418_v41 = vld [vmem:[%s10549_s1 + $0xc70] sm:$0xff]   ;;  %v45_v49 = vld [vmem:[%s10550_s0 + $0xc0] sm:$0xff] }
 0x179   :  { %v7355_v45 = vadd.f32 %v7354_v42, %v7353_v39  ;;  %v7356_v48 = vpop.f32.mrb[18].mxu1  ;;  %v7335_v52 = vpop.f32.mrb[19].mxu0  ;;  %7656 = vmatpush3.bf16.msra.mxu1 %v8381_v51  ;;  %7635 = vmatprep.subr.bf16.mxu0 %v8382_v54  ;;  %v8419_v42 = vld [vmem:[%s10549_s1 + $0xcf0] sm:$0xff]   ;;  %v8424_v47 = vld [vmem:[%s10549_s1 + $0xc38] sm:$0xff]   ;;  %v6530_v51 = vcombine.low %v45_v49, %v45_v49  ;;  %v8430_v54 = vld [vmem:[%s10549_s1 + $0xd40] sm:$0xff]  }
 0x17a   :  { %v5279_v50 = vadd.f32 %v7333_v44, %v9757_v5  ;;  %v7357_v53 = vpop.f32.mrb[19].mxu1  ;;  %7657 = vmatprep.subr.bf16.mxu1 %v8383_v56  ;;  %v8394_v5 = vld [vmem:[%s10549_s1 + $0xc40] sm:$0xff]   ;;  %v8421_v44 = vld [vmem:[%s10549_s1 + $0xcb0] sm:$0xff]   ;;  %v8425_v48 = vld [vmem:[%s10549_s1 + $0xcb8] sm:$0xff]   ;;  %v6531_v52 = vcombine.high %v45_v49, %v45_v49 }
 0x17b   :  { %v8431_v56 = vld [vmem:[%s10549_s1 + $0xdc0] sm:$0xff]   ;;  %v8474_v49 = vld [vmem:[%s10549_s1 + $0xe50] sm:$0xff]  }
 0x17c   :  { %v9862_v55 = vadd.f32 %v7355_v45, %v5279_v50  ;;  %7636 = vmatpush3.bf16.msra.mxu0 %v8384_v57  ;;  %v8422_v45 = vld [vmem:[%s10549_s1 + $0xc78] sm:$0xff]   ;;  %v46_v50 = vld [vmem:[%s10550_s0 + $0xc8] sm:$0xff]  ;;  %v8432_v57 = vld [vmem:[%s10549_s1 + $0xd00] sm:$0xff]  }
 0x17d   :  { %7658 = vmatpush3.bf16.msra.mxu1 %v8385_v58  ;;  %7637 = vmatprep.subr.bf16.mxu0 %v8386_v59  ;;  %v6532_v53 = vcombine.low %v46_v50, %v46_v50  ;;  %v8433_v58 = vld [vmem:[%s10549_s1 + $0xd80] sm:$0xff]   ;;  %v8434_v59 = vld [vmem:[%s10549_s1 + $0xd48] sm:$0xff]  }
 0x17e   :  { %7659 = vmatprep.subr.bf16.mxu1 %v8387_v60  ;;  %v8435_v60 = vld [vmem:[%s10549_s1 + $0xdc8] sm:$0xff]  }
 0x180   :  { %7638 = vmatpush3.bf16.msra.mxu0 %v8388_v61  ;;  %v8436_v61 = vld [vmem:[%s10549_s1 + $0xd08] sm:$0xff]  }
 0x181   :  { %7660 = vmatpush3.bf16.msra.mxu1 %v8389_v62  ;;  %7667 = vmatprep.subr.bf16.mxu0 %v8394_v5  ;;  %v8437_v62 = vld [vmem:[%s10549_s1 + $0xd88] sm:$0xff]   ;;  %v8444_v5 = vld [vmem:[%s10549_s1 + $0xd18] sm:$0xff]  }
 0x182   :  { %7689 = vmatprep.subr.bf16.mxu1 %v8395_v6  ;;  %v8445_v6 = vld [vmem:[%s10549_s1 + $0xd98] sm:$0xff]  }
 0x183   :  { %5837 = vmatmul.mubr.bf16.vlgmr.msra.gmra.mrb[44].mxu0 %v6526_v1  ;;  %v8440_v1 = vld [vmem:[%s10549_s1 + $0xd10] sm:$0xff]  }
 0x184   :  { %5877 = vmatmul.mubr.bf16.vlgmr.msra.gmra.mrb[44].mxu1 %v6528_v3  ;;  %7668 = vmatpush3.bf16.msra.mxu0 %v8396_v7  ;;  %v8442_v3 = vld [vmem:[%s10549_s1 + $0xd58] sm:$0xff]   ;;  %v8446_v7 = vld [vmem:[%s10549_s1 + $0xd60] sm:$0xff]  }
 0x185   :  { %7690 = vmatpush3.bf16.msra.mxu1 %v8397_v8  ;;  %7669 = vmatprep.subr.bf16.mxu0 %v8398_v9  ;;  %v8447_v8 = vld [vmem:[%s10549_s1 + $0xde0] sm:$0xff]  }
 0x186   :  { %7691 = vmatprep.subr.bf16.mxu1 %v8399_v10  ;;  %5916 = vmatprep.mubr.bf16.mxu0 %v6531_v52  ;;  %v8448_v10 = vld [vmem:[%s10549_s1 + $0xd20] sm:$0xff]   ;;  %v8477_v52 = vld [vmem:[%s10549_s1 + $0xe90] sm:$0xff]  }
 0x188   :  { %7670 = vmatpush3.bf16.msra.mxu0 %v8400_v11 }
 0x189   :  { %7692 = vmatpush3.bf16.msra.mxu1 %v8401_v12  ;;  %7671 = vmatprep.subr.bf16.mxu0 %v8402_v13  ;;  %v8449_v12 = vld [vmem:[%s10549_s1 + $0xda0] sm:$0xff]  }
 0x18a   :  { %7693 = vmatprep.subr.bf16.mxu1 %v8403_v14 }
 0x18c   :  { %7672 = vmatpush3.bf16.msra.mxu0 %v8404_v15  ;;  %v8450_v15 = vld [vmem:[%s10549_s1 + $0xd68] sm:$0xff]  }
 0x18d   :  { %7694 = vmatpush3.bf16.msra.mxu1 %v8405_v16  ;;  %7673 = vmatprep.subr.bf16.mxu0 %v8406_v17 }
 0x18e   :  { %7695 = vmatprep.subr.bf16.mxu1 %v8407_v18  ;;  %v8451_v18 = vld [vmem:[%s10549_s1 + $0xde8] sm:$0xff]  }
 0x190   :  { %7674 = vmatpush3.bf16.msra.mxu0 %v8408_v19 }
 0x191   :  { %7696 = vmatpush3.bf16.msra.mxu1 %v8409_v20  ;;  %7675 = vmatprep.subr.bf16.mxu0 %v8410_v21  ;;  %v8452_v21 = vld [vmem:[%s10549_s1 + $0xd28] sm:$0xff]  }
 0x192   :  { %7697 = vmatprep.subr.bf16.mxu1 %v8411_v22 }
 0x194   :  { %7676 = vmatpush3.bf16.msra.mxu0 %v8412_v24 }
 0x195   :  { %7698 = vmatpush3.bf16.msra.mxu1 %v8413_v26  ;;  %7677 = vmatprep.subr.bf16.mxu0 %v8414_v30  ;;  %v8454_v26 = vld [vmem:[%s10549_s1 + $0xd70] sm:$0xff]  }
 0x196   :  { %v7375_v23 = vpop.f32.mrb[20].mxu0  ;;  %7699 = vmatprep.subr.bf16.mxu1 %v8415_v32  ;;  %v8457_v30 = vld [vmem:[%s10549_s1 + $0xdb0] sm:$0xff]   ;;  %v8459_v32 = vld [vmem:[%s10549_s1 + $0xdf8] sm:$0xff]  }
 0x197   :  { %v7397_v25 = vpop.f32.mrb[20].mxu1  ;;  %v7376_v27 = vpop.f32.mrb[21].mxu0 }
 0x198   :  { %v7377_v28 = vadd.f32 %v7376_v27, %v7375_v23  ;;  %v7398_v29 = vpop.f32.mrb[21].mxu1  ;;  %v7378_v33 = vpop.f32.mrb[22].mxu0  ;;  %7678 = vmatpush3.bf16.msra.mxu0 %v8416_v36  ;;  %v8453_v23 = vld [vmem:[%s10549_s1 + $0xda8] sm:$0xff]  }
 0x199   :  { %v7399_v31 = vadd.f32 %v7398_v29, %v7397_v25  ;;  %v7400_v35 = vpop.f32.mrb[22].mxu1  ;;  %v7379_v38 = vpop.f32.mrb[23].mxu0  ;;  %7700 = vmatpush3.bf16.msra.mxu1 %v8417_v37  ;;  %7679 = vmatprep.subr.bf16.mxu0 %v8418_v41  ;;  %v8456_v29 = vld [vmem:[%s10549_s1 + $0xd30] sm:$0xff]   ;;  %v8460_v33 = vld [vmem:[%s10549_s1 + $0xd38] sm:$0xff]   ;;  %v8466_v41 = vld [vmem:[%s10549_s1 + $0xe40] sm:$0xff]  }
 0x19a   :  { %v5359_v34 = vadd.f32 %v7377_v28, %v9862_v55  ;;  %v7401_v40 = vpop.f32.mrb[23].mxu1  ;;  %7701 = vmatprep.subr.bf16.mxu1 %v8419_v42  ;;  %v6533_v55 = vcombine.high %v46_v50, %v46_v50  ;;  %v8455_v28 = vld [vmem:[%s10549_s1 + $0xdf0] sm:$0xff]   ;;  %v48_v38 = vld [vmem:[%s10550_s0 + $0xd8] sm:$0xff]  ;;  %v8467_v42 = vld [vmem:[%s10549_s1 + $0xec0] sm:$0xff]  }
 0x19b   :  { %v47_v35 = vld [vmem:[%s10550_s0 + $0xd0] sm:$0xff]  ;;  %v6537_v40 = vcombine.high %v48_v38, %v48_v38 }
 0x19c   :  { %v9964_v39 = vadd.f32 %v7399_v31, %v5359_v34  ;;  %7680 = vmatpush3.bf16.msra.mxu0 %v8420_v43  ;;  %5956 = vmatprep.mubr.bf16.mxu1 %v6533_v55  ;;  %v8458_v31 = vld [vmem:[%s10549_s1 + $0xd78] sm:$0xff]   ;;  %v6534_v36 = vcombine.low %v47_v35, %v47_v35  ;;  %v6535_v37 = vcombine.high %v47_v35, %v47_v35  ;;  %v8468_v43 = vld [vmem:[%s10549_s1 + $0xe00] sm:$0xff]   ;;  %v8475_v50 = vld [vmem:[%s10549_s1 + $0xed0] sm:$0xff]  }
 0x19d   :  { %7702 = vmatpush3.bf16.msra.mxu1 %v8421_v44  ;;  %7681 = vmatprep.subr.bf16.mxu0 %v8422_v45  ;;  %v8461_v34 = vld [vmem:[%s10549_s1 + $0xdb8] sm:$0xff]   ;;  %v8469_v44 = vld [vmem:[%s10549_s1 + $0xe80] sm:$0xff]   ;;  %v8470_v45 = vld [vmem:[%s10549_s1 + $0xe48] sm:$0xff]  }
 0x19e   :  { %7703 = vmatprep.subr.bf16.mxu1 %v8423_v46  ;;  %v8471_v46 = vld [vmem:[%s10549_s1 + $0xec8] sm:$0xff]   ;;  %v8480_v55 = vld [vmem:[%s10549_s1 + $0xe18] sm:$0xff]   ;;  %v8510_v35 = vld [vmem:[%s10549_s1 + $0xf50] sm:$0xff]  }
 0x1a0   :  { %7682 = vmatpush3.bf16.msra.mxu0 %v8424_v47  ;;  %v8472_v47 = vld [vmem:[%s10549_s1 + $0xe08] sm:$0xff]  }
 0x1a1   :  { %7704 = vmatpush3.bf16.msra.mxu1 %v8425_v48  ;;  %7711 = vmatprep.subr.bf16.mxu0 %v8430_v54  ;;  %v8473_v48 = vld [vmem:[%s10549_s1 + $0xe88] sm:$0xff]   ;;  %v8479_v54 = vld [vmem:[%s10549_s1 + $0xed8] sm:$0xff]  }
 0x1a2   :  { %7733 = vmatprep.subr.bf16.mxu1 %v8431_v56  ;;  %v8481_v56 = vld [vmem:[%s10549_s1 + $0xe98] sm:$0xff]  }
 0x1a3   :  { %5917 = vmatmul.mubr.bf16.vlgmr.msra.gmra.mrb[48].mxu0 %v6530_v51  ;;  %v8476_v51 = vld [vmem:[%s10549_s1 + $0xe10] sm:$0xff]  }
 0x1a4   :  { %5957 = vmatmul.mubr.bf16.vlgmr.msra.gmra.mrb[48].mxu1 %v6532_v53  ;;  %7712 = vmatpush3.bf16.msra.mxu0 %v8432_v57  ;;  %v8478_v53 = vld [vmem:[%s10549_s1 + $0xe58] sm:$0xff]   ;;  %v8482_v57 = vld [vmem:[%s10549_s1 + $0xe60] sm:$0xff]  }
 0x1a5   :  { %7734 = vmatpush3.bf16.msra.mxu1 %v8433_v58  ;;  %7713 = vmatprep.subr.bf16.mxu0 %v8434_v59  ;;  %v8483_v58 = vld [vmem:[%s10549_s1 + $0xee0] sm:$0xff]  }
 0x1a6   :  { %7735 = vmatprep.subr.bf16.mxu1 %v8435_v60  ;;  %5996 = vmatprep.mubr.bf16.mxu0 %v6535_v37  ;;  %v8484_v60 = vld [vmem:[%s10549_s1 + $0xe20] sm:$0xff]   ;;  %v8512_v37 = vld [vmem:[%s10549_s1 + $0xf10] sm:$0xff]  }
 0x1a7   :  { %6036 = vmatprep.mubr.bf16.mxu1 %v6537_v40  ;;  %v8515_v40 = vld [vmem:[%s10549_s1 + $0xfd8] sm:$0xff]  }
 0x1a8   :  { %7714 = vmatpush3.bf16.msra.mxu0 %v8436_v61 }
 0x1a9   :  { %7736 = vmatpush3.bf16.msra.mxu1 %v8437_v62  ;;  %7715 = vmatprep.subr.bf16.mxu0 %v8438_v63  ;;  %v8485_v62 = vld [vmem:[%s10549_s1 + $0xea0] sm:$0xff]  }
 0x1aa   :  { %7737 = vmatprep.subr.bf16.mxu1 %v8439_v0 }
 0x1ac   :  { %7716 = vmatpush3.bf16.msra.mxu0 %v8440_v1  ;;  %v8486_v1 = vld [vmem:[%s10549_s1 + $0xe68] sm:$0xff]  }
 0x1ad   :  { %7738 = vmatpush3.bf16.msra.mxu1 %v8441_v2  ;;  %7717 = vmatprep.subr.bf16.mxu0 %v8442_v3 }
 0x1ae   :  { %7739 = vmatprep.subr.bf16.mxu1 %v8443_v4  ;;  %v8487_v4 = vld [vmem:[%s10549_s1 + $0xee8] sm:$0xff]  }
 0x1b0   :  { %7718 = vmatpush3.bf16.msra.mxu0 %v8444_v5 }
 0x1b1   :  { %7740 = vmatpush3.bf16.msra.mxu1 %v8445_v6  ;;  %7719 = vmatprep.subr.bf16.mxu0 %v8446_v7  ;;  %v8488_v7 = vld [vmem:[%s10549_s1 + $0xe28] sm:$0xff]  }
 0x1b2   :  { %7741 = vmatprep.subr.bf16.mxu1 %v8447_v8 }
 0x1b4   :  { %7720 = vmatpush3.bf16.msra.mxu0 %v8448_v10 }
 0x1b5   :  { %7742 = vmatpush3.bf16.msra.mxu1 %v8449_v12  ;;  %7721 = vmatprep.subr.bf16.mxu0 %v8450_v15  ;;  %v8490_v12 = vld [vmem:[%s10549_s1 + $0xe70] sm:$0xff]  }
 0x1b6   :  { %v7419_v9 = vpop.f32.mrb[24].mxu0  ;;  %7743 = vmatprep.subr.bf16.mxu1 %v8451_v18  ;;  %v8492_v15 = vld [vmem:[%s10549_s1 + $0xe30] sm:$0xff]   ;;  %v8495_v18 = vld [vmem:[%s10549_s1 + $0xef8] sm:$0xff]  }
 0x1b7   :  { %v7441_v11 = vpop.f32.mrb[24].mxu1  ;;  %v7420_v13 = vpop.f32.mrb[25].mxu0 }
 0x1b8   :  { %v7442_v14 = vpop.f32.mrb[25].mxu1  ;;  %v7421_v16 = vadd.f32 %v7420_v13, %v7419_v9  ;;  %v7422_v19 = vpop.f32.mrb[26].mxu0  ;;  %7722 = vmatpush3.bf16.msra.mxu0 %v8452_v21  ;;  %v8489_v9 = vld [vmem:[%s10549_s1 + $0xea8] sm:$0xff]   ;;  %v49_v21 = vld [vmem:[%s10550_s0 + $0xe0] sm:$0xff] }
 0x1b9   :  { %v7443_v17 = vadd.f32 %v7442_v14, %v7441_v11  ;;  %v7444_v20 = vpop.f32.mrb[26].mxu1  ;;  %v7423_v24 = vpop.f32.mrb[27].mxu0  ;;  %7744 = vmatpush3.bf16.msra.mxu1 %v8453_v23  ;;  %7723 = vmatprep.subr.bf16.mxu0 %v8454_v26  ;;  %v8491_v14 = vld [vmem:[%s10549_s1 + $0xef0] sm:$0xff]   ;;  %v8496_v19 = vld [vmem:[%s10549_s1 + $0xe38] sm:$0xff]   ;;  %v6538_v23 = vcombine.low %v49_v21, %v49_v21 }
 0x1ba   :  { %v5439_v22 = vadd.f32 %v7421_v16, %v9964_v39  ;;  %v7445_v25 = vpop.f32.mrb[27].mxu1  ;;  %7745 = vmatprep.subr.bf16.mxu1 %v8455_v28  ;;  %v6536_v39 = vcombine.low %v48_v38, %v48_v38  ;;  %v8493_v16 = vld [vmem:[%s10549_s1 + $0xeb0] sm:$0xff]   ;;  %v8497_v20 = vld [vmem:[%s10549_s1 + $0xeb8] sm:$0xff]   ;;  %v6539_v24 = vcombine.high %v49_v21, %v49_v21  ;;  %v8503_v28 = vld [vmem:[%s10549_s1 + $0xfc0] sm:$0xff]  }
 0x1bb   :  { %v8513_v38 = vld [vmem:[%s10549_s1 + $0xf90] sm:$0xff]  }
 0x1bc   :  { %v10072_v27 = vadd.f32 %v7443_v17, %v5439_v22  ;;  %7724 = vmatpush3.bf16.msra.mxu0 %v8456_v29  ;;  %v8494_v17 = vld [vmem:[%s10549_s1 + $0xe78] sm:$0xff]   ;;  %v50_v22 = vld [vmem:[%s10550_s0 + $0xe8] sm:$0xff]  ;;  %v8504_v29 = vld [vmem:[%s10549_s1 + $0xf00] sm:$0xff]  }
 0x1bd   :  { %7746 = vmatpush3.bf16.msra.mxu1 %v8457_v30  ;;  %7725 = vmatprep.subr.bf16.mxu0 %v8458_v31  ;;  %v6540_v25 = vcombine.low %v50_v22, %v50_v22  ;;  %v6541_v26 = vcombine.high %v50_v22, %v50_v22  ;;  %v8505_v30 = vld [vmem:[%s10549_s1 + $0xf80] sm:$0xff]   ;;  %v8506_v31 = vld [vmem:[%s10549_s1 + $0xf48] sm:$0xff]   ;;  %v8546_v21 = vld [vmem:[%s10549_s1 + $0x1050] sm:$0xff]  }
 0x1be   :  { %7747 = vmatprep.subr.bf16.mxu1 %v8459_v32  ;;  %v8507_v32 = vld [vmem:[%s10549_s1 + $0xfc8] sm:$0xff]   ;;  %v8547_v22 = vld [vmem:[%s10549_s1 + $0x10d0] sm:$0xff]  }
 0x1c0   :  { %7726 = vmatpush3.bf16.msra.mxu0 %v8460_v33  ;;  %v8508_v33 = vld [vmem:[%s10549_s1 + $0xf08] sm:$0xff]  }
 0x1c1   :  { %7748 = vmatpush3.bf16.msra.mxu1 %v8461_v34  ;;  %7755 = vmatprep.subr.bf16.mxu0 %v8466_v41  ;;  %v8509_v34 = vld [vmem:[%s10549_s1 + $0xf88] sm:$0xff]   ;;  %v8516_v41 = vld [vmem:[%s10549_s1 + $0xf18] sm:$0xff]  }
 0x1c2   :  { %7777 = vmatprep.subr.bf16.mxu1 %v8467_v42  ;;  %v8517_v42 = vld [vmem:[%s10549_s1 + $0xf98] sm:$0xff]  }
 0x1c3   :  { %5997 = vmatmul.mubr.bf16.vlgmr.msra.gmra.mrb[52].mxu0 %v6534_v36  ;;  %v8511_v36 = vld [vmem:[%s10549_s1 + $0xfd0] sm:$0xff]  }
 0x1c4   :  { %6037 = vmatmul.mubr.bf16.vlgmr.msra.gmra.mrb[52].mxu1 %v6536_v39  ;;  %7756 = vmatpush3.bf16.msra.mxu0 %v8468_v43  ;;  %v8514_v39 = vld [vmem:[%s10549_s1 + $0xf58] sm:$0xff]   ;;  %v8518_v43 = vld [vmem:[%s10549_s1 + $0xf60] sm:$0xff]  }
 0x1c5   :  { %7778 = vmatpush3.bf16.msra.mxu1 %v8469_v44  ;;  %7757 = vmatprep.subr.bf16.mxu0 %v8470_v45  ;;  %v8519_v44 = vld [vmem:[%s10549_s1 + $0xfe0] sm:$0xff]  }
 0x1c6   :  { %7779 = vmatprep.subr.bf16.mxu1 %v8471_v46  ;;  %6076 = vmatprep.mubr.bf16.mxu0 %v6539_v24  ;;  %v8520_v45 = vld [vmem:[%s10549_s1 + $0xf20] sm:$0xff]   ;;  %v8549_v24 = vld [vmem:[%s10549_s1 + $0x1090] sm:$0xff]  }
 0x1c7   :  { %6116 = vmatprep.mubr.bf16.mxu1 %v6541_v26  ;;  %v8551_v26 = vld [vmem:[%s10549_s1 + $0x10d8] sm:$0xff]  }
 0x1c8   :  { %7758 = vmatpush3.bf16.msra.mxu0 %v8472_v47  ;;  %v8521_v47 = vld [vmem:[%s10549_s1 + $0xfa0] sm:$0xff]  }
 0x1c9   :  { %7780 = vmatpush3.bf16.msra.mxu1 %v8473_v48  ;;  %7759 = vmatprep.subr.bf16.mxu0 %v8474_v49 }
 0x1ca   :  { %7781 = vmatprep.subr.bf16.mxu1 %v8475_v50 }
 0x1cc   :  { %7760 = vmatpush3.bf16.msra.mxu0 %v8476_v51 }
 0x1cd   :  { %7782 = vmatpush3.bf16.msra.mxu1 %v8477_v52  ;;  %7761 = vmatprep.subr.bf16.mxu0 %v8478_v53  ;;  %v8522_v53 = vld [vmem:[%s10549_s1 + $0xf68] sm:$0xff]  }
 0x1ce   :  { %7783 = vmatprep.subr.bf16.mxu1 %v8479_v54 }
 0x1d0   :  { %7762 = vmatpush3.bf16.msra.mxu0 %v8480_v55  ;;  %v8523_v55 = vld [vmem:[%s10549_s1 + $0xfe8] sm:$0xff]  }
 0x1d1   :  { %7784 = vmatpush3.bf16.msra.mxu1 %v8481_v56  ;;  %7763 = vmatprep.subr.bf16.mxu0 %v8482_v57 }
 0x1d2   :  { %7785 = vmatprep.subr.bf16.mxu1 %v8483_v58  ;;  %v8524_v58 = vld [vmem:[%s10549_s1 + $0xf28] sm:$0xff]  }
 0x1d4   :  { %7764 = vmatpush3.bf16.msra.mxu0 %v8484_v60  ;;  %v8525_v60 = vld [vmem:[%s10549_s1 + $0xfa8] sm:$0xff]  }
 0x1d5   :  { %7786 = vmatpush3.bf16.msra.mxu1 %v8485_v62  ;;  %7765 = vmatprep.subr.bf16.mxu0 %v8486_v1  ;;  %v8528_v1 = vld [vmem:[%s10549_s1 + $0xf30] sm:$0xff]  }
 0x1d6   :  { %v7463_v59 = vpop.f32.mrb[28].mxu0  ;;  %7787 = vmatprep.subr.bf16.mxu1 %v8487_v4  ;;  %v8531_v4 = vld [vmem:[%s10549_s1 + $0xff8] sm:$0xff]  }
 0x1d7   :  { %v7485_v61 = vpop.f32.mrb[28].mxu1  ;;  %v7464_v63 = vpop.f32.mrb[29].mxu0 }
 0x1d8   :  { %v7486_v0 = vpop.f32.mrb[29].mxu1  ;;  %v7465_v2 = vadd.f32 %v7464_v63, %v7463_v59  ;;  %v7466_v5 = vpop.f32.mrb[30].mxu0  ;;  %7766 = vmatpush3.bf16.msra.mxu0 %v8488_v7  ;;  %v8526_v63 = vld [vmem:[%s10549_s1 + $0xf70] sm:$0xff]  }
 0x1d9   :  { %v7487_v3 = vadd.f32 %v7486_v0, %v7485_v61  ;;  %v7488_v6 = vpop.f32.mrb[30].mxu1  ;;  %v7467_v10 = vpop.f32.mrb[31].mxu0  ;;  %7788 = vmatpush3.bf16.msra.mxu1 %v8489_v9  ;;  %7767 = vmatprep.subr.bf16.mxu0 %v8490_v12  ;;  %v8527_v0 = vld [vmem:[%s10549_s1 + $0xff0] sm:$0xff]   ;;  %v8532_v5 = vld [vmem:[%s10549_s1 + $0xf38] sm:$0xff]  }
 0x1da   :  { %v5519_v8 = vadd.f32 %v7465_v2, %v10072_v27  ;;  %v7489_v11 = vpop.f32.mrb[31].mxu1  ;;  %7789 = vmatprep.subr.bf16.mxu1 %v8491_v14  ;;  %v8502_v27 = vld [vmem:[%s10549_s1 + $0xf40] sm:$0xff]   ;;  %v8529_v2 = vld [vmem:[%s10549_s1 + $0xfb0] sm:$0xff]   ;;  %v8533_v6 = vld [vmem:[%s10549_s1 + $0xfb8] sm:$0xff]  }
 0x1db   :  { %v51_v7 = vld [vmem:[%s10550_s0 + $0xf0] sm:$0xff]  ;;  %v8539_v14 = vld [vmem:[%s10549_s1 + $0x10c0] sm:$0xff]  }
 0x1dc   :  { %v10177_v13 = vadd.f32 %v7487_v3, %v5519_v8  ;;  %7768 = vmatpush3.bf16.msra.mxu0 %v8492_v15  ;;  %v8530_v3 = vld [vmem:[%s10549_s1 + $0xf78] sm:$0xff]   ;;  %v6542_v9 = vcombine.low %v51_v7, %v51_v7  ;;  %v6543_v10 = vcombine.high %v51_v7, %v51_v7  ;;  %v8540_v15 = vld [vmem:[%s10549_s1 + $0x1000] sm:$0xff]   ;;  %v8582_v7 = vld [vmem:[%s10549_s1 + $0x1150] sm:$0xff]  }
 0x1dd   :  { %7790 = vmatpush3.bf16.msra.mxu1 %v8493_v16  ;;  %7769 = vmatprep.subr.bf16.mxu0 %v8494_v17  ;;  %v52_v8 = vld [vmem:[%s10550_s0 + $0xf8] sm:$0xff]  ;;  %v8541_v16 = vld [vmem:[%s10549_s1 + $0x1080] sm:$0xff]   ;;  %v8542_v17 = vld [vmem:[%s10549_s1 + $0x1048] sm:$0xff]  }
 0x1de   :  { %7791 = vmatprep.subr.bf16.mxu1 %v8495_v18  ;;  %v6544_v11 = vcombine.low %v52_v8, %v52_v8  ;;  %v6545_v12 = vcombine.high %v52_v8, %v52_v8  ;;  %v8543_v18 = vld [vmem:[%s10549_s1 + $0x10c8] sm:$0xff]   ;;  %v8583_v8 = vld [vmem:[%s10549_s1 + $0x11d0] sm:$0xff]  }
 0x1e0   :  { %7770 = vmatpush3.bf16.msra.mxu0 %v8496_v19  ;;  %v8544_v19 = vld [vmem:[%s10549_s1 + $0x1008] sm:$0xff]  }
 0x1e1   :  { %7792 = vmatpush3.bf16.msra.mxu1 %v8497_v20  ;;  %7799 = vmatprep.subr.bf16.mxu0 %v8502_v27  ;;  %v8545_v20 = vld [vmem:[%s10549_s1 + $0x1088] sm:$0xff]   ;;  %v8552_v27 = vld [vmem:[%s10549_s1 + $0x1018] sm:$0xff]  }
 0x1e2   :  { %7821 = vmatprep.subr.bf16.mxu1 %v8503_v28  ;;  %v8553_v28 = vld [vmem:[%s10549_s1 + $0x1098] sm:$0xff]  }
 0x1e3   :  { %6077 = vmatmul.mubr.bf16.vlgmr.msra.gmra.mrb[56].mxu0 %v6538_v23  ;;  %v8548_v23 = vld [vmem:[%s10549_s1 + $0x1010] sm:$0xff]  }
 0x1e4   :  { %6117 = vmatmul.mubr.bf16.vlgmr.msra.gmra.mrb[56].mxu1 %v6540_v25  ;;  %7800 = vmatpush3.bf16.msra.mxu0 %v8504_v29  ;;  %v8550_v25 = vld [vmem:[%s10549_s1 + $0x1058] sm:$0xff]   ;;  %v8554_v29 = vld [vmem:[%s10549_s1 + $0x1060] sm:$0xff]  }
 0x1e5   :  { %7822 = vmatpush3.bf16.msra.mxu1 %v8505_v30  ;;  %7801 = vmatprep.subr.bf16.mxu0 %v8506_v31  ;;  %v8555_v30 = vld [vmem:[%s10549_s1 + $0x10e0] sm:$0xff]  }
 0x1e6   :  { %7823 = vmatprep.subr.bf16.mxu1 %v8507_v32  ;;  %6156 = vmatprep.mubr.bf16.mxu0 %v6543_v10  ;;  %v8556_v31 = vld [vmem:[%s10549_s1 + $0x1020] sm:$0xff]   ;;  %v8585_v10 = vld [vmem:[%s10549_s1 + $0x1190] sm:$0xff]  }
 0x1e7   :  { %6196 = vmatprep.mubr.bf16.mxu1 %v6545_v12  ;;  %v8587_v12 = vld [vmem:[%s10549_s1 + $0x11d8] sm:$0xff]  }
 0x1e8   :  { %7802 = vmatpush3.bf16.msra.mxu0 %v8508_v33  ;;  %v8557_v33 = vld [vmem:[%s10549_s1 + $0x10a0] sm:$0xff]  }
 0x1e9   :  { %7824 = vmatpush3.bf16.msra.mxu1 %v8509_v34  ;;  %7803 = vmatprep.subr.bf16.mxu0 %v8510_v35 }
 0x1ea   :  { %7825 = vmatprep.subr.bf16.mxu1 %v8511_v36 }
 0x1ec   :  { %7804 = vmatpush3.bf16.msra.mxu0 %v8512_v37 }
 0x1ed   :  { %7826 = vmatpush3.bf16.msra.mxu1 %v8513_v38  ;;  %7805 = vmatprep.subr.bf16.mxu0 %v8514_v39  ;;  %v8558_v39 = vld [vmem:[%s10549_s1 + $0x1068] sm:$0xff]  }
 0x1ee   :  { %7827 = vmatprep.subr.bf16.mxu1 %v8515_v40 }
 0x1f0   :  { %7806 = vmatpush3.bf16.msra.mxu0 %v8516_v41  ;;  %v8559_v41 = vld [vmem:[%s10549_s1 + $0x10e8] sm:$0xff]  }
 0x1f1   :  { %7828 = vmatpush3.bf16.msra.mxu1 %v8517_v42  ;;  %7807 = vmatprep.subr.bf16.mxu0 %v8518_v43 }
 0x1f2   :  { %7829 = vmatprep.subr.bf16.mxu1 %v8519_v44  ;;  %v8560_v44 = vld [vmem:[%s10549_s1 + $0x1028] sm:$0xff]  }
 0x1f4   :  { %7808 = vmatpush3.bf16.msra.mxu0 %v8520_v45 }
 0x1f5   :  { %7830 = vmatpush3.bf16.msra.mxu1 %v8521_v47  ;;  %7809 = vmatprep.subr.bf16.mxu0 %v8522_v53  ;;  %v8566_v53 = vld [vmem:[%s10549_s1 + $0x1078] sm:$0xff]  }
 0x1f6   :  { %v7507_v46 = vpop.f32.mrb[32].mxu0  ;;  %7831 = vmatprep.subr.bf16.mxu1 %v8523_v55  ;;  %v8568_v55 = vld [vmem:[%s10549_s1 + $0x1038] sm:$0xff]  }
 0x1f7   :  { %v7529_v48 = vpop.f32.mrb[32].mxu1  ;;  %v7508_v49 = vpop.f32.mrb[33].mxu0 }
 0x1f8   :  { %v7530_v50 = vpop.f32.mrb[33].mxu1  ;;  %v7509_v51 = vadd.f32 %v7508_v49, %v7507_v46  ;;  %v7510_v54 = vpop.f32.mrb[34].mxu0  ;;  %7810 = vmatpush3.bf16.msra.mxu0 %v8524_v58  ;;  %v8561_v46 = vld [vmem:[%s10549_s1 + $0x10a8] sm:$0xff]   ;;  %v8562_v49 = vld [vmem:[%s10549_s1 + $0x1070] sm:$0xff]  }
 0x1f9   :  { %v7531_v52 = vadd.f32 %v7530_v50, %v7529_v48  ;;  %v7532_v56 = vpop.f32.mrb[34].mxu1  ;;  %v7511_v59 = vpop.f32.mrb[35].mxu0  ;;  %7832 = vmatpush3.bf16.msra.mxu1 %v8525_v60  ;;  %7811 = vmatprep.subr.bf16.mxu0 %v8526_v63  ;;  %v8563_v50 = vld [vmem:[%s10549_s1 + $0x10f0] sm:$0xff]   ;;  %v8567_v54 = vld [vmem:[%s10549_s1 + $0x10f8] sm:$0xff]   ;;  %v54_v58 = vld [vmem:[%s10550_s0 + $0x108] sm:$0xff] }
 0x1fa   :  { %v5599_v57 = vadd.f32 %v7509_v51, %v10177_v13  ;;  %v7533_v61 = vpop.f32.mrb[35].mxu1  ;;  %7833 = vmatprep.subr.bf16.mxu1 %v8527_v0  ;;  %v8538_v13 = vld [vmem:[%s10549_s1 + $0x1040] sm:$0xff]   ;;  %v8564_v51 = vld [vmem:[%s10549_s1 + $0x1030] sm:$0xff]   ;;  %v8569_v56 = vld [vmem:[%s10549_s1 + $0x10b8] sm:$0xff]  }
 0x1fb   :  { %v6548_v61 = vcombine.low %v54_v58, %v54_v58  ;;  %v8574_v63 = vld [vmem:[%s10549_s1 + $0x1140] sm:$0xff]  }
 0x1fc   :  { %v10279_v62 = vadd.f32 %v7531_v52, %v5599_v57  ;;  %7812 = vmatpush3.bf16.msra.mxu0 %v8528_v1  ;;  %v8565_v52 = vld [vmem:[%s10549_s1 + $0x10b0] sm:$0xff]   ;;  %v53_v57 = vld [vmem:[%s10550_s0 + $0x100] sm:$0xff] }
 0x1fd   :  { %7834 = vmatpush3.bf16.msra.mxu1 %v8529_v2  ;;  %7813 = vmatprep.subr.bf16.mxu0 %v8530_v3  ;;  %v6546_v59 = vcombine.low %v53_v57, %v53_v57  ;;  %v6547_v60 = vcombine.high %v53_v57, %v53_v57  ;;  %v8575_v0 = vld [vmem:[%s10549_s1 + $0x11c0] sm:$0xff]   ;;  %v8578_v3 = vld [vmem:[%s10549_s1 + $0x1148] sm:$0xff]  }
 0x1fe   :  { %7835 = vmatprep.subr.bf16.mxu1 %v8531_v4  ;;  %v8576_v1 = vld [vmem:[%s10549_s1 + $0x1100] sm:$0xff]   ;;  %v8579_v4 = vld [vmem:[%s10549_s1 + $0x11c8] sm:$0xff]  }
 0x1ff   :  { %v8577_v2 = vld [vmem:[%s10549_s1 + $0x1180] sm:$0xff]  }
 0x200   :  { %7814 = vmatpush3.bf16.msra.mxu0 %v8532_v5  ;;  %v8580_v5 = vld [vmem:[%s10549_s1 + $0x1108] sm:$0xff]  }
 0x201   :  { %7836 = vmatpush3.bf16.msra.mxu1 %v8533_v6  ;;  %7843 = vmatprep.subr.bf16.mxu0 %v8538_v13  ;;  %v8581_v6 = vld [vmem:[%s10549_s1 + $0x1188] sm:$0xff]   ;;  %v8588_v13 = vld [vmem:[%s10549_s1 + $0x1118] sm:$0xff]  }
 0x202   :  { %7865 = vmatprep.subr.bf16.mxu1 %v8539_v14  ;;  %v8589_v14 = vld [vmem:[%s10549_s1 + $0x1198] sm:$0xff]  }
 0x203   :  { %6157 = vmatmul.mubr.bf16.vlgmr.msra.gmra.mrb[60].mxu0 %v6542_v9  ;;  %v8584_v9 = vld [vmem:[%s10549_s1 + $0x1110] sm:$0xff]  }
 0x204   :  { %6197 = vmatmul.mubr.bf16.vlgmr.msra.gmra.mrb[60].mxu1 %v6544_v11  ;;  %7844 = vmatpush3.bf16.msra.mxu0 %v8540_v15  ;;  %v8586_v11 = vld [vmem:[%s10549_s1 + $0x1158] sm:$0xff]   ;;  %v8590_v15 = vld [vmem:[%s10549_s1 + $0x1160] sm:$0xff]  }
 0x205   :  { %7866 = vmatpush3.bf16.msra.mxu1 %v8541_v16  ;;  %7845 = vmatprep.subr.bf16.mxu0 %v8542_v17  ;;  %v8591_v16 = vld [vmem:[%s10549_s1 + $0x11e0] sm:$0xff]  }
 0x206   :  { %7867 = vmatprep.subr.bf16.mxu1 %v8543_v18  ;;  %6236 = vmatprep.mubr.bf16.mxu0 %v6547_v60  ;;  %v8592_v17 = vld [vmem:[%s10549_s1 + $0x1120] sm:$0xff]  }
 0x208   :  { %7846 = vmatpush3.bf16.msra.mxu0 %v8544_v19  ;;  %v8593_v19 = vld [vmem:[%s10549_s1 + $0x11a0] sm:$0xff]  }
 0x209   :  { %7868 = vmatpush3.bf16.msra.mxu1 %v8545_v20  ;;  %7847 = vmatprep.subr.bf16.mxu0 %v8546_v21 }
 0x20a   :  { %7869 = vmatprep.subr.bf16.mxu1 %v8547_v22 }
 0x20c   :  { %7848 = vmatpush3.bf16.msra.mxu0 %v8548_v23 }
 0x20d   :  { %7870 = vmatpush3.bf16.msra.mxu1 %v8549_v24  ;;  %7849 = vmatprep.subr.bf16.mxu0 %v8550_v25  ;;  %v8594_v25 = vld [vmem:[%s10549_s1 + $0x1168] sm:$0xff]  }
 0x20e   :  { %7871 = vmatprep.subr.bf16.mxu1 %v8551_v26 }
 0x210   :  { %7850 = vmatpush3.bf16.msra.mxu0 %v8552_v27  ;;  %v8595_v27 = vld [vmem:[%s10549_s1 + $0x11e8] sm:$0xff]  }
 0x211   :  { %7872 = vmatpush3.bf16.msra.mxu1 %v8553_v28  ;;  %7851 = vmatprep.subr.bf16.mxu0 %v8554_v29 }
 0x212   :  { %7873 = vmatprep.subr.bf16.mxu1 %v8555_v30  ;;  %v8596_v30 = vld [vmem:[%s10549_s1 + $0x1128] sm:$0xff]  }
 0x214   :  { %7852 = vmatpush3.bf16.msra.mxu0 %v8556_v31 }
 0x215   :  { %7874 = vmatpush3.bf16.msra.mxu1 %v8557_v33  ;;  %7853 = vmatprep.subr.bf16.mxu0 %v8558_v39  ;;  %v8602_v39 = vld [vmem:[%s10549_s1 + $0x1178] sm:$0xff]  }
 0x216   :  { %v7551_v32 = vpop.f32.mrb[36].mxu0  ;;  %7875 = vmatprep.subr.bf16.mxu1 %v8559_v41  ;;  %v8604_v41 = vld [vmem:[%s10549_s1 + $0x1138] sm:$0xff]  }
 0x217   :  { %v7573_v34 = vpop.f32.mrb[36].mxu1  ;;  %v7552_v35 = vpop.f32.mrb[37].mxu0 }
 0x218   :  { %v7574_v36 = vpop.f32.mrb[37].mxu1  ;;  %v7553_v37 = vadd.f32 %v7552_v35, %v7551_v32  ;;  %v7554_v40 = vpop.f32.mrb[38].mxu0  ;;  %7854 = vmatpush3.bf16.msra.mxu0 %v8560_v44  ;;  %v8597_v32 = vld [vmem:[%s10549_s1 + $0x11a8] sm:$0xff]   ;;  %v8598_v35 = vld [vmem:[%s10549_s1 + $0x1170] sm:$0xff]   ;;  %v56_v44 = vld [vmem:[%s10550_s0 + $0x118] sm:$0xff] }
 0x219   :  { %v7575_v38 = vadd.f32 %v7574_v36, %v7573_v34  ;;  %v7576_v42 = vpop.f32.mrb[38].mxu1  ;;  %v7555_v45 = vpop.f32.mrb[39].mxu0  ;;  %7876 = vmatpush3.bf16.msra.mxu1 %v8561_v46  ;;  %7855 = vmatprep.subr.bf16.mxu0 %v8562_v49  ;;  %v8599_v36 = vld [vmem:[%s10549_s1 + $0x11f0] sm:$0xff]   ;;  %v8603_v40 = vld [vmem:[%s10549_s1 + $0x11f8] sm:$0xff]  }
 0x21a   :  { %v5679_v43 = vadd.f32 %v7553_v37, %v10279_v62  ;;  %v7577_v47 = vpop.f32.mrb[39].mxu1  ;;  %7877 = vmatprep.subr.bf16.mxu1 %v8563_v50  ;;  %v6549_v62 = vcombine.high %v54_v58, %v54_v58  ;;  %v8600_v37 = vld [vmem:[%s10549_s1 + $0x1130] sm:$0xff]   ;;  %v8605_v42 = vld [vmem:[%s10549_s1 + $0x11b8] sm:$0xff]  }
 0x21b   :  { %v6552_v47 = vcombine.low %v56_v44, %v56_v44 }
 0x21c   :  { %v10384_v48 = vadd.f32 %v7575_v38, %v5679_v43  ;;  %7856 = vmatpush3.bf16.msra.mxu0 %v8564_v51  ;;  %6276 = vmatprep.mubr.bf16.mxu1 %v6549_v62  ;;  %v8601_v38 = vld [vmem:[%s10549_s1 + $0x11b0] sm:$0xff]  }
 0x21d   :  { %7878 = vmatpush3.bf16.msra.mxu1 %v8565_v52  ;;  %7857 = vmatprep.subr.bf16.mxu0 %v8566_v53  ;;  %v55_v43 = vld [vmem:[%s10550_s0 + $0x110] sm:$0xff] }
 0x21e   :  { %7879 = vmatprep.subr.bf16.mxu1 %v8567_v54  ;;  %v6550_v45 = vcombine.low %v55_v43, %v55_v43  ;;  %v6551_v46 = vcombine.high %v55_v43, %v55_v43 }
 0x220   :  { %7858 = vmatpush3.bf16.msra.mxu0 %v8568_v55 }
 0x221   :  { %7880 = vmatpush3.bf16.msra.mxu1 %v8569_v56  ;;  %7887 = vmatprep.subr.bf16.mxu0 %v8574_v63 }
 0x222   :  { %7909 = vmatprep.subr.bf16.mxu1 %v8575_v0 }
 0x223   :  { %6237 = vmatmul.mubr.bf16.vlgmr.msra.gmra.mrb[64].mxu0 %v6546_v59 }
 0x224   :  { %6277 = vmatmul.mubr.bf16.vlgmr.msra.gmra.mrb[64].mxu1 %v6548_v61  ;;  %7888 = vmatpush3.bf16.msra.mxu0 %v8576_v1 }
 0x225   :  { %7910 = vmatpush3.bf16.msra.mxu1 %v8577_v2  ;;  %7889 = vmatprep.subr.bf16.mxu0 %v8578_v3 }
 0x226   :  { %7911 = vmatprep.subr.bf16.mxu1 %v8579_v4  ;;  %6316 = vmatprep.mubr.bf16.mxu0 %v6551_v46 }
 0x228   :  { %7890 = vmatpush3.bf16.msra.mxu0 %v8580_v5 }
 0x229   :  { %7912 = vmatpush3.bf16.msra.mxu1 %v8581_v6  ;;  %7891 = vmatprep.subr.bf16.mxu0 %v8582_v7 }
 0x22a   :  { %7913 = vmatprep.subr.bf16.mxu1 %v8583_v8 }
 0x22c   :  { %7892 = vmatpush3.bf16.msra.mxu0 %v8584_v9  ;;  %v8618_v9 = vmov 0.0  }
 0x22d   :  { %7914 = vmatpush3.bf16.msra.mxu1 %v8585_v10  ;;  %7893 = vmatprep.subr.bf16.mxu0 %v8586_v11  ;;  %v8610_v10 = vld [vmem:[%s10552_s3] sm:$0xff]   ;;  %v8611_v11 = vld [vmem:[%s10552_s3 + $0x8] sm:$0xff]  }
 0x22e   :  { %7915 = vmatprep.subr.bf16.mxu1 %v8587_v12  ;;  %v8612_v12 = vld [vmem:[%s10552_s3 + $0x10] sm:$0xff]  }
 0x230   :  { %7894 = vmatpush3.bf16.msra.mxu0 %v8588_v13  ;;  %v8613_v13 = vld [vmem:[%s10552_s3 + $0x18] sm:$0xff]  }
 0x231   :  { %7916 = vmatpush3.bf16.msra.mxu1 %v8589_v14  ;;  %7895 = vmatprep.subr.bf16.mxu0 %v8590_v15  ;;  %v8614_v14 = vld [vmem:[%s10552_s3 + $0x20] sm:$0xff]   ;;  %v8615_v15 = vld [vmem:[%s10552_s3 + $0x28] sm:$0xff]  }
 0x232   :  { %7917 = vmatprep.subr.bf16.mxu1 %v8591_v16 }
 0x234   :  { %7896 = vmatpush3.bf16.msra.mxu0 %v8592_v17 }
 0x235   :  { %7918 = vmatpush3.bf16.msra.mxu1 %v8593_v19  ;;  %7897 = vmatprep.subr.bf16.mxu0 %v8594_v25 }
 0x236   :  { %v7595_v18 = vpop.f32.mrb[40].mxu0  ;;  %7919 = vmatprep.subr.bf16.mxu1 %v8595_v27  ;;  %v8616_v27 = vld [vmem:[%s10552_s3 + $0x30] sm:$0xff]  }
 0x237   :  { %v7617_v20 = vpop.f32.mrb[40].mxu1  ;;  %v7596_v21 = vpop.f32.mrb[41].mxu0 }
 0x238   :  { %v7618_v22 = vpop.f32.mrb[41].mxu1  ;;  %v7597_v23 = vadd.f32 %v7596_v21, %v7595_v18  ;;  %v7598_v26 = vpop.f32.mrb[42].mxu0  ;;  %7898 = vmatpush3.bf16.msra.mxu0 %v8596_v30 }
 0x239   :  { %v7619_v24 = vadd.f32 %v7618_v22, %v7617_v20  ;;  %v7620_v28 = vpop.f32.mrb[42].mxu1  ;;  %v7599_v31 = vpop.f32.mrb[43].mxu0  ;;  %7920 = vmatpush3.bf16.msra.mxu1 %v8597_v32  ;;  %7899 = vmatprep.subr.bf16.mxu0 %v8598_v35 }
 0x23a   :  { %v5759_v29 = vadd.f32 %v7597_v23, %v10384_v48  ;;  %v7621_v33 = vpop.f32.mrb[43].mxu1  ;;  %7921 = vmatprep.subr.bf16.mxu1 %v8599_v36  ;;  %v6553_v48 = vcombine.high %v56_v44, %v56_v44 }
 0x23c   :  { %v5799_v34 = vadd.f32 %v7619_v24, %v5759_v29  ;;  %7900 = vmatpush3.bf16.msra.mxu0 %v8600_v37  ;;  %6356 = vmatprep.mubr.bf16.mxu1 %v6553_v48  ;;  %v8617_v29 = vld [vmem:[%s10552_s3 + $0x38] sm:$0xff]  }
 0x23d   :  { %7922 = vmatpush3.bf16.msra.mxu1 %v8601_v38  ;;  %7901 = vmatprep.subr.bf16.mxu0 %v8602_v39 }
 0x23e   :  { %7923 = vmatprep.subr.bf16.mxu1 %v8603_v40 }
 0x240   :  { %7902 = vmatpush3.bf16.msra.mxu0 %v8604_v41 }
 0x241   :  { %7924 = vmatpush3.bf16.msra.mxu1 %v8605_v42  ;;  %7940 = vmatprep.subr.bf16.mxu0 %v8618_v9 }
 0x243   :  { %6317 = vmatmul.mubr.bf16.vlgmr.msra.gmra.mrb[68].mxu0 %v6550_v45 }
 0x244   :  { %6357 = vmatmul.mubr.bf16.vlgmr.msra.gmra.mrb[68].mxu1 %v6552_v47  ;;  %7941 = vmatpush3.bf16.msra.mxu0 %v8610_v10 }
 0x245   :  { %7942 = vmatprep.subr.bf16.mxu0 %v8618_v9  ;;  %7956 = vmatprep.mubr.msk.bf16.mxu0 %vm8619_vm0, %v8618_v9 }
 0x248   :  { %7943 = vmatpush3.bf16.msra.mxu0 %v8611_v11 }
 0x249   :  { %7944 = vmatprep.subr.bf16.mxu0 %v8618_v9 }
 0x24c   :  { %7945 = vmatpush3.bf16.msra.mxu0 %v8612_v12 }
 0x24d   :  { %7946 = vmatprep.subr.bf16.mxu0 %v8618_v9 }
 0x250   :  { %7947 = vmatpush3.bf16.msra.mxu0 %v8613_v13 }
 0x251   :  { %7948 = vmatprep.subr.bf16.mxu0 %v8618_v9 }
 0x254   :  { %7949 = vmatpush3.bf16.msra.mxu0 %v8614_v14 }
 0x255   :  { %7950 = vmatprep.subr.bf16.mxu0 %v8618_v9 }
 0x256   :  { %v7639_v49 = vpop.f32.mrb[44].mxu0 }
 0x257   :  { %v7661_v50 = vpop.f32.mrb[44].mxu1  ;;  %v7640_v51 = vpop.f32.mrb[45].mxu0 }
 0x258   :  { %v7641_v52 = vadd.f32 %v7640_v51, %v7639_v49  ;;  %v7662_v53 = vpop.f32.mrb[45].mxu1  ;;  %v7642_v54 = vpop.f32.mrb[46].mxu0  ;;  %7951 = vmatpush3.bf16.msra.mxu0 %v8615_v15  ;;  %v7130_v15 = vld [vmem:[%s10553_s4] ss:$0 sm:$0xff] }
 0x259   :  { %v7663_v55 = vadd.f32 %v7662_v53, %v7661_v50  ;;  %v7664_v56 = vpop.f32.mrb[46].mxu1  ;;  %v7643_v57 = vpop.f32.mrb[47].mxu0  ;;  %7952 = vmatprep.subr.bf16.mxu0 %v8618_v9 }
 0x25a   :  { %v5839_v58 = vadd.f32 %v7641_v52, %v5799_v34  ;;  %v7665_v59 = vpop.f32.mrb[47].mxu1 }
 0x25c   :  { %v5879_v60 = vadd.f32 %v7663_v55, %v5839_v58  ;;  %7953 = vmatpush3.bf16.msra.mxu0 %v8616_v27 }
 0x25d   :  { %7954 = vmatprep.subr.bf16.mxu0 %v8618_v9 }
 0x260   :  { %7955 = vmatpush3.bf16.msra.mxu0 %v8617_v29 }
 0x276   :  { %v7683_v61 = vpop.f32.mrb[48].mxu0 }
 0x277   :  { %v7705_v62 = vpop.f32.mrb[48].mxu1  ;;  %v7684_v63 = vpop.f32.mrb[49].mxu0 }
 0x278   :  { %v7685_v0 = vadd.f32 %v7684_v63, %v7683_v61  ;;  %v7706_v1 = vpop.f32.mrb[49].mxu1  ;;  %v7686_v2 = vpop.f32.mrb[50].mxu0 }
 0x279   :  { %v7707_v3 = vadd.f32 %v7706_v1, %v7705_v62  ;;  %v7708_v4 = vpop.f32.mrb[50].mxu1  ;;  %v7687_v5 = vpop.f32.mrb[51].mxu0 }
 0x27a   :  { %v5919_v6 = vadd.f32 %v7685_v0, %v5879_v60  ;;  %v7709_v7 = vpop.f32.mrb[51].mxu1 }
 0x27c   :  { %v5959_v8 = vadd.f32 %v7707_v3, %v5919_v6 }
 0x296   :  { %v7727_v16 = vpop.f32.mrb[52].mxu0 }
 0x297   :  { %v7749_v17 = vpop.f32.mrb[52].mxu1  ;;  %v7728_v18 = vpop.f32.mrb[53].mxu0 }
 0x298   :  { %v7750_v19 = vpop.f32.mrb[53].mxu1  ;;  %v7729_v20 = vadd.f32 %v7728_v18, %v7727_v16  ;;  %v7730_v22 = vpop.f32.mrb[54].mxu0 }
 0x299   :  { %v7751_v21 = vadd.f32 %v7750_v19, %v7749_v17  ;;  %v7752_v23 = vpop.f32.mrb[54].mxu1  ;;  %v7731_v24 = vpop.f32.mrb[55].mxu0 }
 0x29a   :  { %v7753_v25 = vpop.f32.mrb[55].mxu1  ;;  %v5999_v26 = vadd.f32 %v7729_v20, %v5959_v8 }
 0x29c   :  { %v6039_v28 = vadd.f32 %v7751_v21, %v5999_v26 }
 0x2b6   :  { %v7771_v30 = vpop.f32.mrb[56].mxu0 }
 0x2b7   :  { %v7793_v31 = vpop.f32.mrb[56].mxu1  ;;  %v7772_v32 = vpop.f32.mrb[57].mxu0 }
 0x2b8   :  { %v7773_v33 = vadd.f32 %v7772_v32, %v7771_v30  ;;  %v7794_v34 = vpop.f32.mrb[57].mxu1  ;;  %v7774_v35 = vpop.f32.mrb[58].mxu0 }
 0x2b9   :  { %v7795_v36 = vadd.f32 %v7794_v34, %v7793_v31  ;;  %v7796_v37 = vpop.f32.mrb[58].mxu1  ;;  %v7775_v38 = vpop.f32.mrb[59].mxu0 }
 0x2ba   :  { %v6079_v39 = vadd.f32 %v7773_v33, %v6039_v28  ;;  %v7797_v40 = vpop.f32.mrb[59].mxu1 }
 0x2bc   :  { %v6119_v41 = vadd.f32 %v7795_v36, %v6079_v39 }
 0x2d6   :  { %v7815_v42 = vpop.f32.mrb[60].mxu0 }
 0x2d7   :  { %v7837_v43 = vpop.f32.mrb[60].mxu1  ;;  %v7816_v44 = vpop.f32.mrb[61].mxu0 }
 0x2d8   :  { %v7817_v45 = vadd.f32 %v7816_v44, %v7815_v42  ;;  %v7838_v46 = vpop.f32.mrb[61].mxu1  ;;  %v7818_v47 = vpop.f32.mrb[62].mxu0 }
 0x2d9   :  { %v7839_v48 = vadd.f32 %v7838_v46, %v7837_v43  ;;  %v7840_v49 = vpop.f32.mrb[62].mxu1  ;;  %v7819_v50 = vpop.f32.mrb[63].mxu0 }
 0x2da   :  { %v6159_v51 = vadd.f32 %v7817_v45, %v6119_v41  ;;  %v7841_v52 = vpop.f32.mrb[63].mxu1 }
 0x2dc   :  { %v6199_v53 = vadd.f32 %v7839_v48, %v6159_v51 }
 0x2f6   :  { %v7859_v54 = vpop.f32.mrb[64].mxu0 }
 0x2f7   :  { %v7881_v55 = vpop.f32.mrb[64].mxu1  ;;  %v7860_v56 = vpop.f32.mrb[65].mxu0 }
 0x2f8   :  { %v7861_v57 = vadd.f32 %v7860_v56, %v7859_v54  ;;  %v7882_v58 = vpop.f32.mrb[65].mxu1  ;;  %v7862_v59 = vpop.f32.mrb[66].mxu0 }
 0x2f9   :  { %v7883_v60 = vadd.f32 %v7882_v58, %v7881_v55  ;;  %v7884_v61 = vpop.f32.mrb[66].mxu1  ;;  %v7863_v62 = vpop.f32.mrb[67].mxu0 }
 0x2fa   :  { %v6239_v63 = vadd.f32 %v7861_v57, %v6199_v53  ;;  %v7885_v0 = vpop.f32.mrb[67].mxu1 }
 0x2fc   :  { %v6279_v1 = vadd.f32 %v7883_v60, %v6239_v63 }
 0x316   :  { %v7903_v2 = vpop.f32.mrb[68].mxu0 }
 0x317   :  { %v7925_v3 = vpop.f32.mrb[68].mxu1  ;;  %v7904_v4 = vpop.f32.mrb[69].mxu0 }
 0x318   :  { %v7905_v5 = vadd.f32 %v7904_v4, %v7903_v2  ;;  %v7926_v6 = vpop.f32.mrb[69].mxu1  ;;  %v7906_v7 = vpop.f32.mrb[70].mxu0 }
 0x319   :  { %v7927_v8 = vadd.f32 %v7926_v6, %v7925_v3  ;;  %v7928_v9 = vpop.f32.mrb[70].mxu1  ;;  %v7907_v10 = vpop.f32.mrb[71].mxu0 }
 0x31a   :  { %v6319_v11 = vadd.f32 %v7905_v5, %v6279_v1  ;;  %v7929_v12 = vpop.f32.mrb[71].mxu1 }
 0x31c   :  { %v6359_v13 = vadd.f32 %v7927_v8, %v6319_v11 }
 0x31e   :  { %v6364_v14 = vpack.c.bf16 %v6359_v13, %v6359_v13 }
 0x320   :  { %7957 = vmatmul.mubr.bf16.vlgmr.msra.gmra.mrb[72].mxu0 %v6364_v14 }
 0x3f3   :  { %v6470_v16 = vpop.f32.mrb[72].mxu0 }
 0x3f4   :  { %v6471_v17 = vadd.f32 %v7130_v15, %v6470_v16  ;;  %v7958_v18 = vpop.f32.mrb[73].mxu0 }
 0x3f5   :  { %v6473_v19 = vpop.f32.mrb[74].mxu0 }
 0x3f6   :  { %6476 = vst [vmem:[%s10554_s5] sm:$0xff] %v6471_v17  ;;  %v7959_v20 = vpop.f32.mrb[75].mxu0 }

</bundles_post_ra>
